<compile_context>
chip_gen: v6e
topology: v6e:2x2x1
jax: 0.10.0
libtpu: 0.0.40
codegen_flags: <defaults>
</compile_context>

<pallas_src>
import jax
import jax.numpy as jnp
from jax.experimental import pallas as pl
from jax.experimental.pallas import tpu as pltpu

EMBED_SIZE = 512     # `embed_size` in the reference script
FEATURE_DIM = 256    # feature_info[-1]['num_chs'] for tf_efficientnetv2_s
STEM_CH = 24         # efficientnetv2_s stem width
STEM_PAD = 128       # stem width zero-padded to a lane-dense 128
K_PAD = 128          # im2col contraction (9*Cin) zero-padded to 128
BB = 8               # images per batch block (sublane-aligned)
THW_MAX = 256        # HW rows per image processed per grid step


def _silu(x):
    # SiLU(x) = x*sigmoid(x) = 0.5*x*(tanh(x/2)+1): one EUP op per element
    # (exact; avoids exp + approx-reciprocal which doubled EUP pressure).
    return 0.5 * x * (jnp.tanh(0.5 * x) + 1.0)


def _make_kernel(hw_valid, thw, needs_mask):
    """Kernel closure over static HW sizes."""

    def kernel(xp_ref, w_stem_ref, b_stem_ref, w_head_ref, b_head_ref,
               w_fc_ref, b_fc_ref, out_ref, pooled_ref):
        # xp_ref:     [BB, thw, K_PAD]       bf16 im2col patches (this HW chunk)
        # pooled_ref: [BB, FEATURE_DIM]      f32 running per-image sum (scratch)
        # out_ref:    [BB, EMBED_SIZE]       f32 embeddings
        h = pl.program_id(1)

        @pl.when(h == 0)
        def _():
            pooled_ref[...] = jnp.zeros_like(pooled_ref)

        patches = xp_ref[...].reshape(BB * thw, K_PAD)

        # stem 3x3 s2 conv (as matmul) + bias + SiLU; bf16 ops, f32 accumulate.
        h1 = jnp.dot(patches, w_stem_ref[...],
                     preferred_element_type=jnp.float32) + b_stem_ref[...]
        h1 = _silu(h1)                                     # [BB*thw, STEM_PAD]

        # 1x1 "head" conv to feature_dim + SiLU.
        h2 = jnp.dot(h1.astype(jnp.bfloat16), w_head_ref[...],
                     preferred_element_type=jnp.float32) + b_head_ref[...]
        h2 = _silu(h2).reshape(BB, thw, FEATURE_DIM)

        if needs_mask:
            # zero out padded HW rows (only the last chunk can contain them);
            # padded patches are zero but silu(bias) would otherwise leak in.
            row = h * thw + jax.lax.broadcasted_iota(
                jnp.int32, (BB, thw, FEATURE_DIM), 1)
            h2 = jnp.where(row < hw_valid, h2, 0.0)

        # partial global-average-pool: per-image sum over this chunk (XLU slot,
        # which is otherwise idle -- no pool matrix, no extra MXU work).
        pooled_ref[...] += jnp.sum(h2, axis=1)

        @pl.when(h == pl.num_programs(1) - 1)
        def _():
            pooled = pooled_ref[...] * (1.0 / hw_valid)    # == mean([2, 3])
            emb = jnp.dot(pooled.astype(jnp.bfloat16), w_fc_ref[...],
                          preferred_element_type=jnp.float32) + b_fc_ref[...]
            out_ref[...] = emb

    return kernel


def _im2col_stem(images):
    """NCHW float -> [B, Ho*Wo, 9*Cin] stride-2 3x3 patches (pad=1)."""
    B, Cin, H, W = images.shape
    x = jnp.transpose(images, (0, 2, 3, 1))               # NHWC
    x = jnp.pad(x, ((0, 0), (1, 1), (1, 1), (0, 0)))
    Ho, Wo = H // 2, W // 2
    taps = [x[:, dy:dy + 2 * Ho:2, dx:dx + 2 * Wo:2, :]
            for dy in range(3) for dx in range(3)]
    patches = jnp.concatenate(taps, axis=-1)               # [B, Ho, Wo, 9*Cin]
    return patches.reshape(B, Ho * Wo, 9 * Cin).astype(jnp.float32)


def _pad_params(params):
    """Zero-pad weights to lane-dense shapes; bf16 matmul operands, f32 biases."""
    w_stem, b_stem, w_head, b_head, w_fc, b_fc = params
    K = w_stem.shape[0]
    w_stem_p = jnp.zeros((K_PAD, STEM_PAD), jnp.float32).at[:K, :STEM_CH].set(w_stem)
    b_stem_p = jnp.zeros((1, STEM_PAD), jnp.float32).at[:, :STEM_CH].set(b_stem)
    w_head_p = jnp.zeros((STEM_PAD, FEATURE_DIM), jnp.float32).at[:STEM_CH, :].set(w_head)
    return (w_stem_p.astype(jnp.bfloat16), b_stem_p,
            w_head_p.astype(jnp.bfloat16), b_head.astype(jnp.float32),
            w_fc.astype(jnp.bfloat16), b_fc.astype(jnp.float32))


def efficientnet_encoder(images, params):
    """images: NCHW float32 [B, Cin, H, W] -> [B, 1, EMBED_SIZE]."""
    B, Cin, H, W = images.shape
    K = 9 * Cin
    assert K <= K_PAD, "im2col contraction exceeds padded lane width"
    HW = (H // 2) * (W // 2)

    # HW chunking: thw rows per image per grid step (sublane-aligned).
    thw = min(THW_MAX, pl.cdiv(HW, 8) * 8)
    n_hw = pl.cdiv(HW, thw)
    HW_pad = n_hw * thw
    B_pad = pl.cdiv(B, BB) * BB
    n_bb = B_pad // BB

    # ---- glue: im2col + lane-dense zero pad + bf16 cast ----
    patches = _im2col_stem(images)                          # [B, HW, K] f32
    patches = jnp.pad(
        patches, ((0, B_pad - B), (0, HW_pad - HW), (0, K_PAD - K)))
    patches = patches.astype(jnp.bfloat16)                  # [B_pad, HW_pad, K_PAD]

    w_stem, b_stem, w_head, b_head, w_fc, b_fc = _pad_params(params)

    kernel = _make_kernel(HW, thw, HW_pad != HW)

    cost = pl.CostEstimate(
        flops=(2 * B_pad * HW_pad * (K_PAD * STEM_PAD + STEM_PAD * FEATURE_DIM)
               + B_pad * HW_pad * FEATURE_DIM               # pooled-sum adds
               + 2 * B_pad * FEATURE_DIM * EMBED_SIZE),
        transcendentals=B_pad * HW_pad * (STEM_PAD + FEATURE_DIM),
        bytes_accessed=(patches.size * 2
                        + (w_stem.size + w_head.size + w_fc.size) * 2
                        + (b_stem.size + b_head.size + b_fc.size) * 4
                        + B_pad * EMBED_SIZE * 4),
    )

    out = pl.pallas_call(
        kernel,
        out_shape=jax.ShapeDtypeStruct((B_pad, EMBED_SIZE), jnp.float32),
        grid_spec=pltpu.PrefetchScalarGridSpec(
            num_scalar_prefetch=0,
            grid=(n_bb, n_hw),
            in_specs=[
                pl.BlockSpec((BB, thw, K_PAD), lambda b, h: (b, h, 0)),
                pl.BlockSpec((K_PAD, STEM_PAD), lambda b, h: (0, 0)),
                pl.BlockSpec((1, STEM_PAD), lambda b, h: (0, 0)),
                pl.BlockSpec((STEM_PAD, FEATURE_DIM), lambda b, h: (0, 0)),
                pl.BlockSpec((1, FEATURE_DIM), lambda b, h: (0, 0)),
                pl.BlockSpec((FEATURE_DIM, EMBED_SIZE), lambda b, h: (0, 0)),
                pl.BlockSpec((1, EMBED_SIZE), lambda b, h: (0, 0)),
            ],
            out_specs=pl.BlockSpec((BB, EMBED_SIZE), lambda b, h: (b, 0)),
            scratch_shapes=[pltpu.VMEM((BB, FEATURE_DIM), jnp.float32)],
        ),
        compiler_params=pltpu.CompilerParams(
            dimension_semantics=("parallel", "arbitrary"),
            vmem_limit_bytes=32 * 1024 * 1024),
        cost_estimate=cost,
    )(patches, w_stem, b_stem, w_head, b_head, w_fc, b_fc)

    return out[:B].reshape(B, 1, EMBED_SIZE)


def _reference(images, params):
    """Pure-JAX reference mirroring the kernel math (bf16 operands, f32 acc)."""
    B = images.shape[0]
    HW = (images.shape[2] // 2) * (images.shape[3] // 2)
    w_stem, b_stem, w_head, b_head, w_fc, b_fc = params
    bf = jnp.bfloat16
    patches = _im2col_stem(images).reshape(B * HW, -1)
    h1 = jax.nn.silu(jnp.dot(patches.astype(bf), w_stem.astype(bf),
                             preferred_element_type=jnp.float32) + b_stem)
    h2 = jax.nn.silu(jnp.dot(h1.astype(bf), w_head.astype(bf),
                             preferred_element_type=jnp.float32) + b_head)
    pooled = h2.reshape(B, HW, FEATURE_DIM).mean(axis=1)
    emb = jnp.dot(pooled.astype(bf), w_fc.astype(bf),
                  preferred_element_type=jnp.float32) + b_fc
    return emb[:, None, :]


if __name__ == "__main__":
    B, Cin, H, W = 2, 3, 32, 32
    K = 9 * Cin

    key = jax.random.PRNGKey(0)
    k = jax.random.split(key, 7)
    params = (
        jax.random.normal(k[0], (K, STEM_CH), jnp.float32) * 0.10,
        jax.random.normal(k[1], (1, STEM_CH), jnp.float32) * 0.01,
        jax.random.normal(k[2], (STEM_CH, FEATURE_DIM), jnp.float32) * 0.10,
        jax.random.normal(k[3], (1, FEATURE_DIM), jnp.float32) * 0.01,
        jax.random.normal(k[4], (FEATURE_DIM, EMBED_SIZE), jnp.float32) * 0.05,
        jax.random.normal(k[5], (1, EMBED_SIZE), jnp.float32) * 0.01,
    )
    images = jax.random.normal(k[6], (B, Cin, H, W), jnp.float32)

    out = efficientnet_encoder(images, params)
    jax.block_until_ready(out)

    assert out.shape == (B, 1, EMBED_SIZE), out.shape
    ref = _reference(images, params)
    assert jnp.allclose(out, ref, atol=1e-2, rtol=1e-2), \
        float(jnp.max(jnp.abs(out - ref)))
    print("KERNEL_OK")
</pallas_src>

<mosaic_0001>
module attributes {stable_mosaic.version = 11 : i64} {
  func.func @kernel(%arg0: i32, %arg1: i32, %arg2: memref<8x256x128xbf16, #tpu.memory_space<vmem>>, %arg3: memref<128x128xbf16, #tpu.memory_space<vmem>>, %arg4: memref<1x128xf32, #tpu.memory_space<vmem>>, %arg5: memref<128x256xbf16, #tpu.memory_space<vmem>>, %arg6: memref<1x256xf32, #tpu.memory_space<vmem>>, %arg7: memref<256x512xbf16, #tpu.memory_space<vmem>>, %arg8: memref<1x512xf32, #tpu.memory_space<vmem>>, %arg9: memref<8x512xf32, #tpu.memory_space<vmem>>, %arg10: memref<8x256xf32, #tpu.memory_space<vmem>>) attributes {dimension_semantics = [#tpu.dimension_semantics<parallel>, #tpu.dimension_semantics<arbitrary>], iteration_bounds = array<i64: 1, 1>, scalar_prefetch = 0 : i64, scratch_operands = 1 : i64, tpu.core_type = #tpu.core_type<tc>, window_params = [{transform_indices = @transform_0, window_bounds = array<i64: 8, 256, 128>}, {pipeline_mode = #tpu.pipeline_mode<synchronous>, transform_indices = @transform_1, window_bounds = array<i64: 128, 128>}, {pipeline_mode = #tpu.pipeline_mode<synchronous>, transform_indices = @transform_2, window_bounds = array<i64: 1, 128>}, {pipeline_mode = #tpu.pipeline_mode<synchronous>, transform_indices = @transform_3, window_bounds = array<i64: 128, 256>}, {pipeline_mode = #tpu.pipeline_mode<synchronous>, transform_indices = @transform_4, window_bounds = array<i64: 1, 256>}, {pipeline_mode = #tpu.pipeline_mode<synchronous>, transform_indices = @transform_5, window_bounds = array<i64: 256, 512>}, {pipeline_mode = #tpu.pipeline_mode<synchronous>, transform_indices = @transform_6, window_bounds = array<i64: 1, 512>}, {transform_indices = @transform_7, window_bounds = array<i64: 8, 512>}]} {
    %c0_i32 = arith.constant 0 : i32
    %0 = arith.cmpi eq, %arg1, %c0_i32 : i32
    %1 = arith.extui %0 : i1 to i32
    %c0_i32_0 = arith.constant 0 : i32
    %2 = arith.cmpi ne, %1, %c0_i32_0 : i32
    scf.if %2 {
      %cst_25 = arith.constant 0.000000e+00 : f32
      %40 = vector.broadcast %cst_25 : f32 to vector<8x256xf32>
      %c0_26 = arith.constant 0 : index
      %c0_27 = arith.constant 0 : index
      %41 = vector.load %arg10[%c0_26, %c0_27] : memref<8x256xf32, #tpu.memory_space<vmem>>, vector<8x256xf32>
      tpu.vector_store %arg10[%c0_26, %c0_27], %40 {strides = array<i32>} : memref<8x256xf32, #tpu.memory_space<vmem>>, vector<8x256xf32>,
    } else {
    }
    %c0 = arith.constant 0 : index
    %c0_1 = arith.constant 0 : index
    %c0_2 = arith.constant 0 : index
    %3 = vector.load %arg2[%c0, %c0_1, %c0_2] : memref<8x256x128xbf16, #tpu.memory_space<vmem>>, vector<8x256x128xbf16>
    %4 = vector.shape_cast %3 : vector<8x256x128xbf16> to vector<2048x128xbf16>
    %c0_3 = arith.constant 0 : index
    %c0_4 = arith.constant 0 : index
    %5 = vector.load %arg3[%c0_3, %c0_4] : memref<128x128xbf16, #tpu.memory_space<vmem>>, vector<128x128xbf16>
    %cst = arith.constant dense<0.000000e+00> : vector<2048x128xf32>
    %6 = tpu.matmul %4, %5, %cst {dimension_numbers = #tpu.dot_dimension_numbers<[1], [0], [0], [1], [0, 0, 1, 1], [], []>} : vector<2048x128xbf16>, vector<128x128xbf16>, vector<2048x128xf32> -> vector<2048x128xf32>
    %c0_5 = arith.constant 0 : index
    %c0_6 = arith.constant 0 : index
    %7 = vector.load %arg4[%c0_5, %c0_6] : memref<1x128xf32, #tpu.memory_space<vmem>>, vector<1x128xf32>
    %8 = vector.broadcast %7 : vector<1x128xf32> to vector<2048x128xf32>
    %9 = arith.addf %6, %8 : vector<2048x128xf32>
    %cst_7 = arith.constant 5.000000e-01 : f32
    %10 = vector.broadcast %cst_7 : f32 to vector<2048x128xf32>
    %11 = arith.mulf %10, %9 : vector<2048x128xf32>
    %cst_8 = arith.constant 5.000000e-01 : f32
    %12 = vector.broadcast %cst_8 : f32 to vector<2048x128xf32>
    %13 = arith.mulf %12, %9 : vector<2048x128xf32>
    %14 = math.tanh %13 : vector<2048x128xf32>
    %cst_9 = arith.constant 1.000000e+00 : f32
    %15 = vector.broadcast %cst_9 : f32 to vector<2048x128xf32>
    %16 = arith.addf %14, %15 : vector<2048x128xf32>
    %17 = arith.mulf %11, %16 : vector<2048x128xf32>
    %18 = arith.truncf %17 : vector<2048x128xf32> to vector<2048x128xbf16>
    %c0_10 = arith.constant 0 : index
    %c0_11 = arith.constant 0 : index
    %19 = vector.load %arg5[%c0_10, %c0_11] : memref<128x256xbf16, #tpu.memory_space<vmem>>, vector<128x256xbf16>
    %cst_12 = arith.constant dense<0.000000e+00> : vector<2048x256xf32>
    %20 = tpu.matmul %18, %19, %cst_12 {dimension_numbers = #tpu.dot_dimension_numbers<[1], [0], [0], [1], [0, 0, 1, 1], [], []>} : vector<2048x128xbf16>, vector<128x256xbf16>, vector<2048x256xf32> -> vector<2048x256xf32>
    %c0_13 = arith.constant 0 : index
    %c0_14 = arith.constant 0 : index
    %21 = vector.load %arg6[%c0_13, %c0_14] : memref<1x256xf32, #tpu.memory_space<vmem>>, vector<1x256xf32>
    %22 = vector.broadcast %21 : vector<1x256xf32> to vector<2048x256xf32>
    %23 = arith.addf %20, %22 : vector<2048x256xf32>
    %cst_15 = arith.constant 5.000000e-01 : f32
    %24 = vector.broadcast %cst_15 : f32 to vector<2048x256xf32>
    %25 = arith.mulf %24, %23 : vector<2048x256xf32>
    %cst_16 = arith.constant 5.000000e-01 : f32
    %26 = vector.broadcast %cst_16 : f32 to vector<2048x256xf32>
    %27 = arith.mulf %26, %23 : vector<2048x256xf32>
    %28 = math.tanh %27 : vector<2048x256xf32>
    %cst_17 = arith.constant 1.000000e+00 : f32
    %29 = vector.broadcast %cst_17 : f32 to vector<2048x256xf32>
    %30 = arith.addf %28, %29 : vector<2048x256xf32>
    %31 = arith.mulf %25, %30 : vector<2048x256xf32>
    %32 = vector.shape_cast %31 : vector<2048x256xf32> to vector<8x256x256xf32>
    %c0_18 = arith.constant 0 : index
    %c0_19 = arith.constant 0 : index
    %33 = vector.load %arg10[%c0_18, %c0_19] : memref<8x256xf32, #tpu.memory_space<vmem>>, vector<8x256xf32>
    %cst_20 = arith.constant dense<0.000000e+00> : vector<8x256xf32>
    %34 = vector.multi_reduction <add>, %32, %cst_20 [1] : vector<8x256x256xf32> to vector<8x256xf32>
    %35 = arith.addf %33, %34 : vector<8x256xf32>
    %c0_21 = arith.constant 0 : index
    %c0_22 = arith.constant 0 : index
    %36 = vector.load %arg10[%c0_21, %c0_22] : memref<8x256xf32, #tpu.memory_space<vmem>>, vector<8x256xf32>
    tpu.vector_store %arg10[%c0_21, %c0_22], %35 {strides = array<i32>} : memref<8x256xf32, #tpu.memory_space<vmem>>, vector<8x256xf32>,
    %c0_i32_23 = arith.constant 0 : i32
    %37 = arith.cmpi eq, %arg1, %c0_i32_23 : i32
    %38 = arith.extui %37 : i1 to i32
    %c0_i32_24 = arith.constant 0 : i32
    %39 = arith.cmpi ne, %38, %c0_i32_24 : i32
    scf.if %39 {
      %c0_25 = arith.constant 0 : index
      %c0_26 = arith.constant 0 : index
      %40 = vector.load %arg10[%c0_25, %c0_26] : memref<8x256xf32, #tpu.memory_space<vmem>>, vector<8x256xf32>
      %cst_27 = arith.constant 3.906250e-03 : f32
      %41 = vector.broadcast %cst_27 : f32 to vector<8x256xf32>
      %42 = arith.mulf %40, %41 : vector<8x256xf32>
      %43 = arith.truncf %42 : vector<8x256xf32> to vector<8x256xbf16>
      %c0_28 = arith.constant 0 : index
      %c0_29 = arith.constant 0 : index
      %44 = vector.load %arg7[%c0_28, %c0_29] : memref<256x512xbf16, #tpu.memory_space<vmem>>, vector<256x512xbf16>
      %cst_30 = arith.constant dense<0.000000e+00> : vector<8x512xf32>
      %45 = tpu.matmul %43, %44, %cst_30 {dimension_numbers = #tpu.dot_dimension_numbers<[1], [0], [0], [1], [0, 0, 1, 1], [], []>} : vector<8x256xbf16>, vector<256x512xbf16>, vector<8x512xf32> -> vector<8x512xf32>
      %c0_31 = arith.constant 0 : index
      %c0_32 = arith.constant 0 : index
      %46 = vector.load %arg8[%c0_31, %c0_32] : memref<1x512xf32, #tpu.memory_space<vmem>>, vector<1x512xf32>
      %47 = vector.broadcast %46 : vector<1x512xf32> to vector<8x512xf32>
      %48 = arith.addf %45, %47 : vector<8x512xf32>
      %c0_33 = arith.constant 0 : index
      %c0_34 = arith.constant 0 : index
      %49 = vector.load %arg9[%c0_33, %c0_34] : memref<8x512xf32, #tpu.memory_space<vmem>>, vector<8x512xf32>
      tpu.vector_store %arg9[%c0_33, %c0_34], %48 {strides = array<i32>} : memref<8x512xf32, #tpu.memory_space<vmem>>, vector<8x512xf32>,
    } else {
    }
    return
  }
  func.func @transform_0(%arg0: i32, %arg1: i32) -> (i32, i32, i32) {
    %c0_i32 = arith.constant 0 : i32
    %c0_i32_0 = arith.constant 0 : i32
    return %arg0, %arg1, %c0_i32 : i32, i32, i32
  }
  func.func @transform_1(%arg0: i32, %arg1: i32) -> (i32, i32) {
    %c0_i32 = arith.constant 0 : i32
    %c0_i32_0 = arith.constant 0 : i32
    %c0_i32_1 = arith.constant 0 : i32
    return %c0_i32, %c0_i32_0 : i32, i32
  }
  func.func @transform_2(%arg0: i32, %arg1: i32) -> (i32, i32) {
    %c0_i32 = arith.constant 0 : i32
    %c0_i32_0 = arith.constant 0 : i32
    %c0_i32_1 = arith.constant 0 : i32
    return %c0_i32, %c0_i32_0 : i32, i32
  }
  func.func @transform_3(%arg0: i32, %arg1: i32) -> (i32, i32) {
    %c0_i32 = arith.constant 0 : i32
    %c0_i32_0 = arith.constant 0 : i32
    %c0_i32_1 = arith.constant 0 : i32
    return %c0_i32, %c0_i32_0 : i32, i32
  }
  func.func @transform_4(%arg0: i32, %arg1: i32) -> (i32, i32) {
    %c0_i32 = arith.constant 0 : i32
    %c0_i32_0 = arith.constant 0 : i32
    %c0_i32_1 = arith.constant 0 : i32
    return %c0_i32, %c0_i32_0 : i32, i32
  }
  func.func @transform_5(%arg0: i32, %arg1: i32) -> (i32, i32) {
    %c0_i32 = arith.constant 0 : i32
    %c0_i32_0 = arith.constant 0 : i32
    %c0_i32_1 = arith.constant 0 : i32
    return %c0_i32, %c0_i32_0 : i32, i32
  }
  func.func @transform_6(%arg0: i32, %arg1: i32) -> (i32, i32) {
    %c0_i32 = arith.constant 0 : i32
    %c0_i32_0 = arith.constant 0 : i32
    %c0_i32_1 = arith.constant 0 : i32
    return %c0_i32, %c0_i32_0 : i32, i32
  }
  func.func @transform_7(%arg0: i32, %arg1: i32) -> (i32, i32) {
    %c0_i32 = arith.constant 0 : i32
    %c0_i32_0 = arith.constant 0 : i32
    return %arg0, %c0_i32 : i32, i32
  }
}

</mosaic_0001>

<bundles_post_ra>
// kernel: tpu_custom_call.1
= control target key start
LH: loop header
LB: loop body
LE: loop exit
PB: predicated region body
PF: predicated region fallthrough
CT: control target
= control target key end

     0   :  { %12 = vsyncpa [#allocation4], 0  ;;  %s17707_s0 = inlined_call_operand.hbm [shape: bf16[8,256,128], index: 0, kind: input, shape index: {}]   ;;  %s17708_s1 = inlined_call_operand.hbm [shape: bf16[128,128], index: 1, kind: input, shape index: {}]   ;;  %s17709_s2 = inlined_call_operand.vmem [shape: f32[1,128], index: 2, kind: input, shape index: {}]   ;;  %s17710_s3 = inlined_call_operand.hbm [shape: bf16[128,256], index: 3, kind: input, shape index: {}]   ;;  %s17711_s4 = inlined_call_operand.vmem [shape: f32[1,256], index: 4, kind: input, shape index: {}]   ;;  %s17712_s5 = inlined_call_operand.hbm [shape: bf16[256,512], index: 5, kind: input, shape index: {}]   ;;  %s17713_s6 = inlined_call_operand.vmem [shape: f32[1,512], index: 6, kind: input, shape index: {}]   ;;  %s17714_s7 = inlined_call_operand.hbm [shape: f32[8,512], index: 7, kind: output, shape index: {}]  }
   0x1   :  { %13 = vsyncpa [#allocation7], 0 }
   0x2   :  { %14 = vsyncpa [#allocation10], 0 }
   0x3   :  { %15 = vsyncpa [#allocation5], 0  ;;  %s10575_s24 = smov [#allocation6]   ;;  %s10576_s26 = smov [#allocation3]  }
   0x4   :  { %s33_s25 = sshll.u32 %s10575_s24, 4  ;;  %s21_s27 = sshll.u32 %s10576_s26, 4  ;;  %s34_s25 = int_to_ptr.vmem [resolvable:$true] %s33_s25  ;;  %s22_s27 = int_to_ptr.vmem [resolvable:$true] %s21_s27 }
   0x5   :  { %s10475_s28 = scalar_lea.vmem %s34_s25, 1024  ;;  %p10480_p1 = scmp.lt.s32.totalorder %s34_s25, %s34_s25 }
   0x6   :  { %p10476_p0 = scmp.ne.s32.totalorder %s34_s25, %s10475_s28  ;;  %p10481_p2 = scmp.lt.s32.totalorder %s10475_s28, %s10475_s28 }
   0x8   :  { %p10482_p3 = por %p10481_p2, %p10480_p1 }
   0xa   :  { %p10483_p4 = pnand %p10482_p3, %p10476_p0 }
   0xc   :  { %10486 = shalt.err (!%p10483_p4)
}
   0xd   :  { %s10577_s29 = smov 64   ;;  %s10578_s30 = smov 4  }
   0xe   :  { %39 = dma.hbm_to_vmem [thread:$0]  %s17708_s1, 1024, %s34_s25, [#allocation7], %s10577_s29, %s10577_s29, %s10578_s30  }
   0xf   :  { %s10495_s10 = scalar_lea.vmem %s22_s27, 16384  ;;  %p10500_p6 = scmp.lt.s32.totalorder %s22_s27, %s22_s27 }
  0x10   :  { %p10496_p5 = scmp.ne.s32.totalorder %s22_s27, %s10495_s10  ;;  %p10501_p7 = scmp.lt.s32.totalorder %s10495_s10, %s10495_s10 }
  0x12   :  { %p10502_p8 = por %p10501_p7, %p10500_p6 }
  0x14   :  { %p10503_p9 = pnand %p10502_p8, %p10496_p5 }
  0x16   :  { %10506 = shalt.err (!%p10503_p9)
}
  0x17   :  { %27 = dma.hbm_to_vmem [thread:$0]  %s17707_s0, 16384, %s22_s27, [#allocation4], %s10577_s29, %s10577_s29, %s10578_s30  }
  0x18   :  { %s10579_s13 = smov [#allocation8]  }
  0x19   :  { %s47_s14 = sshll.u32 %s10579_s13, 4  ;;  %s48_s14 = int_to_ptr.vmem [resolvable:$true] %s47_s14 }
  0x1a   :  { %s10515_s15 = scalar_lea.vmem %s48_s14, 2048  ;;  %p10520_p11 = scmp.lt.s32.totalorder %s48_s14, %s48_s14 }
  0x1b   :  { %p10516_p10 = scmp.ne.s32.totalorder %s48_s14, %s10515_s15  ;;  %p10521_p12 = scmp.lt.s32.totalorder %s10515_s15, %s10515_s15 }
  0x1d   :  { %p10522_p13 = por %p10521_p12, %p10520_p11 }
  0x1f   :  { %p10523_p0 = pnand %p10522_p13, %p10516_p10 }
  0x21   :  { %10526 = shalt.err (!%p10523_p0)
}
  0x22   :  { %s10580_s1 = smov 128   ;;  %s10581_s16 = smov 8  }
  0x23   :  { %53 = dma.hbm_to_vmem [thread:$0]  %s17710_s3, 2048, %s48_s14, [#allocation7], %s10580_s1, %s10580_s1, %s10581_s16  }
  0x24   :  { %s10582_s19 = smov [#allocation9]  }
  0x25   :  { %s61_s20 = sshll.u32 %s10582_s19, 4  ;;  %s62_s20 = int_to_ptr.vmem [resolvable:$true] %s61_s20 }
  0x26   :  { %s10535_s0 = scalar_lea.vmem %s62_s20, 8192  ;;  %p10540_p2 = scmp.lt.s32.totalorder %s62_s20, %s62_s20 }
  0x27   :  { %p10536_p1 = scmp.ne.s32.totalorder %s62_s20, %s10535_s0  ;;  %p10541_p3 = scmp.lt.s32.totalorder %s10535_s0, %s10535_s0 }
  0x29   :  { %p10542_p4 = por %p10541_p3, %p10540_p2 }
  0x2b   :  { %p10543_p5 = pnand %p10542_p4, %p10536_p1 }
  0x2d   :  { %10546 = shalt.err (!%p10543_p5)
}
  0x2e   :  { %s10583_s21 = smov 256   ;;  %s10584_s22 = smov 16  }
  0x2f   :  { %67 = dma.hbm_to_vmem [thread:$0]  %s17712_s5, 8192, %s62_s20, [#allocation10], %s10583_s21, %s10583_s21, %s10584_s22  }
  0x30   :  { %10567 = dma.done.wait [#allocation4], 16384  }
  0x31   :  { %10568 = vsyncadd [#allocation4], 4294950912 }
  0x32   :  { %10569 = dma.done.wait [#allocation7], 3072  }
  0x33   :  { %10570 = vsyncadd [#allocation7], 4294964224 }
  0x34   :  { %10571 = dma.done.wait [#allocation10], 8192  }
  0x35   :  { %10572 = vsyncadd [#allocation10], 4294959104  ;;  %v8670_v0 = vld [vmem:[#allocation6 + $0x38] sm:$0xff]   ;;  %v8671_v1 = vld [vmem:[#allocation6 + $0x30] sm:$0xff]   ;;  %vm7472_vm0 = vcmask 1041409   ;;  %vm7474_vm1 = vcmask 1042434  }
  0x36   :  { %8370 = vmatprep.subr.bf16.mxu0 %v8670_v0  ;;  %v8672_v2 = vld [vmem:[#allocation6 + $0x28] sm:$0xff]   ;;  %v8673_v3 = vld [vmem:[#allocation6 + $0x20] sm:$0xff]   ;;  %v8674_v5 = vld [vmem:[#allocation6 + $0x18] sm:$0xff]   ;;  %vm7476_vm2 = vcmask 1043459   ;;  %vm7478_vm3 = vcmask 1044484   ;;  %vm7480_vm4 = vcmask 1045509  }
  0x37   :  { %8371 = vmatpush3.bf16.msra.mxu0 %v8670_v0  ;;  %v8678_v4 = vld [vmem:[#allocation3] sm:$0xff]   ;;  %v8675_v6 = vld [vmem:[#allocation6 + $0x10] sm:$0xff]   ;;  %v8676_v7 = vld [vmem:[#allocation6 + $0x8] sm:$0xff]   ;;  %vm7482_vm5 = vcmask 1046534   ;;  %vm7484_vm6 = vcmask 1047559  }
  0x38   :  { %8372 = vmatprep.subr.bf16.mxu0 %v8671_v1  ;;  %8386 = vmatprep.mubr.bf16.mxu0 %v8678_v4  ;;  %v8677_v8 = vld [vmem:[#allocation6] sm:$0xff]   ;;  %v8679_v9 = vld [vmem:[#allocation3 + $0x8] sm:$0xff]   ;;  %v8680_v10 = vld [vmem:[#allocation3 + $0x10] sm:$0xff]  }
  0x39   :  { %v8681_v11 = vld [vmem:[#allocation3 + $0x18] sm:$0xff]   ;;  %v8682_v12 = vld [vmem:[#allocation3 + $0x20] sm:$0xff]   ;;  %v8683_v13 = vld [vmem:[#allocation3 + $0x28] sm:$0xff]  }
  0x3a   :  { %v8684_v14 = vld [vmem:[#allocation3 + $0x30] sm:$0xff]   ;;  %v8685_v15 = vld [vmem:[#allocation3 + $0x38] sm:$0xff]   ;;  %v8686_v16 = vld [vmem:[#allocation3 + $0x40] sm:$0xff]  }
  0x3b   :  { %8373 = vmatpush3.bf16.msra.mxu0 %v8671_v1  ;;  %v8687_v17 = vld [vmem:[#allocation3 + $0x48] sm:$0xff]   ;;  %v8688_v18 = vld [vmem:[#allocation3 + $0x50] sm:$0xff]   ;;  %v8689_v19 = vld [vmem:[#allocation3 + $0x58] sm:$0xff]  }
  0x3c   :  { %8374 = vmatprep.subr.bf16.mxu0 %v8672_v2  ;;  %v8690_v20 = vld [vmem:[#allocation3 + $0x60] sm:$0xff]   ;;  %v8691_v21 = vld [vmem:[#allocation3 + $0x68] sm:$0xff]   ;;  %v8692_v22 = vld [vmem:[#allocation3 + $0x70] sm:$0xff]  }
  0x3d   :  { %v8693_v23 = vld [vmem:[#allocation3 + $0x78] sm:$0xff]   ;;  %v8694_v24 = vld [vmem:[#allocation3 + $0x80] sm:$0xff]   ;;  %v8695_v25 = vld [vmem:[#allocation3 + $0x88] sm:$0xff]  }
  0x3e   :  { %v8696_v26 = vld [vmem:[#allocation3 + $0x90] sm:$0xff]   ;;  %v8697_v27 = vld [vmem:[#allocation3 + $0x98] sm:$0xff]   ;;  %v8698_v28 = vld [vmem:[#allocation3 + $0xa0] sm:$0xff]  }
  0x3f   :  { %8375 = vmatpush3.bf16.msra.mxu0 %v8672_v2  ;;  %v8699_v29 = vld [vmem:[#allocation3 + $0xa8] sm:$0xff]   ;;  %v8700_v30 = vld [vmem:[#allocation3 + $0xb0] sm:$0xff]   ;;  %v8701_v31 = vld [vmem:[#allocation3 + $0xb8] sm:$0xff]  }
  0x40   :  { %8376 = vmatprep.subr.bf16.mxu0 %v8673_v3  ;;  %v8702_v32 = vld [vmem:[#allocation3 + $0xc0] sm:$0xff]   ;;  %v8703_v33 = vld [vmem:[#allocation3 + $0xc8] sm:$0xff]   ;;  %v8704_v34 = vld [vmem:[#allocation3 + $0xd0] sm:$0xff]  }
  0x41   :  { %v8705_v35 = vld [vmem:[#allocation3 + $0xd8] sm:$0xff]   ;;  %v8706_v36 = vld [vmem:[#allocation3 + $0xe0] sm:$0xff]   ;;  %v8707_v37 = vld [vmem:[#allocation3 + $0xe8] sm:$0xff]  }
  0x42   :  { %v8708_v38 = vld [vmem:[#allocation3 + $0xf0] sm:$0xff]   ;;  %v8709_v39 = vld [vmem:[#allocation3 + $0xf8] sm:$0xff]   ;;  %v8710_v40 = vld [vmem:[#allocation3 + $0x100] sm:$0xff]  }
  0x43   :  { %8377 = vmatpush3.bf16.msra.mxu0 %v8673_v3  ;;  %v8711_v41 = vld [vmem:[#allocation3 + $0x108] sm:$0xff]   ;;  %v8712_v42 = vld [vmem:[#allocation3 + $0x110] sm:$0xff]   ;;  %v8713_v43 = vld [vmem:[#allocation3 + $0x118] sm:$0xff]  }
  0x44   :  { %8378 = vmatprep.subr.bf16.mxu0 %v8674_v5  ;;  %v8714_v44 = vld [vmem:[#allocation3 + $0x120] sm:$0xff]   ;;  %v8715_v45 = vld [vmem:[#allocation3 + $0x128] sm:$0xff]   ;;  %v8716_v46 = vld [vmem:[#allocation3 + $0x130] sm:$0xff]  }
  0x45   :  { %v8717_v47 = vld [vmem:[#allocation3 + $0x138] sm:$0xff]   ;;  %v8718_v48 = vld [vmem:[#allocation3 + $0x140] sm:$0xff]   ;;  %v8719_v49 = vld [vmem:[#allocation3 + $0x148] sm:$0xff]  }
  0x46   :  { %v8720_v50 = vld [vmem:[#allocation3 + $0x150] sm:$0xff]   ;;  %v8721_v51 = vld [vmem:[#allocation3 + $0x158] sm:$0xff]   ;;  %v8722_v53 = vld [vmem:[#allocation3 + $0x160] sm:$0xff]  }
  0x47   :  { %8379 = vmatpush3.bf16.msra.mxu0 %v8674_v5  ;;  %v8752_v52 = vld [vmem:[#allocation8 + $0x74] ss:$8 sps:$4 sm:$0xff]   ;;  %v8754_v54 = vld [vmem:[#allocation8 + $0x70] ss:$8 sps:$4 sm:$0xff]   ;;  %v8757_v55 = vld [vmem:[#allocation8 + $0x64] ss:$8 sps:$4 sm:$0xff]  }
  0x48   :  { %8380 = vmatprep.subr.bf16.mxu0 %v8675_v6  ;;  %8642 = vmatprep.subr.bf16.mxu1 %v8752_v52  ;;  %v8759_v56 = vld [vmem:[#allocation8 + $0x60] ss:$8 sps:$4 sm:$0xff]   ;;  %v8760_v58 = vld [vmem:[#allocation8 + $0x54] ss:$8 sps:$4 sm:$0xff]   ;;  %v8762_v60 = vld [vmem:[#allocation8 + $0x50] ss:$8 sps:$4 sm:$0xff]  }
  0x49   :  { %8650 = vmatpush1.bf16.msra.mxu1 %v8754_v54  ;;  %v8723_v57 = vld [vmem:[#allocation3 + $0x168] sm:$0xff]   ;;  %v8724_v59 = vld [vmem:[#allocation3 + $0x170] sm:$0xff]   ;;  %v8725_v63 = vld [vmem:[#allocation3 + $0x178] sm:$0xff]  }
  0x4a   :  { %8643 = vmatprep.subr.bf16.mxu1 %v8757_v55  ;;  %v8765_v61 = vld [vmem:[#allocation8 + $0x44] ss:$8 sps:$4 sm:$0xff]   ;;  %v8767_v62 = vld [vmem:[#allocation8 + $0x40] ss:$8 sps:$4 sm:$0xff]   ;;  %v8768_v0 = vld [vmem:[#allocation8 + $0x34] ss:$8 sps:$4 sm:$0xff]  }
  0x4b   :  { %8381 = vmatpush3.bf16.msra.mxu0 %v8675_v6  ;;  %v8726_v1 = vld [vmem:[#allocation3 + $0x180] sm:$0xff]   ;;  %v8770_v2 = vld [vmem:[#allocation8 + $0x30] ss:$8 sps:$4 sm:$0xff]   ;;  %v8727_v5 = vld [vmem:[#allocation3 + $0x188] sm:$0xff]  }
  0x4c   :  { %8382 = vmatprep.subr.bf16.mxu0 %v8676_v7  ;;  %v8773_v3 = vld [vmem:[#allocation8 + $0x24] ss:$8 sps:$4 sm:$0xff]   ;;  %v8775_v4 = vld [vmem:[#allocation8 + $0x20] ss:$8 sps:$4 sm:$0xff]   ;;  %v8776_v6 = vld [vmem:[#allocation8 + $0x14] ss:$8 sps:$4 sm:$0xff]  }
  0x4d   :  { %8651 = vmatpush1.bf16.msra.mxu1 %v8759_v56 }
  0x4e   :  { %8644 = vmatprep.subr.bf16.mxu1 %v8760_v58 }
  0x4f   :  { %8383 = vmatpush3.bf16.msra.mxu0 %v8676_v7  ;;  %v8728_v7 = vld [vmem:[#allocation3 + $0x190] sm:$0xff]  }
  0x50   :  { %8384 = vmatprep.subr.bf16.mxu0 %v8677_v8 }
  0x51   :  { %8652 = vmatpush1.bf16.msra.mxu1 %v8762_v60 }
  0x52   :  { %8645 = vmatprep.subr.bf16.mxu1 %v8765_v61 }
  0x53   :  { %8385 = vmatpush3.bf16.msra.mxu0 %v8677_v8  ;;  %v8778_v8 = vld [vmem:[#allocation8 + $0x10] ss:$8 sps:$4 sm:$0xff]  }
  0x54   :  { %3501 = vmatprep.subr.bf16.mxu0 %v8752_v52  ;;  %v8734_v52 = vld [vmem:[#allocation3 + $0x1c0] sm:$0xff]  }
  0x55   :  { %8653 = vmatpush1.bf16.msra.mxu1 %v8767_v62 }
  0x56   :  { %8387 = vmatmul.mubr.bf16.vlgmr.msra.gmra.mxu0 %v8679_v9  ;;  %8646 = vmatprep.subr.bf16.mxu1 %v8768_v0  ;;  %v10642_v9 = vld [vmem:[%s17709_s2] ss:$0 sm:$0xff] }
  0x57   :  { %8390 = vmatprep.mubr.bf16.mxu0 %v8680_v10  ;;  %3502 = vmatpush1.bf16.msra.mxu0 %v8754_v54 }
  0x58   :  { %3503 = vmatprep.subr.bf16.mxu0 %v8757_v55 }
  0x59   :  { %8654 = vmatpush1.bf16.msra.mxu1 %v8770_v2 }
  0x5a   :  { %8647 = vmatprep.subr.bf16.mxu1 %v8773_v3 }
  0x5b   :  { %3504 = vmatpush1.bf16.msra.mxu0 %v8759_v56 }
  0x5c   :  { %3505 = vmatprep.subr.bf16.mxu0 %v8760_v58 }
  0x5d   :  { %8655 = vmatpush1.bf16.msra.mxu1 %v8775_v4 }
  0x5e   :  { %8391 = vmatmul.mubr.bf16.gmra.mxu0 %v8681_v11  ;;  %8648 = vmatprep.subr.bf16.mxu1 %v8776_v6  ;;  %v8781_v11 = vld [vmem:[#allocation8 + $0x4] ss:$8 sps:$4 sm:$0xff]  }
  0x5f   :  { %8394 = vmatprep.mubr.bf16.mxu0 %v8682_v12  ;;  %3506 = vmatpush1.bf16.msra.mxu0 %v8762_v60 }
  0x60   :  { %3507 = vmatprep.subr.bf16.mxu0 %v8765_v61 }
  0x61   :  { %8656 = vmatpush1.bf16.msra.mxu1 %v8778_v8 }
  0x62   :  { %8649 = vmatprep.subr.bf16.mxu1 %v8781_v11 }
  0x63   :  { %3508 = vmatpush1.bf16.msra.mxu0 %v8767_v62 }
  0x64   :  { %3509 = vmatprep.subr.bf16.mxu0 %v8768_v0 }
  0x66   :  { %8395 = vmatmul.mubr.bf16.gmra.mxu0 %v8683_v13  ;;  %v8783_v13 = vld [vmem:[#allocation8] ss:$8 sps:$4 sm:$0xff]  }
  0x67   :  { %8398 = vmatprep.mubr.bf16.mxu0 %v8684_v14  ;;  %3510 = vmatpush1.bf16.msra.mxu0 %v8770_v2 }
  0x68   :  { %3511 = vmatprep.subr.bf16.mxu0 %v8773_v3  ;;  %8657 = vmatpush1.bf16.msra.mxu1 %v8783_v13 }
  0x6b   :  { %3512 = vmatpush1.bf16.msra.mxu0 %v8775_v4 }
  0x6c   :  { %3513 = vmatprep.subr.bf16.mxu0 %v8776_v6 }
  0x6e   :  { %8399 = vmatmul.mubr.bf16.gmra.mxu0 %v8685_v15 }
  0x6f   :  { %8402 = vmatprep.mubr.bf16.mxu0 %v8686_v16  ;;  %3514 = vmatpush1.bf16.msra.mxu0 %v8778_v8 }
  0x70   :  { %3515 = vmatprep.subr.bf16.mxu0 %v8781_v11 }
  0x73   :  { %3516 = vmatpush1.bf16.msra.mxu0 %v8783_v13 }
  0x76   :  { %8403 = vmatmul.mubr.bf16.gmra.mxu0 %v8687_v17 }
  0x77   :  { %8406 = vmatprep.mubr.bf16.mxu0 %v8688_v18  ;;  %v8729_v18 = vld [vmem:[#allocation3 + $0x198] sm:$0xff]  }
  0x7e   :  { %8407 = vmatmul.mubr.bf16.gmra.mxu0 %v8689_v19 }
  0x7f   :  { %8410 = vmatprep.mubr.bf16.mxu0 %v8690_v20 }
  0x86   :  { %8411 = vmatmul.mubr.bf16.gmra.mxu0 %v8691_v21  ;;  %v8730_v21 = vld [vmem:[#allocation3 + $0x1a0] sm:$0xff]  }
  0x87   :  { %8414 = vmatprep.mubr.bf16.mxu0 %v8692_v22  ;;  %v17715_v22 = vmov 0  }
  0x88   :  { %3803 = vmatprep.mubr.bf16.mxu1 %v17715_v22 }
  0x8e   :  { %8415 = vmatmul.mubr.bf16.gmra.mxu0 %v8693_v23 }
  0x8f   :  { %8418 = vmatprep.mubr.bf16.mxu0 %v8694_v24 }
  0x96   :  { %8419 = vmatmul.mubr.bf16.gmra.mxu0 %v8695_v25 }
  0x97   :  { %8422 = vmatprep.mubr.bf16.mxu0 %v8696_v26 }
  0x9e   :  { %8423 = vmatmul.mubr.bf16.gmra.mxu0 %v8697_v27 }
  0x9f   :  { %8426 = vmatprep.mubr.bf16.mxu0 %v8698_v28 }
  0xa6   :  { %8427 = vmatmul.mubr.bf16.gmra.mxu0 %v8699_v29 }
  0xa7   :  { %8430 = vmatprep.mubr.bf16.mxu0 %v8700_v30 }
  0xae   :  { %8431 = vmatmul.mubr.bf16.gmra.mxu0 %v8701_v31 }
  0xaf   :  { %8434 = vmatprep.mubr.bf16.mxu0 %v8702_v32 }
  0xb6   :  { %8435 = vmatmul.mubr.bf16.gmra.mxu0 %v8703_v33  ;;  %v8731_v33 = vld [vmem:[#allocation3 + $0x1a8] sm:$0xff]  }
  0xb7   :  { %8438 = vmatprep.mubr.bf16.mxu0 %v8704_v34 }
  0xbe   :  { %8439 = vmatmul.mubr.bf16.gmra.mxu0 %v8705_v35 }
  0xbf   :  { %8442 = vmatprep.mubr.bf16.mxu0 %v8706_v36  ;;  %v8732_v36 = vld [vmem:[#allocation3 + $0x1b0] sm:$0xff]  }
  0xc6   :  { %8443 = vmatmul.mubr.bf16.gmra.mxu0 %v8707_v37 }
  0xc7   :  { %8446 = vmatprep.mubr.bf16.mxu0 %v8708_v38 }
  0xce   :  { %8447 = vmatmul.mubr.bf16.gmra.mxu0 %v8709_v39 }
  0xcf   :  { %8450 = vmatprep.mubr.bf16.mxu0 %v8710_v40 }
  0xd6   :  { %8451 = vmatmul.mubr.bf16.gmra.mxu0 %v8711_v41 }
  0xd7   :  { %8454 = vmatprep.mubr.bf16.mxu0 %v8712_v42 }
  0xde   :  { %8455 = vmatmul.mubr.bf16.gmra.mxu0 %v8713_v43 }
  0xdf   :  { %8458 = vmatprep.mubr.bf16.mxu0 %v8714_v44 }
  0xe6   :  { %8459 = vmatmul.mubr.bf16.gmra.mxu0 %v8715_v45 }
  0xe7   :  { %8462 = vmatprep.mubr.bf16.mxu0 %v8716_v46 }
  0xee   :  { %8463 = vmatmul.mubr.bf16.gmra.mxu0 %v8717_v47 }
  0xef   :  { %8466 = vmatprep.mubr.bf16.mxu0 %v8718_v48 }
  0xf6   :  { %8467 = vmatmul.mubr.bf16.gmra.mxu0 %v8719_v49 }
  0xf7   :  { %8470 = vmatprep.mubr.bf16.mxu0 %v8720_v50  ;;  %v8733_v50 = vld [vmem:[#allocation3 + $0x1b8] sm:$0xff]  }
  0xfe   :  { %8471 = vmatmul.mubr.bf16.gmra.mxu0 %v8721_v51 }
  0xff   :  { %8474 = vmatprep.mubr.bf16.mxu0 %v8722_v53 }
 0x106   :  { %8475 = vmatmul.mubr.bf16.gmra.mxu0 %v8723_v57 }
 0x107   :  { %8478 = vmatprep.mubr.bf16.mxu0 %v8724_v59 }
 0x10e   :  { %8479 = vmatmul.mubr.bf16.gmra.mxu0 %v8725_v63 }
 0x10f   :  { %8482 = vmatprep.mubr.bf16.mxu0 %v8726_v1 }
 0x116   :  { %v8388_v10 = vpop.f32.mrf.mxu0  ;;  %8483 = vmatmul.mubr.bf16.gmra.mxu0 %v8727_v5 }
 0x117   :  { %v1227_v12 = vadd.f32 %v8388_v10, %v10642_v9  ;;  %8486 = vmatprep.mubr.bf16.mxu0 %v8728_v7 }
 0x118   :  { %v1218_v14 = vpop.f32.mrf.mxu0 }
 0x119   :  { %v2243_v15 = vmul.f32 0.5, %v1227_v12  ;;  %v1219_v16 = vadd.f32 %v10642_v9, %v1218_v14  ;;  %v8735_v14 = vld [vmem:[#allocation3 + $0x1c8] sm:$0xff]  }
 0x11a   :  { %v8389_v17 = vpop.f32.mrf.mxu0 }
 0x11b   :  { %8926 = vtanh.f32 %v2243_v15  ;;  %v10646_v19 = vmul.f32 0.5, %v1219_v16  ;;  %v1230_v20 = vadd.f32 %v8389_v17, %v10642_v9  ;;  %v8736_v17 = vld [vmem:[#allocation3 + $0x1d0] sm:$0xff]  }
 0x11c   :  { %v1221_v23 = vpop.f32.mrf.mxu0 }
 0x11d   :  { %8928 = vtanh.f32 %v10646_v19  ;;  %v2244_v24 = vmul.f32 0.5, %v1230_v20  ;;  %v1222_v25 = vadd.f32 %v10642_v9, %v1221_v23 }
 0x11e   :  { %v8392_v26 = vpop.f32.mrf.mxu0  ;;  %8487 = vmatmul.mubr.bf16.gmra.mxu0 %v8729_v18 }
 0x11f   :  { %8930 = vtanh.f32 %v2244_v24  ;;  %v2242_v27 = vmul.f32 0.5, %v1222_v25  ;;  %v1243_v28 = vadd.f32 %v8392_v26, %v10642_v9  ;;  %8490 = vmatprep.mubr.bf16.mxu0 %v8730_v21 }
 0x120   :  { %v1234_v29 = vpop.f32.mrf.mxu0 }
 0x121   :  { %8932 = vtanh.f32 %v2242_v27  ;;  %v10653_v30 = vmul.f32 0.5, %v1243_v28  ;;  %v1235_v31 = vadd.f32 %v10642_v9, %v1234_v29 }
 0x122   :  { %v8393_v32 = vpop.f32.mrf.mxu0 }
 0x123   :  { %8934 = vtanh.f32 %v10653_v30  ;;  %v10657_v34 = vmul.f32 0.5, %v1235_v31  ;;  %v1246_v35 = vadd.f32 %v8393_v32, %v10642_v9 }
 0x124   :  { %v1237_v37 = vpop.f32.mrf.mxu0 }
 0x125   :  { %8936 = vtanh.f32 %v10657_v34  ;;  %v10661_v38 = vmul.f32 0.5, %v1246_v35  ;;  %v1238_v39 = vadd.f32 %v10642_v9, %v1237_v37 }
 0x126   :  { %v8396_v40 = vpop.f32.mrf.mxu0  ;;  %8491 = vmatmul.mubr.bf16.gmra.mxu0 %v8731_v33 }
 0x127   :  { %8938 = vtanh.f32 %v10661_v38  ;;  %v10665_v41 = vmul.f32 0.5, %v1238_v39  ;;  %v1259_v42 = vadd.f32 %v8396_v40, %v10642_v9  ;;  %8494 = vmatprep.mubr.bf16.mxu0 %v8732_v36 }
 0x128   :  { %v8927_v43 = vpop.eup %8926  ;;  %v1250_v44 = vpop.f32.mrf.mxu0 }
 0x129   :  { %8940 = vtanh.f32 %v10665_v41  ;;  %v10669_v45 = vmul.f32 0.5, %v1259_v42  ;;  %v1251_v46 = vadd.f32 %v10642_v9, %v1250_v44  ;;  %v2755_v48 = vadd.f32 1.0, %v8927_v43  ;;  %v8737_v44 = vld [vmem:[#allocation3 + $0x1d8] sm:$0xff]  }
 0x12a   :  { %v8929_v47 = vpop.eup %8928  ;;  %v8397_v49 = vpop.f32.mrf.mxu0 }
 0x12b   :  { %v10672_v51 = vmul.f32 0.5, %v1251_v46  ;;  %8942 = vtanh.f32 %v10669_v45  ;;  %v1262_v54 = vadd.f32 %v8397_v49, %v10642_v9  ;;  %v2753_v56 = vadd.f32 1.0, %v8929_v47  ;;  %v8738_v47 = vld [vmem:[#allocation3 + $0x1e0] sm:$0xff]   ;;  %v8755_v46 = vld [vmem:[#allocation3 + $0x250] sm:$0xff]  }
 0x12c   :  { %v8931_v53 = vpop.eup %8930  ;;  %v1253_v55 = vpop.f32.mrf.mxu0  ;;  %v10678_v60 = vmul.f32 %v2755_v48, %v2243_v15 }
 0x12d   :  { %v2756_v57 = vadd.f32 1.0, %v8931_v53  ;;  %8944 = vtanh.f32 %v10672_v51  ;;  %v1254_v58 = vadd.f32 %v10642_v9, %v1253_v55  ;;  %v10680_v61 = vmul.f32 0.5, %v1262_v54 }
 0x12e   :  { %v8933_v59 = vpop.eup %8932  ;;  %v8400_v62 = vpop.f32.mrf.mxu0  ;;  %8495 = vmatmul.mubr.bf16.gmra.mxu0 %v8733_v50  ;;  %v10689_v5 = vmul.f32 %v2753_v56, %v10646_v19 }
 0x12f   :  { %v10682_v63 = vmul.f32 %v2756_v57, %v2244_v24  ;;  %v2754_v0 = vadd.f32 1.0, %v8933_v59  ;;  %v10684_v1 = vmul.f32 0.5, %v1254_v58  ;;  %v1275_v2 = vadd.f32 %v8400_v62, %v10642_v9  ;;  %8498 = vmatprep.mubr.bf16.mxu0 %v8734_v52 }
 0x130   :  { %v8935_v3 = vpop.eup %8934  ;;  %8946 = vtanh.f32 %v10680_v61  ;;  %v1266_v4 = vpop.f32.mrf.mxu0 }
 0x131   :  { %v10693_v7 = vmul.f32 %v2754_v0, %v2242_v27  ;;  %8948 = vtanh.f32 %v10684_v1  ;;  %v2759_v10 = vadd.f32 1.0, %v8935_v3  ;;  %v10696_v11 = vmul.f32 0.5, %v1275_v2 }
 0x132   :  { %v8937_v8 = vpop.eup %8936  ;;  %v1267_v12 = vadd.f32 %v10642_v9, %v1266_v4  ;;  %v8401_v13 = vpop.f32.mrf.mxu0 }
 0x133   :  { %v1278_v16 = vadd.f32 %v8401_v13, %v10642_v9  ;;  %8950 = vtanh.f32 %v10696_v11  ;;  %v2757_v21 = vadd.f32 1.0, %v8937_v8  ;;  %v10709_v27 = vmul.f32 %v2759_v10, %v10653_v30 }
 0x134   :  { %v8939_v18 = vpop.eup %8938  ;;  %v10703_v19 = vmul.f32 0.5, %v1267_v12  ;;  %v1269_v20 = vpop.f32.mrf.mxu0 }
 0x135   :  { %v2760_v23 = vadd.f32 1.0, %v8939_v18  ;;  %v10705_v24 = vmul.f32 0.5, %v1278_v16  ;;  %v1270_v25 = vadd.f32 %v10642_v9, %v1269_v20  ;;  %17924 = vst [vmem:[#allocation16_spill] sm:$0xff] %v10709_v27  ;;  %v10720_v30 = vmul.f32 %v2757_v21, %v10657_v34  ;;  %v8739_v16 = vld [vmem:[#allocation3 + $0x1e8] sm:$0xff]   ;;  %v8740_v20 = vld [vmem:[#allocation3 + $0x1f0] sm:$0xff]  }
 0x136   :  { %v8941_v26 = vpop.eup %8940  ;;  %8952 = vtanh.f32 %v10703_v19  ;;  %v8404_v28 = vpop.f32.mrf.mxu0  ;;  %8499 = vmatmul.mubr.bf16.gmra.mxu0 %v8735_v14 }
 0x137   :  { %v10713_v29 = vmul.f32 %v2760_v23, %v10661_v38  ;;  %v2758_v31 = vadd.f32 1.0, %v8941_v26  ;;  %8954 = vtanh.f32 %v10705_v24  ;;  %v10716_v32 = vmul.f32 0.5, %v1270_v25  ;;  %8502 = vmatprep.mubr.bf16.mxu0 %v8736_v17  ;;  %17926 = vst [vmem:[#allocation18_spill] sm:$0xff] %v10720_v30 }
 0x138   :  { %v1291_v33 = vadd.f32 %v8404_v28, %v10642_v9  ;;  %v1282_v35 = vpop.f32.mrf.mxu0  ;;  %v8943_v36 = vpop.eup %8942 }
 0x139   :  { %17925 = vst [vmem:[#allocation17_spill] sm:$0xff] %v10713_v29  ;;  %v10725_v39 = vmul.f32 %v2758_v31, %v10665_v41  ;;  %8956 = vtanh.f32 %v10716_v32  ;;  %v1283_v42 = vadd.f32 %v10642_v9, %v1282_v35  ;;  %v2763_v48 = vadd.f32 1.0, %v8943_v36 }
 0x13a   :  { %v8945_v38 = vpop.eup %8944  ;;  %v10728_v40 = vmul.f32 0.5, %v1291_v33  ;;  %v8405_v43 = vpop.f32.mrf.mxu0 }
 0x13b   :  { %v1294_v34 = vadd.f32 %v8405_v43, %v10642_v9  ;;  %v2761_v49 = vadd.f32 1.0, %v8945_v38  ;;  %v10735_v41 = vmul.f32 0.5, %v1283_v42  ;;  %v10746_v0 = vmul.f32 %v2763_v48, %v10669_v45 }
 0x13c   :  { %8958 = vtanh.f32 %v10728_v40  ;;  %v1285_v50 = vpop.f32.mrf.mxu0 }
 0x13d   :  { %v8947_v52 = vpop.eup %8946  ;;  %v10737_v53 = vmul.f32 0.5, %v1294_v34  ;;  %v1286_v54 = vadd.f32 %v10642_v9, %v1285_v50  ;;  %8960 = vtanh.f32 %v10735_v41  ;;  %17927 = vst [vmem:[#allocation19_spill] sm:$0xff] %v10746_v0  ;;  %v10749_v2 = vmul.f32 %v2761_v49, %v10672_v51  ;;  %v8809_v0 = vld [vmem:[#allocation3 + $0x358] sm:$0xff]  }
 0x13e   :  { %v8949_v55 = vpop.eup %8948  ;;  %v2764_v56 = vadd.f32 1.0, %v8947_v52  ;;  %v8408_v57 = vpop.f32.mrf.mxu0  ;;  %8503 = vmatmul.mubr.bf16.gmra.mxu0 %v8737_v44 }
 0x13f   :  { %v2762_v58 = vadd.f32 1.0, %v8949_v55  ;;  %8962 = vtanh.f32 %v10737_v53  ;;  %v10742_v59 = vmul.f32 0.5, %v1286_v54  ;;  %v1307_v62 = vadd.f32 %v8408_v57, %v10642_v9  ;;  %8506 = vmatprep.mubr.bf16.mxu0 %v8738_v47  ;;  %17928 = vst [vmem:[#allocation20_spill] sm:$0xff] %v10749_v2 }
 0x140   :  { %v10752_v3 = vmul.f32 %v2764_v56, %v10680_v61  ;;  %v1298_v4 = vpop.f32.mrf.mxu0  ;;  %v8951_v8 = vpop.eup %8950 }
 0x141   :  { %v10755_v10 = vmul.f32 %v2762_v58, %v10684_v1  ;;  %8964 = vtanh.f32 %v10742_v59  ;;  %v10758_v12 = vmul.f32 0.5, %v1307_v62  ;;  %v1299_v13 = vadd.f32 %v10642_v9, %v1298_v4  ;;  %v8742_v62 = vld [vmem:[#allocation3 + $0x200] sm:$0xff]  }
 0x142   :  { %17929 = vst [vmem:[#allocation21_spill] sm:$0xff] %v10752_v3  ;;  %v2767_v14 = vadd.f32 1.0, %v8951_v8  ;;  %v8409_v51 = vpop.f32.mrf.mxu0 }
 0x143   :  { %17930 = vst [vmem:[#allocation22_spill] sm:$0xff] %v10755_v10  ;;  %v8953_v17 = vpop.eup %8952  ;;  %8966 = vtanh.f32 %v10758_v12  ;;  %v10766_v1 = vmul.f32 0.5, %v1299_v13  ;;  %v1310_v18 = vadd.f32 %v8409_v51, %v10642_v9  ;;  %v8810_v10 = vld [vmem:[#allocation3 + $0x360] sm:$0xff]  }
 0x144   :  { %v8955_v21 = vpop.eup %8954  ;;  %v2765_v23 = vadd.f32 1.0, %v8953_v17  ;;  %v1301_v25 = vpop.f32.mrf.mxu0  ;;  %v10774_v35 = vmul.f32 %v2767_v14, %v10696_v11 }
 0x145   :  { %v2768_v26 = vadd.f32 1.0, %v8955_v21  ;;  %8968 = vtanh.f32 %v10766_v1  ;;  %v10770_v28 = vmul.f32 0.5, %v1310_v18  ;;  %v1302_v31 = vadd.f32 %v10642_v9, %v1301_v25 }
 0x146   :  { %v8957_v33 = vpop.eup %8956  ;;  %17931 = vst [vmem:[#allocation23_spill] sm:$0xff] %v10774_v35  ;;  %v8412_v36 = vpop.f32.mrf.mxu0  ;;  %8507 = vmatmul.mubr.bf16.gmra.mxu0 %v8739_v16  ;;  %v10783_v44 = vmul.f32 %v2765_v23, %v10703_v19  ;;  %v8741_v19 = vld [vmem:[#allocation3 + $0x1f8] sm:$0xff]  }
 0x147   :  { %v10777_v38 = vmul.f32 %v2768_v26, %v10705_v24  ;;  %v2766_v42 = vadd.f32 1.0, %v8957_v33  ;;  %8970 = vtanh.f32 %v10770_v28  ;;  %v10780_v43 = vmul.f32 0.5, %v1302_v31  ;;  %8510 = vmatprep.mubr.bf16.mxu0 %v8740_v20 }
 0x148   :  { %17933 = vst [vmem:[#allocation25_spill] sm:$0xff] %v10783_v44  ;;  %v1323_v34 = vadd.f32 %v8412_v36, %v10642_v9  ;;  %v1314_v47 = vpop.f32.mrf.mxu0 }
 0x149   :  { %17932 = vst [vmem:[#allocation24_spill] sm:$0xff] %v10777_v38  ;;  %v8959_v48 = vpop.eup %8958  ;;  %v10789_v49 = vmul.f32 %v2766_v42, %v10716_v32  ;;  %8972 = vtanh.f32 %v10780_v43  ;;  %v1315_v24 = vadd.f32 %v10642_v9, %v1314_v47 }
 0x14a   :  { %v2771_v50 = vadd.f32 1.0, %v8959_v48  ;;  %v10793_v52 = vmul.f32 0.5, %v1323_v34  ;;  %v8413_v54 = vpop.f32.mrf.mxu0  ;;  %v8961_v55 = vpop.eup %8960 }
 0x14b   :  { %17934 = vst [vmem:[#allocation26_spill] sm:$0xff] %v10789_v49  ;;  %v10797_v57 = vmul.f32 0.5, %v1315_v24  ;;  %v1326_v58 = vadd.f32 %v8413_v54, %v10642_v9  ;;  %v2769_v4 = vadd.f32 1.0, %v8961_v55  ;;  %v8743_v24 = vld [vmem:[#allocation3 + $0x208] sm:$0xff]   ;;  %v8744_v54 = vld [vmem:[#allocation3 + $0x210] sm:$0xff]  }
 0x14c   :  { %v8963_v32 = vpop.eup %8962  ;;  %8974 = vtanh.f32 %v10793_v52  ;;  %v1317_v8 = vpop.f32.mrf.mxu0  ;;  %v10806_v17 = vmul.f32 %v2771_v50, %v10728_v40 }
 0x14d   :  { %v2772_v13 = vadd.f32 1.0, %v8963_v32  ;;  %8976 = vtanh.f32 %v10797_v57  ;;  %v10802_v14 = vmul.f32 0.5, %v1326_v58  ;;  %v1318_v51 = vadd.f32 %v10642_v9, %v1317_v8 }
 0x14e   :  { %v8965_v16 = vpop.eup %8964  ;;  %17935 = vst [vmem:[#allocation27_spill] sm:$0xff] %v10806_v17  ;;  %v8416_v18 = vpop.f32.mrf.mxu0  ;;  %8511 = vmatmul.mubr.bf16.gmra.mxu0 %v8741_v19  ;;  %v10816_v33 = vmul.f32 %v2769_v4, %v10735_v41 }
 0x14f   :  { %v10809_v20 = vmul.f32 %v2772_v13, %v10737_v53  ;;  %v2770_v21 = vadd.f32 1.0, %v8965_v16  ;;  %8978 = vtanh.f32 %v10802_v14  ;;  %v10812_v23 = vmul.f32 0.5, %v1318_v51  ;;  %8514 = vmatprep.mubr.bf16.mxu0 %v8742_v62 }
 0x150   :  { %v8967_v25 = vpop.eup %8966  ;;  %v1339_v26 = vadd.f32 %v8416_v18, %v10642_v9  ;;  %v1330_v31 = vpop.f32.mrf.mxu0  ;;  %17937 = vst [vmem:[#allocation29_spill] sm:$0xff] %v10816_v33 }
 0x151   :  { %17936 = vst [vmem:[#allocation28_spill] sm:$0xff] %v10809_v20  ;;  %v10821_v36 = vmul.f32 %v2770_v21, %v10742_v59  ;;  %8980 = vtanh.f32 %v10812_v23  ;;  %v2775_v42 = vadd.f32 1.0, %v8967_v25  ;;  %v1331_v47 = vadd.f32 %v10642_v9, %v1330_v31 }
 0x152   :  { %v8969_v53 = vpop.eup %8968  ;;  %v10824_v34 = vmul.f32 0.5, %v1339_v26  ;;  %v8417_v48 = vpop.f32.mrf.mxu0 }
 0x153   :  { %17938 = vst [vmem:[#allocation30_spill] sm:$0xff] %v10821_v36  ;;  %v1342_v50 = vadd.f32 %v8417_v48, %v10642_v9  ;;  %v2773_v55 = vadd.f32 1.0, %v8969_v53  ;;  %v10831_v59 = vmul.f32 0.5, %v1331_v47  ;;  %v10837_v13 = vmul.f32 %v2775_v42, %v10758_v12  ;;  %v8806_v36 = vld [vmem:[#allocation3 + $0x340] sm:$0xff]  }
 0x154   :  { %v8971_v19 = vpop.eup %8970  ;;  %8982 = vtanh.f32 %v10824_v34  ;;  %v1333_v58 = vpop.f32.mrf.mxu0 }
 0x155   :  { %v2776_v62 = vadd.f32 1.0, %v8971_v19  ;;  %v10833_v32 = vmul.f32 0.5, %v1342_v50  ;;  %v1334_v4 = vadd.f32 %v10642_v9, %v1333_v58  ;;  %17939 = vst [vmem:[#allocation31_spill] sm:$0xff] %v10837_v13  ;;  %8984 = vtanh.f32 %v10831_v59  ;;  %v8745_v50 = vld [vmem:[#allocation3 + $0x218] sm:$0xff]   ;;  %v8746_v58 = vld [vmem:[#allocation3 + $0x220] sm:$0xff]  }
 0x156   :  { %v8973_v8 = vpop.eup %8972  ;;  %v8420_v51 = vpop.f32.mrf.mxu0  ;;  %8515 = vmatmul.mubr.bf16.gmra.mxu0 %v8743_v24  ;;  %v10847_v25 = vmul.f32 %v2773_v55, %v10766_v1 }
 0x157   :  { %v10841_v16 = vmul.f32 %v2776_v62, %v10770_v28  ;;  %v2774_v18 = vadd.f32 1.0, %v8973_v8  ;;  %8986 = vtanh.f32 %v10833_v32  ;;  %v10844_v21 = vmul.f32 0.5, %v1334_v4  ;;  %8518 = vmatprep.mubr.bf16.mxu0 %v8744_v54 }
 0x158   :  { %17941 = vst [vmem:[#allocation33_spill] sm:$0xff] %v10847_v25  ;;  %v1355_v26 = vadd.f32 %v8420_v51, %v10642_v9  ;;  %v1346_v12 = vpop.f32.mrf.mxu0 }
 0x159   :  { %17940 = vst [vmem:[#allocation32_spill] sm:$0xff] %v10841_v16  ;;  %v8975_v31 = vpop.eup %8974  ;;  %v10853_v42 = vmul.f32 %v2774_v18, %v10780_v43  ;;  %8988 = vtanh.f32 %v10844_v21  ;;  %v1347_v28 = vadd.f32 %v10642_v9, %v1346_v12 }
 0x15a   :  { %v8977_v47 = vpop.eup %8976  ;;  %v2779_v48 = vadd.f32 1.0, %v8975_v31  ;;  %v10857_v24 = vmul.f32 0.5, %v1355_v26  ;;  %v8421_v1 = vpop.f32.mrf.mxu0 }
 0x15b   :  { %17942 = vst [vmem:[#allocation34_spill] sm:$0xff] %v10853_v42  ;;  %v10861_v19 = vmul.f32 0.5, %v1347_v28  ;;  %v1358_v55 = vadd.f32 %v8421_v1, %v10642_v9  ;;  %v2777_v62 = vadd.f32 1.0, %v8977_v47 }
 0x15c   :  { %v8979_v43 = vpop.eup %8978  ;;  %8990 = vtanh.f32 %v10857_v24  ;;  %v1349_v4 = vpop.f32.mrf.mxu0  ;;  %v10868_v26 = vmul.f32 %v2779_v48, %v10793_v52 }
 0x15d   :  { %v2780_v8 = vadd.f32 1.0, %v8979_v43  ;;  %v10865_v51 = vmul.f32 0.5, %v1358_v55  ;;  %8992 = vtanh.f32 %v10861_v19  ;;  %v1350_v12 = vadd.f32 %v10642_v9, %v1349_v4 }
 0x15e   :  { %v8981_v18 = vpop.eup %8980  ;;  %17943 = vst [vmem:[#allocation35_spill] sm:$0xff] %v10868_v26  ;;  %v8424_v31 = vpop.f32.mrf.mxu0  ;;  %8519 = vmatmul.mubr.bf16.gmra.mxu0 %v8745_v50  ;;  %v10878_v55 = vmul.f32 %v2777_v62, %v10797_v57  ;;  %v8747_v57 = vld [vmem:[#allocation3 + $0x228] sm:$0xff]  }
 0x15f   :  { %v10873_v28 = vmul.f32 %v2780_v8, %v10802_v14  ;;  %v2778_v47 = vadd.f32 1.0, %v8981_v18  ;;  %8994 = vtanh.f32 %v10865_v51  ;;  %v1371_v1 = vadd.f32 %v8424_v31, %v10642_v9  ;;  %8522 = vmatprep.mubr.bf16.mxu0 %v8746_v58 }
 0x160   :  { %17945 = vst [vmem:[#allocation37_spill] sm:$0xff] %v10878_v55  ;;  %v10880_v52 = vmul.f32 0.5, %v1350_v12  ;;  %v1362_v48 = vpop.f32.mrf.mxu0 }
 0x161   :  { %17944 = vst [vmem:[#allocation36_spill] sm:$0xff] %v10873_v28  ;;  %v8983_v43 = vpop.eup %8982  ;;  %v10885_v50 = vmul.f32 %v2778_v47, %v10812_v23  ;;  %v10887_v14 = vmul.f32 0.5, %v1371_v1  ;;  %v1363_v8 = vadd.f32 %v10642_v9, %v1362_v48  ;;  %v8748_v47 = vld [vmem:[#allocation3 + $0x230] sm:$0xff]  }
 0x162   :  { %v2783_v18 = vadd.f32 1.0, %v8983_v43  ;;  %8996 = vtanh.f32 %v10880_v52  ;;  %v8425_v58 = vpop.f32.mrf.mxu0  ;;  %v8985_v62 = vpop.eup %8984 }
 0x163   :  { %17946 = vst [vmem:[#allocation38_spill] sm:$0xff] %v10885_v50  ;;  %8998 = vtanh.f32 %v10887_v14  ;;  %v10894_v31 = vmul.f32 0.5, %v1363_v8  ;;  %v1374_v23 = vadd.f32 %v8425_v58, %v10642_v9  ;;  %v2781_v4 = vadd.f32 1.0, %v8985_v62 }
 0x164   :  { %v8987_v1 = vpop.eup %8986  ;;  %v1365_v53 = vpop.f32.mrf.mxu0  ;;  %v10902_v12 = vmul.f32 %v2783_v18, %v10824_v34  ;;  %v8750_v34 = vld [vmem:[#allocation3 + $0x240] sm:$0xff]  }
 0x165   :  { %v2784_v48 = vadd.f32 1.0, %v8987_v1  ;;  %9000 = vtanh.f32 %v10894_v31  ;;  %v10898_v43 = vmul.f32 0.5, %v1374_v23  ;;  %v1366_v54 = vadd.f32 %v10642_v9, %v1365_v53 }
 0x166   :  { %v8989_v40 = vpop.eup %8988  ;;  %17947 = vst [vmem:[#allocation39_spill] sm:$0xff] %v10902_v12  ;;  %v8428_v41 = vpop.f32.mrf.mxu0  ;;  %8523 = vmatmul.mubr.bf16.gmra.mxu0 %v8747_v57  ;;  %v10911_v23 = vmul.f32 %v2781_v4, %v10831_v59  ;;  %v8749_v57 = vld [vmem:[#allocation3 + $0x238] sm:$0xff]  }
 0x167   :  { %v10905_v8 = vmul.f32 %v2784_v48, %v10833_v32  ;;  %v2782_v58 = vadd.f32 1.0, %v8989_v40  ;;  %9002 = vtanh.f32 %v10898_v43  ;;  %v10908_v62 = vmul.f32 0.5, %v1366_v54  ;;  %8526 = vmatprep.mubr.bf16.mxu0 %v8748_v47 }
 0x168   :  { %17949 = vst [vmem:[#allocation41_spill] sm:$0xff] %v10911_v23  ;;  %v1387_v53 = vadd.f32 %v8428_v41, %v10642_v9  ;;  %v1378_v1 = vpop.f32.mrf.mxu0 }
 0x169   :  { %17948 = vst [vmem:[#allocation40_spill] sm:$0xff] %v10905_v8  ;;  %v8991_v11 = vpop.eup %8990  ;;  %v10917_v18 = vmul.f32 %v2782_v58, %v10844_v21  ;;  %9004 = vtanh.f32 %v10908_v62  ;;  %v1379_v40 = vadd.f32 %v10642_v9, %v1378_v1 }
 0x16a   :  { %v10921_v32 = vmul.f32 0.5, %v1387_v53  ;;  %v8429_v54 = vpop.f32.mrf.mxu0  ;;  %v8993_v59 = vpop.eup %8992  ;;  %v2787_v4 = vadd.f32 1.0, %v8991_v11 }
 0x16b   :  { %17950 = vst [vmem:[#allocation42_spill] sm:$0xff] %v10917_v18  ;;  %v10925_v47 = vmul.f32 0.5, %v1379_v40  ;;  %v1390_v48 = vadd.f32 %v8429_v54, %v10642_v9  ;;  %v2785_v53 = vadd.f32 1.0, %v8993_v59 }
 0x16c   :  { %v8995_v21 = vpop.eup %8994  ;;  %9006 = vtanh.f32 %v10921_v32  ;;  %v1381_v58 = vpop.f32.mrf.mxu0  ;;  %v10934_v40 = vmul.f32 %v2787_v4, %v10857_v24 }
 0x16d   :  { %v2788_v56 = vadd.f32 1.0, %v8995_v21  ;;  %v10929_v1 = vmul.f32 0.5, %v1390_v48  ;;  %9008 = vtanh.f32 %v10925_v47  ;;  %v1382_v45 = vadd.f32 %v10642_v9, %v1381_v58 }
 0x16e   :  { %v8432_v61 = vpop.f32.mrf.mxu0  ;;  %8527 = vmatmul.mubr.bf16.gmra.mxu0 %v8749_v57  ;;  %17951 = vst [vmem:[#allocation43_spill] sm:$0xff] %v10934_v40 }
 0x16f   :  { %v8997_v11 = vpop.eup %8996  ;;  %v10937_v54 = vmul.f32 %v2788_v56, %v10865_v51  ;;  %9010 = vtanh.f32 %v10929_v1  ;;  %v1403_v21 = vadd.f32 %v8432_v61, %v10642_v9  ;;  %8530 = vmatprep.mubr.bf16.mxu0 %v8750_v34  ;;  %v10941_v41 = vmul.f32 0.5, %v1382_v45  ;;  %v8751_v34 = vld [vmem:[#allocation3 + $0x248] sm:$0xff]  }
 0x170   :  { %v8999_v48 = vpop.eup %8998  ;;  %v2786_v59 = vadd.f32 1.0, %v8997_v11  ;;  %v1394_v37 = vpop.f32.mrf.mxu0  ;;  %v10949_v56 = vmul.f32 %v2785_v53, %v10861_v19 }
 0x171   :  { %17952 = vst [vmem:[#allocation44_spill] sm:$0xff] %v10937_v54  ;;  %v10945_v58 = vmul.f32 0.5, %v1403_v21  ;;  %v1395_v24 = vadd.f32 %v10642_v9, %v1394_v37  ;;  %v2791_v61 = vadd.f32 1.0, %v8999_v48  ;;  %9012 = vtanh.f32 %v10941_v41 }
 0x172   :  { %v9001_v4 = vpop.eup %9000  ;;  %17953 = vst [vmem:[#allocation45_spill] sm:$0xff] %v10949_v56  ;;  %v10952_v51 = vmul.f32 %v2786_v59, %v10880_v52  ;;  %v8433_v45 = vpop.f32.mrf.mxu0 }
 0x173   :  { %v10955_v11 = vmul.f32 0.5, %v1395_v24  ;;  %v2789_v37 = vadd.f32 1.0, %v9001_v4  ;;  %9014 = vtanh.f32 %v10945_v58  ;;  %v1406_v19 = vadd.f32 %v8433_v45, %v10642_v9 }
 0x174   :  { %17954 = vst [vmem:[#allocation46_spill] sm:$0xff] %v10952_v51  ;;  %v9003_v57 = vpop.eup %9002  ;;  %v1397_v53 = vpop.f32.mrf.mxu0  ;;  %v10964_v24 = vmul.f32 %v2791_v61, %v10887_v14 }
 0x175   :  { %v2792_v52 = vadd.f32 1.0, %v9003_v57  ;;  %9016 = vtanh.f32 %v10955_v11  ;;  %v1398_v48 = vadd.f32 %v10642_v9, %v1397_v53  ;;  %v10966_v6 = vmul.f32 0.5, %v1406_v19 }
 0x176   :  { %v9005_v59 = vpop.eup %9004  ;;  %17955 = vst [vmem:[#allocation47_spill] sm:$0xff] %v10964_v24  ;;  %v8436_v15 = vpop.f32.mrf.mxu0  ;;  %8531 = vmatmul.mubr.bf16.gmra.mxu0 %v8751_v34  ;;  %v10975_v45 = vmul.f32 %v2789_v37, %v10894_v31  ;;  %v8756_v31 = vld [vmem:[#allocation3 + $0x258] sm:$0xff]  }
 0x177   :  { %v10969_v4 = vmul.f32 %v2792_v52, %v10898_v43  ;;  %v2790_v21 = vadd.f32 1.0, %v9005_v59  ;;  %v10971_v22 = vmul.f32 0.5, %v1398_v48  ;;  %v1419_v57 = vadd.f32 %v8436_v15, %v10642_v9  ;;  %8534 = vmatprep.mubr.bf16.mxu0 %v8755_v46  ;;  %v8763_v59 = vld [vmem:[#allocation3 + $0x260] sm:$0xff]  }
 0x178   :  { %17957 = vst [vmem:[#allocation49_spill] sm:$0xff] %v10975_v45  ;;  %9018 = vtanh.f32 %v10966_v6  ;;  %v1410_v14 = vpop.f32.mrf.mxu0 }
 0x179   :  { %17956 = vst [vmem:[#allocation48_spill] sm:$0xff] %v10969_v4  ;;  %v9007_v61 = vpop.eup %9006  ;;  %v10981_v34 = vmul.f32 %v2790_v21, %v10908_v62  ;;  %9020 = vtanh.f32 %v10971_v22  ;;  %v10984_v43 = vmul.f32 0.5, %v1419_v57  ;;  %v1411_v15 = vadd.f32 %v10642_v9, %v1410_v14 }
 0x17a   :  { %v2795_v53 = vadd.f32 1.0, %v9007_v61  ;;  %v8437_v46 = vpop.f32.mrf.mxu0  ;;  %v9009_v37 = vpop.eup %9008 }
 0x17b   :  { %17958 = vst [vmem:[#allocation50_spill] sm:$0xff] %v10981_v34  ;;  %9022 = vtanh.f32 %v10984_v43  ;;  %v1422_v48 = vadd.f32 %v8437_v46, %v10642_v9  ;;  %v10991_v21 = vmul.f32 0.5, %v1411_v15  ;;  %v2793_v4 = vadd.f32 1.0, %v9009_v37  ;;  %v8771_v34 = vld [vmem:[#allocation3 + $0x270] sm:$0xff]  }
 0x17c   :  { %v9011_v62 = vpop.eup %9010  ;;  %v1413_v19 = vpop.f32.mrf.mxu0  ;;  %v10997_v61 = vmul.f32 %v2795_v53, %v10921_v32 }
 0x17d   :  { %v2796_v57 = vadd.f32 1.0, %v9011_v62  ;;  %v10993_v24 = vmul.f32 0.5, %v1422_v48  ;;  %v1414_v14 = vadd.f32 %v10642_v9, %v1413_v19  ;;  %9024 = vtanh.f32 %v10991_v21 }
 0x17e   :  { %17959 = vst [vmem:[#allocation51_spill] sm:$0xff] %v10997_v61  ;;  %v8440_v52 = vpop.f32.mrf.mxu0  ;;  %8535 = vmatmul.mubr.bf16.gmra.mxu0 %v8756_v31  ;;  %v9013_v45 = vpop.eup %9012 }
 0x17f   :  { %v11001_v46 = vmul.f32 %v2796_v57, %v10929_v1  ;;  %9026 = vtanh.f32 %v10993_v24  ;;  %v11004_v15 = vmul.f32 0.5, %v1414_v14  ;;  %v1435_v48 = vadd.f32 %v8440_v52, %v10642_v9  ;;  %8538 = vmatprep.mubr.bf16.mxu0 %v8763_v59 }
 0x180   :  { %v2794_v19 = vadd.f32 1.0, %v9013_v45  ;;  %v1426_v62 = vpop.f32.mrf.mxu0  ;;  %v9015_v32 = vpop.eup %9014  ;;  %v11013_v1 = vmul.f32 %v2793_v4, %v10925_v47  ;;  %v8764_v45 = vld [vmem:[#allocation3 + $0x268] sm:$0xff]  }
 0x181   :  { %17960 = vst [vmem:[#allocation52_spill] sm:$0xff] %v11001_v46  ;;  %9028 = vtanh.f32 %v11004_v15  ;;  %v11010_v31 = vmul.f32 0.5, %v1435_v48  ;;  %v1427_v52 = vadd.f32 %v10642_v9, %v1426_v62  ;;  %v2799_v61 = vadd.f32 1.0, %v9015_v32 }
 0x182   :  { %v9017_v37 = vpop.eup %9016  ;;  %17961 = vst [vmem:[#allocation53_spill] sm:$0xff] %v11013_v1  ;;  %v11016_v57 = vmul.f32 %v2794_v19, %v10941_v41  ;;  %v8441_v59 = vpop.f32.mrf.mxu0 }
 0x183   :  { %v1438_v14 = vadd.f32 %v8441_v59, %v10642_v9  ;;  %9030 = vtanh.f32 %v11010_v31  ;;  %v11023_v48 = vmul.f32 0.5, %v1427_v52  ;;  %v2797_v46 = vadd.f32 1.0, %v9017_v37 }
 0x184   :  { %17962 = vst [vmem:[#allocation54_spill] sm:$0xff] %v11016_v57  ;;  %v1429_v47 = vpop.f32.mrf.mxu0  ;;  %v11033_v53 = vmul.f32 %v2799_v61, %v10945_v58  ;;  %v8772_v61 = vld [vmem:[#allocation3 + $0x278] sm:$0xff]  }
 0x185   :  { %v9019_v4 = vpop.eup %9018  ;;  %v11025_v41 = vmul.f32 0.5, %v1438_v14  ;;  %v1430_v19 = vadd.f32 %v10642_v9, %v1429_v47  ;;  %9032 = vtanh.f32 %v11023_v48  ;;  %v11039_v47 = vmul.f32 %v2797_v46, %v10955_v11  ;;  %v8779_v11 = vld [vmem:[#allocation3 + $0x280] sm:$0xff]  }
 0x186   :  { %v9021_v62 = vpop.eup %9020  ;;  %v2800_v40 = vadd.f32 1.0, %v9019_v4  ;;  %v8444_v59 = vpop.f32.mrf.mxu0  ;;  %8539 = vmatmul.mubr.bf16.gmra.mxu0 %v8764_v45  ;;  %17963 = vst [vmem:[#allocation55_spill] sm:$0xff] %v11033_v53 }
 0x187   :  { %v2798_v54 = vadd.f32 1.0, %v9021_v62  ;;  %9034 = vtanh.f32 %v11025_v41  ;;  %v11030_v32 = vmul.f32 0.5, %v1430_v19  ;;  %8542 = vmatprep.mubr.bf16.mxu0 %v8771_v34  ;;  %17965 = vst [vmem:[#allocation57_spill] sm:$0xff] %v11039_v47 }
 0x188   :  { %v9023_v52 = vpop.eup %9022  ;;  %v11036_v37 = vmul.f32 %v2800_v40, %v10966_v6  ;;  %v1442_v14 = vpop.f32.mrf.mxu0 }
 0x189   :  { %v11042_v4 = vmul.f32 %v2798_v54, %v10971_v22  ;;  %9036 = vtanh.f32 %v11030_v32  ;;  %v2803_v34 = vadd.f32 1.0, %v9023_v52  ;;  %v1443_v19 = vadd.f32 %v10642_v9, %v1442_v14 }
 0x18a   :  { %17964 = vst [vmem:[#allocation56_spill] sm:$0xff] %v11036_v37  ;;  %v8445_v58 = vpop.f32.mrf.mxu0  ;;  %v9025_v62 = vpop.eup %9024  ;;  %v1451_v22 = vadd.f32 %v8444_v59, %v10642_v9 }
 0x18b   :  { %17966 = vst [vmem:[#allocation58_spill] sm:$0xff] %v11042_v4  ;;  %v1454_v40 = vadd.f32 %v8445_v58, %v10642_v9  ;;  %v11052_v54 = vmul.f32 0.5, %v1443_v19  ;;  %v2801_v57 = vadd.f32 1.0, %v9025_v62  ;;  %v11056_v53 = vmul.f32 %v2803_v34, %v10984_v43 }
 0x18c   :  { %v9027_v46 = vpop.eup %9026  ;;  %v1445_v1 = vpop.f32.mrf.mxu0  ;;  %v11064_v62 = vmul.f32 0.5, %v1451_v22 }
 0x18d   :  { %v2804_v45 = vadd.f32 1.0, %v9027_v46  ;;  %v1446_v52 = vadd.f32 %v10642_v9, %v1445_v1  ;;  %17967 = vst [vmem:[#allocation59_spill] sm:$0xff] %v11056_v53  ;;  %9038 = vtanh.f32 %v11052_v54  ;;  %v11062_v59 = vmul.f32 0.5, %v1454_v40 }
 0x18e   :  { %v9029_v14 = vpop.eup %9028  ;;  %v8448_v6 = vpop.f32.mrf.mxu0  ;;  %8543 = vmatmul.mubr.bf16.gmra.mxu0 %v8772_v61  ;;  %v11067_v47 = vmul.f32 %v2801_v57, %v10991_v21 }
 0x18f   :  { %v11060_v58 = vmul.f32 %v2804_v45, %v10993_v24  ;;  %v2802_v37 = vadd.f32 1.0, %v9029_v14  ;;  %v2298_v19 = vmul.f32 0.5, %v1446_v52  ;;  %8546 = vmatprep.mubr.bf16.mxu0 %v8779_v11  ;;  %v8780_v45 = vld [vmem:[#allocation3 + $0x288] sm:$0xff]   ;;  %v8784_v11 = vld [vmem:[#allocation3 + $0x290] sm:$0xff]  }
 0x190   :  { %v1458_v46 = vpop.f32.mrf.mxu0  ;;  %v9031_v1 = vpop.eup %9030  ;;  %17969 = vst [vmem:[#allocation61_spill] sm:$0xff] %v11067_v47 }
 0x191   :  { %17968 = vst [vmem:[#allocation60_spill] sm:$0xff] %v11060_v58  ;;  %v11072_v34 = vmul.f32 %v2802_v37, %v11004_v15  ;;  %9040 = vtanh.f32 %v2298_v19  ;;  %v2807_v52 = vadd.f32 1.0, %v9031_v1  ;;  %v1459_v15 = vadd.f32 %v10642_v9, %v1458_v46 }
 0x192   :  { %v8449_v24 = vpop.f32.mrf.mxu0  ;;  %v9033_v61 = vpop.eup %9032  ;;  %9042 = vtanh.f32 %v11062_v59 }
 0x193   :  { %17970 = vst [vmem:[#allocation62_spill] sm:$0xff] %v11072_v34  ;;  %9044 = vtanh.f32 %v11064_v62  ;;  %v2805_v57 = vadd.f32 1.0, %v9033_v61  ;;  %v3063_v1 = vmul.f32 %v2807_v52, %v11010_v31  ;;  %v11099_v31 = vld [vmem:[%s17709_s2] ss:$0 sm:$0xff] }
 0x194   :  { %v9035_v22 = vpop.eup %9034  ;;  %v1461_v21 = vpop.f32.mrf.mxu0 }
 0x195   :  { %v2808_v14 = vadd.f32 1.0, %v9035_v22  ;;  %v1462_v37 = vadd.f32 %v10642_v9, %v1461_v21  ;;  %v11087_v61 = vmul.f32 %v2805_v57, %v11023_v48  ;;  %v11092_v9 = vmul.f32 0.5, %v1459_v15 }
 0x196   :  { %v9037_v43 = vpop.eup %9036  ;;  %v11080_v53 = vpop.f32.mrf.mxu0  ;;  %8547 = vmatmul.mubr.bf16.gmra.mxu0 %v8780_v45  ;;  %v8785_v45 = vld [vmem:[#allocation3 + $0x298] sm:$0xff]   ;;  %v1470_v48 = vadd.f32 %v11099_v31, %v8449_v24 }
 0x197   :  { %v3064_v40 = vmul.f32 %v2808_v14, %v11025_v41  ;;  %v2806_v58 = vadd.f32 1.0, %v9037_v43  ;;  %v11083_v47 = vmul.f32 0.5, %v1462_v37  ;;  %8550 = vmatprep.mubr.bf16.mxu0 %v8784_v11  ;;  %17971 = vst [vmem:[#allocation63_spill] sm:$0xff] %v11087_v61  ;;  %v17973_v11 = vmov 0   ;;  %v8787_v61 = vld [vmem:[#allocation3 + $0x2a8] sm:$0xff]  }
 0x198   :  { %v1474_v34 = vpop.f32.mrf.mxu0  ;;  %v11108_v15 = vmul.f32 0.5, %v1470_v48  ;;  %v8788_v48 = vld [vmem:[#allocation3 + $0x2b0] sm:$0xff]  }
 0x199   :  { %v11090_v46 = vmul.f32 %v2806_v58, %v11030_v32  ;;  %v3292_v21 = vpack.c.bf16 %v3064_v40, %v3063_v1  ;;  %9046 = vtanh.f32 %v11083_v47  ;;  %v8786_v32 = vld [vmem:[#allocation3 + $0x2a0] sm:$0xff]   ;;  %v1467_v40 = vadd.f32 %v11099_v31, %v8448_v6 }
 0x19a   :  { %v8453_v22 = vpop.f32.mrf.mxu0  ;;  %v9039_v4 = vpop.eup %9038  ;;  %9048 = vtanh.f32 %v11092_v9  ;;  %v1475_v51 = vadd.f32 %v11099_v31, %v1474_v34 }
 0x19b   :  { %17972 = vst [vmem:[#allocation64_spill] sm:$0xff] %v11090_v46  ;;  %3804 = vmatmul.mubr.bf16.vlgmr.msra.gmra.mxu1 %v3292_v21  ;;  %v2809_v43 = vadd.f32 1.0, %v9039_v4  ;;  %v11111_v41 = vmul.f32 0.5, %v1467_v40  ;;  %9050 = vtanh.f32 %v11108_v15 }
 0x19c   :  { %v1477_v58 = vpop.f32.mrf.mxu0  ;;  %3813 = vmatprep.mubr.bf16.mxu1 %v17973_v11 }
 0x19d   :  { %v3065_v21 = vmul.f32 %v2809_v43, %v11052_v54  ;;  %9052 = vtanh.f32 %v11111_v41 }
 0x19e   :  { %v9041_v52 = vpop.eup %9040  ;;  %v11106_v57 = vpop.f32.mrf.mxu0  ;;  %8551 = vmatmul.mubr.bf16.gmra.mxu0 %v8785_v45  ;;  %v1478_v45 = vadd.f32 %v11099_v31, %v1477_v58 }
 0x19f   :  { %v2810_v14 = vadd.f32 1.0, %v9041_v52  ;;  %8554 = vmatprep.mubr.bf16.mxu0 %v8786_v32  ;;  %v9043_v24 = vpop.eup %9042 }
 0x1a0   :  { %v1490_v37 = vpop.f32.mrf.mxu0  ;;  %v9045_v1 = vpop.eup %9044  ;;  %v2812_v46 = vadd.f32 1.0, %v9043_v24  ;;  %v11123_v43 = vmul.f32 0.5, %v1478_v45  ;;  %v11128_v24 = vmul.f32 0.5, %v1475_v51 }
 0x1a1   :  { %v3066_v4 = vmul.f32 %v2810_v14, %v2298_v19  ;;  %v2811_v32 = vadd.f32 1.0, %v9045_v1 }
 0x1a2   :  { %v11113_v6 = vpop.f32.mrf.mxu0  ;;  %v3068_v19 = vmul.f32 %v2812_v46, %v11062_v59  ;;  %9054 = vtanh.f32 %v11123_v43  ;;  %v8790_v46 = vld [vmem:[#allocation3 + $0x2c0] sm:$0xff]  }
 0x1a3   :  { %v3293_v52 = vpack.c.bf16 %v3066_v4, %v3065_v21  ;;  %v3067_v14 = vmul.f32 %v2811_v32, %v11064_v62  ;;  %v8789_v21 = vld [vmem:[#allocation3 + $0x2b8] sm:$0xff]   ;;  %9056 = vtanh.f32 %v11128_v24 }
 0x1a4   :  { %v1493_v56 = vpop.f32.mrf.mxu0 }
 0x1a5   :  { %3814 = vmatmul.mubr.bf16.gmra.mxu1 %v3293_v52  ;;  %v3294_v59 = vpack.c.bf16 %v3068_v19, %v3067_v14 }
 0x1a6   :  { %v11119_v54 = vpop.f32.mrf.mxu0  ;;  %8555 = vmatmul.mubr.bf16.gmra.mxu0 %v8787_v61  ;;  %3823 = vmatprep.mubr.bf16.mxu1 %v17973_v11  ;;  %v9047_v58 = vpop.eup %9046  ;;  %v1486_v61 = vadd.f32 %v11099_v31, %v8453_v22 }
 0x1a7   :  { %8558 = vmatprep.mubr.bf16.mxu0 %v8788_v48  ;;  %v9049_v1 = vpop.eup %9048  ;;  %v2814_v4 = vadd.f32 1.0, %v9047_v58  ;;  %v1483_v48 = vadd.f32 %v11099_v31, %v11080_v53 }
 0x1a8   :  { %v11125_v40 = vpop.f32.mrf.mxu0  ;;  %v2813_v52 = vadd.f32 1.0, %v9049_v1  ;;  %v11143_v22 = vmul.f32 0.5, %v1486_v61  ;;  %v9051_v32 = vpop.eup %9050  ;;  %v1491_v1 = vadd.f32 %v11099_v31, %v1490_v37  ;;  %v8792_v61 = vld [vmem:[#allocation3 + $0x2d0] sm:$0xff]  }
 0x1a9   :  { %v3070_v62 = vmul.f32 %v2814_v4, %v11083_v47  ;;  %v11148_v14 = vmul.f32 0.5, %v1483_v48  ;;  %v2816_v12 = vadd.f32 1.0, %v9051_v32  ;;  %v1494_v47 = vadd.f32 %v11099_v31, %v1493_v56 }
 0x1aa   :  { %v11130_v34 = vpop.f32.mrf.mxu0  ;;  %v3069_v58 = vmul.f32 %v2813_v52, %v11092_v9  ;;  %v9053_v53 = vpop.eup %9052  ;;  %9058 = vtanh.f32 %v11143_v22  ;;  %v11158_v9 = vmul.f32 0.5, %v1491_v1  ;;  %v1502_v1 = vadd.f32 %v11099_v31, %v11113_v6 }
 0x1ab   :  { %v2815_v8 = vadd.f32 1.0, %v9053_v53  ;;  %9060 = vtanh.f32 %v11148_v14  ;;  %v3072_v37 = vmul.f32 %v2816_v12, %v11108_v15  ;;  %v11164_v48 = vmul.f32 0.5, %v1494_v47  ;;  %v8793_v12 = vld [vmem:[#allocation3 + $0x2d8] sm:$0xff]  }
 0x1ac   :  { %v11134_v45 = vpop.f32.mrf.mxu0  ;;  %v3295_v4 = vpack.c.bf16 %v3070_v62, %v3069_v58  ;;  %v1499_v58 = vadd.f32 %v11099_v31, %v11106_v57  ;;  %9062 = vtanh.f32 %v11158_v9  ;;  %v11181_v57 = vmul.f32 0.5, %v1502_v1  ;;  %v8795_v1 = vld [vmem:[#allocation3 + $0x2e8] sm:$0xff]  }
 0x1ad   :  { %3824 = vmatmul.mubr.bf16.gmra.mxu1 %v3294_v59  ;;  %v3071_v32 = vmul.f32 %v2815_v8, %v11111_v41  ;;  %9064 = vtanh.f32 %v11164_v48 }
 0x1ae   :  { %v11139_v51 = vpop.f32.mrf.mxu0  ;;  %8559 = vmatmul.mubr.bf16.gmra.mxu0 %v8789_v21  ;;  %3833 = vmatprep.mubr.bf16.mxu1 %v17973_v11  ;;  %v8791_v21 = vld [vmem:[#allocation3 + $0x2c8] sm:$0xff]   ;;  %v11179_v41 = vmul.f32 0.5, %v1499_v58  ;;  %v1507_v58 = vadd.f32 %v11099_v31, %v11125_v40 }
 0x1af   :  { %8562 = vmatprep.mubr.bf16.mxu0 %v8790_v46  ;;  %v9055_v56 = vpop.eup %9054  ;;  %v3296_v47 = vpack.c.bf16 %v3072_v37, %v3071_v32 }
 0x1b0   :  { %v11145_v19 = vpop.f32.mrf.mxu0  ;;  %v9057_v53 = vpop.eup %9056  ;;  %v2818_v15 = vadd.f32 1.0, %v9055_v56  ;;  %9066 = vtanh.f32 %v11179_v41 }
 0x1b1   :  { %v2817_v8 = vadd.f32 1.0, %v9057_v53  ;;  %9068 = vtanh.f32 %v11181_v57 }
 0x1b2   :  { %v11151_v59 = vpop.f32.mrf.mxu0  ;;  %v3074_v6 = vmul.f32 %v2818_v15, %v11123_v43  ;;  %v1510_v43 = vadd.f32 %v11099_v31, %v11134_v45 }
 0x1b3   :  { %v3073_v37 = vmul.f32 %v2817_v8, %v11128_v24  ;;  %v11200_v8 = vmul.f32 0.5, %v1507_v58  ;;  %v1518_v58 = vadd.f32 %v11099_v31, %v11130_v34 }
 0x1b4   :  { %v11155_v46 = vpop.f32.mrf.mxu0 }
 0x1b5   :  { %3834 = vmatmul.mubr.bf16.gmra.mxu1 %v3295_v4  ;;  %v8794_v4 = vld [vmem:[#allocation3 + $0x2e0] sm:$0xff]   ;;  %v3297_v15 = vpack.c.bf16 %v3074_v6, %v3073_v37  ;;  %9070 = vtanh.f32 %v11200_v8 }
 0x1b6   :  { %v11160_v52 = vpop.f32.mrf.mxu0  ;;  %8563 = vmatmul.mubr.bf16.gmra.mxu0 %v8791_v21  ;;  %3843 = vmatprep.mubr.bf16.mxu1 %v17973_v11 }
 0x1b7   :  { %8566 = vmatprep.mubr.bf16.mxu0 %v8792_v61  ;;  %v9059_v56 = vpop.eup %9058 }
 0x1b8   :  { %v11166_v62 = vpop.f32.mrf.mxu0  ;;  %v9061_v32 = vpop.eup %9060 }
 0x1b9   :  { %v2819_v24 = vadd.f32 1.0, %v9061_v32  ;;  %v9063_v40 = vpop.eup %9062  ;;  %v1515_v32 = vadd.f32 %v11099_v31, %v11119_v54 }
 0x1ba   :  { %v11174_v21 = vpop.f32.mrf.mxu0  ;;  %v9065_v45 = vpop.eup %9064 }
 0x1bb   :  { %v3075_v37 = vmul.f32 %v2819_v24, %v11148_v14  ;;  %v11221_v24 = vmul.f32 0.5, %v1515_v32 }
 0x1bc   :  { %v11177_v61 = vpop.f32.mrf.mxu0 }
 0x1bd   :  { %3844 = vmatmul.mubr.bf16.gmra.mxu1 %v3296_v47  ;;  %v8796_v47 = vld [vmem:[#allocation3 + $0x2f0] sm:$0xff]   ;;  %v9067_v14 = vpop.eup %9066 }
 0x1be   :  { %v11183_v23 = vpop.f32.mrf.mxu0  ;;  %8567 = vmatmul.mubr.bf16.gmra.mxu0 %v8793_v12  ;;  %3853 = vmatprep.mubr.bf16.mxu1 %v17973_v11  ;;  %v2820_v12 = vadd.f32 1.0, %v9059_v56  ;;  %v11206_v56 = vmul.f32 0.5, %v1510_v43  ;;  %v9069_v34 = vpop.eup %9068  ;;  %v2823_v32 = vadd.f32 1.0, %v9067_v14 }
 0x1bf   :  { %8570 = vmatprep.mubr.bf16.mxu0 %v8794_v4 }
 0x1c0   :  { %v11187_v18 = vpop.f32.mrf.mxu0  ;;  %v3076_v28 = vmul.f32 %v2820_v12, %v11143_v22  ;;  %v2821_v22 = vadd.f32 1.0, %v9063_v40  ;;  %v2822_v12 = vadd.f32 1.0, %v9065_v45  ;;  %9072 = vtanh.f32 %v11206_v56 }
 0x1c1   :  { %v11228_v45 = vmul.f32 0.5, %v1518_v58  ;;  %9074 = vtanh.f32 %v11221_v24  ;;  %v8800_v58 = vld [vmem:[#allocation3 + $0x310] sm:$0xff]  }
 0x1c2   :  { %v11194_v53 = vpop.f32.mrf.mxu0  ;;  %v3298_v43 = vpack.c.bf16 %v3076_v28, %v3075_v37  ;;  %v3077_v50 = vmul.f32 %v2821_v22, %v11158_v9  ;;  %v3078_v40 = vmul.f32 %v2822_v12, %v11164_v48  ;;  %v1523_v37 = vadd.f32 %v11099_v31, %v11145_v19  ;;  %v8799_v9 = vld [vmem:[#allocation3 + $0x308] sm:$0xff]  }
 0x1c3   :  { %9076 = vtanh.f32 %v11228_v45  ;;  %v3079_v19 = vmul.f32 %v2823_v32, %v11179_v41  ;;  %v1534_v41 = vadd.f32 %v11099_v31, %v11151_v59 }
 0x1c4   :  { %v11198_v4 = vpop.f32.mrf.mxu0  ;;  %v3299_v48 = vpack.c.bf16 %v3078_v40, %v3077_v50  ;;  %v11242_v12 = vmul.f32 0.5, %v1523_v37  ;;  %v1531_v40 = vadd.f32 %v11099_v31, %v11139_v51 }
 0x1c5   :  { %3854 = vmatmul.mubr.bf16.gmra.mxu1 %v3297_v15  ;;  %v8797_v15 = vld [vmem:[#allocation3 + $0x2f8] sm:$0xff]   ;;  %v11266_v42 = vmul.f32 0.5, %v1534_v41  ;;  %v1547_v41 = vadd.f32 %v11099_v31, %v11160_v52 }
 0x1c6   :  { %v11202_v26 = vpop.f32.mrf.mxu0  ;;  %8571 = vmatmul.mubr.bf16.gmra.mxu0 %v8795_v1  ;;  %3863 = vmatprep.mubr.bf16.mxu1 %v17973_v11  ;;  %9078 = vtanh.f32 %v11242_v12 }
 0x1c7   :  { %8574 = vmatprep.mubr.bf16.mxu0 %v8796_v47  ;;  %v8798_v47 = vld [vmem:[#allocation3 + $0x300] sm:$0xff]   ;;  %v11289_v17 = vmul.f32 0.5, %v1547_v41 }
 0x1c8   :  { %v11208_v6 = vpop.f32.mrf.mxu0 }
 0x1ca   :  { %v11216_v1 = vpop.f32.mrf.mxu0 }
 0x1cc   :  { %v11219_v55 = vpop.f32.mrf.mxu0 }
 0x1cd   :  { %3864 = vmatmul.mubr.bf16.gmra.mxu1 %v3298_v43  ;;  %v2824_v43 = vadd.f32 1.0, %v9069_v34 }
 0x1ce   :  { %v11223_v54 = vpop.f32.mrf.mxu0  ;;  %8575 = vmatmul.mubr.bf16.gmra.mxu0 %v8797_v15  ;;  %3873 = vmatprep.mubr.bf16.mxu1 %v17973_v11  ;;  %v1526_v15 = vadd.f32 %v11099_v31, %v11155_v46  ;;  %v9071_v46 = vpop.eup %9070 }
 0x1cf   :  { %8578 = vmatprep.mubr.bf16.mxu0 %v8798_v47  ;;  %v3080_v47 = vmul.f32 %v2824_v43, %v11181_v57  ;;  %v9073_v50 = vpop.eup %9072 }
 0x1d0   :  { %v11230_v28 = vpop.f32.mrf.mxu0  ;;  %v11246_v14 = vmul.f32 0.5, %v1526_v15  ;;  %v8801_v15 = vld [vmem:[#allocation3 + $0x318] sm:$0xff]  }
 0x1d1   :  { %v3300_v43 = vpack.c.bf16 %v3080_v47, %v3079_v19  ;;  %v9075_v19 = vpop.eup %9074 }
 0x1d2   :  { %v11237_v13 = vpop.f32.mrf.mxu0  ;;  %9080 = vtanh.f32 %v11246_v14 }
 0x1d4   :  { %v11240_v22 = vpop.f32.mrf.mxu0 }
 0x1d5   :  { %3874 = vmatmul.mubr.bf16.gmra.mxu1 %v3299_v48  ;;  %v2826_v48 = vadd.f32 1.0, %v9073_v50 }
 0x1d6   :  { %v8484_v34 = vpop.f32.mrf.mxu0  ;;  %8579 = vmatmul.mubr.bf16.gmra.mxu0 %v8799_v9  ;;  %3883 = vmatprep.mubr.bf16.mxu1 %v17973_v11  ;;  %v2825_v9 = vadd.f32 1.0, %v9071_v46 }
 0x1d7   :  { %v1611_v16 = vadd.f32 %v11099_v31, %v8484_v34  ;;  %8582 = vmatprep.mubr.bf16.mxu0 %v8800_v58  ;;  %v8802_v58 = vld [vmem:[#allocation3 + $0x320] sm:$0xff]   ;;  %v11262_v34 = vmul.f32 0.5, %v1531_v40  ;;  %v3082_v46 = vmul.f32 %v2826_v48, %v11206_v56  ;;  %v9077_v40 = vpop.eup %9076  ;;  %v2827_v56 = vadd.f32 1.0, %v9075_v19  ;;  %v8803_v48 = vld [vmem:[#allocation3 + $0x328] sm:$0xff]  }
 0x1d8   :  { %v11252_v37 = vpop.f32.mrf.mxu0  ;;  %v3081_v47 = vmul.f32 %v2825_v9, %v11200_v8  ;;  %v1539_v8 = vadd.f32 %v11099_v31, %v11166_v62  ;;  %v1550_v62 = vadd.f32 %v11099_v31, %v11174_v21 }
 0x1d9   :  { %v11257_v57 = vmul.f32 0.5, %v1611_v16 }
 0x1da   :  { %v8485_v32 = vpop.f32.mrf.mxu0  ;;  %v11295_v19 = vmul.f32 0.5, %v1539_v8 }
 0x1db   :  { %9082 = vtanh.f32 %v11257_v57  ;;  %v1614_v51 = vadd.f32 %v11099_v31, %v8485_v32 }
 0x1dc   :  { %v11264_v25 = vpop.f32.mrf.mxu0 }
 0x1dd   :  { %v11268_v16 = vmul.f32 0.5, %v1614_v51  ;;  %3884 = vmatmul.mubr.bf16.gmra.mxu1 %v3300_v43  ;;  %v2828_v51 = vadd.f32 1.0, %v9077_v40 }
 0x1de   :  { %v8488_v59 = vpop.f32.mrf.mxu0  ;;  %8583 = vmatmul.mubr.bf16.gmra.mxu0 %v8801_v15  ;;  %3893 = vmatprep.mubr.bf16.mxu1 %v17973_v11  ;;  %v1542_v15 = vadd.f32 %v11099_v31, %v11177_v61  ;;  %v9079_v61 = vpop.eup %9078 }
 0x1df   :  { %9084 = vtanh.f32 %v11268_v16  ;;  %v1627_v50 = vadd.f32 %v11099_v31, %v8488_v59  ;;  %8586 = vmatprep.mubr.bf16.mxu0 %v8802_v58  ;;  %v3301_v58 = vpack.c.bf16 %v3082_v46, %v3081_v47  ;;  %v8804_v59 = vld [vmem:[#allocation3 + $0x330] sm:$0xff]   ;;  %v9081_v47 = vpop.eup %9080  ;;  %v3083_v46 = vmul.f32 %v2827_v56, %v11221_v24 }
 0x1e0   :  { %9086 = vtanh.f32 %v11262_v34  ;;  %v11278_v32 = vpop.f32.mrf.mxu0  ;;  %v11299_v40 = vmul.f32 0.5, %v1542_v15  ;;  %v3084_v41 = vmul.f32 %v2828_v51, %v11228_v45  ;;  %v1563_v15 = vadd.f32 %v11099_v31, %v11183_v23 }
 0x1e1   :  { %9088 = vtanh.f32 %v11266_v42  ;;  %v11283_v43 = vmul.f32 0.5, %v1627_v50  ;;  %v1555_v24 = vadd.f32 %v11099_v31, %v11187_v18  ;;  %v2829_v56 = vadd.f32 1.0, %v9079_v61 }
 0x1e2   :  { %v8489_v9 = vpop.f32.mrf.mxu0  ;;  %v11321_v18 = vmul.f32 0.5, %v1563_v15 }
 0x1e3   :  { %9090 = vtanh.f32 %v11283_v43  ;;  %v1630_v52 = vadd.f32 %v11099_v31, %v8489_v9  ;;  %v11307_v9 = vmul.f32 0.5, %v1550_v62  ;;  %v3302_v62 = vpack.c.bf16 %v3084_v41, %v3083_v46 }
 0x1e4   :  { %v11293_v50 = vpop.f32.mrf.mxu0  ;;  %v11325_v38 = vmul.f32 0.5, %v1555_v24  ;;  %v3085_v46 = vmul.f32 %v2829_v56, %v11242_v12  ;;  %v1566_v41 = vadd.f32 %v11099_v31, %v11194_v53 }
 0x1e5   :  { %v11297_v20 = vmul.f32 0.5, %v1630_v52  ;;  %3894 = vmatmul.mubr.bf16.gmra.mxu1 %v3301_v58  ;;  %v8805_v58 = vld [vmem:[#allocation3 + $0x338] sm:$0xff]  }
 0x1e6   :  { %v8492_v33 = vpop.f32.mrf.mxu0  ;;  %8587 = vmatmul.mubr.bf16.gmra.mxu0 %v8803_v48  ;;  %3903 = vmatprep.mubr.bf16.mxu1 %v17973_v11 }
 0x1e7   :  { %9092 = vtanh.f32 %v11297_v20  ;;  %v1643_v21 = vadd.f32 %v11099_v31, %v8492_v33  ;;  %8590 = vmatprep.mubr.bf16.mxu0 %v8804_v59  ;;  %v2830_v59 = vadd.f32 1.0, %v9081_v47 }
 0x1e8   :  { %v9083_v8 = vpop.eup %9082  ;;  %9094 = vtanh.f32 %v11289_v17  ;;  %v1634_v48 = vpop.f32.mrf.mxu0 }
 0x1e9   :  { %9096 = vtanh.f32 %v11295_v19  ;;  %v11314_v45 = vmul.f32 0.5, %v1643_v21  ;;  %v2851_v33 = vadd.f32 1.0, %v9083_v8  ;;  %v1635_v51 = vadd.f32 %v11099_v31, %v1634_v48 }
 0x1ea   :  { %9098 = vtanh.f32 %v11299_v40  ;;  %v8493_v52 = vpop.f32.mrf.mxu0 }
 0x1eb   :  { %9100 = vtanh.f32 %v11314_v45  ;;  %v1646_v23 = vadd.f32 %v11099_v31, %v8493_v52  ;;  %v11323_v61 = vmul.f32 0.5, %v1635_v51  ;;  %v11334_v15 = vmul.f32 %v2851_v33, %v11257_v57 }
 0x1ec   :  { %v9085_v35 = vpop.eup %9084  ;;  %9102 = vtanh.f32 %v11307_v9  ;;  %v1637_v21 = vpop.f32.mrf.mxu0  ;;  %v1558_v57 = vadd.f32 %v11099_v31, %v11198_v4 }
 0x1ed   :  { %v9087_v8 = vpop.eup %9086  ;;  %v2852_v48 = vadd.f32 1.0, %v9085_v35  ;;  %v11327_v44 = vmul.f32 0.5, %v1646_v23  ;;  %v1638_v47 = vadd.f32 %v11099_v31, %v1637_v21  ;;  %3904 = vmatmul.mubr.bf16.gmra.mxu1 %v3302_v62  ;;  %9104 = vtanh.f32 %v11323_v61  ;;  %v8807_v21 = vld [vmem:[#allocation3 + $0x348] sm:$0xff]  }
 0x1ee   :  { %v9089_v52 = vpop.eup %9088  ;;  %v8496_v51 = vpop.f32.mrf.mxu0  ;;  %8591 = vmatmul.mubr.bf16.gmra.mxu0 %v8805_v58  ;;  %3913 = vmatprep.mubr.bf16.mxu1 %v17973_v11  ;;  %v3086_v35 = vmul.f32 %v2830_v59, %v11246_v14  ;;  %v2831_v58 = vadd.f32 1.0, %v9087_v8 }
 0x1ef   :  { %v11340_v24 = vmul.f32 %v2852_v48, %v11268_v16  ;;  %9106 = vtanh.f32 %v11327_v44  ;;  %v11343_v12 = vmul.f32 0.5, %v1638_v47  ;;  %8594 = vmatprep.mubr.bf16.mxu0 %v8806_v36  ;;  %v1659_v56 = vadd.f32 %v11099_v31, %v8496_v51 }
 0x1f0   :  { %v9091_v53 = vpop.eup %9090  ;;  %9108 = vtanh.f32 %v11321_v18  ;;  %v1650_v33 = vpop.f32.mrf.mxu0  ;;  %v2832_v23 = vadd.f32 1.0, %v9089_v52  ;;  %v11351_v16 = vmul.f32 0.5, %v1566_v41  ;;  %v3303_v47 = vpack.c.bf16 %v3086_v35, %v3085_v46  ;;  %v8808_v52 = vld [vmem:[#allocation3 + $0x350] sm:$0xff]  }
 0x1f1   :  { %9110 = vtanh.f32 %v11343_v12  ;;  %v1651_v14 = vadd.f32 %v11099_v31, %v1650_v33  ;;  %v2855_v59 = vadd.f32 1.0, %v9091_v53  ;;  %v11353_v62 = vmul.f32 0.5, %v1659_v56 }
 0x1f2   :  { %v8497_v36 = vpop.f32.mrf.mxu0  ;;  %9112 = vtanh.f32 %v11325_v38  ;;  %v11361_v33 = vmul.f32 0.5, %v1558_v57 }
 0x1f3   :  { %v11358_v4 = vmul.f32 0.5, %v1651_v14  ;;  %v1662_v8 = vadd.f32 %v11099_v31, %v8497_v36  ;;  %9114 = vtanh.f32 %v11353_v62  ;;  %v3087_v36 = vmul.f32 %v2831_v58, %v11262_v34 }
 0x1f4   :  { %v9093_v51 = vpop.eup %9092  ;;  %v1653_v41 = vpop.f32.mrf.mxu0  ;;  %v11371_v46 = vmul.f32 %v2855_v59, %v11283_v43  ;;  %v1579_v43 = vadd.f32 %v11099_v31, %v11202_v26 }
 0x1f5   :  { %v9095_v53 = vpop.eup %9094  ;;  %v2856_v56 = vadd.f32 1.0, %v9093_v51  ;;  %9116 = vtanh.f32 %v11358_v4  ;;  %v11365_v49 = vmul.f32 0.5, %v1662_v8  ;;  %v1654_v48 = vadd.f32 %v11099_v31, %v1653_v41  ;;  %3914 = vmatmul.mubr.bf16.gmra.mxu1 %v3303_v47 }
 0x1f6   :  { %v9097_v14 = vpop.eup %9096  ;;  %9118 = vtanh.f32 %v11351_v16  ;;  %v8500_v35 = vpop.f32.mrf.mxu0  ;;  %8595 = vmatmul.mubr.bf16.gmra.mxu0 %v8807_v21  ;;  %3923 = vmatprep.mubr.bf16.mxu1 %v17973_v11  ;;  %v3088_v51 = vmul.f32 %v2832_v23, %v11266_v42  ;;  %v1571_v42 = vadd.f32 %v11099_v31, %v11208_v6  ;;  %v2835_v3 = vadd.f32 1.0, %v9095_v53 }
 0x1f7   :  { %v9099_v57 = vpop.eup %9098  ;;  %v11376_v8 = vmul.f32 %v2856_v56, %v11297_v20  ;;  %9120 = vtanh.f32 %v11365_v49  ;;  %v11379_v47 = vmul.f32 0.5, %v1654_v48  ;;  %8598 = vmatprep.mubr.bf16.mxu0 %v8808_v52  ;;  %v1675_v58 = vadd.f32 %v11099_v31, %v8500_v35 }
 0x1f8   :  { %v9101_v34 = vpop.eup %9100  ;;  %9122 = vtanh.f32 %v11361_v33  ;;  %v1666_v59 = vpop.f32.mrf.mxu0  ;;  %v2833_v48 = vadd.f32 1.0, %v9097_v14  ;;  %v2834_v52 = vadd.f32 1.0, %v9099_v57  ;;  %v11396_v29 = vmul.f32 0.5, %v1579_v43 }
 0x1f9   :  { %v9103_v21 = vpop.eup %9102  ;;  %v2859_v20 = vadd.f32 1.0, %v9101_v34  ;;  %9124 = vtanh.f32 %v11379_v47  ;;  %v1667_v23 = vadd.f32 %v11099_v31, %v1666_v59  ;;  %v11389_v41 = vmul.f32 0.5, %v1675_v58 }
 0x1fa   :  { %v8501_v56 = vpop.f32.mrf.mxu0  ;;  %v9105_v35 = vpop.eup %9104  ;;  %v3304_v34 = vpack.c.bf16 %v3088_v51, %v3087_v36  ;;  %v3089_v43 = vmul.f32 %v2833_v48, %v11295_v19 }
 0x1fb   :  { %v11393_v2 = vmul.f32 0.5, %v1667_v23  ;;  %v1678_v6 = vadd.f32 %v11099_v31, %v8501_v56  ;;  %v11399_v14 = vmul.f32 %v2859_v20, %v11314_v45  ;;  %v2857_v57 = vadd.f32 1.0, %v9105_v35 }
 0x1fc   :  { %v9107_v27 = vpop.eup %9106  ;;  %9126 = vtanh.f32 %v11389_v41  ;;  %v1669_v58 = vpop.f32.mrf.mxu0  ;;  %v3090_v45 = vmul.f32 %v2834_v52, %v11299_v40  ;;  %v11410_v20 = vmul.f32 0.5, %v1571_v42  ;;  %v1582_v40 = vadd.f32 %v11099_v31, %v11216_v1 }
 0x1fd   :  { %17974 = vst [vmem:[#allocation65_spill] sm:$0xff] %v11399_v14  ;;  %v11402_v59 = vpop.eup %9108  ;;  %v2860_v26 = vadd.f32 1.0, %v9107_v27  ;;  %9128 = vtanh.f32 %v11393_v2  ;;  %v11405_v53 = vmul.f32 0.5, %v1678_v6  ;;  %v1670_v36 = vadd.f32 %v11099_v31, %v1669_v58  ;;  %3924 = vmatmul.mubr.bf16.gmra.mxu1 %v3304_v34  ;;  %v8811_v58 = vld [vmem:[#allocation3 + $0x368] sm:$0xff]  }
 0x1fe   :  { %v9111_v51 = vpop.eup %9110  ;;  %v11413_v23 = vmul.f32 %v2857_v57, %v11323_v61  ;;  %v8504_v56 = vpop.f32.mrf.mxu0  ;;  %8599 = vmatmul.mubr.bf16.gmra.mxu0 %v8809_v0  ;;  %3933 = vmatprep.mubr.bf16.mxu1 %v17973_v11  ;;  %v1574_v0 = vadd.f32 %v11099_v31, %v11219_v55  ;;  %v2836_v34 = vadd.f32 1.0, %v9103_v21  ;;  %v3091_v21 = vmul.f32 %v2835_v3, %v11289_v17 }
 0x1ff   :  { %v11417_v27 = vmul.f32 %v2860_v26, %v11327_v44  ;;  %v2858_v35 = vadd.f32 1.0, %v9111_v51  ;;  %9130 = vtanh.f32 %v11405_v53  ;;  %v11420_v6 = vmul.f32 0.5, %v1670_v36  ;;  %8602 = vmatprep.mubr.bf16.mxu0 %v8810_v10  ;;  %v9113_v19 = vpop.eup %9112 }
 0x200   :  { %9132 = vtanh.f32 %v11396_v29  ;;  %v1691_v61 = vadd.f32 %v11099_v31, %v8504_v56  ;;  %v1682_v42 = vpop.f32.mrf.mxu0  ;;  %v9115_v44 = vpop.eup %9114  ;;  %v3305_v56 = vpack.c.bf16 %v3090_v45, %v3089_v43  ;;  %v11446_v14 = vmul.f32 0.5, %v1574_v0 }
 0x201   :  { %17975 = vst [vmem:[#allocation66_spill] sm:$0xff] %v11417_v27  ;;  %v11429_v48 = vmul.f32 %v2858_v35, %v11343_v12  ;;  %9134 = vtanh.f32 %v11420_v6  ;;  %v1683_v10 = vadd.f32 %v11099_v31, %v1682_v42  ;;  %v2863_v1 = vadd.f32 1.0, %v9115_v44  ;;  %v8812_v35 = vld [vmem:[#allocation3 + $0x370] sm:$0xff]  }
 0x202   :  { %v9117_v26 = vpop.eup %9116  ;;  %9136 = vtanh.f32 %v11410_v20  ;;  %v11436_v55 = vmul.f32 0.5, %v1691_v61  ;;  %v8505_v57 = vpop.f32.mrf.mxu0  ;;  %v11456_v3 = vmul.f32 0.5, %v1582_v40  ;;  %v1595_v17 = vadd.f32 %v11099_v31, %v11223_v54 }
 0x203   :  { %v11438_v36 = vpop.eup %9118  ;;  %v11440_v12 = vmul.f32 0.5, %v1683_v10  ;;  %v1694_v51 = vadd.f32 %v11099_v31, %v8505_v57  ;;  %v2861_v61 = vadd.f32 1.0, %v9117_v26  ;;  %v11450_v10 = vmul.f32 %v2863_v1, %v11353_v62 }
 0x204   :  { %v9121_v52 = vpop.eup %9120  ;;  %9138 = vtanh.f32 %v11436_v55  ;;  %v1685_v44 = vpop.f32.mrf.mxu0  ;;  %v3092_v57 = vmul.f32 %v2836_v34, %v11307_v9  ;;  %v2837_v9 = vadd.f32 1.0, %v9113_v19 }
 0x205   :  { %v9123_v27 = vpop.eup %9122  ;;  %v2864_v30 = vadd.f32 1.0, %v9121_v52  ;;  %9140 = vtanh.f32 %v11440_v12  ;;  %v11453_v43 = vmul.f32 0.5, %v1694_v51  ;;  %3934 = vmatmul.mubr.bf16.gmra.mxu1 %v3305_v56  ;;  %v1686_v0 = vadd.f32 %v11099_v31, %v1685_v44 }
 0x206   :  { %v9125_v45 = vpop.eup %9124  ;;  %v8508_v26 = vpop.f32.mrf.mxu0  ;;  %8603 = vmatmul.mubr.bf16.gmra.mxu0 %v8811_v58  ;;  %3943 = vmatprep.mubr.bf16.mxu1 %v17973_v11  ;;  %v11469_v54 = vmul.f32 %v2861_v61, %v11358_v4  ;;  %v3306_v61 = vpack.c.bf16 %v3092_v57, %v3091_v21 }
 0x207   :  { %v11463_v62 = vmul.f32 %v2864_v30, %v11365_v49  ;;  %v2862_v52 = vadd.f32 1.0, %v9125_v45  ;;  %9142 = vtanh.f32 %v11453_v43  ;;  %v1707_v1 = vadd.f32 %v11099_v31, %v8508_v26  ;;  %8606 = vmatprep.mubr.bf16.mxu0 %v8812_v35  ;;  %v8813_v45 = vld [vmem:[#allocation3 + $0x378] sm:$0xff]  }
 0x208   :  { %9144 = vtanh.f32 %v11446_v14  ;;  %v11471_v40 = vmul.f32 0.5, %v1686_v0  ;;  %v1698_v34 = vpop.f32.mrf.mxu0  ;;  %v2838_v35 = vadd.f32 1.0, %v9123_v27  ;;  %v3093_v30 = vmul.f32 %v2837_v9, %v11325_v38 }
 0x209   :  { %v9127_v58 = vpop.eup %9126  ;;  %v11476_v49 = vmul.f32 %v2862_v52, %v11379_v47  ;;  %v11478_v51 = vmul.f32 0.5, %v1707_v1  ;;  %v1699_v56 = vadd.f32 %v11099_v31, %v1698_v34  ;;  %v8814_v52 = vld [vmem:[#allocation3 + $0x380] sm:$0xff]   ;;  %v1587_v27 = vadd.f32 %v11099_v31, %v11230_v28 }
 0x20a   :  { %v9129_v19 = vpop.eup %9128  ;;  %v2867_v44 = vadd.f32 1.0, %v9127_v58  ;;  %9146 = vtanh.f32 %v11471_v40  ;;  %v8509_v4 = vpop.f32.mrf.mxu0  ;;  %v1590_v34 = vadd.f32 %v11099_v31, %v11240_v22  ;;  %v3094_v28 = vmul.f32 %v2838_v35, %v11361_v33 }
 0x20b   :  { %v2865_v0 = vadd.f32 1.0, %v9129_v19  ;;  %9148 = vtanh.f32 %v11478_v51  ;;  %v11483_v26 = vmul.f32 0.5, %v1699_v56  ;;  %v1710_v47 = vadd.f32 %v11099_v31, %v8509_v4 }
 0x20c   :  { %v9131_v1 = vpop.eup %9130  ;;  %v1701_v58 = vpop.f32.mrf.mxu0  ;;  %v11496_v56 = vmul.f32 %v2867_v44, %v11389_v41  ;;  %v11516_v35 = vmul.f32 0.5, %v1595_v17  ;;  %v11531_v17 = vmul.f32 0.5, %v1590_v34 }
 0x20d   :  { %v11493_v57 = vpop.eup %9132  ;;  %v2868_v19 = vadd.f32 1.0, %v9131_v1  ;;  %9150 = vtanh.f32 %v11483_v26  ;;  %v11499_v4 = vmul.f32 0.5, %v1710_v47  ;;  %3944 = vmatmul.mubr.bf16.gmra.mxu1 %v3306_v61  ;;  %v11504_v22 = vmul.f32 %v2865_v0, %v11393_v2 }
 0x20e   :  { %17976 = vst [vmem:[#allocation67_spill] sm:$0xff] %v11496_v56  ;;  %v9135_v38 = vpop.eup %9134  ;;  %9152 = vtanh.f32 %v11456_v3  ;;  %v1702_v9 = vadd.f32 %v11099_v31, %v1701_v58  ;;  %v8512_v21 = vpop.f32.mrf.mxu0  ;;  %8607 = vmatmul.mubr.bf16.gmra.mxu0 %v8813_v45  ;;  %3953 = vmatprep.mubr.bf16.mxu1 %v17973_v11  ;;  %v2839_v2 = vadd.f32 1.0, %v11402_v59  ;;  %v11518_v0 = vmul.f32 0.5, %v1587_v27 }
 0x20f   :  { %17977 = vst [vmem:[#allocation68_spill] sm:$0xff] %v11504_v22  ;;  %v11508_v41 = vpop.eup %9136  ;;  %v11511_v44 = vmul.f32 %v2868_v19, %v11405_v53  ;;  %v2866_v61 = vadd.f32 1.0, %v9135_v38  ;;  %9154 = vtanh.f32 %v11499_v4  ;;  %v1723_v33 = vadd.f32 %v11099_v31, %v8512_v21  ;;  %8610 = vmatprep.mubr.bf16.mxu0 %v8814_v52 }
 0x210   :  { %v11520_v45 = vmul.f32 0.5, %v1702_v9  ;;  %v1714_v47 = vpop.f32.mrf.mxu0  ;;  %v2840_v59 = vadd.f32 1.0, %v11438_v36  ;;  %v8815_v9 = vld [vmem:[#allocation3 + $0x388] sm:$0xff]   ;;  %v3095_v42 = vmul.f32 %v2839_v2, %v11321_v18  ;;  %v1598_v18 = vadd.f32 %v11099_v31, %v11237_v13 }
 0x211   :  { %17978 = vst [vmem:[#allocation69_spill] sm:$0xff] %v11511_v44  ;;  %v9139_v1 = vpop.eup %9138  ;;  %v11525_v58 = vmul.f32 %v2866_v61, %v11420_v6  ;;  %v11527_v19 = vmul.f32 0.5, %v1723_v33  ;;  %v1715_v52 = vadd.f32 %v11099_v31, %v1714_v47  ;;  %v3307_v61 = vpack.c.bf16 %v3094_v28, %v3093_v30  ;;  %v8816_v33 = vld [vmem:[#allocation3 + $0x390] sm:$0xff]  }
 0x212   :  { %v9141_v21 = vpop.eup %9140  ;;  %v2871_v27 = vadd.f32 1.0, %v9139_v1  ;;  %9156 = vtanh.f32 %v11520_v45  ;;  %v8513_v38 = vpop.f32.mrf.mxu0  ;;  %v3096_v30 = vmul.f32 %v2840_v59, %v11351_v16  ;;  %v11563_v16 = vld [vmem:[%s17709_s2] ss:$0 sm:$0xff] }
 0x213   :  { %9158 = vtanh.f32 %v11527_v19  ;;  %v11537_v6 = vmul.f32 0.5, %v1715_v52  ;;  %v2869_v36 = vadd.f32 1.0, %v9141_v21  ;;  %v1726_v34 = vadd.f32 %v11099_v31, %v8513_v38 }
 0x214   :  { %v9143_v47 = vpop.eup %9142  ;;  %9160 = vtanh.f32 %v11516_v35  ;;  %v1717_v1 = vpop.f32.mrf.mxu0  ;;  %v11543_v44 = vmul.f32 %v2871_v27, %v11436_v55 }
 0x215   :  { %v9145_v56 = vpop.eup %9144  ;;  %v2872_v53 = vadd.f32 1.0, %v9143_v47  ;;  %9162 = vtanh.f32 %v11537_v6  ;;  %v1718_v52 = vadd.f32 %v11099_v31, %v1717_v1  ;;  %3954 = vmatmul.mubr.bf16.gmra.mxu1 %v3307_v61  ;;  %v11551_v28 = vmul.f32 0.5, %v1726_v34 }
 0x216   :  { %17979 = vst [vmem:[#allocation70_spill] sm:$0xff] %v11543_v44  ;;  %9164 = vtanh.f32 %v11518_v0  ;;  %v8516_v2 = vpop.f32.mrf.mxu0  ;;  %8611 = vmatmul.mubr.bf16.gmra.mxu0 %v8815_v9  ;;  %3963 = vmatprep.mubr.bf16.mxu1 %v17973_v11  ;;  %v11567_v59 = vmul.f32 %v2869_v36, %v11440_v12  ;;  %v2841_v34 = vadd.f32 1.0, %v11508_v41 }
 0x217   :  { %v9147_v55 = vpop.eup %9146  ;;  %9166 = vtanh.f32 %v11531_v17  ;;  %v11556_v21 = vmul.f32 %v2872_v53, %v11453_v43  ;;  %v11558_v27 = vmul.f32 0.5, %v1718_v52  ;;  %v1739_v13 = vadd.f32 %v11563_v16, %v8516_v2  ;;  %8614 = vmatprep.mubr.bf16.mxu0 %v8816_v33  ;;  %v8817_v52 = vld [vmem:[#allocation3 + $0x398] sm:$0xff]   ;;  %v8818_v43 = vld [vmem:[#allocation3 + $0x3a0] sm:$0xff]  }
 0x218   :  { %v9149_v31 = vpop.eup %9148  ;;  %v2870_v38 = vadd.f32 1.0, %v9147_v55  ;;  %9168 = vtanh.f32 %v11551_v28  ;;  %v1730_v9 = vpop.f32.mrf.mxu0  ;;  %v2842_v33 = vadd.f32 1.0, %v9145_v56  ;;  %v11580_v55 = vmul.f32 0.5, %v1598_v18 }
 0x219   :  { %17980 = vst [vmem:[#allocation71_spill] sm:$0xff] %v11556_v21  ;;  %v2875_v53 = vadd.f32 1.0, %v9149_v31  ;;  %9170 = vtanh.f32 %v11558_v27  ;;  %v11573_v61 = vmul.f32 0.5, %v1739_v13  ;;  %v1731_v12 = vadd.f32 %v11563_v16, %v1730_v9 }
 0x21a   :  { %v9151_v47 = vpop.eup %9150  ;;  %v11577_v1 = vmul.f32 %v2870_v38, %v11471_v40  ;;  %v8517_v36 = vpop.f32.mrf.mxu0  ;;  %v3308_v13 = vpack.c.bf16 %v3096_v30, %v3095_v42  ;;  %v1603_v56 = vadd.f32 %v11563_v16, %v11252_v37  ;;  %v2843_v30 = vadd.f32 1.0, %v11493_v57 }
 0x21b   :  { %v9153_v2 = vpop.eup %9152  ;;  %9172 = vtanh.f32 %v11573_v61  ;;  %v1742_v31 = vadd.f32 %v11563_v16, %v8517_v36  ;;  %v2873_v41 = vadd.f32 1.0, %v9151_v47  ;;  %v11588_v38 = vmul.f32 0.5, %v1731_v12 }
 0x21c   :  { %v9155_v44 = vpop.eup %9154  ;;  %v1733_v9 = vpop.f32.mrf.mxu0  ;;  %v11591_v18 = vmul.f32 %v2875_v53, %v11478_v51  ;;  %v3097_v37 = vmul.f32 %v2841_v34, %v11410_v20  ;;  %v3098_v36 = vmul.f32 %v2842_v33, %v11446_v14  ;;  %v11608_v34 = vmul.f32 0.5, %v1603_v56 }
 0x21d   :  { %v2876_v21 = vadd.f32 1.0, %v9155_v44  ;;  %v11593_v22 = vmul.f32 0.5, %v1742_v31  ;;  %v1734_v42 = vadd.f32 %v11563_v16, %v1733_v9  ;;  %3964 = vmatmul.mubr.bf16.gmra.mxu1 %v3308_v13  ;;  %9174 = vtanh.f32 %v11588_v38  ;;  %v8819_v9 = vld [vmem:[#allocation3 + $0x3a8] sm:$0xff]  }
 0x21e   :  { %17981 = vst [vmem:[#allocation72_spill] sm:$0xff] %v11591_v18  ;;  %v8520_v47 = vpop.f32.mrf.mxu0  ;;  %8615 = vmatmul.mubr.bf16.gmra.mxu0 %v8817_v52  ;;  %3973 = vmatprep.mubr.bf16.mxu1 %v17973_v11  ;;  %v1606_v14 = vadd.f32 %v11563_v16, %v11264_v25  ;;  %v11613_v33 = vmul.f32 %v2873_v41, %v11483_v26 }
 0x21f   :  { %v9157_v51 = vpop.eup %9156  ;;  %v11602_v44 = vmul.f32 %v2876_v21, %v11499_v4  ;;  %9176 = vtanh.f32 %v11593_v22  ;;  %v11605_v53 = vmul.f32 0.5, %v1734_v42  ;;  %v1755_v57 = vadd.f32 %v11563_v16, %v8520_v47  ;;  %8618 = vmatprep.mubr.bf16.mxu0 %v8818_v43 }
 0x220   :  { %v9159_v20 = vpop.eup %9158  ;;  %v2874_v12 = vadd.f32 1.0, %v9157_v51  ;;  %v1746_v52 = vpop.f32.mrf.mxu0  ;;  %v2844_v21 = vadd.f32 1.0, %v9153_v2  ;;  %v3309_v51 = vpack.c.bf16 %v3098_v36, %v3097_v37  ;;  %v3099_v40 = vmul.f32 %v2843_v30, %v11396_v29 }
 0x221   :  { %17982 = vst [vmem:[#allocation73_spill] sm:$0xff] %v11602_v44  ;;  %v11615_v4 = vpop.eup %9160  ;;  %9178 = vtanh.f32 %v11605_v53  ;;  %v11620_v43 = vmul.f32 0.5, %v1755_v57  ;;  %v2879_v26 = vadd.f32 1.0, %v9159_v20  ;;  %v1747_v56 = vadd.f32 %v11563_v16, %v1746_v52  ;;  %v8820_v57 = vld [vmem:[#allocation3 + $0x3b0] sm:$0xff]  }
 0x222   :  { %v9163_v13 = vpop.eup %9162  ;;  %9180 = vtanh.f32 %v11580_v55  ;;  %v11624_v25 = vmul.f32 %v2874_v12, %v11520_v45  ;;  %v8521_v41 = vpop.f32.mrf.mxu0  ;;  %v11630_v18 = vmul.f32 0.5, %v1606_v14 }
 0x223   :  { %v9165_v42 = vpop.eup %9164  ;;  %v2877_v2 = vadd.f32 1.0, %v9163_v13  ;;  %9182 = vtanh.f32 %v11620_v43  ;;  %v1758_v47 = vadd.f32 %v11563_v16, %v8521_v41  ;;  %v11634_v20 = vmul.f32 0.5, %v1747_v56 }
 0x224   :  { %v9167_v31 = vpop.eup %9166  ;;  %v1749_v12 = vpop.f32.mrf.mxu0  ;;  %v3100_v13 = vmul.f32 %v2844_v21, %v11456_v3  ;;  %9184 = vtanh.f32 %v11608_v34  ;;  %v11642_v29 = vmul.f32 %v2879_v26, %v11527_v19 }
 0x225   :  { %v9169_v52 = vpop.eup %9168  ;;  %v11638_v44 = vmul.f32 0.5, %v1758_v47  ;;  %v1750_v37 = vadd.f32 %v11563_v16, %v1749_v12  ;;  %3974 = vmatmul.mubr.bf16.gmra.mxu1 %v3309_v51  ;;  %v11645_v30 = vmul.f32 %v2877_v2, %v11537_v6  ;;  %9186 = vtanh.f32 %v11634_v20 }
 0x226   :  { %v9171_v36 = vpop.eup %9170  ;;  %17983 = vst [vmem:[#allocation74_spill] sm:$0xff] %v11642_v29  ;;  %v2880_v14 = vadd.f32 1.0, %v9169_v52  ;;  %v8524_v56 = vpop.f32.mrf.mxu0  ;;  %8619 = vmatmul.mubr.bf16.gmra.mxu0 %v8819_v9  ;;  %3983 = vmatprep.mubr.bf16.mxu1 %v17973_v11  ;;  %v1619_v6 = vadd.f32 %v11563_v16, %v11278_v32  ;;  %v2845_v12 = vadd.f32 1.0, %v9165_v42 }
 0x227   :  { %v2878_v3 = vadd.f32 1.0, %v9171_v36  ;;  %9188 = vtanh.f32 %v11638_v44  ;;  %v11650_v21 = vmul.f32 0.5, %v1750_v37  ;;  %v1771_v41 = vadd.f32 %v11563_v16, %v8524_v56  ;;  %8622 = vmatprep.mubr.bf16.mxu0 %v8820_v57  ;;  %v8821_v36 = vld [vmem:[#allocation3 + $0x3b8] sm:$0xff]  }
 0x228   :  { %v9173_v19 = vpop.eup %9172  ;;  %9190 = vtanh.f32 %v11630_v18  ;;  %v11657_v26 = vmul.f32 %v2880_v14, %v11551_v28  ;;  %v1762_v9 = vpop.f32.mrf.mxu0  ;;  %v2846_v57 = vadd.f32 1.0, %v9167_v31  ;;  %v3310_v56 = vpack.c.bf16 %v3100_v13, %v3099_v40 }
 0x229   :  { %v11660_v2 = vmul.f32 %v2878_v3, %v11558_v27  ;;  %v2883_v47 = vadd.f32 1.0, %v9173_v19  ;;  %9192 = vtanh.f32 %v11650_v21  ;;  %v11663_v51 = vmul.f32 0.5, %v1771_v41  ;;  %v8822_v3 = vld [vmem:[#allocation3 + $0x3c0] sm:$0xff]  }
 0x22a   :  { %17984 = vst [vmem:[#allocation75_spill] sm:$0xff] %v11657_v26  ;;  %v1763_v37 = vadd.f32 %v11563_v16, %v1762_v9  ;;  %v8525_v32 = vpop.f32.mrf.mxu0  ;;  %v9175_v28 = vpop.eup %9174  ;;  %v11672_v42 = vmul.f32 0.5, %v1619_v6  ;;  %v3101_v40 = vmul.f32 %v2845_v12, %v11518_v0  ;;  %v3102_v13 = vmul.f32 %v2846_v57, %v11531_v17 }
 0x22b   :  { %9194 = vtanh.f32 %v11663_v51  ;;  %v1774_v27 = vadd.f32 %v11563_v16, %v8525_v32  ;;  %v2881_v31 = vadd.f32 1.0, %v9175_v28  ;;  %v11677_v9 = vmul.f32 %v2883_v47, %v11573_v61 }
 0x22c   :  { %v9177_v41 = vpop.eup %9176  ;;  %v11674_v19 = vmul.f32 0.5, %v1763_v37  ;;  %v1765_v52 = vpop.f32.mrf.mxu0  ;;  %v1622_v17 = vadd.f32 %v11563_v16, %v11293_v50 }
 0x22d   :  { %17985 = vst [vmem:[#allocation76_spill] sm:$0xff] %v11677_v9  ;;  %v2884_v45 = vadd.f32 1.0, %v9177_v41  ;;  %v11679_v29 = vmul.f32 0.5, %v1774_v27  ;;  %v1766_v14 = vadd.f32 %v11563_v16, %v1765_v52  ;;  %3984 = vmatmul.mubr.bf16.gmra.mxu1 %v3310_v56  ;;  %v11685_v6 = vmul.f32 %v2881_v31, %v11588_v38  ;;  %v8823_v56 = vld [vmem:[#allocation3 + $0x3c8] sm:$0xff]  }
 0x22e   :  { %v9179_v26 = vpop.eup %9178  ;;  %9196 = vtanh.f32 %v11674_v19  ;;  %v8528_v37 = vpop.f32.mrf.mxu0  ;;  %8623 = vmatmul.mubr.bf16.gmra.mxu0 %v8821_v36  ;;  %3993 = vmatprep.mubr.bf16.mxu1 %v17973_v11  ;;  %v3311_v31 = vpack.c.bf16 %v3102_v13, %v3101_v40 }
 0x22f   :  { %v9181_v61 = vpop.eup %9180  ;;  %v11690_v47 = vmul.f32 %v2884_v45, %v11593_v22  ;;  %v2882_v52 = vadd.f32 1.0, %v9179_v26  ;;  %9198 = vtanh.f32 %v11679_v29  ;;  %v11693_v32 = vmul.f32 0.5, %v1766_v14  ;;  %8626 = vmatprep.mubr.bf16.mxu0 %v8822_v3 }
 0x230   :  { %v9183_v0 = vpop.eup %9182  ;;  %v1787_v38 = vadd.f32 %v11563_v16, %v8528_v37  ;;  %v1778_v12 = vpop.f32.mrf.mxu0  ;;  %v2847_v26 = vadd.f32 1.0, %v11615_v4  ;;  %v2848_v28 = vadd.f32 1.0, %v9181_v61  ;;  %v8824_v37 = vld [vmem:[#allocation3 + $0x3d0] sm:$0xff]  }
 0x231   :  { %17986 = vst [vmem:[#allocation77_spill] sm:$0xff] %v11690_v47  ;;  %v11701_v36 = vmul.f32 %v2882_v52, %v11605_v53  ;;  %v2887_v22 = vadd.f32 1.0, %v9183_v0  ;;  %9200 = vtanh.f32 %v11693_v32  ;;  %v9185_v45 = vpop.eup %9184  ;;  %v1779_v50 = vadd.f32 %v11563_v16, %v1778_v12 }
 0x232   :  { %v11705_v14 = vmul.f32 0.5, %v1787_v38  ;;  %v8529_v27 = vpop.f32.mrf.mxu0  ;;  %v9187_v3 = vpop.eup %9186  ;;  %9202 = vtanh.f32 %v11672_v42  ;;  %v11712_v0 = vmul.f32 0.5, %v1622_v17  ;;  %v3103_v13 = vmul.f32 %v2847_v26, %v11516_v35 }
 0x233   :  { %v1790_v41 = vadd.f32 %v11563_v16, %v8529_v27  ;;  %v2885_v4 = vadd.f32 1.0, %v9187_v3  ;;  %v11715_v61 = vmul.f32 0.5, %v1779_v50  ;;  %v11718_v57 = vmul.f32 %v2887_v22, %v11620_v43 }
 0x234   :  { %v9189_v52 = vpop.eup %9188  ;;  %9204 = vtanh.f32 %v11705_v14  ;;  %v1781_v38 = vpop.f32.mrf.mxu0  ;;  %v3104_v17 = vmul.f32 %v2848_v28, %v11580_v55 }
 0x235   :  { %v9191_v12 = vpop.eup %9190  ;;  %17987 = vst [vmem:[#allocation78_spill] sm:$0xff] %v11718_v57  ;;  %v2888_v9 = vadd.f32 1.0, %v9189_v52  ;;  %v11720_v47 = vmul.f32 0.5, %v1790_v41  ;;  %v1782_v27 = vadd.f32 %v11563_v16, %v1781_v38  ;;  %3994 = vmatmul.mubr.bf16.gmra.mxu1 %v3311_v31  ;;  %v11726_v3 = vmul.f32 %v2885_v4, %v11634_v20  ;;  %v8825_v4 = vld [vmem:[#allocation3 + $0x3d8] sm:$0xff]  }
 0x236   :  { %v9193_v40 = vpop.eup %9192  ;;  %9206 = vtanh.f32 %v11715_v61  ;;  %v8532_v50 = vpop.f32.mrf.mxu0  ;;  %8627 = vmatmul.mubr.bf16.gmra.mxu0 %v8823_v56  ;;  %4003 = vmatprep.mubr.bf16.mxu1 %v17973_v11  ;;  %v2850_v56 = vadd.f32 1.0, %v9191_v12 }
 0x237   :  { %17988 = vst [vmem:[#allocation79_spill] sm:$0xff] %v11726_v3  ;;  %v11731_v43 = vmul.f32 %v2888_v9, %v11638_v44  ;;  %v2886_v22 = vadd.f32 1.0, %v9193_v40  ;;  %9208 = vtanh.f32 %v11720_v47  ;;  %v11734_v41 = vmul.f32 0.5, %v1782_v27  ;;  %8630 = vmatprep.mubr.bf16.mxu0 %v8824_v37 }
 0x238   :  { %v9195_v35 = vpop.eup %9194  ;;  %9210 = vtanh.f32 %v11712_v0  ;;  %v1803_v55 = vadd.f32 %v11563_v16, %v8532_v50  ;;  %v1794_v20 = vpop.f32.mrf.mxu0  ;;  %v2849_v9 = vadd.f32 1.0, %v9185_v45  ;;  %v3312_v50 = vpack.c.bf16 %v3104_v17, %v3103_v13 }
 0x239   :  { %17989 = vst [vmem:[#allocation80_spill] sm:$0xff] %v11731_v43  ;;  %v11741_v28 = vmul.f32 %v2886_v22, %v11650_v21  ;;  %v2891_v44 = vadd.f32 1.0, %v9195_v35  ;;  %9212 = vtanh.f32 %v11734_v41  ;;  %v1795_v37 = vadd.f32 %v11563_v16, %v1794_v20  ;;  %v8826_v21 = vld [vmem:[#allocation3 + $0x3e0] sm:$0xff]  }
 0x23a   :  { %v11744_v31 = vmul.f32 0.5, %v1803_v55  ;;  %v8533_v52 = vpop.f32.mrf.mxu0  ;;  %v3105_v13 = vmul.f32 %v2849_v9, %v11608_v34  ;;  %v3106_v17 = vmul.f32 %v2850_v56, %v11630_v18 }
 0x23b   :  { %v9197_v38 = vpop.eup %9196  ;;  %v1806_v40 = vadd.f32 %v11563_v16, %v8533_v52  ;;  %v11751_v45 = vmul.f32 0.5, %v1795_v37  ;;  %v11754_v55 = vmul.f32 %v2891_v44, %v11663_v51 }
 0x23c   :  { %v9199_v22 = vpop.eup %9198  ;;  %v2889_v35 = vadd.f32 1.0, %v9197_v38  ;;  %9214 = vtanh.f32 %v11744_v31  ;;  %v1797_v12 = vpop.f32.mrf.mxu0 }
 0x23d   :  { %17990 = vst [vmem:[#allocation81_spill] sm:$0xff] %v11754_v55  ;;  %v2892_v20 = vadd.f32 1.0, %v9199_v22  ;;  %v11756_v26 = vmul.f32 0.5, %v1806_v40  ;;  %v1798_v53 = vadd.f32 %v11563_v16, %v1797_v12  ;;  %4004 = vmatmul.mubr.bf16.gmra.mxu1 %v3312_v50  ;;  %9216 = vtanh.f32 %v11751_v45  ;;  %v8827_v50 = vld [vmem:[#allocation3 + $0x3e8] sm:$0xff]  }
 0x23e   :  { %v9201_v27 = vpop.eup %9200  ;;  %v11762_v52 = vmul.f32 %v2889_v35, %v11674_v19  ;;  %v8536_v37 = vpop.f32.mrf.mxu0  ;;  %8631 = vmatmul.mubr.bf16.gmra.mxu0 %v8825_v4  ;;  %4013 = vmatprep.mubr.bf16.mxu1 %v17973_v11 }
 0x23f   :  { %v11767_v51 = vmul.f32 %v2892_v20, %v11679_v29  ;;  %v2890_v44 = vadd.f32 1.0, %v9201_v27  ;;  %9218 = vtanh.f32 %v11756_v26  ;;  %v11770_v38 = vmul.f32 0.5, %v1798_v53  ;;  %8634 = vmatprep.mubr.bf16.mxu0 %v8826_v21  ;;  %v9203_v34 = vpop.eup %9202 }
 0x240   :  { %17991 = vst [vmem:[#allocation82_spill] sm:$0xff] %v11762_v52  ;;  %v1819_v18 = vadd.f32 %v11563_v16, %v8536_v37  ;;  %v1810_v19 = vpop.f32.mrf.mxu0  ;;  %v3313_v20 = vpack.c.bf16 %v3106_v17, %v3105_v13 }
 0x241   :  { %17992 = vst [vmem:[#allocation83_spill] sm:$0xff] %v11767_v51  ;;  %v9205_v9 = vpop.eup %9204  ;;  %v11776_v4 = vmul.f32 %v2890_v44, %v11693_v32  ;;  %9220 = vtanh.f32 %v11770_v38  ;;  %v1811_v29 = vadd.f32 %v11563_v16, %v1810_v19  ;;  %v8828_v32 = vld [vmem:[#allocation3 + $0x3f0] sm:$0xff]  }
 0x242   :  { %v2895_v27 = vadd.f32 1.0, %v9205_v9  ;;  %v11780_v40 = vmul.f32 0.5, %v1819_v18  ;;  %v8537_v53 = vpop.f32.mrf.mxu0 }
 0x243   :  { %17993 = vst [vmem:[#allocation84_spill] sm:$0xff] %v11776_v4  ;;  %v9207_v21 = vpop.eup %9206  ;;  %v11784_v35 = vmul.f32 0.5, %v1811_v29  ;;  %v1822_v12 = vadd.f32 %v11563_v16, %v8537_v53 }
 0x244   :  { %v9209_v37 = vpop.eup %9208  ;;  %v11788_v44 = vmul.f32 %v2895_v27, %v11705_v14  ;;  %v2893_v19 = vadd.f32 1.0, %v9207_v21  ;;  %9222 = vtanh.f32 %v11780_v40  ;;  %v1813_v18 = vpop.f32.mrf.mxu0 }
 0x245   :  { %v9211_v9 = vpop.eup %9210  ;;  %v2896_v56 = vadd.f32 1.0, %v9209_v37  ;;  %9224 = vtanh.f32 %v11784_v35  ;;  %v11792_v55 = vmul.f32 0.5, %v1822_v12  ;;  %v1814_v29 = vadd.f32 %v11563_v16, %v1813_v18  ;;  %4014 = vmatmul.mubr.bf16.gmra.mxu1 %v3313_v20 }
 0x246   :  { %17994 = vst [vmem:[#allocation85_spill] sm:$0xff] %v11788_v44  ;;  %v9213_v53 = vpop.eup %9212  ;;  %v11796_v13 = vmul.f32 %v2893_v19, %v11715_v61  ;;  %v8540_v17 = vpop.f32.mrf.mxu0  ;;  %8635 = vmatmul.mubr.bf16.gmra.mxu0 %v8827_v50  ;;  %4023 = vmatprep.mubr.bf16.mxu1 %v17973_v11  ;;  %v2854_v19 = vadd.f32 1.0, %v9211_v9  ;;  %v18042_v44 = vpack.c.bf16 %v11463_v62, %v11450_v10 }
 0x247   :  { %v11800_v14 = vmul.f32 %v2896_v56, %v11720_v47  ;;  %v2894_v27 = vadd.f32 1.0, %v9213_v53  ;;  %9226 = vtanh.f32 %v11792_v55  ;;  %v11803_v21 = vmul.f32 0.5, %v1814_v29  ;;  %8638 = vmatprep.mubr.bf16.mxu0 %v8828_v32  ;;  %v8829_v53 = vld [vmem:[#allocation3 + $0x3f8] sm:$0xff]  }
 0x248   :  { %17995 = vst [vmem:[#allocation86_spill] sm:$0xff] %v11796_v13  ;;  %v1835_v12 = vadd.f32 %v11563_v16, %v8540_v17  ;;  %v1826_v20 = vpop.f32.mrf.mxu0  ;;  %v2853_v56 = vadd.f32 1.0, %v9203_v34 }
 0x249   :  { %17996 = vst [vmem:[#allocation87_spill] sm:$0xff] %v11800_v14  ;;  %v9215_v37 = vpop.eup %9214  ;;  %v11809_v50 = vmul.f32 %v2894_v27, %v11734_v41  ;;  %9228 = vtanh.f32 %v11803_v21  ;;  %v1827_v47 = vadd.f32 %v11563_v16, %v1826_v20 }
 0x24a   :  { %v2899_v18 = vadd.f32 1.0, %v9215_v37  ;;  %v11813_v29 = vmul.f32 0.5, %v1835_v12  ;;  %v8541_v32 = vpop.f32.mrf.mxu0  ;;  %v9217_v17 = vpop.eup %9216  ;;  %v3109_v22 = vmul.f32 %v2853_v56, %v11672_v42 }
 0x24b   :  { %17997 = vst [vmem:[#allocation88_spill] sm:$0xff] %v11809_v50  ;;  %v11817_v51 = vmul.f32 0.5, %v1827_v47  ;;  %v1838_v41 = vadd.f32 %v11563_v16, %v8541_v32  ;;  %v2897_v20 = vadd.f32 1.0, %v9217_v17  ;;  %v17999_v47 = vpack.c.bf16 %v11340_v24, %v11334_v15 }
 0x24c   :  { %v9219_v27 = vpop.eup %9218  ;;  %v11821_v61 = vmul.f32 %v2899_v18, %v11744_v31  ;;  %9230 = vtanh.f32 %v11813_v29  ;;  %v1829_v34 = vpop.f32.mrf.mxu0  ;;  %v3110_v31 = vmul.f32 %v2854_v19, %v11712_v0 }
 0x24d   :  { %v2900_v9 = vadd.f32 1.0, %v9219_v27  ;;  %9232 = vtanh.f32 %v11817_v51  ;;  %v11825_v12 = vmul.f32 0.5, %v1838_v41  ;;  %v1830_v37 = vadd.f32 %v11563_v16, %v1829_v34  ;;  %4024 = vmatmul.mubr.bf16.gmra.mxu1 %v17999_v47 }
 0x24e   :  { %17998 = vst [vmem:[#allocation89_spill] sm:$0xff] %v11821_v61  ;;  %v9221_v32 = vpop.eup %9220  ;;  %v11834_v18 = vmul.f32 %v2897_v20, %v11751_v45  ;;  %v8544_v17 = vpop.f32.mrf.mxu0  ;;  %8639 = vmatmul.mubr.bf16.gmra.mxu0 %v8829_v53  ;;  %4033 = vmatprep.mubr.bf16.mxu1 %v17973_v11 }
 0x24f   :  { %v11838_v41 = vmul.f32 %v2900_v9, %v11756_v26  ;;  %v2898_v27 = vadd.f32 1.0, %v9221_v32  ;;  %9234 = vtanh.f32 %v11825_v12  ;;  %v11841_v15 = vmul.f32 0.5, %v1830_v37  ;;  %3533 = vmatprep.mubr.bf16.mxu0 %v17973_v11 }
 0x250   :  { %18000 = vst [vmem:[#allocation90_spill] sm:$0xff] %v11834_v18  ;;  %v1851_v24 = vadd.f32 %v11563_v16, %v8544_v17  ;;  %v1842_v42 = vpop.f32.mrf.mxu0  ;;  %v3315_v9 = vpack.c.bf16 %v3110_v31, %v3109_v22 }
 0x251   :  { %18001 = vst [vmem:[#allocation91_spill] sm:$0xff] %v11838_v41  ;;  %v9223_v0 = vpop.eup %9222  ;;  %v11848_v56 = vmul.f32 %v2898_v27, %v11770_v38  ;;  %9236 = vtanh.f32 %v11841_v15  ;;  %v1843_v26 = vadd.f32 %v11563_v16, %v1842_v42  ;;  %v18028_v41 = vld [vmem:[#allocation17_spill] sm:$0xff] }
 0x252   :  { %v9225_v19 = vpop.eup %9224  ;;  %v2903_v53 = vadd.f32 1.0, %v9223_v0  ;;  %v11852_v20 = vmul.f32 0.5, %v1851_v24  ;;  %v8545_v34 = vpop.f32.mrf.mxu0 }
 0x253   :  { %18002 = vst [vmem:[#allocation92_spill] sm:$0xff] %v11848_v56  ;;  %v2901_v47 = vadd.f32 1.0, %v9225_v19  ;;  %v11856_v32 = vmul.f32 0.5, %v1843_v26  ;;  %v1854_v17 = vadd.f32 %v11563_v16, %v8545_v34  ;;  %v18005_v34 = vpack.c.bf16 %v10693_v7, %v10689_v5 }
 0x254   :  { %v9227_v38 = vpop.eup %9226  ;;  %9238 = vtanh.f32 %v11852_v20  ;;  %v1845_v27 = vpop.f32.mrf.mxu0  ;;  %v11861_v42 = vmul.f32 %v2903_v53, %v11780_v40 }
 0x255   :  { %v2904_v0 = vadd.f32 1.0, %v9227_v38  ;;  %9240 = vtanh.f32 %v11856_v32  ;;  %v11864_v24 = vmul.f32 0.5, %v1854_v17  ;;  %4034 = vmatmul.mubr.bf16.gmra.mxu1 %v3315_v9  ;;  %v11867_v31 = vmul.f32 %v2901_v47, %v11784_v35 }
 0x256   :  { %18003 = vst [vmem:[#allocation93_spill] sm:$0xff] %v11861_v42  ;;  %v9229_v22 = vpop.eup %9228  ;;  %v1846_v26 = vadd.f32 %v11563_v16, %v1845_v27  ;;  %v8548_v19 = vpop.f32.mrf.mxu0  ;;  %3534 = vmatmul.mubr.bf16.vlgmr.msra.gmra.mxu0 %v18005_v34  ;;  %4043 = vmatprep.mubr.bf16.mxu1 %v17973_v11 }
 0x257   :  { %18004 = vst [vmem:[#allocation94_spill] sm:$0xff] %v11867_v31  ;;  %v11875_v40 = vmul.f32 %v2904_v0, %v11792_v55  ;;  %v2902_v53 = vadd.f32 1.0, %v9229_v22  ;;  %9242 = vtanh.f32 %v11864_v24  ;;  %v1867_v9 = vadd.f32 %v11563_v16, %v8548_v19  ;;  %3543 = vmatprep.mubr.bf16.mxu0 %v17973_v11 }
 0x258   :  { %v11880_v35 = vmul.f32 0.5, %v1846_v26  ;;  %v1858_v47 = vpop.f32.mrf.mxu0  ;;  %v3411_v19 = vlaneseq  ;;  %v18009_v26 = vpack.c.bf16 %v11376_v8, %v11371_v46 }
 0x259   :  { %18006 = vst [vmem:[#allocation95_spill] sm:$0xff] %v11875_v40  ;;  %v9231_v17 = vpop.eup %9230  ;;  %v11885_v7 = vmul.f32 %v2902_v53, %v11803_v21  ;;  %v11887_v38 = vmul.f32 0.5, %v1867_v9  ;;  %v1859_v55 = vadd.f32 %v11563_v16, %v1858_v47 }
 0x25a   :  { %v9233_v27 = vpop.eup %9232  ;;  %v2907_v0 = vadd.f32 1.0, %v9231_v17  ;;  %9244 = vtanh.f32 %v11880_v35  ;;  %v8549_v22 = vpop.f32.mrf.mxu0 }
 0x25b   :  { %18007 = vst [vmem:[#allocation96_spill] sm:$0xff] %v11885_v7  ;;  %v2905_v34 = vadd.f32 1.0, %v9233_v27  ;;  %9246 = vtanh.f32 %v11887_v38  ;;  %v11894_v5 = vmul.f32 0.5, %v1859_v55  ;;  %v1870_v53 = vadd.f32 %v11563_v16, %v8549_v22  ;;  %v11897_v9 = vpop.f32.mrf.mxu1 }
 0x25c   :  { %v9235_v21 = vpop.eup %9234  ;;  %v1861_v47 = vpop.f32.mrf.mxu0  ;;  %v11900_v17 = vmul.f32 %v2907_v0, %v11813_v29  ;;  %v11908_v55 = vshrl.u32 %v3411_v19, 7  ;;  %v18011_v29 = vpack.c.bf16 %v10682_v63, %v10678_v60 }
 0x25d   :  { %v2908_v45 = vadd.f32 1.0, %v9235_v21  ;;  %9248 = vtanh.f32 %v11894_v5  ;;  %4044 = vmatmul.mubr.bf16.gmra.mxu1 %v18009_v26  ;;  %v11906_v37 = vmul.f32 0.5, %v1870_v53  ;;  %v1862_v22 = vadd.f32 %v11563_v16, %v1861_v47  ;;  %v11911_v42 = vpop.f32.mrf.mxu1 }
 0x25e   :  { %18008 = vst [vmem:[#allocation97_spill] sm:$0xff] %v11900_v17  ;;  %v9237_v27 = vpop.eup %9236  ;;  %18010 = vst [vmem:[#allocation98_spill] sm:$0xff] %v11908_v55  ;;  %v8552_v40 = vpop.f32.mrf.mxu0  ;;  %3544 = vmatmul.mubr.bf16.gmra.mxu0 %v18011_v29  ;;  %4053 = vmatprep.mubr.bf16.mxu1 %v17973_v11  ;;  %v11918_v0 = vmul.f32 %v2905_v34, %v11817_v51 }
 0x25f   :  { %v11921_v46 = vmul.f32 %v2908_v45, %v11825_v12  ;;  %v2906_v8 = vadd.f32 1.0, %v9237_v27  ;;  %3553 = vmatprep.mubr.bf16.mxu0 %v17973_v11  ;;  %9250 = vtanh.f32 %v11906_v37  ;;  %v11925_v19 = vmul.f32 0.5, %v1862_v22  ;;  %v11928_v21 = vpop.f32.mrf.mxu1  ;;  %v3409_v22 = vld [vmem:[%s17711_s4] sm:$0x3] }
 0x260   :  { %18012 = vst [vmem:[#allocation99_spill] sm:$0xff] %v11918_v0  ;;  %v1883_v26 = vadd.f32 %v11563_v16, %v8552_v40  ;;  %v1874_v60 = vpop.f32.mrf.mxu0 }
 0x261   :  { %18013 = vst [vmem:[#allocation100_spill] sm:$0xff] %v11921_v46  ;;  %v9239_v63 = vpop.eup %9238  ;;  %v11933_v34 = vmul.f32 %v2906_v8, %v11841_v15  ;;  %9252 = vtanh.f32 %v11925_v19  ;;  %v1875_v29 = vadd.f32 %v11563_v16, %v1874_v60  ;;  %v11945_v15 = vpop.f32.mrf.mxu1  ;;  %v18016_v60 = vpack.c.bf16 %v11429_v48, %v11413_v23 }
 0x262   :  { %v9241_v12 = vpop.eup %9240  ;;  %v2911_v45 = vadd.f32 1.0, %v9239_v63  ;;  %v11937_v47 = vmul.f32 0.5, %v1883_v26  ;;  %v8553_v27 = vpop.f32.mrf.mxu0 }
 0x263   :  { %18014 = vst [vmem:[#allocation101_spill] sm:$0xff] %v11933_v34  ;;  %v2909_v63 = vadd.f32 1.0, %v9241_v12  ;;  %v11952_v40 = vmul.f32 0.5, %v1875_v29  ;;  %v1886_v46 = vadd.f32 %v11563_v16, %v8553_v27  ;;  %v18017_v12 = vsub.s32 0, %v11908_v55 }
 0x264   :  { %v9243_v8 = vpop.eup %9242  ;;  %9254 = vtanh.f32 %v11937_v47  ;;  %v1877_v26 = vpop.f32.mrf.mxu0  ;;  %v11950_v53 = vmul.f32 %v2911_v45, %v11852_v20  ;;  %v18018_v20 = vld [vmem:[#allocation18_spill] sm:$0xff] }
 0x265   :  { %v2912_v17 = vadd.f32 1.0, %v9243_v8  ;;  %v11955_v0 = vpop.f32.mrf.mxu1  ;;  %4054 = vmatmul.mubr.bf16.gmra.mxu1 %v18016_v60  ;;  %v11962_v51 = vrot.slane %v3409_v22, %v18017_v12  ;;  %v1878_v34 = vadd.f32 %v11563_v16, %v1877_v26  ;;  %v18019_v45 = vpack.c.bf16 %v10725_v39, %v18018_v20 }
 0x266   :  { %18015 = vst [vmem:[#allocation102_spill] sm:$0xff] %v11950_v53  ;;  %v8556_v31 = vpop.f32.mrf.mxu0  ;;  %4063 = vmatprep.mubr.bf16.mxu1 %v17973_v11  ;;  %9256 = vtanh.f32 %v11952_v40  ;;  %v11973_v23 = vmul.f32 0.5, %v1886_v46  ;;  %v11980_v39 = vmul.f32 %v2909_v63, %v11856_v32 }
 0x267   :  { %3554 = vmatmul.mubr.bf16.gmra.mxu0 %v18019_v45  ;;  %v9245_v27 = vpop.eup %9244  ;;  %v11970_v29 = vmul.f32 %v2912_v17, %v11864_v24  ;;  %v1899_v48 = vadd.f32 %v11563_v16, %v8556_v31  ;;  %v11976_v8 = vpop.f32.mrf.mxu1  ;;  %v11982_v12 = vmul.f32 0.5, %v1878_v34  ;;  %v18022_v17 = vsub.s32 1, %v11908_v55 }
 0x268   :  { %3563 = vmatprep.mubr.bf16.mxu0 %v17973_v11  ;;  %v9247_v26 = vpop.eup %9246  ;;  %18021 = vst [vmem:[#allocation103_spill] sm:$0xff] %v11980_v39  ;;  %v2910_v60 = vadd.f32 1.0, %v9245_v27  ;;  %v1890_v20 = vpop.f32.mrf.mxu0  ;;  %9258 = vtanh.f32 %v11973_v23 }
 0x269   :  { %18020 = vst [vmem:[#allocation18_spill] sm:$0xff] %v11970_v29  ;;  %v11988_v46 = vrot.slane %v3409_v22, %v18022_v17  ;;  %v11991_v31 = vmul.f32 0.5, %v1899_v48  ;;  %v11993_v45 = vpop.f32.mrf.mxu1  ;;  %v2915_v34 = vadd.f32 1.0, %v9247_v26  ;;  %9260 = vtanh.f32 %v11982_v12  ;;  %v18025_v29 = vld [vmem:[#allocation65_spill] sm:$0xff] }
 0x26a   :  { %v9249_v7 = vpop.eup %9248  ;;  %v11996_v32 = vmul.f32 %v2910_v60, %v11880_v35  ;;  %v1891_v63 = vadd.f32 %v11563_v16, %v1890_v20  ;;  %v8557_v27 = vpop.f32.mrf.mxu0  ;;  %v3806_v22 = vadd.f32 %v11897_v9, %v11962_v51  ;;  %v18024_v9 = vld [vmem:[#allocation66_spill] sm:$0xff] }
 0x26b   :  { %v12002_v17 = vpop.f32.mrf.mxu1  ;;  %v2913_v24 = vadd.f32 1.0, %v9249_v7  ;;  %9262 = vtanh.f32 %v11991_v31  ;;  %v3808_v60 = vadd.f32 %v11911_v42, %v11988_v46  ;;  %v1902_v20 = vadd.f32 %v11563_v16, %v8557_v27  ;;  %v18029_v42 = vld [vmem:[#allocation16_spill] sm:$0xff] }
 0x26c   :  { %18023 = vst [vmem:[#allocation104_spill] sm:$0xff] %v11996_v32  ;;  %v12007_v55 = vmul.f32 0.5, %v1891_v63  ;;  %v1893_v35 = vpop.f32.mrf.mxu0  ;;  %v9251_v26 = vpop.eup %9250  ;;  %v18026_v61 = vpack.c.bf16 %v18024_v9, %v18025_v29  ;;  %v12018_v48 = vmul.f32 %v2915_v34, %v11887_v38  ;;  %v3810_v63 = vadd.f32 %v11928_v21, %v11962_v51 }
 0x26d   :  { %v12012_v53 = vpop.f32.mrf.mxu1  ;;  %v2916_v7 = vadd.f32 1.0, %v9251_v26  ;;  %v1894_v39 = vadd.f32 %v11563_v16, %v1893_v35  ;;  %v18030_v18 = vpack.c.bf16 %v18028_v41, %v18029_v42  ;;  %v12027_v56 = vmul.f32 0.5, %v3806_v22 }
 0x26e   :  { %4064 = vmatmul.mubr.bf16.gmra.mxu1 %v18026_v61  ;;  %18027 = vst [vmem:[#allocation66_spill] sm:$0xff] %v12018_v48  ;;  %v8560_v32 = vpop.f32.mrf.mxu0  ;;  %v9253_v27 = vpop.eup %9252  ;;  %9264 = vtanh.f32 %v12007_v55  ;;  %v12030_v61 = vmul.f32 0.5, %v1902_v20  ;;  %v12036_v21 = vmul.f32 %v2913_v24, %v11894_v5  ;;  %v12043_v35 = vmul.f32 0.5, %v3808_v60 }
 0x26f   :  { %3564 = vmatmul.mubr.bf16.gmra.mxu0 %v18030_v18  ;;  %4073 = vmatprep.mubr.bf16.mxu1 %v17973_v11  ;;  %v12032_v38 = vpop.f32.mrf.mxu1  ;;  %v12039_v29 = vmul.f32 %v2916_v7, %v11906_v37  ;;  %v2914_v18 = vadd.f32 1.0, %v9253_v27  ;;  %v12041_v41 = vmul.f32 0.5, %v1894_v39  ;;  %v12053_v24 = vmul.f32 0.5, %v3810_v63 }
 0x270   :  { %3573 = vmatprep.mubr.bf16.mxu0 %v17973_v11  ;;  %18031 = vst [vmem:[#allocation65_spill] sm:$0xff] %v12036_v21  ;;  %v1906_v34 = vpop.f32.mrf.mxu0  ;;  %9266 = vtanh.f32 %v12030_v61  ;;  %v1915_v39 = vadd.f32 %v11563_v16, %v8560_v32  ;;  %v18034_v20 = vpack.c.bf16 %v11476_v49, %v11469_v54  ;;  %v18036_v21 = vld [vmem:[#allocation20_spill] sm:$0xff] }
 0x271   :  { %18032 = vst [vmem:[#allocation17_spill] sm:$0xff] %v12039_v29  ;;  %v9255_v22 = vpop.eup %9254  ;;  %v12046_v26 = vpop.f32.mrf.mxu1  ;;  %v12051_v5 = vmul.f32 %v2914_v18, %v11925_v19  ;;  %9268 = vtanh.f32 %v12041_v41  ;;  %v3812_v19 = vadd.f32 %v11945_v15, %v11988_v46  ;;  %v18035_v29 = vld [vmem:[#allocation22_spill] sm:$0xff] }
 0x272   :  { %v8561_v37 = vpop.f32.mrf.mxu0  ;;  %v2919_v9 = vadd.f32 1.0, %v9255_v22  ;;  %9270 = vtanh.f32 %v12027_v56  ;;  %v12065_v18 = vmul.f32 0.5, %v1915_v39  ;;  %v1907_v22 = vadd.f32 %v11563_v16, %v1906_v34 }
 0x273   :  { %18033 = vst [vmem:[#allocation16_spill] sm:$0xff] %v12051_v5  ;;  %v12057_v60 = vpop.f32.mrf.mxu1  ;;  %v9257_v7 = vpop.eup %9256  ;;  %9272 = vtanh.f32 %v12043_v35  ;;  %v1918_v42 = vadd.f32 %v11563_v16, %v8561_v37  ;;  %v18037_v5 = vpack.c.bf16 %v18035_v29, %v18036_v21  ;;  %v12091_v21 = vmul.f32 0.5, %v3812_v19 }
 0x274   :  { %v1909_v27 = vpop.f32.mrf.mxu0  ;;  %v2917_v63 = vadd.f32 1.0, %v9257_v7  ;;  %9274 = vtanh.f32 %v12053_v24  ;;  %v12080_v34 = vmul.f32 %v2919_v9, %v11937_v47  ;;  %v12083_v54 = vmul.f32 0.5, %v1907_v22 }
 0x275   :  { %v12068_v32 = vpop.f32.mrf.mxu1  ;;  %v9259_v48 = vpop.eup %9258  ;;  %9276 = vtanh.f32 %v12065_v18  ;;  %v12099_v37 = vmul.f32 0.5, %v1918_v42 }
 0x276   :  { %4074 = vmatmul.mubr.bf16.gmra.mxu1 %v18034_v20  ;;  %v8564_v15 = vpop.f32.mrf.mxu0  ;;  %v9261_v39 = vpop.eup %9260  ;;  %18038 = vst [vmem:[#allocation22_spill] sm:$0xff] %v12080_v34  ;;  %v2920_v7 = vadd.f32 1.0, %v9259_v48  ;;  %v12089_v16 = vmul.f32 %v2917_v63, %v11952_v40  ;;  %v3816_v20 = vadd.f32 %v11955_v0, %v11962_v51  ;;  %9278 = vtanh.f32 %v12083_v54  ;;  %v12112_v0 = vld [vmem:[%s17709_s2] ss:$0 sm:$0xff] }
 0x277   :  { %3574 = vmatmul.mubr.bf16.gmra.mxu0 %v18037_v5  ;;  %4083 = vmatprep.mubr.bf16.mxu1 %v17973_v11  ;;  %v12085_v49 = vpop.f32.mrf.mxu1  ;;  %v2918_v29 = vadd.f32 1.0, %v9261_v39  ;;  %9280 = vtanh.f32 %v12099_v37 }
 0x278   :  { %3583 = vmatprep.mubr.bf16.mxu0 %v17973_v11  ;;  %18039 = vst [vmem:[#allocation20_spill] sm:$0xff] %v12089_v16  ;;  %v1922_v47 = vpop.f32.mrf.mxu0  ;;  %v9263_v5 = vpop.eup %9262  ;;  %v12096_v48 = vmul.f32 %v2920_v7, %v11973_v23  ;;  %v1910_v23 = vadd.f32 %v12112_v0, %v1909_v27  ;;  %9282 = vtanh.f32 %v12091_v21  ;;  %v12120_v7 = vmul.f32 0.5, %v3816_v20  ;;  %v18043_v16 = vld [vmem:[#allocation21_spill] sm:$0xff] }
 0x279   :  { %v12101_v9 = vpop.f32.mrf.mxu1  ;;  %v12104_v40 = vmul.f32 %v2918_v29, %v11982_v12  ;;  %v2923_v22 = vadd.f32 1.0, %v9263_v5  ;;  %v3818_v29 = vadd.f32 %v11976_v8, %v11988_v46  ;;  %v3820_v20 = vadd.f32 %v11993_v45, %v11962_v51 }
 0x27a   :  { %18040 = vst [vmem:[#allocation105_spill] sm:$0xff] %v12096_v48  ;;  %v8565_v19 = vpop.f32.mrf.mxu0  ;;  %v12124_v34 = vmul.f32 0.5, %v1910_v23  ;;  %v1931_v48 = vadd.f32 %v12112_v0, %v8564_v15  ;;  %v3822_v12 = vadd.f32 %v12002_v17, %v11988_v46  ;;  %v3826_v45 = vadd.f32 %v12012_v53, %v11962_v51 }
 0x27b   :  { %18041 = vst [vmem:[#allocation106_spill] sm:$0xff] %v12104_v40  ;;  %v12115_v42 = vpop.f32.mrf.mxu1  ;;  %v9265_v39 = vpop.eup %9264  ;;  %v12141_v15 = vmul.f32 %v2923_v22, %v11991_v31  ;;  %v12165_v13 = vmul.f32 0.5, %v3820_v20 }
 0x27c   :  { %v1925_v5 = vpop.f32.mrf.mxu0  ;;  %v2921_v63 = vadd.f32 1.0, %v9265_v39  ;;  %v18044_v39 = vld [vmem:[#allocation19_spill] sm:$0xff]  ;;  %9284 = vtanh.f32 %v12124_v34  ;;  %v12152_v17 = vmul.f32 0.5, %v1931_v48  ;;  %v12167_v53 = vmul.f32 0.5, %v3822_v12 }
 0x27d   :  { %v12127_v27 = vpop.f32.mrf.mxu1  ;;  %v9267_v14 = vpop.eup %9266  ;;  %v18045_v23 = vpack.c.bf16 %v18043_v16, %v18044_v39  ;;  %18046 = vst [vmem:[#allocation21_spill] sm:$0xff] %v12141_v15  ;;  %9286 = vtanh.f32 %v12120_v7  ;;  %v12182_v12 = vmul.f32 0.5, %v3826_v45 }
 0x27e   :  { %4084 = vmatmul.mubr.bf16.gmra.mxu1 %v18042_v44  ;;  %v8568_v8 = vpop.f32.mrf.mxu0  ;;  %v2924_v40 = vadd.f32 1.0, %v9267_v14  ;;  %v9269_v62 = vpop.eup %9268  ;;  %v12148_v44 = vmul.f32 0.5, %v3818_v29  ;;  %v12157_v14 = vmul.f32 %v2921_v63, %v12007_v55  ;;  %18051 = vst [vmem:[#allocation110_spill] sm:$0xff] %v12167_v53  ;;  %9288 = vtanh.f32 %v12152_v17  ;;  %v18055_v55 = vld [vmem:[#allocation68_spill] sm:$0xff] }
 0x27f   :  { %3584 = vmatmul.mubr.bf16.gmra.mxu0 %v18045_v23  ;;  %4093 = vmatprep.mubr.bf16.mxu1 %v17973_v11  ;;  %v12144_v10 = vpop.f32.mrf.mxu1  ;;  %v9271_v31 = vpop.eup %9270  ;;  %v2922_v39 = vadd.f32 1.0, %v9269_v62  ;;  %v1923_v23 = vadd.f32 %v12112_v0, %v1922_v47  ;;  %v3828_v47 = vadd.f32 %v12032_v38, %v11988_v46  ;;  %18054 = vst [vmem:[#allocation113_spill] sm:$0xff] %v12182_v12 }
 0x280   :  { %18047 = vst [vmem:[#allocation19_spill] sm:$0xff] %v12144_v10  ;;  %3593 = vmatprep.mubr.bf16.mxu0 %v17973_v11  ;;  %v12154_v16 = vpop.f32.mrf.mxu0  ;;  %18048 = vst [vmem:[#allocation107_spill] sm:$0xff] %v12157_v14  ;;  %v12160_v22 = vmul.f32 %v2924_v40, %v12030_v61  ;;  %v9273_v29 = vpop.eup %9272  ;;  %9290 = vtanh.f32 %v12148_v44  ;;  %v1934_v62 = vadd.f32 %v12112_v0, %v8565_v19  ;;  %v18058_v14 = vld [vmem:[#allocation25_spill] sm:$0xff] }
 0x281   :  { %v12163_v10 = vpop.f32.mrf.mxu1  ;;  %v9275_v50 = vpop.eup %9274  ;;  %v12173_v61 = vmul.f32 %v2922_v39, %v12041_v41  ;;  %v12177_v40 = vmul.f32 0.5, %v1923_v23  ;;  %v1926_v38 = vadd.f32 %v12112_v0, %v1925_v5  ;;  %v18056_v15 = vpack.c.bf16 %v11525_v58, %v18055_v55  ;;  %v18057_v41 = vld [vmem:[#allocation26_spill] sm:$0xff] }
 0x282   :  { %18049 = vst [vmem:[#allocation108_spill] sm:$0xff] %v12160_v22  ;;  %18050 = vst [vmem:[#allocation109_spill] sm:$0xff] %v12163_v10  ;;  %v8569_v48 = vpop.f32.mrf.mxu0  ;;  %v9277_v20 = vpop.eup %9276  ;;  %v5946_v22 = vadd.f32 1.0, %v9271_v31  ;;  %v3830_v19 = vadd.f32 %v12046_v26, %v11962_v51  ;;  %v18059_v5 = vpack.c.bf16 %v18057_v41, %v18058_v14  ;;  %v12208_v58 = vmul.f32 0.5, %v3828_v47 }
 0x283   :  { %18052 = vst [vmem:[#allocation111_spill] sm:$0xff] %v12173_v61  ;;  %v12179_v63 = vpop.f32.mrf.mxu1  ;;  %v2927_v39 = vadd.f32 1.0, %v9277_v20  ;;  %9292 = vtanh.f32 %v12177_v40  ;;  %v9279_v45 = vpop.eup %9278  ;;  %v5947_v61 = vadd.f32 1.0, %v9273_v29  ;;  %v5948_v55 = vadd.f32 1.0, %v9275_v50 }
 0x284   :  { %18053 = vst [vmem:[#allocation112_spill] sm:$0xff] %v12179_v63  ;;  %v12185_v10 = vpop.f32.mrf.mxu0  ;;  %9294 = vtanh.f32 %v12165_v13  ;;  %v12199_v63 = vmul.f32 0.5, %v1934_v62  ;;  %18060 = vst [vmem:[#allocation68_spill] sm:$0xff] %v12208_v58  ;;  %v9281_v26 = vpop.eup %9280  ;;  %v3832_v62 = vadd.f32 %v12057_v60, %v11988_v46  ;;  %v1947_v14 = vadd.f32 %v12112_v0, %v8568_v8 }
 0x285   :  { %v12191_v23 = vpop.f32.mrf.mxu1  ;;  %9296 = vtanh.f32 %v12167_v53  ;;  %v9283_v41 = vpop.eup %9282  ;;  %v12223_v47 = vmul.f32 %v2927_v39, %v12065_v18  ;;  %v12227_v50 = vmul.f32 0.5, %v3830_v19  ;;  %v3836_v60 = vadd.f32 %v12068_v32, %v11962_v51 }
 0x286   :  { %4094 = vmatmul.mubr.bf16.gmra.mxu1 %v18056_v15  ;;  %v12201_v20 = vpop.f32.mrf.mxu0  ;;  %v12210_v15 = vmul.f32 0.5, %v1926_v38  ;;  %9298 = vtanh.f32 %v12199_v63  ;;  %v2925_v38 = vadd.f32 1.0, %v9279_v45  ;;  %v12232_v8 = vmul.f32 0.5, %v1947_v14 }
 0x287   :  { %3594 = vmatmul.mubr.bf16.gmra.mxu0 %v18059_v5  ;;  %4103 = vmatprep.mubr.bf16.mxu1 %v17973_v11  ;;  %v12212_v31 = vpop.f32.mrf.mxu1  ;;  %9300 = vtanh.f32 %v12182_v12  ;;  %18061 = vst [vmem:[#allocation26_spill] sm:$0xff] %v12223_v47  ;;  %v2928_v5 = vadd.f32 1.0, %v9281_v26  ;;  %18062 = vst [vmem:[#allocation25_spill] sm:$0xff] %v12227_v50  ;;  %v3838_v39 = vadd.f32 %v12085_v49, %v11988_v46  ;;  %v5949_v26 = vadd.f32 1.0, %v9283_v41  ;;  %v18067_v41 = vld [vmem:[#allocation67_spill] sm:$0xff] }
 0x288   :  { %3603 = vmatprep.mubr.bf16.mxu0 %v17973_v11  ;;  %v12219_v29 = vpop.f32.mrf.mxu0  ;;  %9302 = vtanh.f32 %v12210_v15  ;;  %v1939_v45 = vadd.f32 %v12112_v0, %v12154_v16  ;;  %v12246_v12 = vmul.f32 0.5, %v3832_v62  ;;  %v1950_v14 = vadd.f32 %v12112_v0, %v8569_v48  ;;  %v18066_v62 = vld [vmem:[#allocation69_spill] sm:$0xff] }
 0x289   :  { %v12225_v53 = vpop.f32.mrf.mxu1  ;;  %9304 = vtanh.f32 %v12208_v58  ;;  %v12238_v18 = vmul.f32 %v2928_v5, %v12099_v37  ;;  %v9285_v32 = vpop.eup %9284  ;;  %v12253_v5 = vmul.f32 %v2925_v38, %v12083_v54  ;;  %v18068_v43 = vpack.c.bf16 %v18066_v62, %v18067_v41 }
 0x28a   :  { %v12234_v52 = vpop.f32.mrf.mxu0  ;;  %18064 = vst [vmem:[#allocation115_spill] sm:$0xff] %v12246_v12  ;;  %9306 = vtanh.f32 %v12232_v8  ;;  %v9287_v37 = vpop.eup %9286  ;;  %v2926_v16 = vadd.f32 1.0, %v9285_v32  ;;  %v12257_v4 = vmul.f32 0.5, %v1939_v45  ;;  %v12265_v48 = vmul.f32 %v5946_v22, %v12027_v56  ;;  %v18071_v32 = vld [vmem:[#allocation24_spill] sm:$0xff]  ;;  %v18072_v45 = vld [vmem:[#allocation23_spill] sm:$0xff] }
 0x28b   :  { %18063 = vst [vmem:[#allocation114_spill] sm:$0xff] %v12238_v18  ;;  %v12244_v19 = vpop.f32.mrf.mxu1  ;;  %18065 = vst [vmem:[#allocation116_spill] sm:$0xff] %v12253_v5  ;;  %9308 = vtanh.f32 %v12227_v50  ;;  %v12268_v3 = vmul.f32 0.5, %v3836_v60  ;;  %v12270_v54 = vmul.f32 0.5, %v1950_v14  ;;  %v18073_v49 = vpack.c.bf16 %v18071_v32, %v18072_v45  ;;  %v9289_v47 = vpop.eup %9288 }
 0x28c   :  { %v12250_v58 = vpop.f32.mrf.mxu0  ;;  %18069 = vst [vmem:[#allocation69_spill] sm:$0xff] %v12265_v48  ;;  %v12281_v56 = vmul.f32 0.5, %v3838_v39  ;;  %9310 = vtanh.f32 %v12257_v4  ;;  %v1942_v22 = vadd.f32 %v12112_v0, %v12185_v10  ;;  %v12290_v14 = vmul.f32 %v5947_v61, %v12043_v35 }
 0x28d   :  { %v12259_v57 = vpop.f32.mrf.mxu1  ;;  %18070 = vst [vmem:[#allocation67_spill] sm:$0xff] %v12268_v3  ;;  %9312 = vtanh.f32 %v12246_v12  ;;  %v12301_v10 = vmul.f32 %v5949_v26, %v12091_v21  ;;  %v3840_v35 = vadd.f32 %v12101_v9, %v11962_v51  ;;  %v1963_v9 = vadd.f32 %v12112_v0, %v12201_v20 }
 0x28e   :  { %4104 = vmatmul.mubr.bf16.gmra.mxu1 %v18068_v43  ;;  %v12272_v38 = vpop.f32.mrf.mxu0  ;;  %v12279_v43 = vmul.f32 %v2926_v16, %v12124_v34  ;;  %18075 = vst [vmem:[#allocation23_spill] sm:$0xff] %v12281_v56  ;;  %18076 = vst [vmem:[#allocation117_spill] sm:$0xff] %v12290_v14  ;;  %v3856_v34 = vadd.f32 %v12191_v23, %v11962_v51  ;;  %v9291_v16 = vpop.eup %9290  ;;  %9314 = vtanh.f32 %v12270_v54  ;;  %v2931_v23 = vadd.f32 1.0, %v9289_v47 }
 0x28f   :  { %3604 = vmatmul.mubr.bf16.gmra.mxu0 %v18073_v49  ;;  %4113 = vmatprep.mubr.bf16.mxu1 %v17973_v11  ;;  %v12286_v60 = vpop.f32.mrf.mxu1  ;;  %v12293_v49 = vmul.f32 %v5948_v55, %v12053_v24  ;;  %18078 = vst [vmem:[#allocation119_spill] sm:$0xff] %v12301_v10  ;;  %9316 = vtanh.f32 %v12268_v3  ;;  %v12311_v55 = vmul.f32 0.5, %v1942_v22  ;;  %v3858_v45 = vadd.f32 %v12212_v31, %v11988_v46  ;;  %v18100_v3 = vld [vmem:[#allocation27_spill] sm:$0xff] }
 0x290   :  { %18074 = vst [vmem:[#allocation24_spill] sm:$0xff] %v12279_v43  ;;  %3613 = vmatprep.mubr.bf16.mxu0 %v17973_v11  ;;  %v12298_v39 = vpop.f32.mrf.mxu0  ;;  %v9293_v61 = vpop.eup %9292  ;;  %v12313_v41 = vmul.f32 0.5, %v3856_v34  ;;  %9318 = vtanh.f32 %v12281_v56  ;;  %v5950_v47 = vadd.f32 1.0, %v9287_v37  ;;  %v1955_v22 = vadd.f32 %v12112_v0, %v12219_v29  ;;  %v18085_v43 = vld [vmem:[#allocation29_spill] sm:$0xff] }
 0x291   :  { %18077 = vst [vmem:[#allocation118_spill] sm:$0xff] %v12293_v49  ;;  %v12308_v24 = vpop.f32.mrf.mxu1  ;;  %v9295_v26 = vpop.eup %9294  ;;  %v2929_v32 = vadd.f32 1.0, %v9293_v61  ;;  %9320 = vtanh.f32 %v12311_v55  ;;  %v3860_v34 = vadd.f32 %v12225_v53, %v11962_v51  ;;  %v12333_v20 = vmul.f32 0.5, %v3840_v35 }
 0x292   :  { %v12315_v21 = vpop.f32.mrf.mxu0  ;;  %v12324_v10 = vpop.eup %9296  ;;  %9322 = vtanh.f32 %v12313_v41  ;;  %v12336_v31 = vmul.f32 0.5, %v1963_v9  ;;  %v12338_v49 = vmul.f32 0.5, %v3858_v45  ;;  %v18081_v48 = vpack.c.bf16 %v11577_v1, %v11567_v59  ;;  %v18084_v45 = vld [vmem:[#allocation30_spill] sm:$0xff] }
 0x293   :  { %v12322_v62 = vpop.f32.mrf.mxu1  ;;  %18079 = vst [vmem:[#allocation120_spill] sm:$0xff] %v12324_v10  ;;  %v9299_v14 = vpop.eup %9298  ;;  %18080 = vst [vmem:[#allocation121_spill] sm:$0xff] %v12333_v20  ;;  %v12348_v53 = vmul.f32 %v2931_v23, %v12152_v17  ;;  %v12350_v35 = vmul.f32 0.5, %v1955_v22  ;;  %v12352_v5 = vmul.f32 0.5, %v3860_v34  ;;  %v18086_v56 = vpack.c.bf16 %v18084_v45, %v18085_v43 }
 0x294   :  { %v12331_v61 = vpop.f32.mrf.mxu0  ;;  %v12345_v29 = vpop.eup %9300  ;;  %v2932_v18 = vadd.f32 1.0, %v9299_v14  ;;  %v12361_v1 = vmul.f32 %v2929_v32, %v12177_v40  ;;  %9324 = vtanh.f32 %v12336_v31  ;;  %v1966_v17 = vadd.f32 %v12112_v0, %v12234_v52 }
 0x295   :  { %v12340_v37 = vpop.f32.mrf.mxu1  ;;  %18082 = vst [vmem:[#allocation122_spill] sm:$0xff] %v12345_v29  ;;  %18083 = vst [vmem:[#allocation123_spill] sm:$0xff] %v12348_v53  ;;  %v9303_v59 = vpop.eup %9302  ;;  %9326 = vtanh.f32 %v12338_v49  ;;  %v1958_v40 = vadd.f32 %v12112_v0, %v12250_v58  ;;  %v5951_v22 = vadd.f32 1.0, %v9291_v16  ;;  %v1979_v53 = vadd.f32 %v12112_v0, %v12272_v38  ;;  %v18099_v38 = vld [vmem:[#allocation28_spill] sm:$0xff] }
 0x296   :  { %4114 = vmatmul.mubr.bf16.gmra.mxu1 %v18081_v48  ;;  %v12354_v9 = vpop.f32.mrf.mxu0  ;;  %18087 = vst [vmem:[#allocation30_spill] sm:$0xff] %v12361_v1  ;;  %v3862_v48 = vadd.f32 %v12244_v19, %v11988_v46  ;;  %v12371_v43 = vpop.eup %9304  ;;  %v2930_v23 = vadd.f32 1.0, %v9303_v59  ;;  %v12382_v19 = vmul.f32 %v5950_v47, %v12120_v7  ;;  %9328 = vtanh.f32 %v12350_v35  ;;  %v18096_v1 = vld [vmem:[#allocation70_spill] sm:$0xff] }
 0x297   :  { %3614 = vmatmul.mubr.bf16.gmra.mxu0 %v18086_v56  ;;  %4123 = vmatprep.mubr.bf16.mxu1 %v17973_v11  ;;  %v12368_v14 = vpop.f32.mrf.mxu1  ;;  %18088 = vst [vmem:[#allocation29_spill] sm:$0xff] %v12371_v43  ;;  %v12374_v56 = vmul.f32 %v2932_v18, %v12199_v63  ;;  %v9307_v52 = vpop.eup %9306  ;;  %v12385_v34 = vmul.f32 0.5, %v1966_v17  ;;  %v5952_v63 = vadd.f32 1.0, %v9295_v26  ;;  %9330 = vtanh.f32 %v12352_v5 }
 0x298   :  { %3623 = vmatprep.mubr.bf16.mxu0 %v17973_v11  ;;  %v12379_v32 = vpop.f32.mrf.mxu0  ;;  %18090 = vst [vmem:[#allocation125_spill] sm:$0xff] %v12382_v19  ;;  %v12392_v59 = vmul.f32 %v2930_v23, %v12210_v15  ;;  %v12397_v7 = vpop.eup %9308  ;;  %v2935_v16 = vadd.f32 1.0, %v9307_v52  ;;  %v12400_v47 = vmul.f32 0.5, %v3862_v48  ;;  %v12402_v17 = vmul.f32 0.5, %v1958_v40  ;;  %v18095_v23 = vld [vmem:[#allocation71_spill] sm:$0xff] }
 0x299   :  { %18089 = vst [vmem:[#allocation124_spill] sm:$0xff] %v12374_v56  ;;  %v12387_v45 = vpop.f32.mrf.mxu1  ;;  %18092 = vst [vmem:[#allocation127_spill] sm:$0xff] %v12397_v7  ;;  %9332 = vtanh.f32 %v12385_v34  ;;  %v9311_v19 = vpop.eup %9310  ;;  %v3842_v15 = vadd.f32 %v12115_v42, %v11988_v46  ;;  %v3866_v52 = vadd.f32 %v12259_v57, %v11962_v51  ;;  %v12418_v40 = vmul.f32 %v5951_v22, %v12148_v44 }
 0x29a   :  { %18091 = vst [vmem:[#allocation126_spill] sm:$0xff] %v12392_v59  ;;  %v12395_v58 = vpop.f32.mrf.mxu0  ;;  %9334 = vtanh.f32 %v12333_v20  ;;  %v12415_v48 = vpop.eup %9312  ;;  %v3868_v42 = vadd.f32 %v12286_v60, %v11988_v46  ;;  %v18097_v57 = vpack.c.bf16 %v18095_v23, %v18096_v1  ;;  %v12431_v20 = vmul.f32 %v5952_v63, %v12165_v13 }
 0x29b   :  { %v12404_v26 = vpop.f32.mrf.mxu1  ;;  %18093 = vst [vmem:[#allocation128_spill] sm:$0xff] %v12415_v48  ;;  %18094 = vst [vmem:[#allocation129_spill] sm:$0xff] %v12418_v40  ;;  %9336 = vtanh.f32 %v12400_v47  ;;  %v9315_v59 = vpop.eup %9314  ;;  %v2933_v44 = vadd.f32 1.0, %v9311_v19  ;;  %v12434_v22 = vmul.f32 0.5, %v3866_v52  ;;  %v18101_v60 = vpack.c.bf16 %v18099_v38, %v18100_v3 }
 0x29c   :  { %v12413_v18 = vpop.f32.mrf.mxu0  ;;  %18098 = vst [vmem:[#allocation71_spill] sm:$0xff] %v12431_v20  ;;  %9338 = vtanh.f32 %v12402_v17  ;;  %v12442_v12 = vpop.eup %9316  ;;  %v12445_v1 = vmul.f32 %v2935_v16, %v12232_v8  ;;  %v2936_v13 = vadd.f32 1.0, %v9315_v59  ;;  %v12447_v63 = vmul.f32 0.5, %v1979_v53 }
 0x29d   :  { %v12425_v56 = vpop.f32.mrf.mxu1  ;;  %18102 = vst [vmem:[#allocation70_spill] sm:$0xff] %v12442_v12  ;;  %v12449_v19 = vmul.f32 0.5, %v3868_v42  ;;  %v12454_v52 = vpop.eup %9318  ;;  %v12456_v3 = vmul.f32 0.5, %v3842_v15  ;;  %9340 = vtanh.f32 %v12434_v22  ;;  %v1971_v8 = vadd.f32 %v12112_v0, %v12298_v39 }
 0x29e   :  { %4124 = vmatmul.mubr.bf16.gmra.mxu1 %v18097_v57  ;;  %v12436_v40 = vpop.f32.mrf.mxu0  ;;  %18103 = vst [vmem:[#allocation28_spill] sm:$0xff] %v12445_v1  ;;  %18104 = vst [vmem:[#allocation27_spill] sm:$0xff] %v12454_v52  ;;  %v12460_v57 = vadd.f32 %v12127_v27, %v11962_v51  ;;  %v9321_v59 = vpop.eup %9320  ;;  %v12468_v16 = vmul.f32 %v2936_v13, %v12270_v54  ;;  %9342 = vtanh.f32 %v12447_v63 }
 0x29f   :  { %3624 = vmatmul.mubr.bf16.gmra.mxu0 %v18101_v60  ;;  %4133 = vmatprep.mubr.bf16.mxu1 %v17973_v11  ;;  %v12451_v23 = vpop.f32.mrf.mxu1  ;;  %18105 = vst [vmem:[#allocation130_spill] sm:$0xff] %v12456_v3  ;;  %v3870_v15 = vadd.f32 %v12308_v24, %v11962_v51  ;;  %v1982_v27 = vadd.f32 %v12112_v0, %v12315_v21  ;;  %v9323_v38 = vpop.eup %9322  ;;  %v2934_v39 = vadd.f32 1.0, %v9321_v59  ;;  %9344 = vtanh.f32 %v12449_v19 }
 0x2a0   :  { %3633 = vmatprep.mubr.bf16.mxu0 %v17973_v11  ;;  %18106 = vst [vmem:[#allocation131_spill] sm:$0xff] %v12460_v57  ;;  %v12465_v53 = vpop.f32.mrf.mxu0  ;;  %18107 = vst [vmem:[#allocation132_spill] sm:$0xff] %v12468_v16  ;;  %v12478_v60 = vmul.f32 %v2933_v44, %v12257_v4  ;;  %v12481_v20 = vmul.f32 0.5, %v1971_v8  ;;  %v5966_v24 = vadd.f32 1.0, %v9323_v38  ;;  %v3872_v44 = vadd.f32 %v12322_v62, %v11988_v46  ;;  %v18112_v16 = vld [vmem:[#allocation33_spill] sm:$0xff] }
 0x2a1   :  { %v12475_v42 = vpop.f32.mrf.mxu1  ;;  %v12487_v50 = vmul.f32 0.5, %v3870_v15  ;;  %v12489_v21 = vmul.f32 0.5, %v1982_v27  ;;  %v9325_v12 = vpop.eup %9324  ;;  %v12494_v4 = vmul.f32 %v2934_v39, %v12311_v55  ;;  %v1974_v8 = vadd.f32 %v12112_v0, %v12331_v61 }
 0x2a2   :  { %18108 = vst [vmem:[#allocation133_spill] sm:$0xff] %v12478_v60  ;;  %v12483_v54 = vpop.f32.mrf.mxu0  ;;  %9346 = vtanh.f32 %v12481_v20  ;;  %v9327_v15 = vpop.eup %9326  ;;  %v6478_v27 = vmul.f32 %v5966_v24, %v12313_v41  ;;  %v2939_v38 = vadd.f32 1.0, %v9325_v12  ;;  %v3876_v55 = vadd.f32 %v12340_v37, %v11962_v51  ;;  %v18111_v24 = vld [vmem:[#allocation34_spill] sm:$0xff] }
 0x2a3   :  { %v12491_v52 = vpop.f32.mrf.mxu1  ;;  %18109 = vst [vmem:[#allocation134_spill] sm:$0xff] %v12494_v4  ;;  %9348 = vtanh.f32 %v12487_v50  ;;  %v18110_v13 = vpack.c.bf16 %v11624_v25, %v11613_v33  ;;  %v9329_v62 = vpop.eup %9328  ;;  %v5967_v1 = vadd.f32 1.0, %v9327_v15  ;;  %v12515_v41 = vmul.f32 0.5, %v3872_v44 }
 0x2a4   :  { %v12501_v59 = vpop.f32.mrf.mxu0  ;;  %9350 = vtanh.f32 %v12489_v21  ;;  %v18113_v37 = vpack.c.bf16 %v18111_v24, %v18112_v16  ;;  %v9331_v48 = vpop.eup %9330  ;;  %v12524_v33 = vmul.f32 %v2939_v38, %v12336_v31  ;;  %v2937_v25 = vadd.f32 1.0, %v9329_v62 }
 0x2a5   :  { %v12507_v39 = vpop.f32.mrf.mxu1  ;;  %v12528_v15 = vmul.f32 0.5, %v3876_v55  ;;  %v6479_v60 = vmul.f32 %v5967_v1, %v12338_v49  ;;  %v5968_v16 = vadd.f32 1.0, %v9331_v48  ;;  %9352 = vtanh.f32 %v12515_v41 }
 0x2a6   :  { %4134 = vmatmul.mubr.bf16.gmra.mxu1 %v18110_v13  ;;  %v12517_v12 = vpop.f32.mrf.mxu0  ;;  %18114 = vst [vmem:[#allocation34_spill] sm:$0xff] %v12524_v33  ;;  %v12526_v13 = vmul.f32 0.5, %v1974_v8  ;;  %v9333_v44 = vpop.eup %9332  ;;  %v1995_v24 = vadd.f32 %v12112_v0, %v12354_v9  ;;  %v12542_v8 = vmul.f32 %v2937_v25, %v12350_v35  ;;  %v3878_v62 = vadd.f32 %v12368_v14, %v11988_v46 }
 0x2a7   :  { %3634 = vmatmul.mubr.bf16.gmra.mxu0 %v18113_v37  ;;  %4143 = vmatprep.mubr.bf16.mxu1 %v17973_v11  ;;  %v12530_v61 = vpop.f32.mrf.mxu1  ;;  %v12539_v38 = vpop.eup %9334  ;;  %v2940_v55 = vadd.f32 1.0, %v9333_v44  ;;  %v6480_v1 = vmul.f32 %v5968_v16, %v12352_v5  ;;  %v1987_v37 = vadd.f32 %v12112_v0, %v12379_v32 }
 0x2a8   :  { %3643 = vmatprep.mubr.bf16.mxu0 %v17973_v11  ;;  %v12537_v31 = vpop.f32.mrf.mxu0  ;;  %18115 = vst [vmem:[#allocation33_spill] sm:$0xff] %v12539_v38  ;;  %18116 = vst [vmem:[#allocation135_spill] sm:$0xff] %v12542_v8  ;;  %9354 = vtanh.f32 %v12526_v13  ;;  %v9337_v48 = vpop.eup %9336  ;;  %v12551_v9 = vmul.f32 0.5, %v1995_v24  ;;  %v12560_v14 = vmul.f32 0.5, %v3878_v62  ;;  %v3880_v38 = vadd.f32 %v12387_v45, %v11962_v51 }
 0x2a9   :  { %v12547_v49 = vpop.f32.mrf.mxu1  ;;  %9356 = vtanh.f32 %v12528_v15  ;;  %v9339_v25 = vpop.eup %9338  ;;  %v12558_v44 = vmul.f32 %v2940_v55, %v12385_v34  ;;  %v5969_v4 = vadd.f32 1.0, %v9337_v48  ;;  %v7012_v16 = vadd.f32 %v6480_v1, %v6478_v27  ;;  %v18118_v27 = vld [vmem:[#allocation73_spill] sm:$0xff]  ;;  %v18119_v48 = vld [vmem:[#allocation72_spill] sm:$0xff]  ;;  %v18123_v34 = vld [vmem:[#allocation31_spill] sm:$0xff] }
 0x2aa   :  { %v12555_v35 = vpop.f32.mrf.mxu0  ;;  %v2938_v24 = vadd.f32 1.0, %v9339_v25  ;;  %9358 = vtanh.f32 %v12551_v9  ;;  %v12567_v7 = vmul.f32 0.5, %v1987_v37  ;;  %v9341_v43 = vpop.eup %9340  ;;  %v12575_v62 = vmul.f32 0.5, %v3880_v38  ;;  %v18122_v38 = vld [vmem:[#allocation32_spill] sm:$0xff] }
 0x2ab   :  { %18117 = vst [vmem:[#allocation136_spill] sm:$0xff] %v12558_v44  ;;  %v12564_v5 = vpop.f32.mrf.mxu1  ;;  %v6481_v55 = vmul.f32 %v5969_v4, %v12400_v47  ;;  %9360 = vtanh.f32 %v12560_v14  ;;  %v18120_v1 = vpack.c.bf16 %v18118_v27, %v18119_v48  ;;  %v9343_v37 = vpop.eup %9342  ;;  %v5970_v29 = vadd.f32 1.0, %v9341_v43 }
 0x2ac   :  { %v12569_v32 = vpop.f32.mrf.mxu0  ;;  %v12583_v25 = vmul.f32 %v2938_v24, %v12402_v17  ;;  %9362 = vtanh.f32 %v12567_v7  ;;  %v1998_v47 = vadd.f32 %v12112_v0, %v12395_v58  ;;  %v18124_v33 = vpack.c.bf16 %v18122_v38, %v18123_v34  ;;  %v9345_v27 = vpop.eup %9344 }
 0x2ad   :  { %v12577_v45 = vpop.f32.mrf.mxu1  ;;  %v7049_v48 = vadd.f32 %v6481_v55, %v6479_v60  ;;  %9364 = vtanh.f32 %v12575_v62  ;;  %v3882_v43 = vadd.f32 %v12404_v26, %v11988_v46  ;;  %v6482_v24 = vmul.f32 %v5970_v29, %v12434_v22 }
 0x2ae   :  { %4144 = vmatmul.mubr.bf16.gmra.mxu1 %v18120_v1  ;;  %18121 = vst [vmem:[#allocation73_spill] sm:$0xff] %v12583_v25  ;;  %v12588_v4 = vpop.f32.mrf.mxu0  ;;  %v2943_v1 = vadd.f32 1.0, %v9343_v37  ;;  %v12603_v34 = vmul.f32 0.5, %v1998_v47  ;;  %v1990_v26 = vadd.f32 %v12112_v0, %v12413_v18  ;;  %v3886_v44 = vadd.f32 %v12425_v56, %v11962_v51 }
 0x2af   :  { %3644 = vmatmul.mubr.bf16.gmra.mxu0 %v18124_v33  ;;  %4153 = vmatprep.mubr.bf16.mxu1 %v17973_v11  ;;  %v12597_v17 = vpop.f32.mrf.mxu1  ;;  %v5971_v33 = vadd.f32 1.0, %v9345_v27  ;;  %v9347_v60 = vpop.eup %9346  ;;  %v12610_v37 = vmul.f32 0.5, %v3882_v43  ;;  %v7013_v22 = vadd.f32 %v7012_v16, %v6482_v24  ;;  %v2011_v24 = vadd.f32 %v12112_v0, %v12436_v40 }
 0x2b0   :  { %3653 = vmatprep.mubr.bf16.mxu0 %v17973_v11  ;;  %v12605_v38 = vpop.f32.mrf.mxu0  ;;  %v12608_v55 = vmul.f32 %v2943_v1, %v12447_v63  ;;  %v9349_v29 = vpop.eup %9348  ;;  %v2941_v27 = vadd.f32 1.0, %v9347_v60  ;;  %9366 = vtanh.f32 %v12603_v34  ;;  %v12623_v43 = vmul.f32 0.5, %v1990_v26 }
 0x2b1   :  { %v12616_v58 = vpop.f32.mrf.mxu1  ;;  %v6483_v47 = vmul.f32 %v5971_v33, %v12449_v19  ;;  %v9351_v63 = vpop.eup %9350  ;;  %v5972_v1 = vadd.f32 1.0, %v9349_v29  ;;  %9368 = vtanh.f32 %v12610_v37  ;;  %v12625_v18 = vmul.f32 0.5, %v3886_v44 }
 0x2b2   :  { %18125 = vst [vmem:[#allocation72_spill] sm:$0xff] %v12608_v55  ;;  %v12620_v8 = vpop.f32.mrf.mxu0  ;;  %v12630_v16 = vmul.f32 %v2941_v27, %v12481_v20  ;;  %v2944_v19 = vadd.f32 1.0, %v9351_v63  ;;  %v9353_v60 = vpop.eup %9352  ;;  %9370 = vtanh.f32 %v12623_v43  ;;  %v3888_v44 = vadd.f32 %v12451_v23, %v11988_v46  ;;  %v18129_v23 = vld [vmem:[#allocation38_spill] sm:$0xff] }
 0x2b3   :  { %v12627_v56 = vpop.f32.mrf.mxu1  ;;  %v7050_v25 = vadd.f32 %v7049_v48, %v6483_v47  ;;  %v6484_v29 = vmul.f32 %v5972_v1, %v12487_v50  ;;  %v2003_v48 = vadd.f32 %v12112_v0, %v12465_v53  ;;  %v18127_v20 = vpack.c.bf16 %v11660_v2, %v11645_v30  ;;  %v18130_v1 = vld [vmem:[#allocation37_spill] sm:$0xff] }
 0x2b4   :  { %18126 = vst [vmem:[#allocation32_spill] sm:$0xff] %v12630_v16  ;;  %v12634_v33 = vpop.f32.mrf.mxu0  ;;  %v12648_v47 = vmul.f32 %v2944_v19, %v12489_v21  ;;  %v5973_v27 = vadd.f32 1.0, %v9353_v60  ;;  %9372 = vtanh.f32 %v12625_v18  ;;  %v12651_v50 = vmul.f32 0.5, %v2011_v24 }
 0x2b5   :  { %v12642_v26 = vpop.f32.mrf.mxu1  ;;  %v9355_v40 = vpop.eup %9354  ;;  %v18131_v53 = vpack.c.bf16 %v18129_v23, %v18130_v1  ;;  %v7014_v30 = vadd.f32 %v7013_v22, %v6484_v29  ;;  %v12661_v21 = vmul.f32 0.5, %v2003_v48  ;;  %v2014_v48 = vadd.f32 %v12112_v0, %v12483_v54 }
 0x2b6   :  { %4154 = vmatmul.mubr.bf16.gmra.mxu1 %v18127_v20  ;;  %18128 = vst [vmem:[#allocation31_spill] sm:$0xff] %v12648_v47  ;;  %v12653_v63 = vpop.f32.mrf.mxu0  ;;  %v9357_v10 = vpop.eup %9356  ;;  %v2942_v2 = vadd.f32 1.0, %v9355_v40  ;;  %v12659_v20 = vmul.f32 0.5, %v3888_v44  ;;  %v6485_v60 = vmul.f32 %v5973_v27, %v12515_v41  ;;  %9374 = vtanh.f32 %v12651_v50 }
 0x2b7   :  { %3654 = vmatmul.mubr.bf16.gmra.mxu0 %v18131_v53  ;;  %4163 = vmatprep.mubr.bf16.mxu1 %v17973_v11  ;;  %v12663_v19 = vpop.f32.mrf.mxu1  ;;  %v5974_v23 = vadd.f32 1.0, %v9357_v10  ;;  %v9359_v22 = vpop.eup %9358  ;;  %v3890_v44 = vadd.f32 %v12475_v42, %v11962_v51  ;;  %v12690_v47 = vmul.f32 0.5, %v2014_v48 }
 0x2b8   :  { %3663 = vmatprep.mubr.bf16.mxu0 %v17973_v11  ;;  %v12670_v1 = vpop.f32.mrf.mxu0  ;;  %v12673_v29 = vmul.f32 %v2942_v2, %v12526_v13  ;;  %9376 = vtanh.f32 %v12659_v20  ;;  %v9361_v41 = vpop.eup %9360  ;;  %v7051_v10 = vadd.f32 %v7050_v25, %v6485_v60  ;;  %v2947_v53 = vadd.f32 1.0, %v9359_v22 }
 0x2b9   :  { %v12680_v40 = vpop.f32.mrf.mxu1  ;;  %v6486_v27 = vmul.f32 %v5974_v23, %v12528_v15  ;;  %9378 = vtanh.f32 %v12661_v21  ;;  %v9363_v13 = vpop.eup %9362  ;;  %v5975_v55 = vadd.f32 1.0, %v9361_v41  ;;  %v12688_v42 = vmul.f32 0.5, %v3890_v44 }
 0x2ba   :  { %18132 = vst [vmem:[#allocation38_spill] sm:$0xff] %v12673_v29  ;;  %v12684_v24 = vpop.f32.mrf.mxu0  ;;  %v9365_v3 = vpop.eup %9364  ;;  %v12695_v15 = vmul.f32 %v2947_v53, %v12551_v9  ;;  %v2945_v60 = vadd.f32 1.0, %v9363_v13  ;;  %v3892_v23 = vadd.f32 %v12491_v52, %v11988_v46  ;;  %v2006_v44 = vadd.f32 %v12112_v0, %v12501_v59  ;;  %v18139_v59 = vld [vmem:[#allocation35_spill] sm:$0xff] }
 0x2bb   :  { %v12692_v54 = vpop.f32.mrf.mxu1  ;;  %v7015_v25 = vadd.f32 %v7014_v30, %v6486_v27  ;;  %v6487_v2 = vmul.f32 %v5975_v55, %v12560_v14  ;;  %v5976_v41 = vadd.f32 1.0, %v9365_v3  ;;  %9380 = vtanh.f32 %v12688_v42  ;;  %v18134_v30 = vld [vmem:[#allocation75_spill] sm:$0xff]  ;;  %v18135_v27 = vld [vmem:[#allocation74_spill] sm:$0xff]  ;;  %v18138_v55 = vld [vmem:[#allocation36_spill] sm:$0xff] }
 0x2bc   :  { %18133 = vst [vmem:[#allocation37_spill] sm:$0xff] %v12695_v15  ;;  %v12699_v22 = vpop.f32.mrf.mxu0  ;;  %v18136_v9 = vpack.c.bf16 %v18134_v30, %v18135_v27  ;;  %v12711_v53 = vmul.f32 %v2945_v60, %v12567_v7  ;;  %9382 = vtanh.f32 %v12690_v47  ;;  %v12714_v52 = vmul.f32 0.5, %v3892_v23 }
 0x2bd   :  { %v12705_v48 = vpop.f32.mrf.mxu1  ;;  %v3896_v3 = vadd.f32 %v12507_v39, %v11962_v51  ;;  %v18140_v13 = vpack.c.bf16 %v18138_v55, %v18139_v59  ;;  %v9367_v30 = vpop.eup %9366  ;;  %v7052_v27 = vadd.f32 %v7051_v10, %v6487_v2  ;;  %v6488_v7 = vmul.f32 %v5976_v41, %v12575_v62 }
 0x2be   :  { %4164 = vmatmul.mubr.bf16.gmra.mxu1 %v18136_v9  ;;  %18137 = vst [vmem:[#allocation75_spill] sm:$0xff] %v12711_v53  ;;  %v12718_v14 = vpop.f32.mrf.mxu0  ;;  %v12725_v60 = vmul.f32 0.5, %v2006_v44  ;;  %v2027_v23 = vadd.f32 %v12112_v0, %v12517_v12  ;;  %v9369_v39 = vpop.eup %9368  ;;  %v2948_v16 = vadd.f32 1.0, %v9367_v30  ;;  %9384 = vtanh.f32 %v12714_v52 }
 0x2bf   :  { %3664 = vmatmul.mubr.bf16.gmra.mxu0 %v18140_v13  ;;  %4173 = vmatprep.mubr.bf16.mxu1 %v17973_v11  ;;  %v12729_v9 = vpop.f32.mrf.mxu1  ;;  %v12733_v55 = vmul.f32 0.5, %v3896_v3  ;;  %v3898_v10 = vadd.f32 %v12530_v61, %v11988_v46  ;;  %v7016_v62 = vadd.f32 %v7015_v25, %v6488_v7  ;;  %v5977_v41 = vadd.f32 1.0, %v9369_v39  ;;  %v9371_v59 = vpop.eup %9370 }
 0x2c0   :  { %3673 = vmatprep.mubr.bf16.mxu0 %v17973_v11  ;;  %v12737_v2 = vpop.f32.mrf.mxu0  ;;  %9386 = vtanh.f32 %v12725_v60  ;;  %v12740_v12 = vmul.f32 0.5, %v2027_v23  ;;  %v12745_v13 = vmul.f32 %v2948_v16, %v12603_v34  ;;  %v2019_v61 = vadd.f32 %v12112_v0, %v12537_v31 }
 0x2c1   :  { %v12742_v44 = vpop.f32.mrf.mxu1  ;;  %9388 = vtanh.f32 %v12733_v55  ;;  %v12748_v3 = vmul.f32 0.5, %v3898_v10  ;;  %v9373_v25 = vpop.eup %9372  ;;  %v6489_v7 = vmul.f32 %v5977_v41, %v12610_v37  ;;  %v2946_v23 = vadd.f32 1.0, %v9371_v59 }
 0x2c2   :  { %18141 = vst [vmem:[#allocation74_spill] sm:$0xff] %v12745_v13  ;;  %v12752_v30 = vpop.f32.mrf.mxu0  ;;  %9390 = vtanh.f32 %v12740_v12  ;;  %v3900_v39 = vadd.f32 %v12547_v49, %v11962_v51  ;;  %v5978_v10 = vadd.f32 1.0, %v9373_v25  ;;  %v12763_v31 = vmul.f32 0.5, %v2019_v61 }
 0x2c3   :  { %v12758_v34 = vpop.f32.mrf.mxu1  ;;  %9392 = vtanh.f32 %v12748_v3  ;;  %v9375_v57 = vpop.eup %9374  ;;  %v7053_v37 = vadd.f32 %v7052_v27, %v6489_v7  ;;  %v12768_v41 = vmul.f32 %v2946_v23, %v12623_v43  ;;  %v2030_v49 = vadd.f32 %v12112_v0, %v12555_v35  ;;  %v18145_v7 = vld [vmem:[#allocation42_spill] sm:$0xff]  ;;  %v18146_v23 = vld [vmem:[#allocation41_spill] sm:$0xff] }
 0x2c4   :  { %18142 = vst [vmem:[#allocation36_spill] sm:$0xff] %v12758_v34  ;;  %v12765_v29 = vpop.f32.mrf.mxu0  ;;  %v12770_v59 = vmul.f32 0.5, %v3900_v39  ;;  %v18144_v25 = vpack.c.bf16 %v11701_v36, %v11685_v6  ;;  %v6490_v16 = vmul.f32 %v5978_v10, %v12625_v18  ;;  %v2951_v15 = vadd.f32 1.0, %v9375_v57 }
 0x2c5   :  { %18143 = vst [vmem:[#allocation35_spill] sm:$0xff] %v12768_v41  ;;  %v12774_v34 = vpop.f32.mrf.mxu1  ;;  %v9377_v61 = vpop.eup %9376  ;;  %9394 = vtanh.f32 %v12763_v31  ;;  %v3902_v43 = vadd.f32 %v12564_v5, %v11988_v46  ;;  %v18147_v35 = vpack.c.bf16 %v18145_v7, %v18146_v23  ;;  %v12792_v57 = vmul.f32 0.5, %v2030_v49 }
 0x2c6   :  { %4174 = vmatmul.mubr.bf16.gmra.mxu1 %v18144_v25  ;;  %v12783_v27 = vpop.f32.mrf.mxu0  ;;  %v9379_v39 = vpop.eup %9378  ;;  %v5979_v36 = vadd.f32 1.0, %v9377_v61  ;;  %9396 = vtanh.f32 %v12770_v59  ;;  %v7017_v5 = vadd.f32 %v7016_v62, %v6490_v16  ;;  %v12798_v10 = vmul.f32 %v2951_v15, %v12651_v50 }
 0x2c7   :  { %3674 = vmatmul.mubr.bf16.gmra.mxu0 %v18147_v35  ;;  %4183 = vmatprep.mubr.bf16.mxu1 %v17973_v11  ;;  %v12794_v18 = vpop.f32.mrf.mxu1  ;;  %v2949_v25 = vadd.f32 1.0, %v9379_v39  ;;  %v12800_v7 = vmul.f32 0.5, %v3902_v43  ;;  %9398 = vtanh.f32 %v12792_v57  ;;  %v2022_v49 = vadd.f32 %v12112_v0, %v12569_v32 }
 0x2c8   :  { %3683 = vmatprep.mubr.bf16.mxu0 %v17973_v11  ;;  %18148 = vst [vmem:[#allocation42_spill] sm:$0xff] %v12798_v10  ;;  %v12802_v23 = vpop.f32.mrf.mxu0  ;;  %v6491_v35 = vmul.f32 %v5979_v36, %v12659_v20  ;;  %v3906_v61 = vadd.f32 %v12577_v45, %v11962_v51  ;;  %v9381_v62 = vpop.eup %9380  ;;  %v2043_v15 = vadd.f32 %v12112_v0, %v12588_v4 }
 0x2c9   :  { %v12810_v6 = vpop.f32.mrf.mxu1  ;;  %v12813_v50 = vmul.f32 %v2949_v25, %v12661_v21  ;;  %9400 = vtanh.f32 %v12800_v7  ;;  %v3908_v20 = vadd.f32 %v12597_v17, %v11988_v46  ;;  %v9383_v32 = vpop.eup %9382  ;;  %v5980_v39 = vadd.f32 1.0, %v9381_v62  ;;  %v18152_v62 = vld [vmem:[#allocation77_spill] sm:$0xff] }
 0x2ca   :  { %v12820_v16 = vpop.f32.mrf.mxu0  ;;  %v7054_v43 = vadd.f32 %v7053_v37, %v6491_v35  ;;  %v12822_v45 = vmul.f32 0.5, %v2022_v49  ;;  %v12824_v36 = vmul.f32 0.5, %v3906_v61  ;;  %v2952_v21 = vadd.f32 1.0, %v9383_v32 }
 0x2cb   :  { %18149 = vst [vmem:[#allocation41_spill] sm:$0xff] %v12813_v50  ;;  %v12826_v13 = vpop.f32.mrf.mxu1  ;;  %v12828_v25 = vmul.f32 0.5, %v2043_v15  ;;  %v12830_v53 = vmul.f32 0.5, %v3908_v20  ;;  %v2035_v4 = vadd.f32 %v12112_v0, %v12605_v38  ;;  %v9385_v41 = vpop.eup %9384  ;;  %v6492_v37 = vmul.f32 %v5980_v39, %v12688_v42  ;;  %v18153_v15 = vld [vmem:[#allocation76_spill] sm:$0xff]  ;;  %v18165_v50 = vld [vmem:[#allocation46_spill] sm:$0xff] }
 0x2cc   :  { %18150 = vst [vmem:[#allocation137_spill] sm:$0xff] %v12826_v13  ;;  %v12834_v17 = vpop.f32.mrf.mxu0  ;;  %9402 = vtanh.f32 %v12822_v45  ;;  %v3910_v35 = vadd.f32 %v12616_v58, %v11962_v51  ;;  %v2046_v49 = vadd.f32 %v12112_v0, %v12620_v8  ;;  %v18154_v20 = vpack.c.bf16 %v18152_v62, %v18153_v15  ;;  %v18156_v58 = vld [vmem:[#allocation40_spill] sm:$0xff]  ;;  %v18157_v13 = vld [vmem:[#allocation39_spill] sm:$0xff] }
 0x2cd   :  { %18151 = vst [vmem:[#allocation138_spill] sm:$0xff] %v12834_v17  ;;  %v12842_v61 = vpop.f32.mrf.mxu1  ;;  %v9387_v38 = vpop.eup %9386  ;;  %v12848_v32 = vmul.f32 %v2952_v21, %v12690_v47  ;;  %v5981_v17 = vadd.f32 1.0, %v9385_v41  ;;  %9404 = vtanh.f32 %v12824_v36  ;;  %v12851_v42 = vmul.f32 0.5, %v2035_v4 }
 0x2ce   :  { %4184 = vmatmul.mubr.bf16.gmra.mxu1 %v18154_v20  ;;  %v12853_v39 = vpop.f32.mrf.mxu0  ;;  %v18158_v0 = vpack.c.bf16 %v18156_v58, %v18157_v13  ;;  %v9389_v8 = vpop.eup %9388  ;;  %v7018_v62 = vadd.f32 %v7017_v5, %v6492_v37  ;;  %v2950_v15 = vadd.f32 1.0, %v9387_v38  ;;  %9406 = vtanh.f32 %v12828_v25 }
 0x2cf   :  { %18155 = vst [vmem:[#allocation77_spill] sm:$0xff] %v12848_v32  ;;  %4193 = vmatprep.mubr.bf16.mxu1 %v17973_v11  ;;  %v12860_v47 = vmul.f32 0.5, %v3910_v35  ;;  %v12862_v41 = vpop.f32.mrf.mxu1  ;;  %v9391_v21 = vpop.eup %9390  ;;  %v6493_v13 = vmul.f32 %v5981_v17, %v12714_v52  ;;  %v5982_v20 = vadd.f32 1.0, %v9389_v8  ;;  %9408 = vtanh.f32 %v12830_v53 }
 0x2d0   :  { %3684 = vmatmul.mubr.bf16.gmra.mxu0 %v18158_v0  ;;  %18159 = vst [vmem:[#allocation76_spill] sm:$0xff] %v12862_v41  ;;  %v12869_v58 = vpop.f32.mrf.mxu0  ;;  %v9393_v5 = vpop.eup %9392  ;;  %v12872_v37 = vmul.f32 %v2950_v15, %v12725_v60  ;;  %v2955_v35 = vadd.f32 1.0, %v9391_v21  ;;  %9410 = vtanh.f32 %v12851_v42  ;;  %v12875_v38 = vmul.f32 0.5, %v2046_v49 }
 0x2d1   :  { %3693 = vmatprep.mubr.bf16.mxu0 %v17973_v11  ;;  %v12877_v0 = vpop.f32.mrf.mxu1  ;;  %v7055_v41 = vadd.f32 %v7054_v43, %v6493_v13  ;;  %v6494_v4 = vmul.f32 %v5982_v20, %v12733_v55  ;;  %v5983_v52 = vadd.f32 1.0, %v9393_v5  ;;  %9412 = vtanh.f32 %v12860_v47  ;;  %v12897_v5 = vld [vmem:[%s17709_s2] ss:$0 sm:$0xff] }
 0x2d2   :  { %18160 = vst [vmem:[#allocation40_spill] sm:$0xff] %v12872_v37  ;;  %v12881_v17 = vpop.f32.mrf.mxu0  ;;  %v9395_v8 = vpop.eup %9394  ;;  %v12886_v15 = vmul.f32 %v2955_v35, %v12740_v12  ;;  %9414 = vtanh.f32 %v12875_v38  ;;  %v3912_v49 = vadd.f32 %v12627_v56, %v11988_v46  ;;  %v2038_v12 = vadd.f32 %v12897_v5, %v12634_v33 }
 0x2d3   :  { %v12891_v43 = vpop.f32.mrf.mxu1  ;;  %v9397_v55 = vpop.eup %9396  ;;  %v7019_v21 = vadd.f32 %v7018_v62, %v6494_v4  ;;  %v6495_v13 = vmul.f32 %v5983_v52, %v12748_v3  ;;  %v2953_v20 = vadd.f32 1.0, %v9395_v8  ;;  %v3916_v56 = vadd.f32 %v12642_v26, %v11962_v51  ;;  %v18162_v4 = vld [vmem:[#allocation79_spill] sm:$0xff] }
 0x2d4   :  { %18161 = vst [vmem:[#allocation39_spill] sm:$0xff] %v12886_v15  ;;  %v12901_v35 = vpop.f32.mrf.mxu0  ;;  %v5984_v60 = vadd.f32 1.0, %v9397_v55  ;;  %v12903_v10 = vmul.f32 0.5, %v3912_v49  ;;  %v2059_v3 = vadd.f32 %v12897_v5, %v12653_v63  ;;  %v18163_v52 = vpack.c.bf16 %v11741_v28, %v18162_v4  ;;  %v9399_v8 = vpop.eup %9398  ;;  %v18166_v63 = vld [vmem:[#allocation45_spill] sm:$0xff] }
 0x2d5   :  { %v12909_v62 = vpop.f32.mrf.mxu1  ;;  %v7056_v32 = vadd.f32 %v7055_v41, %v6495_v13  ;;  %v12915_v33 = vmul.f32 %v2953_v20, %v12763_v31  ;;  %v12917_v55 = vmul.f32 0.5, %v2038_v12  ;;  %v3918_v49 = vadd.f32 %v12663_v19, %v11988_v46 }
 0x2d6   :  { %4194 = vmatmul.mubr.bf16.gmra.mxu1 %v18163_v52  ;;  %v12921_v26 = vpop.f32.mrf.mxu0  ;;  %v18167_v37 = vpack.c.bf16 %v18165_v50, %v18166_v63  ;;  %v9401_v28 = vpop.eup %9400  ;;  %v6496_v4 = vmul.f32 %v5984_v60, %v12770_v59  ;;  %v2956_v41 = vadd.f32 1.0, %v9399_v8  ;;  %9416 = vtanh.f32 %v12903_v10 }
 0x2d7   :  { %18164 = vst [vmem:[#allocation79_spill] sm:$0xff] %v12915_v33  ;;  %4203 = vmatprep.mubr.bf16.mxu1 %v17973_v11  ;;  %v12929_v31 = vmul.f32 0.5, %v3916_v56  ;;  %v12931_v13 = vpop.f32.mrf.mxu1  ;;  %v5985_v19 = vadd.f32 1.0, %v9401_v28  ;;  %9418 = vtanh.f32 %v12917_v55  ;;  %v12935_v20 = vmul.f32 0.5, %v2059_v3 }
 0x2d8   :  { %3694 = vmatmul.mubr.bf16.gmra.mxu0 %v18167_v37  ;;  %v12937_v50 = vmul.f32 0.5, %v3918_v49  ;;  %v12939_v37 = vpop.f32.mrf.mxu0  ;;  %v7020_v12 = vadd.f32 %v7019_v21, %v6496_v4  ;;  %v12942_v59 = vmul.f32 %v2956_v41, %v12792_v57  ;;  %v2051_v60 = vadd.f32 %v12897_v5, %v12670_v1 }
 0x2d9   :  { %3703 = vmatprep.mubr.bf16.mxu0 %v17973_v11  ;;  %18168 = vst [vmem:[#allocation46_spill] sm:$0xff] %v12939_v37  ;;  %9420 = vtanh.f32 %v12929_v31  ;;  %v12947_v56 = vpop.f32.mrf.mxu1  ;;  %v9403_v52 = vpop.eup %9402  ;;  %v6497_v8 = vmul.f32 %v5985_v19, %v12800_v7  ;;  %v3920_v3 = vadd.f32 %v12680_v40, %v11962_v51  ;;  %v2062_v21 = vadd.f32 %v12897_v5, %v12684_v24 }
 0x2da   :  { %18169 = vst [vmem:[#allocation45_spill] sm:$0xff] %v12942_v59  ;;  %18170 = vst [vmem:[#allocation139_spill] sm:$0xff] %v12947_v56  ;;  %9422 = vtanh.f32 %v12935_v20  ;;  %v12955_v57 = vpop.f32.mrf.mxu0  ;;  %v9405_v49 = vpop.eup %9404  ;;  %v2954_v1 = vadd.f32 1.0, %v9403_v52  ;;  %v12960_v28 = vmul.f32 0.5, %v2051_v60  ;;  %v3922_v60 = vadd.f32 %v12692_v54, %v11988_v46  ;;  %v18178_v59 = vld [vmem:[#allocation43_spill] sm:$0xff] }
 0x2db   :  { %18171 = vst [vmem:[#allocation140_spill] sm:$0xff] %v12955_v57  ;;  %9424 = vtanh.f32 %v12937_v50  ;;  %v12962_v7 = vpop.f32.mrf.mxu1  ;;  %v9407_v4 = vpop.eup %9406  ;;  %v7057_v41 = vadd.f32 %v7056_v32, %v6497_v8  ;;  %v5986_v19 = vadd.f32 1.0, %v9405_v49  ;;  %v12964_v40 = vmul.f32 0.5, %v3920_v3  ;;  %v18174_v32 = vld [vmem:[#allocation80_spill] sm:$0xff]  ;;  %v18175_v8 = vld [vmem:[#allocation78_spill] sm:$0xff] }
 0x2dc   :  { %v12966_v56 = vmul.f32 0.5, %v2062_v21  ;;  %v12968_v24 = vpop.f32.mrf.mxu0  ;;  %v9409_v57 = vpop.eup %9408  ;;  %v12971_v37 = vmul.f32 %v2954_v1, %v12822_v45  ;;  %v2959_v52 = vadd.f32 1.0, %v9407_v4  ;;  %9426 = vtanh.f32 %v12960_v28  ;;  %v18177_v4 = vld [vmem:[#allocation44_spill] sm:$0xff] }
 0x2dd   :  { %v12976_v63 = vpop.f32.mrf.mxu1  ;;  %v18176_v3 = vpack.c.bf16 %v18174_v32, %v18175_v8  ;;  %v9411_v21 = vpop.eup %9410  ;;  %v6498_v49 = vmul.f32 %v5986_v19, %v12824_v36  ;;  %v5987_v15 = vadd.f32 1.0, %v9409_v57  ;;  %9428 = vtanh.f32 %v12964_v40 }
 0x2de   :  { %18172 = vst [vmem:[#allocation141_spill] sm:$0xff] %v12971_v37  ;;  %18173 = vst [vmem:[#allocation142_spill] sm:$0xff] %v12976_v63  ;;  %v2054_v45 = vadd.f32 %v12897_v5, %v12699_v22  ;;  %v12985_v1 = vpop.f32.mrf.mxu0  ;;  %v18179_v54 = vpack.c.bf16 %v18177_v4, %v18178_v59  ;;  %v9413_v63 = vpop.eup %9412  ;;  %v12994_v36 = vmul.f32 %v2959_v52, %v12828_v25  ;;  %v2957_v57 = vadd.f32 1.0, %v9411_v21 }
 0x2df   :  { %4204 = vmatmul.mubr.bf16.gmra.mxu1 %v18176_v3  ;;  %9430 = vtanh.f32 %v12966_v56  ;;  %v12997_v19 = vpop.f32.mrf.mxu1  ;;  %v9415_v22 = vpop.eup %9414  ;;  %v7021_v8 = vadd.f32 %v7020_v12, %v6498_v49  ;;  %v6499_v59 = vmul.f32 %v5987_v15, %v12830_v53  ;;  %v5988_v3 = vadd.f32 1.0, %v9413_v63 }
 0x2e0   :  { %3704 = vmatmul.mubr.bf16.gmra.mxu0 %v18179_v54  ;;  %4213 = vmatprep.mubr.bf16.mxu1 %v17973_v11  ;;  %18180 = vst [vmem:[#allocation80_spill] sm:$0xff] %v12994_v36  ;;  %v13001_v4 = vmul.f32 0.5, %v3922_v60  ;;  %v13003_v54 = vpop.f32.mrf.mxu0  ;;  %v13006_v32 = vmul.f32 %v2957_v57, %v12851_v42  ;;  %v2960_v25 = vadd.f32 1.0, %v9415_v22  ;;  %v13008_v52 = vmul.f32 0.5, %v2054_v45  ;;  %v18188_v36 = vld [vmem:[#allocation49_spill] sm:$0xff] }
 0x2e1   :  { %3713 = vmatprep.mubr.bf16.mxu0 %v17973_v11  ;;  %v3926_v21 = vadd.f32 %v12705_v48, %v11962_v51  ;;  %v13012_v33 = vpop.f32.mrf.mxu1  ;;  %v7058_v37 = vadd.f32 %v7057_v41, %v6499_v59  ;;  %v6500_v12 = vmul.f32 %v5988_v3, %v12860_v47  ;;  %v2075_v53 = vadd.f32 %v12897_v5, %v12718_v14  ;;  %v18183_v3 = vld [vmem:[#allocation84_spill] sm:$0xff] }
 0x2e2   :  { %18181 = vst [vmem:[#allocation78_spill] sm:$0xff] %v13006_v32  ;;  %9432 = vtanh.f32 %v13001_v4  ;;  %v13018_v15 = vpop.f32.mrf.mxu0  ;;  %v13021_v42 = vmul.f32 %v2960_v25, %v12875_v38  ;;  %v3928_v48 = vadd.f32 %v12729_v9, %v11988_v46  ;;  %v2067_v14 = vadd.f32 %v12897_v5, %v12737_v2  ;;  %v18184_v25 = vld [vmem:[#allocation82_spill] sm:$0xff] }
 0x2e3   :  { %9434 = vtanh.f32 %v13008_v52  ;;  %v13024_v63 = vmul.f32 0.5, %v3926_v21  ;;  %v13028_v41 = vpop.f32.mrf.mxu1  ;;  %v9417_v47 = vpop.eup %9416  ;;  %v7022_v60 = vadd.f32 %v7021_v8, %v6500_v12  ;;  %v13030_v49 = vmul.f32 0.5, %v2075_v53 }
 0x2e4   :  { %18182 = vst [vmem:[#allocation44_spill] sm:$0xff] %v13021_v42  ;;  %v3930_v38 = vadd.f32 %v12742_v44, %v11962_v51  ;;  %v13036_v45 = vpop.f32.mrf.mxu0  ;;  %v9419_v57 = vpop.eup %9418  ;;  %v5989_v59 = vadd.f32 1.0, %v9417_v47  ;;  %v13041_v9 = vmul.f32 0.5, %v3928_v48  ;;  %v18185_v21 = vpack.c.bf16 %v18183_v3, %v18184_v25  ;;  %v18187_v47 = vld [vmem:[#allocation50_spill] sm:$0xff] }
 0x2e5   :  { %9436 = vtanh.f32 %v13024_v63  ;;  %v13043_v8 = vpop.f32.mrf.mxu1  ;;  %v2958_v12 = vadd.f32 1.0, %v9419_v57  ;;  %v13049_v44 = vmul.f32 0.5, %v2067_v14  ;;  %v18189_v48 = vpack.c.bf16 %v18187_v47, %v18188_v36  ;;  %v18192_v47 = vld [vmem:[#allocation36_spill] sm:$0xff] }
 0x2e6   :  { %v9421_v2 = vpop.eup %9420  ;;  %9438 = vtanh.f32 %v13030_v49  ;;  %v13051_v53 = vmul.f32 0.5, %v3930_v38  ;;  %v13053_v22 = vpop.f32.mrf.mxu0  ;;  %v6501_v3 = vmul.f32 %v5989_v59, %v12903_v10  ;;  %v2078_v14 = vadd.f32 %v12897_v5, %v12752_v30 }
 0x2e7   :  { %4214 = vmatmul.mubr.bf16.gmra.mxu1 %v18185_v21  ;;  %18186 = vst [vmem:[#allocation43_spill] sm:$0xff] %v13053_v22  ;;  %v9423_v42 = vpop.eup %9422  ;;  %v5990_v25 = vadd.f32 1.0, %v9421_v2  ;;  %9440 = vtanh.f32 %v13041_v9  ;;  %v13063_v57 = vpop.f32.mrf.mxu1  ;;  %v13067_v21 = vmul.f32 %v2958_v12, %v12917_v55  ;;  %v3932_v10 = vadd.f32 %v18192_v47, %v11988_v46 }
 0x2e8   :  { %3714 = vmatmul.mubr.bf16.gmra.mxu0 %v18189_v48  ;;  %4223 = vmatprep.mubr.bf16.mxu1 %v17973_v11  ;;  %18190 = vst [vmem:[#allocation84_spill] sm:$0xff] %v13063_v57  ;;  %v9425_v38 = vpop.eup %9424  ;;  %v2963_v36 = vadd.f32 1.0, %v9423_v42  ;;  %9442 = vtanh.f32 %v13049_v44  ;;  %v13072_v59 = vpop.f32.mrf.mxu0  ;;  %v7059_v2 = vadd.f32 %v7058_v37, %v6501_v3  ;;  %v13083_v12 = vmul.f32 0.5, %v2078_v14 }
 0x2e9   :  { %3723 = vmatprep.mubr.bf16.mxu0 %v17973_v11  ;;  %18191 = vst [vmem:[#allocation82_spill] sm:$0xff] %v13067_v21  ;;  %18193 = vst [vmem:[#allocation50_spill] sm:$0xff] %v13072_v59  ;;  %v6502_v48 = vmul.f32 %v5990_v25, %v12929_v31  ;;  %v5991_v30 = vadd.f32 1.0, %v9425_v38  ;;  %9444 = vtanh.f32 %v13051_v53  ;;  %v13076_v57 = vpop.f32.mrf.mxu1  ;;  %v9427_v22 = vpop.eup %9426  ;;  %v13085_v47 = vmul.f32 0.5, %v3932_v10  ;;  %v18197_v10 = vld [vmem:[#allocation83_spill] sm:$0xff] }
 0x2ea   :  { %18194 = vst [vmem:[#allocation49_spill] sm:$0xff] %v13076_v57  ;;  %v13081_v42 = vmul.f32 %v2963_v36, %v12935_v20  ;;  %v13087_v59 = vpop.f32.mrf.mxu0  ;;  %v9429_v37 = vpop.eup %9428  ;;  %v2961_v25 = vadd.f32 1.0, %v9427_v22  ;;  %v2070_v38 = vadd.f32 %v12897_v5, %v12765_v29  ;;  %9446 = vtanh.f32 %v13083_v12 }
 0x2eb   :  { %v7023_v31 = vadd.f32 %v7022_v60, %v6502_v48  ;;  %v6503_v3 = vmul.f32 %v5991_v30, %v12937_v50  ;;  %v13092_v57 = vpop.f32.mrf.mxu1  ;;  %v5992_v32 = vadd.f32 1.0, %v9429_v37  ;;  %v3936_v20 = vadd.f32 %v12774_v34, %v11962_v51  ;;  %v18198_v48 = vld [vmem:[#allocation81_spill] sm:$0xff] }
 0x2ec   :  { %18195 = vst [vmem:[#allocation36_spill] sm:$0xff] %v13081_v42  ;;  %v9431_v55 = vpop.eup %9430  ;;  %v2091_v14 = vadd.f32 %v12897_v5, %v12783_v27  ;;  %v13099_v36 = vpop.f32.mrf.mxu0  ;;  %v13102_v50 = vmul.f32 %v2961_v25, %v12960_v28  ;;  %9448 = vtanh.f32 %v13085_v47  ;;  %v18199_v30 = vpack.c.bf16 %v18197_v10, %v18198_v48  ;;  %v18200_v28 = vld [vmem:[#allocation48_spill] sm:$0xff] }
 0x2ed   :  { %v7060_v60 = vadd.f32 %v7059_v2, %v6503_v3  ;;  %v2964_v22 = vadd.f32 1.0, %v9431_v55  ;;  %v13105_v29 = vpop.f32.mrf.mxu1  ;;  %v6504_v34 = vmul.f32 %v5992_v32, %v12964_v40  ;;  %v13111_v37 = vmul.f32 0.5, %v2070_v38  ;;  %v18201_v55 = vld [vmem:[#allocation47_spill] sm:$0xff] }
 0x2ee   :  { %18196 = vst [vmem:[#allocation143_spill] sm:$0xff] %v13102_v50  ;;  %v13113_v27 = vmul.f32 0.5, %v3936_v20  ;;  %v13115_v21 = vmul.f32 0.5, %v2091_v14  ;;  %v13117_v2 = vpop.f32.mrf.mxu0  ;;  %v18202_v3 = vpack.c.bf16 %v18200_v28, %v18201_v55  ;;  %v3938_v40 = vadd.f32 %v12794_v18, %v11988_v46 }
 0x2ef   :  { %4224 = vmatmul.mubr.bf16.gmra.mxu1 %v18199_v30  ;;  %v9433_v25 = vpop.eup %9432  ;;  %v13124_v10 = vmul.f32 %v2964_v22, %v12966_v56  ;;  %v2083_v32 = vadd.f32 %v12897_v5, %v12802_v23  ;;  %v3940_v38 = vadd.f32 %v12810_v6, %v11962_v51  ;;  %v13132_v20 = vpop.f32.mrf.mxu1  ;;  %v7024_v48 = vadd.f32 %v7023_v31, %v6504_v34 }
 0x2f0   :  { %3724 = vmatmul.mubr.bf16.gmra.mxu0 %v18202_v3  ;;  %4233 = vmatprep.mubr.bf16.mxu1 %v17973_v11  ;;  %v9435_v14 = vpop.eup %9434  ;;  %v5993_v30 = vadd.f32 1.0, %v9433_v25  ;;  %9450 = vtanh.f32 %v13111_v37  ;;  %v2094_v56 = vadd.f32 %v12897_v5, %v12820_v16  ;;  %v13138_v22 = vpop.f32.mrf.mxu0  ;;  %v13143_v6 = vmul.f32 0.5, %v3938_v40 }
 0x2f1   :  { %18203 = vst [vmem:[#allocation83_spill] sm:$0xff] %v13124_v10  ;;  %3733 = vmatprep.mubr.bf16.mxu0 %v17973_v11  ;;  %18204 = vst [vmem:[#allocation81_spill] sm:$0xff] %v13138_v22  ;;  %v2962_v23 = vadd.f32 1.0, %v9435_v14  ;;  %9452 = vtanh.f32 %v13113_v27  ;;  %v13145_v28 = vpop.f32.mrf.mxu1  ;;  %v13149_v34 = vmul.f32 0.5, %v2083_v32  ;;  %v13151_v16 = vmul.f32 0.5, %v3940_v38  ;;  %v18209_v32 = vld [vmem:[#allocation137_spill] sm:$0xff] }
 0x2f2   :  { %18205 = vst [vmem:[#allocation48_spill] sm:$0xff] %v13145_v28  ;;  %v9437_v55 = vpop.eup %9436  ;;  %v6505_v31 = vmul.f32 %v5993_v30, %v13001_v4  ;;  %9454 = vtanh.f32 %v13115_v21  ;;  %v13153_v3 = vpop.f32.mrf.mxu0  ;;  %v13159_v40 = vmul.f32 0.5, %v2094_v56  ;;  %v3942_v38 = vadd.f32 %v18209_v32, %v11988_v46 }
 0x2f3   :  { %18206 = vst [vmem:[#allocation47_spill] sm:$0xff] %v13153_v3  ;;  %v9439_v25 = vpop.eup %9438  ;;  %v13156_v14 = vmul.f32 %v2962_v23, %v13008_v52  ;;  %v5994_v18 = vadd.f32 1.0, %v9437_v55  ;;  %9456 = vtanh.f32 %v13143_v6  ;;  %v13161_v42 = vpop.f32.mrf.mxu1 }
 0x2f4   :  { %18208 = vst [vmem:[#allocation145_spill] sm:$0xff] %v13161_v42  ;;  %v9441_v4 = vpop.eup %9440  ;;  %v7061_v30 = vadd.f32 %v7060_v60, %v6505_v31  ;;  %v2967_v10 = vadd.f32 1.0, %v9439_v25  ;;  %9458 = vtanh.f32 %v13149_v34  ;;  %v13166_v3 = vpop.f32.mrf.mxu0  ;;  %v18211_v60 = vld [vmem:[#allocation88_spill] sm:$0xff]  ;;  %v18212_v31 = vld [vmem:[#allocation86_spill] sm:$0xff]  ;;  %v13181_v22 = vmul.f32 0.5, %v3942_v38 }
 0x2f5   :  { %18207 = vst [vmem:[#allocation144_spill] sm:$0xff] %v13156_v14  ;;  %18210 = vst [vmem:[#allocation137_spill] sm:$0xff] %v13166_v3  ;;  %v9443_v28 = vpop.eup %9442  ;;  %v6506_v23 = vmul.f32 %v5994_v18, %v13024_v63  ;;  %v5995_v56 = vadd.f32 1.0, %v9441_v4  ;;  %9460 = vtanh.f32 %v13151_v16  ;;  %v13172_v55 = vpop.f32.mrf.mxu1  ;;  %v18213_v25 = vpack.c.bf16 %v18211_v60, %v18212_v31  ;;  %v18215_v63 = vld [vmem:[#allocation54_spill] sm:$0xff]  ;;  %v18216_v18 = vld [vmem:[#allocation53_spill] sm:$0xff] }
 0x2f6   :  { %v9445_v42 = vpop.eup %9444  ;;  %v13178_v32 = vmul.f32 %v2967_v10, %v13030_v49  ;;  %v2965_v3 = vadd.f32 1.0, %v9443_v28  ;;  %9462 = vtanh.f32 %v13159_v40  ;;  %v13183_v52 = vpop.f32.mrf.mxu0  ;;  %v18217_v4 = vpack.c.bf16 %v18215_v63, %v18216_v18  ;;  %v18221_v18 = vld [vmem:[#allocation76_spill] sm:$0xff] }
 0x2f7   :  { %4234 = vmatmul.mubr.bf16.gmra.mxu1 %v18213_v25  ;;  %v7025_v50 = vadd.f32 %v7024_v48, %v6506_v23  ;;  %v6507_v60 = vmul.f32 %v5995_v56, %v13041_v9  ;;  %v5996_v31 = vadd.f32 1.0, %v9445_v42  ;;  %v18218_v25 = vld [vmem:[#allocation138_spill] sm:$0xff]  ;;  %v13192_v10 = vpop.f32.mrf.mxu1  ;;  %9464 = vtanh.f32 %v13181_v22  ;;  %v9447_v42 = vpop.eup %9446 }
 0x2f8   :  { %18214 = vst [vmem:[#allocation88_spill] sm:$0xff] %v13178_v32  ;;  %3734 = vmatmul.mubr.bf16.gmra.mxu0 %v18217_v4  ;;  %4243 = vmatprep.mubr.bf16.mxu1 %v17973_v11  ;;  %v2086_v49 = vadd.f32 %v12897_v5, %v18218_v25  ;;  %v13196_v28 = vmul.f32 %v2965_v3, %v13049_v44  ;;  %v13203_v9 = vpop.f32.mrf.mxu0  ;;  %v2968_v25 = vadd.f32 1.0, %v9447_v42 }
 0x2f9   :  { %3743 = vmatprep.mubr.bf16.mxu0 %v17973_v11  ;;  %v3946_v38 = vadd.f32 %v12842_v61, %v11962_v51  ;;  %v2107_v48 = vadd.f32 %v12897_v5, %v12853_v39  ;;  %18220 = vst [vmem:[#allocation54_spill] sm:$0xff] %v13203_v9  ;;  %v7062_v23 = vadd.f32 %v7061_v30, %v6507_v60  ;;  %v13210_v3 = vpop.f32.mrf.mxu1  ;;  %v9449_v4 = vpop.eup %9448 }
 0x2fa   :  { %18219 = vst [vmem:[#allocation86_spill] sm:$0xff] %v13196_v28  ;;  %v6508_v56 = vmul.f32 %v5996_v31, %v13051_v53  ;;  %v13206_v63 = vmul.f32 0.5, %v2086_v49  ;;  %v3948_v44 = vadd.f32 %v18221_v18, %v11988_v46  ;;  %v2099_v39 = vadd.f32 %v12897_v5, %v12869_v58  ;;  %v13218_v9 = vpop.f32.mrf.mxu0 }
 0x2fb   :  { %v13212_v14 = vmul.f32 0.5, %v3946_v38  ;;  %v13214_v61 = vmul.f32 0.5, %v2107_v48  ;;  %v5997_v53 = vadd.f32 1.0, %v9449_v4  ;;  %v13223_v31 = vpop.f32.mrf.mxu1  ;;  %v13226_v49 = vmul.f32 %v2968_v25, %v13083_v12  ;;  %v18227_v4 = vld [vmem:[#allocation85_spill] sm:$0xff] }
 0x2fc   :  { %v7026_v30 = vadd.f32 %v7025_v50, %v6508_v56  ;;  %9466 = vtanh.f32 %v13206_v63  ;;  %v13221_v60 = vmul.f32 0.5, %v3948_v44  ;;  %18222 = vst [vmem:[#allocation53_spill] sm:$0xff] %v13223_v31  ;;  %v13229_v38 = vmul.f32 0.5, %v2099_v39  ;;  %v13233_v48 = vpop.f32.mrf.mxu0  ;;  %v18226_v44 = vld [vmem:[#allocation87_spill] sm:$0xff] }
 0x2fd   :  { %18223 = vst [vmem:[#allocation138_spill] sm:$0xff] %v13226_v49  ;;  %9468 = vtanh.f32 %v13212_v14  ;;  %v3950_v58 = vadd.f32 %v12877_v0, %v11962_v51  ;;  %18224 = vst [vmem:[#allocation76_spill] sm:$0xff] %v13233_v48  ;;  %v9451_v50 = vpop.eup %9450  ;;  %v6509_v42 = vmul.f32 %v5997_v53, %v13085_v47  ;;  %v2110_v56 = vadd.f32 %v12897_v5, %v12881_v17  ;;  %v13241_v18 = vpop.f32.mrf.mxu1  ;;  %v18229_v17 = vld [vmem:[#allocation52_spill] sm:$0xff]  ;;  %v18230_v31 = vld [vmem:[#allocation51_spill] sm:$0xff] }
 0x2fe   :  { %9470 = vtanh.f32 %v13214_v61  ;;  %v3952_v12 = vadd.f32 %v12891_v43, %v11988_v46  ;;  %18225 = vst [vmem:[#allocation146_spill] sm:$0xff] %v13241_v18  ;;  %v18228_v25 = vpack.c.bf16 %v18226_v44, %v18227_v4  ;;  %v9453_v0 = vpop.eup %9452  ;;  %v2966_v48 = vadd.f32 1.0, %v9451_v50  ;;  %v13251_v53 = vpop.f32.mrf.mxu0 }
 0x2ff   :  { %9472 = vtanh.f32 %v13221_v60  ;;  %v13249_v47 = vmul.f32 0.5, %v3950_v58  ;;  %v18231_v43 = vpack.c.bf16 %v18229_v17, %v18230_v31  ;;  %v9455_v18 = vpop.eup %9454  ;;  %v7063_v44 = vadd.f32 %v7062_v23, %v6509_v42  ;;  %v13260_v50 = vpop.f32.mrf.mxu1 }
 0x300   :  { %4244 = vmatmul.mubr.bf16.gmra.mxu1 %v18228_v25  ;;  %v5998_v4 = vadd.f32 1.0, %v9453_v0  ;;  %9474 = vtanh.f32 %v13229_v38  ;;  %v13258_v25 = vmul.f32 0.5, %v2110_v56  ;;  %18232 = vst [vmem:[#allocation87_spill] sm:$0xff] %v13260_v50  ;;  %v9457_v58 = vpop.eup %9456  ;;  %v13264_v39 = vmul.f32 %v2966_v48, %v13111_v37  ;;  %v13269_v17 = vpop.f32.mrf.mxu0 }
 0x301   :  { %3744 = vmatmul.mubr.bf16.gmra.mxu0 %v18231_v43  ;;  %4253 = vmatprep.mubr.bf16.mxu1 %v17973_v11  ;;  %v2971_v32 = vadd.f32 1.0, %v9455_v18  ;;  %9476 = vtanh.f32 %v13249_v47  ;;  %v13267_v31 = vmul.f32 0.5, %v3952_v12  ;;  %18234 = vst [vmem:[#allocation52_spill] sm:$0xff] %v13269_v17  ;;  %v9459_v23 = vpop.eup %9458  ;;  %v5999_v56 = vadd.f32 1.0, %v9457_v58  ;;  %v13275_v43 = vpop.f32.mrf.mxu1 }
 0x302   :  { %3753 = vmatprep.mubr.bf16.mxu0 %v17973_v11  ;;  %18233 = vst [vmem:[#allocation85_spill] sm:$0xff] %v13264_v39  ;;  %v6510_v42 = vmul.f32 %v5998_v4, %v13113_v27  ;;  %9478 = vtanh.f32 %v13258_v25  ;;  %v2102_v0 = vadd.f32 %v12897_v5, %v12901_v35  ;;  %18235 = vst [vmem:[#allocation51_spill] sm:$0xff] %v13275_v43  ;;  %v9461_v37 = vpop.eup %9460  ;;  %v2969_v18 = vadd.f32 1.0, %v9459_v23  ;;  %v13283_v49 = vpop.f32.mrf.mxu0 }
 0x303   :  { %v13280_v12 = vmul.f32 %v2971_v32, %v13115_v21  ;;  %9480 = vtanh.f32 %v13267_v31  ;;  %v9463_v27 = vpop.eup %9462  ;;  %v6511_v58 = vmul.f32 %v5999_v56, %v13143_v6  ;;  %v6000_v17 = vadd.f32 1.0, %v9461_v37  ;;  %v13288_v43 = vpop.f32.mrf.mxu1  ;;  %v18239_v37 = vld [vmem:[#allocation90_spill] sm:$0xff] }
 0x304   :  { %v7027_v4 = vadd.f32 %v7026_v30, %v6510_v42  ;;  %v13286_v35 = vmul.f32 0.5, %v2102_v0  ;;  %v13291_v50 = vmul.f32 %v2969_v18, %v13149_v34  ;;  %v2972_v48 = vadd.f32 1.0, %v9463_v27  ;;  %v13297_v23 = vpop.f32.mrf.mxu0  ;;  %v9465_v30 = vpop.eup %9464  ;;  %v18238_v0 = vld [vmem:[#allocation92_spill] sm:$0xff] }
 0x305   :  { %18236 = vst [vmem:[#allocation147_spill] sm:$0xff] %v13280_v12  ;;  %v3956_v21 = vadd.f32 %v12909_v62, %v11962_v51  ;;  %v2123_v32 = vadd.f32 %v12897_v5, %v12921_v26  ;;  %v7064_v42 = vadd.f32 %v7063_v44, %v6511_v58  ;;  %v6512_v6 = vmul.f32 %v6000_v17, %v13151_v16  ;;  %v13303_v34 = vpop.f32.mrf.mxu1  ;;  %v18243_v17 = vld [vmem:[#allocation58_spill] sm:$0xff]  ;;  %v18244_v58 = vld [vmem:[#allocation57_spill] sm:$0xff] }
 0x306   :  { %18237 = vst [vmem:[#allocation148_spill] sm:$0xff] %v13291_v50  ;;  %9482 = vtanh.f32 %v13286_v35  ;;  %v3958_v56 = vadd.f32 %v12931_v13, %v11988_v46  ;;  %v18240_v18 = vpack.c.bf16 %v18238_v0, %v18239_v37  ;;  %v13309_v62 = vmul.f32 %v2972_v48, %v13159_v40  ;;  %v13315_v16 = vpop.f32.mrf.mxu0  ;;  %v18246_v0 = vld [vmem:[#allocation46_spill] sm:$0xff]  ;;  %v18247_v48 = vld [vmem:[#allocation139_spill] sm:$0xff] }
 0x307   :  { %v6001_v26 = vadd.f32 1.0, %v9465_v30  ;;  %v13311_v27 = vmul.f32 0.5, %v3956_v21  ;;  %v13313_v44 = vmul.f32 0.5, %v2123_v32  ;;  %18242 = vst [vmem:[#allocation90_spill] sm:$0xff] %v13315_v16  ;;  %v18245_v28 = vpack.c.bf16 %v18243_v17, %v18244_v58  ;;  %v13327_v30 = vpop.f32.mrf.mxu1 }
 0x308   :  { %4254 = vmatmul.mubr.bf16.gmra.mxu1 %v18240_v18  ;;  %18241 = vst [vmem:[#allocation92_spill] sm:$0xff] %v13309_v62  ;;  %v7028_v13 = vadd.f32 %v7027_v4, %v6512_v6  ;;  %v13321_v39 = vmul.f32 0.5, %v3958_v56  ;;  %v2115_v40 = vadd.f32 %v12897_v5, %v18246_v0  ;;  %v3960_v21 = vadd.f32 %v18247_v48, %v11962_v51  ;;  %v18249_v4 = vld [vmem:[#allocation140_spill] sm:$0xff]  ;;  %v13336_v56 = vpop.f32.mrf.mxu0 }
 0x309   :  { %3754 = vmatmul.mubr.bf16.gmra.mxu0 %v18245_v28  ;;  %4263 = vmatprep.mubr.bf16.mxu1 %v17973_v11  ;;  %18248 = vst [vmem:[#allocation58_spill] sm:$0xff] %v13327_v30  ;;  %v9467_v32 = vpop.eup %9466  ;;  %v6513_v28 = vmul.f32 %v6001_v26, %v13181_v22  ;;  %9484 = vtanh.f32 %v13311_v27  ;;  %v2126_v6 = vadd.f32 %v12897_v5, %v18249_v4  ;;  %18250 = vst [vmem:[#allocation57_spill] sm:$0xff] %v13336_v56  ;;  %v13343_v48 = vpop.f32.mrf.mxu1 }
 0x30a   :  { %3763 = vmatprep.mubr.bf16.mxu0 %v17973_v11  ;;  %v9469_v18 = vpop.eup %9468  ;;  %v2970_v17 = vadd.f32 1.0, %v9467_v32  ;;  %9486 = vtanh.f32 %v13313_v44  ;;  %v13339_v58 = vmul.f32 0.5, %v2115_v40  ;;  %v13341_v0 = vmul.f32 0.5, %v3960_v21  ;;  %18251 = vst [vmem:[#allocation46_spill] sm:$0xff] %v13343_v48  ;;  %v13348_v4 = vpop.f32.mrf.mxu0 }
 0x30b   :  { %v9471_v37 = vpop.eup %9470  ;;  %v7065_v12 = vadd.f32 %v7064_v42, %v6513_v28  ;;  %v6002_v22 = vadd.f32 1.0, %v9469_v18  ;;  %9488 = vtanh.f32 %v13321_v39  ;;  %v13346_v26 = vmul.f32 0.5, %v2126_v6  ;;  %18252 = vst [vmem:[#allocation139_spill] sm:$0xff] %v13348_v4  ;;  %v13356_v21 = vpop.f32.mrf.mxu1 }
 0x30c   :  { %v9473_v62 = vpop.eup %9472  ;;  %v13351_v32 = vmul.f32 %v2970_v17, %v13206_v63  ;;  %v2975_v56 = vadd.f32 1.0, %v9471_v37  ;;  %9490 = vtanh.f32 %v13339_v58  ;;  %v3962_v40 = vadd.f32 %v12962_v7, %v11988_v46  ;;  %18254 = vst [vmem:[#allocation149_spill] sm:$0xff] %v13356_v21  ;;  %v13362_v4 = vpop.f32.mrf.mxu0 }
 0x30d   :  { %v9475_v42 = vpop.eup %9474  ;;  %v6514_v28 = vmul.f32 %v6002_v22, %v13212_v14  ;;  %v6003_v18 = vadd.f32 1.0, %v9473_v62  ;;  %9492 = vtanh.f32 %v13341_v0  ;;  %v2118_v6 = vadd.f32 %v12897_v5, %v12968_v24  ;;  %18255 = vst [vmem:[#allocation150_spill] sm:$0xff] %v13362_v4  ;;  %v13370_v21 = vpop.f32.mrf.mxu1  ;;  %v18257_v14 = vld [vmem:[#allocation91_spill] sm:$0xff]  ;;  %v18258_v62 = vld [vmem:[#allocation89_spill] sm:$0xff] }
 0x30e   :  { %18253 = vst [vmem:[#allocation140_spill] sm:$0xff] %v13351_v32  ;;  %v9477_v63 = vpop.eup %9476  ;;  %v13367_v17 = vmul.f32 %v2975_v56, %v13214_v61  ;;  %v2973_v7 = vadd.f32 1.0, %v9475_v42  ;;  %9494 = vtanh.f32 %v13346_v26  ;;  %v18259_v22 = vpack.c.bf16 %v18257_v14, %v18258_v62  ;;  %v13378_v37 = vpop.f32.mrf.mxu0  ;;  %v18260_v61 = vld [vmem:[#allocation56_spill] sm:$0xff]  ;;  %v18261_v56 = vld [vmem:[#allocation55_spill] sm:$0xff] }
 0x30f   :  { %v9479_v48 = vpop.eup %9478  ;;  %v7029_v24 = vadd.f32 %v7028_v13, %v6514_v28  ;;  %v6515_v4 = vmul.f32 %v6003_v18, %v13221_v60  ;;  %v6004_v30 = vadd.f32 1.0, %v9477_v63  ;;  %v13376_v16 = vmul.f32 0.5, %v3962_v40  ;;  %v18264_v60 = vld [vmem:[#allocation142_spill] sm:$0xff]  ;;  %v13391_v40 = vpop.f32.mrf.mxu1 }
 0x310   :  { %18256 = vst [vmem:[#allocation151_spill] sm:$0xff] %v13367_v17  ;;  %4264 = vmatmul.mubr.bf16.gmra.mxu1 %v18259_v22  ;;  %v18262_v42 = vpack.c.bf16 %v18260_v61, %v18261_v56  ;;  %v9481_v50 = vpop.eup %9480  ;;  %v13385_v32 = vmul.f32 %v2973_v7, %v13229_v38  ;;  %v2976_v14 = vadd.f32 1.0, %v9479_v48  ;;  %v13387_v62 = vmul.f32 0.5, %v2118_v6  ;;  %v13396_v22 = vpop.f32.mrf.mxu0  ;;  %v18273_v61 = vld [vmem:[#allocation61_spill] sm:$0xff] }
 0x311   :  { %4273 = vmatprep.mubr.bf16.mxu1 %v17973_v11  ;;  %v3966_v13 = vadd.f32 %v18264_v60, %v11962_v51  ;;  %v7066_v28 = vadd.f32 %v7065_v12, %v6515_v4  ;;  %v6516_v18 = vmul.f32 %v6004_v30, %v13249_v47  ;;  %v6005_v63 = vadd.f32 1.0, %v9481_v50  ;;  %v13406_v7 = vpop.f32.mrf.mxu1 }
 0x312   :  { %3764 = vmatmul.mubr.bf16.gmra.mxu0 %v18262_v42  ;;  %18263 = vst [vmem:[#allocation91_spill] sm:$0xff] %v13385_v32  ;;  %9496 = vtanh.f32 %v13376_v16  ;;  %v13399_v38 = vmul.f32 %v2976_v14, %v13258_v25  ;;  %v2139_v6 = vadd.f32 %v12897_v5, %v12985_v1  ;;  %v3968_v50 = vadd.f32 %v12997_v19, %v11988_v46  ;;  %v13413_v30 = vpop.f32.mrf.mxu0 }
 0x313   :  { %3773 = vmatprep.mubr.bf16.mxu0 %v17973_v11  ;;  %9498 = vtanh.f32 %v13387_v62  ;;  %v13402_v48 = vmul.f32 0.5, %v3966_v13  ;;  %v9483_v12 = vpop.eup %9482  ;;  %v7030_v4 = vadd.f32 %v7029_v24, %v6516_v18  ;;  %v6517_v47 = vmul.f32 %v6005_v63, %v13267_v31  ;;  %v13420_v42 = vpop.f32.mrf.mxu1 }
 0x314   :  { %18265 = vst [vmem:[#allocation89_spill] sm:$0xff] %v13399_v38  ;;  %v2131_v25 = vadd.f32 %v12897_v5, %v13003_v54  ;;  %v2974_v56 = vadd.f32 1.0, %v9483_v12  ;;  %v13418_v1 = vmul.f32 0.5, %v2139_v6  ;;  %v13422_v31 = vmul.f32 0.5, %v3968_v50  ;;  %v13428_v54 = vpop.f32.mrf.mxu0  ;;  %v18268_v6 = vld [vmem:[#allocation96_spill] sm:$0xff]  ;;  %v18269_v12 = vld [vmem:[#allocation94_spill] sm:$0xff] }
 0x315   :  { %9500 = vtanh.f32 %v13402_v48  ;;  %v7067_v24 = vadd.f32 %v7066_v28, %v6517_v47  ;;  %v3970_v19 = vadd.f32 %v13012_v33, %v11962_v51  ;;  %v2142_v18 = vadd.f32 %v12897_v5, %v13018_v15  ;;  %v13438_v63 = vpop.f32.mrf.mxu1  ;;  %v18272_v15 = vld [vmem:[#allocation62_spill] sm:$0xff] }
 0x316   :  { %v13424_v14 = vmul.f32 0.5, %v2131_v25  ;;  %v9485_v60 = vpop.eup %9484  ;;  %v13431_v13 = vmul.f32 %v2974_v56, %v13286_v35  ;;  %9502 = vtanh.f32 %v13418_v1  ;;  %v3972_v28 = vadd.f32 %v13028_v41, %v11988_v46  ;;  %18267 = vst [vmem:[#allocation55_spill] sm:$0xff] %v13438_v63  ;;  %v13448_v56 = vpop.f32.mrf.mxu0 }
 0x317   :  { %v18270_v47 = vpack.c.bf16 %v18268_v6, %v18269_v12  ;;  %v9487_v33 = vpop.eup %9486  ;;  %v6006_v50 = vadd.f32 1.0, %v9485_v60  ;;  %9504 = vtanh.f32 %v13422_v31  ;;  %v13444_v35 = vmul.f32 0.5, %v3970_v19  ;;  %18271 = vst [vmem:[#allocation142_spill] sm:$0xff] %v13448_v56  ;;  %v13459_v12 = vpop.f32.mrf.mxu1 }
 0x318   :  { %18266 = vst [vmem:[#allocation56_spill] sm:$0xff] %v13431_v13  ;;  %v2134_v25 = vadd.f32 %v12897_v5, %v13036_v45  ;;  %v18274_v41 = vpack.c.bf16 %v18272_v15, %v18273_v61  ;;  %v9489_v17 = vpop.eup %9488  ;;  %v2979_v60 = vadd.f32 1.0, %v9487_v33  ;;  %9506 = vtanh.f32 %v13424_v14  ;;  %18275 = vst [vmem:[#allocation96_spill] sm:$0xff] %v13459_v12 }
 0x319   :  { %4274 = vmatmul.mubr.bf16.gmra.mxu1 %v18270_v47  ;;  %v13457_v19 = vmul.f32 0.5, %v2142_v18  ;;  %v9491_v45 = vpop.eup %9490  ;;  %v6518_v47 = vmul.f32 %v6006_v50, %v13311_v27  ;;  %v6007_v61 = vadd.f32 1.0, %v9489_v17  ;;  %9508 = vtanh.f32 %v13444_v35  ;;  %v13474_v32 = vpop.f32.mrf.mxu1 }
 0x31a   :  { %3774 = vmatmul.mubr.bf16.gmra.mxu0 %v18274_v41  ;;  %4283 = vmatprep.mubr.bf16.mxu1 %v17973_v11  ;;  %v13464_v15 = vmul.f32 0.5, %v3972_v28  ;;  %v13466_v41 = vpop.f32.mrf.mxu0  ;;  %v9493_v6 = vpop.eup %9492  ;;  %v13469_v33 = vmul.f32 %v2979_v60, %v13313_v44  ;;  %v2977_v18 = vadd.f32 1.0, %v9491_v45  ;;  %v13472_v38 = vmul.f32 0.5, %v2134_v25  ;;  %18278 = vst [vmem:[#allocation61_spill] sm:$0xff] %v13474_v32 }
 0x31b   :  { %3783 = vmatprep.mubr.bf16.mxu0 %v17973_v11  ;;  %18276 = vst [vmem:[#allocation94_spill] sm:$0xff] %v13466_v41  ;;  %9510 = vtanh.f32 %v13457_v19  ;;  %v9495_v13 = vpop.eup %9494  ;;  %v7031_v27 = vadd.f32 %v7030_v4, %v6518_v47  ;;  %v6519_v17 = vmul.f32 %v6007_v61, %v13321_v39  ;;  %v6008_v50 = vadd.f32 1.0, %v9493_v6  ;;  %v13486_v60 = vpop.f32.mrf.mxu1  ;;  %v18282_v39 = vld [vmem:[#allocation43_spill] sm:$0xff]  ;;  %v18283_v47 = vld [vmem:[#allocation84_spill] sm:$0xff] }
 0x31c   :  { %18277 = vst [vmem:[#allocation62_spill] sm:$0xff] %v13469_v33  ;;  %9512 = vtanh.f32 %v13464_v15  ;;  %v13478_v28 = vpop.f32.mrf.mxu0  ;;  %v13481_v41 = vmul.f32 %v2977_v18, %v13339_v58  ;;  %v2980_v44 = vadd.f32 1.0, %v9495_v13  ;;  %v3976_v25 = vadd.f32 %v13043_v8, %v11962_v51  ;;  %18281 = vst [vmem:[#allocation154_spill] sm:$0xff] %v13486_v60  ;;  %v18286_v8 = vld [vmem:[#allocation50_spill] sm:$0xff] }
 0x31d   :  { %18279 = vst [vmem:[#allocation152_spill] sm:$0xff] %v13478_v28  ;;  %9514 = vtanh.f32 %v13472_v38  ;;  %v7068_v45 = vadd.f32 %v7067_v24, %v6519_v17  ;;  %v6520_v4 = vmul.f32 %v6008_v50, %v13341_v0  ;;  %v2155_v6 = vadd.f32 %v12897_v5, %v18282_v39  ;;  %v18287_v24 = vld [vmem:[#allocation49_spill] sm:$0xff]  ;;  %v13504_v17 = vpop.f32.mrf.mxu1  ;;  %v18288_v50 = vld [vmem:[#allocation95_spill] sm:$0xff] }
 0x31e   :  { %18280 = vst [vmem:[#allocation153_spill] sm:$0xff] %v13481_v41  ;;  %v3978_v61 = vadd.f32 %v18283_v47, %v11988_v46  ;;  %v13493_v28 = vpop.f32.mrf.mxu0  ;;  %v13496_v13 = vmul.f32 %v2980_v44, %v13346_v26  ;;  %v13498_v18 = vmul.f32 0.5, %v3976_v25  ;;  %v2147_v60 = vadd.f32 %v12897_v5, %v18286_v8  ;;  %v18289_v39 = vld [vmem:[#allocation93_spill] sm:$0xff]  ;;  %v18291_v25 = vld [vmem:[#allocation60_spill] sm:$0xff]  ;;  %v18292_v8 = vld [vmem:[#allocation59_spill] sm:$0xff] }
 0x31f   :  { %18284 = vst [vmem:[#allocation43_spill] sm:$0xff] %v13493_v28  ;;  %v9497_v58 = vpop.eup %9496  ;;  %v3980_v0 = vadd.f32 %v18287_v24, %v11962_v51  ;;  %v18290_v32 = vpack.c.bf16 %v18288_v50, %v18289_v39  ;;  %v7032_v28 = vadd.f32 %v7031_v27, %v6520_v4  ;;  %v13509_v56 = vmul.f32 0.5, %v2155_v6  ;;  %v13524_v27 = vpop.f32.mrf.mxu1  ;;  %v18299_v41 = vld [vmem:[#allocation99_spill] sm:$0xff] }
 0x320   :  { %18285 = vst [vmem:[#allocation84_spill] sm:$0xff] %v13496_v13  ;;  %v9499_v47 = vpop.eup %9498  ;;  %v6009_v12 = vadd.f32 1.0, %v9497_v58  ;;  %v13511_v26 = vmul.f32 0.5, %v3978_v61  ;;  %v13513_v44 = vpop.f32.mrf.mxu0  ;;  %v18293_v63 = vpack.c.bf16 %v18291_v25, %v18292_v8  ;;  %9516 = vtanh.f32 %v13498_v18 }
 0x321   :  { %4284 = vmatmul.mubr.bf16.gmra.mxu1 %v18290_v32  ;;  %v2978_v50 = vadd.f32 1.0, %v9499_v47  ;;  %v13522_v32 = vmul.f32 0.5, %v2147_v60  ;;  %9518 = vtanh.f32 %v13509_v56  ;;  %v2158_v61 = vadd.f32 %v12897_v5, %v13087_v59  ;;  %v13541_v25 = vpop.f32.mrf.mxu1 }
 0x322   :  { %3784 = vmatmul.mubr.bf16.gmra.mxu0 %v18293_v63  ;;  %4293 = vmatprep.mubr.bf16.mxu1 %v17973_v11  ;;  %v9501_v4 = vpop.eup %9500  ;;  %v6521_v6 = vmul.f32 %v6009_v12, %v13376_v16  ;;  %v13529_v63 = vmul.f32 0.5, %v3980_v0  ;;  %v13533_v58 = vpop.f32.mrf.mxu0  ;;  %9520 = vtanh.f32 %v13511_v26  ;;  %v3982_v47 = vadd.f32 %v13092_v57, %v11988_v46 }
 0x323   :  { %3793 = vmatprep.mubr.bf16.mxu0 %v17973_v11  ;;  %v13536_v39 = vmul.f32 %v2978_v50, %v13387_v62  ;;  %v6010_v60 = vadd.f32 1.0, %v9501_v4  ;;  %v9503_v16 = vpop.eup %9502  ;;  %9522 = vtanh.f32 %v13522_v32  ;;  %v13544_v0 = vmul.f32 0.5, %v2158_v61  ;;  %v13554_v24 = vpop.f32.mrf.mxu1 }
 0x324   :  { %v7069_v12 = vadd.f32 %v7068_v45, %v6521_v6  ;;  %v2150_v59 = vadd.f32 %v12897_v5, %v13099_v36  ;;  %v13548_v8 = vpop.f32.mrf.mxu0  ;;  %v9505_v62 = vpop.eup %9504  ;;  %v2983_v57 = vadd.f32 1.0, %v9503_v16  ;;  %9524 = vtanh.f32 %v13529_v63  ;;  %18296 = vst [vmem:[#allocation95_spill] sm:$0xff] %v13554_v24 }
 0x325   :  { %18294 = vst [vmem:[#allocation50_spill] sm:$0xff] %v13536_v39  ;;  %18295 = vst [vmem:[#allocation49_spill] sm:$0xff] %v13548_v8  ;;  %v6522_v4 = vmul.f32 %v6010_v60, %v13402_v48  ;;  %v9507_v45 = vpop.eup %9506  ;;  %v6011_v6 = vadd.f32 1.0, %v9505_v62  ;;  %9526 = vtanh.f32 %v13544_v0  ;;  %v13557_v61 = vmul.f32 0.5, %v3982_v47  ;;  %v13568_v16 = vpop.f32.mrf.mxu1  ;;  %v18298_v62 = vld [vmem:[#allocation101_spill] sm:$0xff] }
 0x326   :  { %v13559_v36 = vmul.f32 0.5, %v2150_v59  ;;  %v13561_v33 = vpop.f32.mrf.mxu0  ;;  %v9509_v13 = vpop.eup %9508  ;;  %v13564_v50 = vmul.f32 %v2983_v57, %v13418_v1  ;;  %v2981_v48 = vadd.f32 1.0, %v9507_v45  ;;  %v3986_v60 = vadd.f32 %v13105_v29, %v11962_v51  ;;  %v18302_v57 = vld [vmem:[#allocation63_spill] sm:$0xff] }
 0x327   :  { %v7033_v8 = vadd.f32 %v7032_v28, %v6522_v4  ;;  %v18300_v39 = vpack.c.bf16 %v18298_v62, %v18299_v41  ;;  %v6523_v59 = vmul.f32 %v6011_v6, %v13422_v31  ;;  %v6012_v24 = vadd.f32 1.0, %v9509_v13  ;;  %v18301_v4 = vld [vmem:[#allocation64_spill] sm:$0xff]  ;;  %v13589_v13 = vpop.f32.mrf.mxu1 }
 0x328   :  { %18297 = vst [vmem:[#allocation93_spill] sm:$0xff] %v13564_v50  ;;  %v9511_v47 = vpop.eup %9510  ;;  %9528 = vtanh.f32 %v13557_v61  ;;  %v2171_v1 = vadd.f32 %v12897_v5, %v13117_v2  ;;  %v13577_v28 = vpop.f32.mrf.mxu0  ;;  %v18303_v29 = vpack.c.bf16 %v18301_v4, %v18302_v57  ;;  %v13584_v41 = vmul.f32 %v2981_v48, %v13424_v14 }
 0x329   :  { %4294 = vmatmul.mubr.bf16.gmra.mxu1 %v18300_v39  ;;  %v9513_v45 = vpop.eup %9512  ;;  %v2984_v39 = vadd.f32 1.0, %v9511_v47  ;;  %9530 = vtanh.f32 %v13559_v36  ;;  %v13587_v31 = vmul.f32 0.5, %v3986_v60  ;;  %v7070_v2 = vadd.f32 %v7069_v12, %v6523_v59  ;;  %v13602_v60 = vpop.f32.mrf.mxu1 }
 0x32a   :  { %3794 = vmatmul.mubr.bf16.gmra.mxu0 %v18303_v29  ;;  %4303 = vmatprep.mubr.bf16.mxu1 %v17973_v11  ;;  %18304 = vst [vmem:[#allocation60_spill] sm:$0xff] %v13584_v41  ;;  %v9515_v5 = vpop.eup %9514  ;;  %v6524_v6 = vmul.f32 %v6012_v24, %v13444_v35  ;;  %v6013_v62 = vadd.f32 1.0, %v9513_v45  ;;  %v13592_v4 = vmul.f32 0.5, %v2171_v1  ;;  %v13594_v57 = vpop.f32.mrf.mxu0  ;;  %v3988_v48 = vadd.f32 %v13132_v20, %v11988_v46  ;;  %v13609_v35 = vld [vmem:[%s17709_s2] ss:$0 sm:$0xff] }
 0x32b   :  { %18305 = vst [vmem:[#allocation59_spill] sm:$0xff] %v13594_v57  ;;  %v13597_v29 = vmul.f32 %v2984_v39, %v13457_v19  ;;  %v2982_v14 = vadd.f32 1.0, %v9515_v5  ;;  %9532 = vtanh.f32 %v13587_v31  ;;  %18307 = vst [vmem:[#allocation99_spill] sm:$0xff] %v13602_v60  ;;  %v18308_v19 = vld [vmem:[#allocation81_spill] sm:$0xff]  ;;  %v13624_v39 = vpop.f32.mrf.mxu1 }
 0x32c   :  { %v7034_v47 = vadd.f32 %v7033_v8, %v6524_v6  ;;  %v6525_v12 = vmul.f32 %v6013_v62, %v13464_v15  ;;  %9534 = vtanh.f32 %v13592_v4  ;;  %v2163_v24 = vadd.f32 %v13609_v35, %v18308_v19  ;;  %v13613_v59 = vpop.f32.mrf.mxu0  ;;  %v18311_v15 = vld [vmem:[#allocation48_spill] sm:$0xff]  ;;  %18312 = vst [vmem:[#allocation81_spill] sm:$0xff] %v13624_v39  ;;  %v18313_v19 = vld [vmem:[#allocation47_spill] sm:$0xff]  ;;  %v18314_v60 = vld [vmem:[#allocation145_spill] sm:$0xff] }
 0x32d   :  { %18306 = vst [vmem:[#allocation101_spill] sm:$0xff] %v13597_v29  ;;  %18309 = vst [vmem:[#allocation64_spill] sm:$0xff] %v13613_v59  ;;  %v13618_v1 = vmul.f32 %v2982_v14, %v13472_v38  ;;  %v13620_v8 = vmul.f32 0.5, %v3988_v48  ;;  %v3990_v45 = vadd.f32 %v18311_v15, %v11962_v51  ;;  %v9517_v5 = vpop.eup %9516  ;;  %v2174_v59 = vadd.f32 %v13609_v35, %v18313_v19 }
 0x32e   :  { %v7071_v6 = vadd.f32 %v7070_v2, %v6525_v12  ;;  %v13626_v62 = vmul.f32 0.5, %v2163_v24  ;;  %v3992_v20 = vadd.f32 %v18314_v60, %v11988_v46  ;;  %v13632_v50 = vpop.f32.mrf.mxu0  ;;  %v9519_v38 = vpop.eup %9518  ;;  %v6014_v48 = vadd.f32 1.0, %v9517_v5  ;;  %v18317_v12 = vld [vmem:[#allocation100_spill] sm:$0xff]  ;;  %v18318_v24 = vld [vmem:[#allocation97_spill] sm:$0xff] }
 0x32f   :  { %18310 = vst [vmem:[#allocation63_spill] sm:$0xff] %v13618_v1  ;;  %18315 = vst [vmem:[#allocation48_spill] sm:$0xff] %v13632_v50  ;;  %9536 = vtanh.f32 %v13620_v8  ;;  %v13637_v15 = vmul.f32 0.5, %v3990_v45  ;;  %v13639_v2 = vpop.f32.mrf.mxu1  ;;  %v18319_v29 = vpack.c.bf16 %v18317_v12, %v18318_v24  ;;  %v9521_v19 = vpop.eup %9520  ;;  %v2987_v39 = vadd.f32 1.0, %v9519_v38  ;;  %v18321_v12 = vld [vmem:[#allocation137_spill] sm:$0xff] }
 0x330   :  { %18316 = vst [vmem:[#allocation47_spill] sm:$0xff] %v13639_v2  ;;  %9538 = vtanh.f32 %v13626_v62  ;;  %v13645_v60 = vmul.f32 0.5, %v2174_v59  ;;  %v13647_v50 = vmul.f32 0.5, %v3992_v20  ;;  %v13649_v14 = vpop.f32.mrf.mxu0  ;;  %v9523_v45 = vpop.eup %9522  ;;  %v6526_v5 = vmul.f32 %v6014_v48, %v13498_v18 }
 0x331   :  { %4304 = vmatmul.mubr.bf16.gmra.mxu1 %v18319_v29  ;;  %18320 = vst [vmem:[#allocation145_spill] sm:$0xff] %v13649_v14  ;;  %v6015_v41 = vadd.f32 1.0, %v9521_v19  ;;  %9540 = vtanh.f32 %v13637_v15  ;;  %v2166_v29 = vadd.f32 %v13609_v35, %v18321_v12  ;;  %v13656_v38 = vpop.f32.mrf.mxu1  ;;  %v9525_v24 = vpop.eup %9524  ;;  %v13659_v59 = vmul.f32 %v2987_v39, %v13509_v56 }
 0x332   :  { %4313 = vmatprep.mubr.bf16.mxu1 %v17973_v11  ;;  %18322 = vst [vmem:[#allocation100_spill] sm:$0xff] %v13656_v38  ;;  %v2985_v20 = vadd.f32 1.0, %v9523_v45  ;;  %9542 = vtanh.f32 %v13645_v60  ;;  %v3996_v1 = vadd.f32 %v13172_v55, %v11962_v51  ;;  %v13664_v14 = vpop.f32.mrf.mxu0  ;;  %v9527_v18 = vpop.eup %9526  ;;  %v7035_v48 = vadd.f32 %v7034_v47, %v6526_v5 }
 0x333   :  { %18323 = vst [vmem:[#allocation97_spill] sm:$0xff] %v13659_v59  ;;  %18324 = vst [vmem:[#allocation137_spill] sm:$0xff] %v13664_v14  ;;  %v6527_v19 = vmul.f32 %v6015_v41, %v13511_v26  ;;  %v6016_v2 = vadd.f32 1.0, %v9525_v24  ;;  %9544 = vtanh.f32 %v13647_v50  ;;  %v13668_v12 = vpop.f32.mrf.mxu1  ;;  %v2988_v39 = vadd.f32 1.0, %v9527_v18  ;;  %v18329_v24 = vld [vmem:[#allocation54_spill] sm:$0xff]  ;;  %v18332_v18 = vld [vmem:[#allocation104_spill] sm:$0xff] }
 0x334   :  { %v13671_v56 = vmul.f32 %v2985_v20, %v13522_v32  ;;  %v13673_v45 = vmul.f32 0.5, %v2166_v29  ;;  %v13675_v38 = vmul.f32 0.5, %v3996_v1  ;;  %v13677_v55 = vpop.f32.mrf.mxu0  ;;  %v2187_v26 = vadd.f32 %v13609_v35, %v13183_v52 }
 0x335   :  { %18326 = vst [vmem:[#allocation156_spill] sm:$0xff] %v13677_v55  ;;  %v9529_v14 = vpop.eup %9528  ;;  %v7072_v57 = vadd.f32 %v7071_v6, %v6527_v19  ;;  %v6528_v47 = vmul.f32 %v6016_v2, %v13529_v63  ;;  %v3998_v41 = vadd.f32 %v13192_v10, %v11988_v46  ;;  %v13684_v5 = vpop.f32.mrf.mxu1  ;;  %v13687_v29 = vmul.f32 %v2988_v39, %v13544_v0  ;;  %v18333_v19 = vld [vmem:[#allocation103_spill] sm:$0xff]  ;;  %v18341_v39 = vld [vmem:[#allocation76_spill] sm:$0xff] }
 0x336   :  { %18325 = vst [vmem:[#allocation155_spill] sm:$0xff] %v13671_v56  ;;  %18327 = vst [vmem:[#allocation157_spill] sm:$0xff] %v13684_v5  ;;  %v9531_v32 = vpop.eup %9530  ;;  %v6017_v1 = vadd.f32 1.0, %v9529_v14  ;;  %9546 = vtanh.f32 %v13673_v45  ;;  %v2179_v6 = vadd.f32 %v13609_v35, %v18329_v24  ;;  %v13692_v20 = vpop.f32.mrf.mxu0  ;;  %v13695_v52 = vmul.f32 0.5, %v2187_v26 }
 0x337   :  { %18328 = vst [vmem:[#allocation158_spill] sm:$0xff] %v13687_v29  ;;  %18330 = vst [vmem:[#allocation54_spill] sm:$0xff] %v13692_v20  ;;  %v7036_v63 = vadd.f32 %v7035_v48, %v6528_v47  ;;  %v2986_v2 = vadd.f32 1.0, %v9531_v32  ;;  %9548 = vtanh.f32 %v13675_v38  ;;  %v13697_v10 = vpop.f32.mrf.mxu1  ;;  %v18334_v0 = vpack.c.bf16 %v18332_v18, %v18333_v19  ;;  %v18343_v29 = vld [vmem:[#allocation146_spill] sm:$0xff] }
 0x338   :  { %18331 = vst [vmem:[#allocation159_spill] sm:$0xff] %v13697_v10  ;;  %v9533_v14 = vpop.eup %9532  ;;  %v6529_v24 = vmul.f32 %v6017_v1, %v13557_v61  ;;  %v13705_v5 = vmul.f32 0.5, %v3998_v41  ;;  %v13707_v48 = vmul.f32 0.5, %v2179_v6  ;;  %v13709_v47 = vpop.f32.mrf.mxu0  ;;  %9550 = vtanh.f32 %v13695_v52 }
 0x339   :  { %4314 = vmatmul.mubr.bf16.gmra.mxu1 %v18334_v0  ;;  %18335 = vst [vmem:[#allocation104_spill] sm:$0xff] %v13709_v47  ;;  %v9535_v26 = vpop.eup %9534  ;;  %v13713_v32 = vmul.f32 %v2986_v2, %v13559_v36  ;;  %v6018_v18 = vadd.f32 1.0, %v9533_v14  ;;  %v4000_v19 = vadd.f32 %v13210_v3, %v11962_v51  ;;  %v13718_v0 = vpop.f32.mrf.mxu1  ;;  %v2190_v1 = vadd.f32 %v13609_v35, %v13218_v9 }
 0x33a   :  { %4323 = vmatprep.mubr.bf16.mxu1 %v17973_v11  ;;  %18337 = vst [vmem:[#allocation160_spill] sm:$0xff] %v13718_v0  ;;  %v7073_v61 = vadd.f32 %v7072_v57, %v6529_v24  ;;  %v2991_v41 = vadd.f32 1.0, %v9535_v26  ;;  %9552 = vtanh.f32 %v13705_v5  ;;  %v18340_v26 = vld [vmem:[#allocation53_spill] sm:$0xff]  ;;  %v2182_v6 = vadd.f32 %v13609_v35, %v18341_v39  ;;  %v13740_v59 = vpop.f32.mrf.mxu0 }
 0x33b   :  { %18336 = vst [vmem:[#allocation103_spill] sm:$0xff] %v13713_v32  ;;  %v6530_v36 = vmul.f32 %v6018_v18, %v13587_v31  ;;  %9554 = vtanh.f32 %v13707_v48  ;;  %v13727_v2 = vmul.f32 0.5, %v4000_v19  ;;  %v13729_v14 = vpop.f32.mrf.mxu1  ;;  %v13734_v24 = vmul.f32 0.5, %v2190_v1  ;;  %18342 = vst [vmem:[#allocation53_spill] sm:$0xff] %v13740_v59  ;;  %v18347_v59 = vld [vmem:[#allocation102_spill] sm:$0xff] }
 0x33c   :  { %18338 = vst [vmem:[#allocation161_spill] sm:$0xff] %v13729_v14  ;;  %v9537_v3 = vpop.eup %9536  ;;  %v13732_v57 = vmul.f32 %v2991_v41, %v13592_v4  ;;  %v4002_v9 = vadd.f32 %v18340_v26, %v11988_v46  ;;  %v4006_v56 = vadd.f32 %v18343_v29, %v11962_v51  ;;  %v13750_v32 = vmul.f32 0.5, %v2182_v6 }
 0x33d   :  { %v9539_v31 = vpop.eup %9538  ;;  %v7037_v18 = vadd.f32 %v7036_v63, %v6530_v36  ;;  %v6019_v19 = vadd.f32 1.0, %v9537_v3  ;;  %9556 = vtanh.f32 %v13727_v2  ;;  %v13745_v4 = vpop.f32.mrf.mxu1  ;;  %v2203_v3 = vadd.f32 %v13609_v35, %v13251_v53 }
 0x33e   :  { %18339 = vst [vmem:[#allocation162_spill] sm:$0xff] %v13732_v57  ;;  %18344 = vst [vmem:[#allocation76_spill] sm:$0xff] %v13745_v4  ;;  %v9541_v41 = vpop.eup %9540  ;;  %v2989_v1 = vadd.f32 1.0, %v9539_v31  ;;  %9558 = vtanh.f32 %v13734_v24  ;;  %v13748_v26 = vmul.f32 0.5, %v4002_v9  ;;  %v13753_v36 = vmul.f32 0.5, %v4006_v56  ;;  %v18346_v4 = vld [vmem:[#allocation18_spill] sm:$0xff] }
 0x33f   :  { %v9543_v39 = vpop.eup %9542  ;;  %v6531_v14 = vmul.f32 %v6019_v19, %v13620_v8  ;;  %v6020_v63 = vadd.f32 1.0, %v9541_v41  ;;  %v13757_v29 = vpop.f32.mrf.mxu1  ;;  %v18348_v31 = vpack.c.bf16 %v18346_v4, %v18347_v59  ;;  %v18350_v8 = vld [vmem:[#allocation87_spill] sm:$0xff]  ;;  %v13779_v4 = vmul.f32 0.5, %v2203_v3 }
 0x340   :  { %18345 = vst [vmem:[#allocation146_spill] sm:$0xff] %v13757_v29  ;;  %v9545_v0 = vpop.eup %9544  ;;  %v13763_v9 = vmul.f32 %v2989_v1, %v13626_v62  ;;  %v2992_v6 = vadd.f32 1.0, %v9543_v39  ;;  %9560 = vtanh.f32 %v13748_v26  ;;  %v4008_v56 = vadd.f32 %v18350_v8, %v11988_v46  ;;  %v13768_v19 = vpop.f32.mrf.mxu0 }
 0x341   :  { %4324 = vmatmul.mubr.bf16.gmra.mxu1 %v18348_v31  ;;  %18351 = vst [vmem:[#allocation102_spill] sm:$0xff] %v13768_v19  ;;  %v7074_v53 = vadd.f32 %v7073_v61, %v6531_v14  ;;  %v6532_v41 = vmul.f32 %v6020_v63, %v13637_v15  ;;  %v6021_v29 = vadd.f32 1.0, %v9545_v0  ;;  %9562 = vtanh.f32 %v13750_v32  ;;  %v13773_v59 = vpop.f32.mrf.mxu1  ;;  %v18354_v14 = vld [vmem:[#allocation52_spill] sm:$0xff]  ;;  %v18355_v0 = vld [vmem:[#allocation51_spill] sm:$0xff] }
 0x342   :  { %18349 = vst [vmem:[#allocation18_spill] sm:$0xff] %v13763_v9  ;;  %4333 = vmatprep.mubr.bf16.mxu1 %v17973_v11  ;;  %18352 = vst [vmem:[#allocation87_spill] sm:$0xff] %v13773_v59  ;;  %v13776_v62 = vmul.f32 %v2992_v6, %v13645_v60  ;;  %9564 = vtanh.f32 %v13753_v36  ;;  %v13781_v1 = vmul.f32 0.5, %v4008_v56  ;;  %v2195_v15 = vadd.f32 %v13609_v35, %v18354_v14  ;;  %v13795_v56 = vpop.f32.mrf.mxu0 }
 0x343   :  { %v9547_v39 = vpop.eup %9546  ;;  %v7038_v31 = vadd.f32 %v7037_v18, %v6532_v41  ;;  %v6533_v61 = vmul.f32 %v6021_v29, %v13647_v50  ;;  %v4010_v63 = vadd.f32 %v18355_v0, %v11962_v51  ;;  %v13788_v8 = vpop.f32.mrf.mxu1  ;;  %9566 = vtanh.f32 %v13779_v4  ;;  %18357 = vst [vmem:[#allocation51_spill] sm:$0xff] %v13795_v56 }
 0x344   :  { %18353 = vst [vmem:[#allocation163_spill] sm:$0xff] %v13776_v62  ;;  %18356 = vst [vmem:[#allocation52_spill] sm:$0xff] %v13788_v8  ;;  %v9549_v60 = vpop.eup %9548  ;;  %v2990_v3 = vadd.f32 1.0, %v9547_v39  ;;  %v2206_v18 = vadd.f32 %v13609_v35, %v13283_v49  ;;  %9568 = vtanh.f32 %v13781_v1  ;;  %v13798_v41 = vmul.f32 0.5, %v2195_v15  ;;  %v18368_v62 = vld [vmem:[#allocation109_spill] sm:$0xff] }
 0x345   :  { %v7075_v50 = vadd.f32 %v7074_v53, %v6533_v61  ;;  %v6022_v29 = vadd.f32 1.0, %v9549_v60  ;;  %v13800_v14 = vpop.f32.mrf.mxu1  ;;  %v9551_v0 = vpop.eup %9550  ;;  %v13805_v39 = vmul.f32 0.5, %v4010_v63  ;;  %v4012_v49 = vadd.f32 %v13288_v43, %v11988_v46 }
 0x346   :  { %18358 = vst [vmem:[#allocation164_spill] sm:$0xff] %v13800_v14  ;;  %v13803_v8 = vmul.f32 %v2990_v3, %v13673_v45  ;;  %v13807_v6 = vmul.f32 0.5, %v2206_v18  ;;  %v2995_v61 = vadd.f32 1.0, %v9551_v0  ;;  %9570 = vtanh.f32 %v13798_v41  ;;  %v18361_v45 = vld [vmem:[#allocation16_spill] sm:$0xff]  ;;  %v18362_v3 = vld [vmem:[#allocation65_spill] sm:$0xff]  ;;  %v18369_v14 = vld [vmem:[#allocation130_spill] sm:$0xff] }
 0x347   :  { %v9553_v57 = vpop.eup %9552  ;;  %v6534_v53 = vmul.f32 %v6022_v29, %v13675_v38  ;;  %v2198_v15 = vadd.f32 %v13609_v35, %v13297_v23  ;;  %v13815_v60 = vpop.f32.mrf.mxu1  ;;  %v18363_v63 = vpack.c.bf16 %v18361_v45, %v18362_v3  ;;  %9572 = vtanh.f32 %v13805_v39  ;;  %v18365_v23 = vld [vmem:[#allocation131_spill] sm:$0xff] }
 0x348   :  { %18359 = vst [vmem:[#allocation165_spill] sm:$0xff] %v13803_v8  ;;  %18360 = vst [vmem:[#allocation166_spill] sm:$0xff] %v13815_v60  ;;  %v9555_v18 = vpop.eup %9554  ;;  %v6023_v43 = vadd.f32 1.0, %v9553_v57  ;;  %v13823_v38 = vmul.f32 0.5, %v4012_v49  ;;  %v13825_v29 = vpop.f32.mrf.mxu0  ;;  %v13829_v0 = vmul.f32 0.5, %v18365_v23  ;;  %v18366_v60 = vld [vmem:[#allocation19_spill] sm:$0xff]  ;;  %9574 = vtanh.f32 %v13807_v6 }
 0x349   :  { %4334 = vmatmul.mubr.bf16.gmra.mxu1 %v18363_v63  ;;  %18364 = vst [vmem:[#allocation16_spill] sm:$0xff] %v13825_v29  ;;  %v3848_v45 = vadd.f32 %v18366_v60, %v11988_v46  ;;  %v7039_v3 = vadd.f32 %v7038_v31, %v6534_v53  ;;  %v13834_v63 = vpop.f32.mrf.mxu1  ;;  %v3850_v49 = vadd.f32 %v18368_v62, %v11962_v51  ;;  %v13840_v8 = vmul.f32 0.5, %v2198_v15  ;;  %v18370_v60 = vld [vmem:[#allocation112_spill] sm:$0xff] }
 0x34a   :  { %4343 = vmatprep.mubr.bf16.mxu1 %v17973_v11  ;;  %18367 = vst [vmem:[#allocation65_spill] sm:$0xff] %v13834_v63  ;;  %v9557_v57 = vpop.eup %9556  ;;  %v6535_v9 = vmul.f32 %v6023_v43, %v13705_v5  ;;  %9576 = vtanh.f32 %v13823_v38  ;;  %v3852_v31 = vadd.f32 %v18370_v60, %v11988_v46  ;;  %v2993_v53 = vadd.f32 1.0, %v9555_v18  ;;  %v13851_v5 = vpop.f32.mrf.mxu0 }
 0x34b   :  { %v9559_v23 = vpop.eup %9558  ;;  %9578 = vtanh.f32 %v18369_v14  ;;  %v6024_v59 = vadd.f32 1.0, %v9557_v57  ;;  %v13845_v29 = vpop.f32.mrf.mxu1  ;;  %v13848_v63 = vmul.f32 %v2995_v61, %v13695_v52  ;;  %18373 = vst [vmem:[#allocation109_spill] sm:$0xff] %v13851_v5  ;;  %v13854_v43 = vmul.f32 0.5, %v3848_v45 }
 0x34c   :  { %18371 = vst [vmem:[#allocation131_spill] sm:$0xff] %v13845_v29  ;;  %v7076_v62 = vadd.f32 %v7075_v50, %v6535_v9  ;;  %v2996_v56 = vadd.f32 1.0, %v9559_v23  ;;  %9580 = vtanh.f32 %v13840_v8  ;;  %v4016_v18 = vadd.f32 %v13303_v34, %v11962_v51  ;;  %v18376_v23 = vld [vmem:[#allocation90_spill] sm:$0xff]  ;;  %v13883_v10 = vpop.f32.mrf.mxu0 }
 0x34d   :  { %18372 = vst [vmem:[#allocation19_spill] sm:$0xff] %v13848_v63  ;;  %v9561_v15 = vpop.eup %9560  ;;  %9582 = vtanh.f32 %v13829_v0  ;;  %v6536_v60 = vmul.f32 %v6024_v59, %v13727_v2  ;;  %v13859_v57 = vpop.f32.mrf.mxu1  ;;  %v13861_v61 = vmul.f32 0.5, %v3850_v49  ;;  %v2219_v29 = vadd.f32 %v13609_v35, %v18376_v23  ;;  %v18380_v49 = vld [vmem:[#allocation66_spill] sm:$0xff] }
 0x34e   :  { %18374 = vst [vmem:[#allocation130_spill] sm:$0xff] %v13859_v57  ;;  %v9563_v52 = vpop.eup %9562  ;;  %v13864_v9 = vmul.f32 %v2996_v56, %v13734_v24  ;;  %v6025_v50 = vadd.f32 1.0, %v9561_v15  ;;  %v13868_v45 = vmul.f32 0.5, %v3852_v31  ;;  %v13871_v2 = vmul.f32 %v2993_v53, %v13707_v48  ;;  %v18379_v57 = vld [vmem:[#allocation17_spill] sm:$0xff]  ;;  %v18382_v31 = vld [vmem:[#allocation58_spill] sm:$0xff] }
 0x34f   :  { %v9565_v5 = vpop.eup %9564  ;;  %v7040_v59 = vadd.f32 %v7039_v3, %v6536_v60  ;;  %v2994_v34 = vadd.f32 1.0, %v9563_v52  ;;  %v13873_v19 = vpop.f32.mrf.mxu1  ;;  %v18381_v47 = vpack.c.bf16 %v18379_v57, %v18380_v49  ;;  %v4018_v23 = vadd.f32 %v18382_v31, %v11988_v46  ;;  %18383 = vst [vmem:[#allocation17_spill] sm:$0xff] %v13883_v10  ;;  %v18385_v53 = vld [vmem:[#allocation46_spill] sm:$0xff]  ;;  %v18387_v57 = vld [vmem:[#allocation120_spill] sm:$0xff] }
 0x350   :  { %18375 = vst [vmem:[#allocation112_spill] sm:$0xff] %v13864_v9  ;;  %18377 = vst [vmem:[#allocation90_spill] sm:$0xff] %v13871_v2  ;;  %v6537_v56 = vmul.f32 %v6025_v50, %v13748_v26  ;;  %v6026_v15 = vadd.f32 1.0, %v9565_v5  ;;  %v9567_v48 = vpop.eup %9566  ;;  %9584 = vtanh.f32 %v13854_v43  ;;  %v4020_v60 = vadd.f32 %v18385_v53, %v11962_v51 }
 0x351   :  { %18378 = vst [vmem:[#allocation167_spill] sm:$0xff] %v13873_v19  ;;  %4344 = vmatmul.mubr.bf16.gmra.mxu1 %v18381_v47  ;;  %v13888_v3 = vmul.f32 %v2994_v34, %v13750_v32  ;;  %v13890_v47 = vmul.f32 0.5, %v4016_v18  ;;  %v13894_v26 = vpop.f32.mrf.mxu1  ;;  %v9569_v5 = vpop.eup %9568  ;;  %v5953_v52 = vadd.f32 1.0, %v18387_v57  ;;  %v13898_v31 = vmul.f32 0.5, %v2219_v29 }
 0x352   :  { %4353 = vmatprep.mubr.bf16.mxu1 %v17973_v11  ;;  %18386 = vst [vmem:[#allocation58_spill] sm:$0xff] %v13894_v26  ;;  %v7077_v50 = vadd.f32 %v7076_v62, %v6537_v56  ;;  %v6538_v49 = vmul.f32 %v6026_v15, %v13753_v36  ;;  %9586 = vtanh.f32 %v13861_v61  ;;  %v2999_v18 = vadd.f32 1.0, %v9567_v48  ;;  %v18389_v62 = vld [vmem:[#allocation57_spill] sm:$0xff]  ;;  %v13910_v29 = vpop.f32.mrf.mxu0 }
 0x353   :  { %18384 = vst [vmem:[#allocation66_spill] sm:$0xff] %v13888_v3  ;;  %v6027_v34 = vadd.f32 1.0, %v9569_v5  ;;  %v13903_v24 = vpop.f32.mrf.mxu1  ;;  %v9571_v53 = vpop.eup %9570  ;;  %9588 = vtanh.f32 %v13868_v45  ;;  %v13906_v9 = vmul.f32 0.5, %v4018_v23  ;;  %v2211_v36 = vadd.f32 %v13609_v35, %v18389_v62  ;;  %18390 = vst [vmem:[#allocation120_spill] sm:$0xff] %v13910_v29  ;;  %v18391_v5 = vld [vmem:[#allocation139_spill] sm:$0xff]  ;;  %v18393_v23 = vld [vmem:[#allocation122_spill] sm:$0xff] }
 0x354   :  { %18388 = vst [vmem:[#allocation46_spill] sm:$0xff] %v13903_v24  ;;  %v7041_v63 = vadd.f32 %v7040_v59, %v6538_v49  ;;  %v9573_v56 = vpop.eup %9572  ;;  %9590 = vtanh.f32 %v13890_v47  ;;  %v13914_v48 = vmul.f32 0.5, %v4020_v60  ;;  %v2222_v57 = vadd.f32 %v13609_v35, %v18391_v5  ;;  %v18394_v24 = vld [vmem:[#allocation29_spill] sm:$0xff]  ;;  %v18397_v5 = vld [vmem:[#allocation106_spill] sm:$0xff]  ;;  %v18398_v29 = vld [vmem:[#allocation20_spill] sm:$0xff] }
 0x355   :  { %v6539_v15 = vmul.f32 %v6027_v34, %v13781_v1  ;;  %v13918_v32 = vpop.f32.mrf.mxu1  ;;  %v9575_v59 = vpop.eup %9574  ;;  %v5954_v49 = vadd.f32 1.0, %v18393_v23  ;;  %v2997_v2 = vadd.f32 1.0, %v9571_v53  ;;  %v6028_v3 = vadd.f32 1.0, %v9573_v56 }
 0x356   :  { %18392 = vst [vmem:[#allocation57_spill] sm:$0xff] %v13918_v32  ;;  %9592 = vtanh.f32 %v13898_v31  ;;  %v5955_v26 = vadd.f32 1.0, %v18394_v24  ;;  %v13924_v1 = vmul.f32 %v2999_v18, %v13779_v4  ;;  %v3000_v34 = vadd.f32 1.0, %v9575_v59  ;;  %v13935_v24 = vpop.f32.mrf.mxu0 }
 0x357   :  { %v9577_v62 = vpop.eup %9576  ;;  %v7078_v60 = vadd.f32 %v7077_v50, %v6539_v15  ;;  %v13926_v19 = vpop.f32.mrf.mxu1  ;;  %v18399_v32 = vpack.c.bf16 %v18397_v5, %v18398_v29  ;;  %v6540_v53 = vmul.f32 %v6028_v3, %v13805_v39  ;;  %9594 = vtanh.f32 %v13906_v9  ;;  %18400 = vst [vmem:[#allocation29_spill] sm:$0xff] %v13935_v24  ;;  %v18405_v5 = vld [vmem:[#allocation127_spill] sm:$0xff]  ;;  %v18407_v24 = vld [vmem:[#allocation150_spill] sm:$0xff] }
 0x358   :  { %18395 = vst [vmem:[#allocation139_spill] sm:$0xff] %v13924_v1  ;;  %18396 = vst [vmem:[#allocation122_spill] sm:$0xff] %v13926_v19  ;;  %v9579_v10 = vpop.eup %9578  ;;  %v6029_v56 = vadd.f32 1.0, %v9577_v62  ;;  %v13933_v23 = vmul.f32 0.5, %v2211_v36  ;;  %v13939_v50 = vmul.f32 %v3000_v34, %v13807_v6  ;;  %9596 = vtanh.f32 %v13914_v48  ;;  %v18406_v34 = vld [vmem:[#allocation128_spill] sm:$0xff] }
 0x359   :  { %4354 = vmatmul.mubr.bf16.gmra.mxu1 %v18399_v32  ;;  %v9581_v4 = vpop.eup %9580  ;;  %v13942_v18 = vmul.f32 0.5, %v2222_v57  ;;  %v18402_v32 = vld [vmem:[#allocation149_spill] sm:$0xff]  ;;  %v13946_v3 = vpop.f32.mrf.mxu1  ;;  %v13949_v36 = vmul.f32 %v2997_v2, %v13798_v41  ;;  %v7042_v15 = vadd.f32 %v7041_v63, %v6540_v53  ;;  %v5956_v6 = vadd.f32 1.0, %v18405_v5  ;;  %v18410_v2 = vld [vmem:[#allocation110_spill] sm:$0xff] }
 0x35a   :  { %4363 = vmatprep.mubr.bf16.mxu1 %v17973_v11  ;;  %18401 = vst [vmem:[#allocation106_spill] sm:$0xff] %v13939_v50  ;;  %v4022_v39 = vadd.f32 %v18402_v32, %v11988_v46  ;;  %18403 = vst [vmem:[#allocation20_spill] sm:$0xff] %v13946_v3  ;;  %v9583_v29 = vpop.eup %9582  ;;  %v6541_v59 = vmul.f32 %v6029_v56, %v13823_v38  ;;  %v2998_v62 = vadd.f32 1.0, %v9581_v4  ;;  %v5957_v19 = vadd.f32 1.0, %v18406_v34  ;;  %v18408_v3 = vld [vmem:[#allocation70_spill] sm:$0xff]  ;;  %v13967_v38 = vpop.f32.mrf.mxu0  ;;  %v18412_v56 = vld [vmem:[#allocation27_spill] sm:$0xff] }
 0x35b   :  { %18404 = vst [vmem:[#allocation149_spill] sm:$0xff] %v13949_v36  ;;  %v2214_v32 = vadd.f32 %v13609_v35, %v18407_v24  ;;  %v13958_v20 = vpop.f32.mrf.mxu1  ;;  %v5958_v55 = vadd.f32 1.0, %v18408_v3  ;;  %9598 = vtanh.f32 %v13933_v23  ;;  %v13970_v53 = vmul.f32 %v5953_v52, %v18410_v2  ;;  %v18413_v5 = vld [vmem:[#allocation33_spill] sm:$0xff]  ;;  %v18420_v50 = vld [vmem:[#allocation68_spill] sm:$0xff] }
 0x35c   :  { %v13961_v41 = vadd.f32 %v7078_v60, %v6541_v59  ;;  %v13964_v63 = vmul.f32 %v2998_v62, %v13840_v8  ;;  %v5959_v4 = vadd.f32 1.0, %v18412_v56  ;;  %v5960_v24 = vadd.f32 1.0, %v18413_v5  ;;  %v18414_v52 = vld [vmem:[#allocation113_spill] sm:$0xff] }
 0x35d   :  { %18411 = vst [vmem:[#allocation128_spill] sm:$0xff] %v13970_v53  ;;  %v13974_v34 = vmul.f32 0.5, %v4022_v39  ;;  %v13976_v57 = vpop.f32.mrf.mxu1  ;;  %v9585_v60 = vpop.eup %9584  ;;  %v5961_v3 = vadd.f32 1.0, %v9579_v10  ;;  %9600 = vtanh.f32 %v13942_v18  ;;  %v4026_v59 = vadd.f32 %v13370_v21, %v11962_v51  ;;  %v18417_v10 = vld [vmem:[#allocation105_spill] sm:$0xff]  ;;  %v18418_v53 = vld [vmem:[#allocation22_spill] sm:$0xff] }
 0x35e   :  { %18409 = vst [vmem:[#allocation127_spill] sm:$0xff] %v13964_v63  ;;  %v13984_v62 = vmul.f32 %v5954_v49, %v18414_v52  ;;  %v7043_v2 = vrot.slane %v7042_v15, 4  ;;  %v13986_v56 = vmul.f32 0.5, %v2214_v32  ;;  %v2235_v39 = vadd.f32 %v13609_v35, %v13378_v37  ;;  %v18422_v21 = vld [vmem:[#allocation25_spill] sm:$0xff]  ;;  %v18424_v49 = vld [vmem:[#allocation115_spill] sm:$0xff]  ;;  %v14007_v37 = vpop.f32.mrf.mxu0 }
 0x35f   :  { %v13990_v5 = vpop.f32.mrf.mxu1  ;;  %v18419_v1 = vpack.c.bf16 %v18417_v10, %v18418_v53  ;;  %v9587_v8 = vpop.eup %9586  ;;  %v13996_v36 = vmul.f32 %v5955_v26, %v18420_v50  ;;  %v13999_v63 = vmul.f32 %v5956_v6, %v18422_v21  ;;  %v14002_v52 = vmul.f32 %v5957_v19, %v18424_v49  ;;  %v18426_v32 = vld [vmem:[#allocation67_spill] sm:$0xff] }
 0x360   :  { %18415 = vst [vmem:[#allocation150_spill] sm:$0xff] %v13984_v62  ;;  %18416 = vst [vmem:[#allocation70_spill] sm:$0xff] %v13990_v5  ;;  %v14005_v62 = vmul.f32 %v5958_v55, %v18426_v32  ;;  %v9589_v5 = vpop.eup %9588  ;;  %v5962_v53 = vadd.f32 1.0, %v9583_v29  ;;  %9602 = vtanh.f32 %v13974_v34  ;;  %v4028_v26 = vadd.f32 %v13391_v40, %v11988_v46  ;;  %v18429_v19 = vld [vmem:[#allocation23_spill] sm:$0xff]  ;;  %v18431_v55 = vld [vmem:[#allocation121_spill] sm:$0xff] }
 0x361   :  { %4364 = vmatmul.mubr.bf16.gmra.mxu1 %v18419_v1  ;;  %18421 = vst [vmem:[#allocation110_spill] sm:$0xff] %v13996_v36  ;;  %18423 = vst [vmem:[#allocation27_spill] sm:$0xff] %v13999_v63  ;;  %v5963_v1 = vadd.f32 1.0, %v9585_v60  ;;  %v14013_v50 = vpop.f32.mrf.mxu1  ;;  %v9591_v6 = vpop.eup %9590  ;;  %v14016_v10 = vmul.f32 %v5959_v4, %v18429_v19  ;;  %v14019_v21 = vmul.f32 %v5960_v24, %v18431_v55  ;;  %v14024_v32 = vmul.f32 0.5, %v4026_v59  ;;  %v18455_v63 = vld [vmem:[#allocation108_spill] sm:$0xff] }
 0x362   :  { %18425 = vst [vmem:[#allocation33_spill] sm:$0xff] %v14002_v52  ;;  %18427 = vst [vmem:[#allocation113_spill] sm:$0xff] %v14005_v62  ;;  %4373 = vmatprep.mubr.bf16.mxu1 %v17973_v11  ;;  %v14022_v49 = vmul.f32 %v5961_v3, %v18369_v14  ;;  %v7044_v60 = vadd.f32 %v7043_v2, %v7042_v15  ;;  %9604 = vtanh.f32 %v13986_v56  ;;  %v14027_v52 = vmul.f32 0.5, %v2235_v39  ;;  %v14036_v3 = vpop.f32.mrf.mxu0 }
 0x363   :  { %18428 = vst [vmem:[#allocation105_spill] sm:$0xff] %v14013_v50  ;;  %18430 = vst [vmem:[#allocation22_spill] sm:$0xff] %v14016_v10  ;;  %v9593_v29 = vpop.eup %9592  ;;  %v4030_v40 = vadd.f32 %v13406_v7, %v11962_v51  ;;  %v14031_v62 = vpop.f32.mrf.mxu1  ;;  %v5964_v4 = vadd.f32 1.0, %v9587_v8  ;;  %v5965_v19 = vadd.f32 1.0, %v9589_v5  ;;  %v7080_v24 = vrot.slane %v13961_v41, 4 }
 0x364   :  { %18432 = vst [vmem:[#allocation68_spill] sm:$0xff] %v14019_v21  ;;  %18433 = vst [vmem:[#allocation25_spill] sm:$0xff] %v14022_v49  ;;  %v2238_v14 = vadd.f32 %v13609_v35, %v13413_v30  ;;  %v9595_v59 = vpop.eup %9594  ;;  %v14039_v15 = vmul.f32 %v5962_v53, %v13829_v0  ;;  %v14042_v2 = vmul.f32 %v5963_v1, %v13854_v43  ;;  %v14044_v39 = vmul.f32 0.5, %v4028_v26  ;;  %v18440_v26 = vld [vmem:[#allocation107_spill] sm:$0xff] }
 0x365   :  { %18434 = vst [vmem:[#allocation115_spill] sm:$0xff] %v14031_v62  ;;  %v2227_v7 = vadd.f32 %v13609_v35, %v13396_v22  ;;  %v14048_v8 = vpop.f32.mrf.mxu1  ;;  %v9597_v5 = vpop.eup %9596  ;;  %v6030_v55 = vadd.f32 1.0, %v9591_v6  ;;  %v3003_v49 = vadd.f32 1.0, %v9593_v29  ;;  %9606 = vtanh.f32 %v14024_v32  ;;  %v18439_v22 = vld [vmem:[#allocation111_spill] sm:$0xff] }
 0x366   :  { %18435 = vst [vmem:[#allocation67_spill] sm:$0xff] %v14039_v15  ;;  %18436 = vst [vmem:[#allocation23_spill] sm:$0xff] %v14042_v2  ;;  %v4032_v30 = vadd.f32 %v13420_v42, %v11988_v46  ;;  %v7045_v0 = vrot.slane %v7044_v60, 2  ;;  %9608 = vtanh.f32 %v14027_v52  ;;  %v14054_v43 = vmul.f32 0.5, %v4030_v40  ;;  %v14072_v40 = vpop.f32.mrf.mxu0 }
 0x367   :  { %18437 = vst [vmem:[#allocation121_spill] sm:$0xff] %v14048_v8  ;;  %v2230_v53 = vadd.f32 %v13609_v35, %v13428_v54  ;;  %v14058_v1 = vpop.f32.mrf.mxu1  ;;  %v18441_v2 = vpack.c.bf16 %v18439_v22, %v18440_v26  ;;  %v14064_v6 = vmul.f32 %v5964_v4, %v13861_v61  ;;  %v14067_v29 = vmul.f32 %v5965_v19, %v13868_v45  ;;  %v18444_v61 = vld [vmem:[#allocation55_spill] sm:$0xff] }
 0x368   :  { %18438 = vst [vmem:[#allocation168_spill] sm:$0xff] %v14058_v1  ;;  %v7081_v42 = vadd.f32 %v7080_v24, %v13961_v41  ;;  %v14070_v15 = vmul.f32 0.5, %v2238_v14  ;;  %v9599_v54 = vpop.eup %9598  ;;  %v6031_v35 = vadd.f32 1.0, %v9595_v59  ;;  %9610 = vtanh.f32 %v14044_v39 }
 0x369   :  { %4374 = vmatmul.mubr.bf16.gmra.mxu1 %v18441_v2  ;;  %18442 = vst [vmem:[#allocation111_spill] sm:$0xff] %v14064_v6  ;;  %18443 = vst [vmem:[#allocation107_spill] sm:$0xff] %v14067_v29  ;;  %v14076_v22 = vmul.f32 0.5, %v2227_v7  ;;  %v4036_v4 = vadd.f32 %v18444_v61, %v11962_v51  ;;  %v14080_v2 = vpop.f32.mrf.mxu1  ;;  %v6542_v45 = vmul.f32 %v6030_v55, %v13890_v47  ;;  %v6032_v19 = vadd.f32 1.0, %v9597_v5  ;;  %v18447_v7 = vld [vmem:[#allocation142_spill] sm:$0xff]  ;;  %v18449_v47 = vld [vmem:[#allocation96_spill] sm:$0xff] }
 0x36a   :  { %4383 = vmatprep.mubr.bf16.mxu1 %v17973_v11  ;;  %18445 = vst [vmem:[#allocation55_spill] sm:$0xff] %v14080_v2  ;;  %v14084_v41 = vmul.f32 %v3003_v49, %v13898_v31  ;;  %v14086_v24 = vmul.f32 0.5, %v4032_v30  ;;  %v9601_v14 = vpop.eup %9600  ;;  %v7046_v26 = vadd.f32 %v7045_v0, %v7044_v60  ;;  %9612 = vtanh.f32 %v14054_v43  ;;  %v14098_v49 = vpop.f32.mrf.mxu0  ;;  %v18450_v55 = vld [vmem:[#allocation94_spill] sm:$0xff] }
 0x36b   :  { %v14089_v59 = vmul.f32 0.5, %v2230_v53  ;;  %v3536_v29 = vadd.f32 %v18447_v7, %v11962_v51  ;;  %v14093_v61 = vpop.f32.mrf.mxu1  ;;  %v7082_v6 = vrot.slane %v7081_v42, 2  ;;  %v3001_v10 = vadd.f32 1.0, %v9599_v54  ;;  %v18459_v2 = vld [vmem:[#allocation154_spill] sm:$0xff] }
 0x36c   :  { %18446 = vst [vmem:[#allocation169_spill] sm:$0xff] %v14084_v41  ;;  %18448 = vst [vmem:[#allocation142_spill] sm:$0xff] %v14093_v61  ;;  %9614 = vtanh.f32 %v14070_v15  ;;  %v4038_v31 = vadd.f32 %v18449_v47, %v11988_v46  ;;  %v14101_v60 = vmul.f32 %v6031_v35, %v13906_v9  ;;  %v14104_v5 = vmul.f32 0.5, %v4036_v4  ;;  %v18452_v47 = vld [vmem:[#allocation61_spill] sm:$0xff]  ;;  %v18453_v4 = vld [vmem:[#allocation152_spill] sm:$0xff]  ;;  %v14131_v1 = vpop.f32.mrf.mxu0 }
 0x36d   :  { %9616 = vtanh.f32 %v14076_v22  ;;  %v3538_v30 = vadd.f32 %v18450_v55, %v11988_v46  ;;  %v14108_v0 = vpop.f32.mrf.mxu1  ;;  %v9603_v53 = vpop.eup %9602  ;;  %v6544_v54 = vmul.f32 %v6032_v19, %v13914_v48  ;;  %v3004_v7 = vadd.f32 1.0, %v9601_v14 }
 0x36e   :  { %18451 = vst [vmem:[#allocation96_spill] sm:$0xff] %v14108_v0  ;;  %9618 = vtanh.f32 %v14086_v24  ;;  %v4040_v21 = vadd.f32 %v18452_v47, %v11962_v51  ;;  %v7047_v9 = vrot.slane %v7046_v26, 1  ;;  %v14115_v35 = vmul.f32 0.5, %v3536_v29  ;;  %v18456_v0 = vld [vmem:[#allocation21_spill] sm:$0xff] }
 0x36f   :  { %9620 = vtanh.f32 %v14089_v59  ;;  %v3540_v36 = vadd.f32 %v18453_v4, %v11962_v51  ;;  %v14119_v55 = vpop.f32.mrf.mxu1  ;;  %v18457_v61 = vpack.c.bf16 %v18455_v63, %v18456_v0  ;;  %v9605_v48 = vpop.eup %9604  ;;  %v7083_v19 = vadd.f32 %v7082_v6, %v7081_v42  ;;  %v18460_v63 = vld [vmem:[#allocation43_spill] sm:$0xff] }
 0x370   :  { %18454 = vst [vmem:[#allocation94_spill] sm:$0xff] %v14119_v55  ;;  %v14125_v14 = vmul.f32 %v3001_v10, %v13933_v23  ;;  %v14127_v47 = vmul.f32 0.5, %v4038_v31  ;;  %v4042_v29 = vadd.f32 %v18459_v2, %v11988_v46  ;;  %v6033_v4 = vadd.f32 1.0, %v9603_v53 }
 0x371   :  { %4384 = vmatmul.mubr.bf16.gmra.mxu1 %v18457_v61  ;;  %9622 = vtanh.f32 %v14104_v5  ;;  %v14135_v55 = vmul.f32 0.5, %v3538_v30  ;;  %v3542_v6 = vadd.f32 %v18460_v63, %v11988_v46  ;;  %v14139_v42 = vpop.f32.mrf.mxu1  ;;  %v14141_v23 = vadd.f32 %v6544_v54, %v6542_v45 }
 0x372   :  { %18458 = vst [vmem:[#allocation61_spill] sm:$0xff] %v14125_v14  ;;  %4393 = vmatprep.mubr.bf16.mxu1 %v17973_v11  ;;  %18461 = vst [vmem:[#allocation152_spill] sm:$0xff] %v14139_v42  ;;  %v14144_v10 = vmul.f32 %v3004_v7, %v13942_v18  ;;  %v14146_v2 = vmul.f32 0.5, %v4040_v21  ;;  %v4046_v61 = vadd.f32 %v13504_v17, %v11962_v51  ;;  %v9607_v31 = vpop.eup %9606  ;;  %v3002_v30 = vadd.f32 1.0, %v9605_v48  ;;  %v14162_v17 = vpop.f32.mrf.mxu0 }
 0x373   :  { %v14150_v0 = vadd.f32 %v7047_v9, %v7046_v26  ;;  %9624 = vtanh.f32 %v14115_v35  ;;  %v14153_v53 = vmul.f32 0.5, %v3540_v36  ;;  %v14155_v63 = vpop.f32.mrf.mxu1  ;;  %v9609_v45 = vpop.eup %9608  ;;  %v7084_v54 = vrot.slane %v7083_v19, 1 }
 0x374   :  { %18462 = vst [vmem:[#allocation108_spill] sm:$0xff] %v14144_v10  ;;  %18464 = vst [vmem:[#allocation154_spill] sm:$0xff] %v14155_v63  ;;  %9626 = vtanh.f32 %v14127_v47  ;;  %v14158_v18 = vmul.f32 0.5, %v4042_v29  ;;  %v3546_v21 = vadd.f32 %v13513_v44, %v11962_v51  ;;  %v6545_v26 = vmul.f32 %v6033_v4, %v13974_v34 }
 0x375   :  { %18463 = vst [vmem:[#allocation21_spill] sm:$0xff] %v14150_v0  ;;  %9628 = vtanh.f32 %v14135_v55  ;;  %v14166_v7 = vmul.f32 0.5, %v3542_v6  ;;  %v4048_v36 = vadd.f32 %v13524_v27, %v11988_v46  ;;  %v14170_v9 = vpop.f32.mrf.mxu1  ;;  %v9611_v48 = vpop.eup %9610  ;;  %v6034_v0 = vadd.f32 1.0, %v9607_v31  ;;  %v18469_v31 = vld [vmem:[#allocation116_spill] sm:$0xff] }
 0x376   :  { %18465 = vst [vmem:[#allocation43_spill] sm:$0xff] %v14170_v9  ;;  %9630 = vtanh.f32 %v14146_v2  ;;  %v14173_v29 = vmul.f32 0.5, %v4046_v61  ;;  %v3548_v44 = vadd.f32 %v13533_v58, %v11988_v46  ;;  %v14180_v4 = vmul.f32 %v3002_v30, %v13986_v56  ;;  %v18468_v9 = vld [vmem:[#allocation24_spill] sm:$0xff]  ;;  %v14195_v30 = vpop.f32.mrf.mxu0 }
 0x377   :  { %v3007_v6 = vadd.f32 1.0, %v9609_v45  ;;  %9632 = vtanh.f32 %v14153_v53  ;;  %v14183_v27 = vpop.f32.mrf.mxu1  ;;  %v18470_v63 = vpack.c.bf16 %v18468_v9, %v18469_v31  ;;  %v9613_v61 = vpop.eup %9612  ;;  %v14188_v42 = vadd.f32 %v7084_v54, %v7083_v19  ;;  %v18472_v19 = vld [vmem:[#allocation49_spill] sm:$0xff] }
 0x378   :  { %18466 = vst [vmem:[#allocation170_spill] sm:$0xff] %v14180_v4  ;;  %18467 = vst [vmem:[#allocation171_spill] sm:$0xff] %v14183_v27  ;;  %9634 = vtanh.f32 %v14158_v18  ;;  %v14191_v58 = vmul.f32 0.5, %v3546_v21  ;;  %v4050_v56 = vadd.f32 %v13541_v25, %v11962_v51  ;;  %v6035_v34 = vadd.f32 1.0, %v9611_v48 }
 0x379   :  { %4394 = vmatmul.mubr.bf16.gmra.mxu1 %v18470_v63  ;;  %18471 = vst [vmem:[#allocation24_spill] sm:$0xff] %v14188_v42  ;;  %v9615_v45 = vpop.eup %9614  ;;  %9636 = vtanh.f32 %v14166_v7  ;;  %v14199_v9 = vmul.f32 0.5, %v4048_v36  ;;  %v3550_v63 = vadd.f32 %v18472_v19, %v11962_v51  ;;  %v14203_v54 = vpop.f32.mrf.mxu1  ;;  %v7123_v31 = vadd.f32 %v6545_v26, %v14101_v60  ;;  %v18475_v19 = vld [vmem:[#allocation95_spill] sm:$0xff] }
 0x37a   :  { %4403 = vmatprep.mubr.bf16.mxu1 %v17973_v11  ;;  %18473 = vst [vmem:[#allocation116_spill] sm:$0xff] %v14203_v54  ;;  %v9617_v21 = vpop.eup %9616  ;;  %v6546_v25 = vmul.f32 %v6034_v0, %v14024_v32  ;;  %9638 = vtanh.f32 %v14173_v29  ;;  %v14208_v42 = vmul.f32 0.5, %v3548_v44  ;;  %v14213_v36 = vmul.f32 %v3007_v6, %v14027_v52  ;;  %v14224_v44 = vpop.f32.mrf.mxu0 }
 0x37b   :  { %v9619_v41 = vpop.eup %9618  ;;  %v6036_v10 = vadd.f32 1.0, %v9613_v61  ;;  %v4052_v54 = vadd.f32 %v18475_v19, %v11988_v46  ;;  %v14217_v27 = vpop.f32.mrf.mxu1  ;;  %v3008_v26 = vadd.f32 1.0, %v9615_v45  ;;  %9640 = vtanh.f32 %v14191_v58 }
 0x37c   :  { %18474 = vst [vmem:[#allocation49_spill] sm:$0xff] %v14213_v36  ;;  %18476 = vst [vmem:[#allocation95_spill] sm:$0xff] %v14217_v27  ;;  %v9621_v60 = vpop.eup %9620  ;;  %v14220_v32 = vmul.f32 0.5, %v4050_v56  ;;  %v3552_v0 = vadd.f32 %v13561_v33, %v11988_v46  ;;  %v6547_v52 = vmul.f32 %v6035_v34, %v14044_v39  ;;  %9642 = vtanh.f32 %v14199_v9  ;;  %v18480_v27 = vld [vmem:[#allocation26_spill] sm:$0xff] }
 0x37d   :  { %v14228_v6 = vmul.f32 0.5, %v3550_v63  ;;  %v4056_v61 = vadd.f32 %v13568_v16, %v11962_v51  ;;  %v14232_v19 = vpop.f32.mrf.mxu1  ;;  %v3005_v48 = vadd.f32 1.0, %v9617_v21  ;;  %v6037_v56 = vadd.f32 1.0, %v9619_v41  ;;  %v18479_v16 = vld [vmem:[#allocation114_spill] sm:$0xff] }
 0x37e   :  { %18477 = vst [vmem:[#allocation172_spill] sm:$0xff] %v14232_v19  ;;  %v9623_v45 = vpop.eup %9622  ;;  %9644 = vtanh.f32 %v14208_v42  ;;  %v3556_v33 = vadd.f32 %v13577_v28, %v11962_v51  ;;  %v7087_v14 = vadd.f32 %v14141_v23, %v6546_v25  ;;  %v6548_v39 = vmul.f32 %v6036_v10, %v14054_v43  ;;  %v14254_v23 = vpop.f32.mrf.mxu0 }
 0x37f   :  { %v3006_v34 = vadd.f32 1.0, %v9621_v60  ;;  %v14239_v63 = vmul.f32 0.5, %v4052_v54  ;;  %v14241_v4 = vpop.f32.mrf.mxu1  ;;  %v18481_v19 = vpack.c.bf16 %v18479_v16, %v18480_v27  ;;  %v14247_v41 = vmul.f32 %v3008_v26, %v14070_v15  ;;  %v18483_v15 = vld [vmem:[#allocation59_spill] sm:$0xff] }
 0x380   :  { %18478 = vst [vmem:[#allocation173_spill] sm:$0xff] %v14241_v4  ;;  %v9625_v21 = vpop.eup %9624  ;;  %9646 = vtanh.f32 %v14220_v32  ;;  %v14250_v28 = vmul.f32 0.5, %v3552_v0  ;;  %v4058_v43 = vadd.f32 %v13589_v13, %v11988_v46  ;;  %v6038_v54 = vadd.f32 1.0, %v9623_v45 }
 0x381   :  { %4404 = vmatmul.mubr.bf16.gmra.mxu1 %v18481_v19  ;;  %18482 = vst [vmem:[#allocation114_spill] sm:$0xff] %v14247_v41  ;;  %v9627_v10 = vpop.eup %9626  ;;  %9648 = vtanh.f32 %v14228_v6  ;;  %v14258_v27 = vmul.f32 0.5, %v4056_v61  ;;  %v3558_v25 = vadd.f32 %v18483_v15, %v11988_v46  ;;  %v14262_v60 = vpop.f32.mrf.mxu1  ;;  %v7124_v0 = vadd.f32 %v7123_v31, %v6547_v52  ;;  %v18487_v61 = vld [vmem:[#allocation99_spill] sm:$0xff] }
 0x382   :  { %4413 = vmatprep.mubr.bf16.mxu1 %v17973_v11  ;;  %18484 = vst [vmem:[#allocation26_spill] sm:$0xff] %v14262_v60  ;;  %v9629_v26 = vpop.eup %9628  ;;  %v14265_v19 = vmul.f32 %v3005_v48, %v14076_v22  ;;  %v6549_v13 = vmul.f32 %v6037_v56, %v14086_v24  ;;  %v14268_v16 = vmul.f32 0.5, %v3556_v33  ;;  %v7088_v45 = vadd.f32 %v7087_v14, %v6548_v39  ;;  %v18488_v24 = vld [vmem:[#allocation64_spill] sm:$0xff]  ;;  %v14283_v14 = vpop.f32.mrf.mxu0 }
 0x383   :  { %v9631_v4 = vpop.eup %9630  ;;  %v14271_v8 = vmul.f32 %v3006_v34, %v14089_v59  ;;  %9650 = vtanh.f32 %v14239_v63  ;;  %v4060_v15 = vadd.f32 %v18487_v61, %v11962_v51  ;;  %v14279_v22 = vmul.f32 0.5, %v4058_v43  ;;  %v14289_v39 = vpop.f32.mrf.mxu1 }
 0x384   :  { %18485 = vst [vmem:[#allocation59_spill] sm:$0xff] %v14265_v19  ;;  %v9633_v60 = vpop.eup %9632  ;;  %9652 = vtanh.f32 %v14250_v28  ;;  %v3560_v48 = vadd.f32 %v18488_v24, %v11962_v51  ;;  %v6550_v52 = vmul.f32 %v6038_v54, %v14104_v5  ;;  %v6039_v56 = vadd.f32 1.0, %v9627_v10  ;;  %18489 = vst [vmem:[#allocation99_spill] sm:$0xff] %v14289_v39  ;;  %v18490_v5 = vld [vmem:[#allocation81_spill] sm:$0xff]  ;;  %v18493_v39 = vld [vmem:[#allocation30_spill] sm:$0xff] }
 0x385   :  { %18486 = vst [vmem:[#allocation174_spill] sm:$0xff] %v14271_v8  ;;  %v9635_v59 = vpop.eup %9634  ;;  %9654 = vtanh.f32 %v14258_v27  ;;  %v14287_v33 = vmul.f32 0.5, %v3558_v25  ;;  %v7125_v61 = vadd.f32 %v7124_v0, %v6549_v13  ;;  %v5838_v31 = vadd.f32 1.0, %v9625_v21  ;;  %v14298_v54 = vpop.f32.mrf.mxu1  ;;  %v18492_v25 = vld [vmem:[#allocation126_spill] sm:$0xff] }
 0x386   :  { %v9637_v34 = vpop.eup %9636  ;;  %v6040_v43 = vadd.f32 1.0, %v9631_v4  ;;  %9656 = vtanh.f32 %v14268_v16  ;;  %v5840_v41 = vadd.f32 1.0, %v9633_v60  ;;  %v14294_v62 = vmul.f32 0.5, %v4060_v15  ;;  %18491 = vst [vmem:[#allocation64_spill] sm:$0xff] %v14298_v54  ;;  %v14306_v13 = vpop.f32.mrf.mxu0 }
 0x387   :  { %v9639_v36 = vpop.eup %9638  ;;  %v4062_v10 = vadd.f32 %v18490_v5, %v11988_v46  ;;  %v18494_v50 = vpack.c.bf16 %v18492_v25, %v18493_v39  ;;  %v5839_v21 = vadd.f32 1.0, %v9629_v26  ;;  %v6041_v4 = vadd.f32 1.0, %v9635_v59  ;;  %v14311_v19 = vpop.f32.mrf.mxu1  ;;  %v18496_v39 = vld [vmem:[#allocation48_spill] sm:$0xff] }
 0x388   :  { %9658 = vtanh.f32 %v14279_v22  ;;  %v14304_v0 = vmul.f32 0.5, %v3560_v48  ;;  %v9641_v60 = vpop.eup %9640  ;;  %v7089_v15 = vadd.f32 %v7088_v45, %v6550_v52  ;;  %v6551_v5 = vmul.f32 %v6039_v56, %v14127_v47  ;;  %18495 = vst [vmem:[#allocation81_spill] sm:$0xff] %v14311_v19  ;;  %v18497_v45 = vld [vmem:[#allocation47_spill] sm:$0xff] }
 0x389   :  { %4414 = vmatmul.mubr.bf16.gmra.mxu1 %v18494_v50  ;;  %v5841_v24 = vadd.f32 1.0, %v9637_v34  ;;  %9660 = vtanh.f32 %v14287_v33  ;;  %v9643_v50 = vpop.eup %9642  ;;  %v6350_v26 = vmul.f32 %v5838_v31, %v14115_v35  ;;  %v6552_v59 = vmul.f32 %v6040_v43, %v14146_v2  ;;  %v14323_v56 = vpop.f32.mrf.mxu1 }
 0x38a   :  { %4423 = vmatprep.mubr.bf16.mxu1 %v17973_v11  ;;  %v6042_v48 = vadd.f32 1.0, %v9639_v36  ;;  %v3562_v25 = vadd.f32 %v18496_v39, %v11988_v46  ;;  %v6352_v54 = vmul.f32 %v5840_v41, %v14153_v53  ;;  %9662 = vtanh.f32 %v14294_v62  ;;  %18498 = vst [vmem:[#allocation126_spill] sm:$0xff] %v14323_v56  ;;  %v14328_v31 = vpop.f32.mrf.mxu0 }
 0x38b   :  { %v9645_v8 = vpop.eup %9644  ;;  %v14319_v47 = vmul.f32 0.5, %v4062_v10  ;;  %v4066_v52 = vadd.f32 %v18497_v45, %v11962_v51  ;;  %v6351_v35 = vmul.f32 %v5839_v21, %v14135_v55  ;;  %v6553_v2 = vmul.f32 %v6041_v4, %v14158_v18  ;;  %v18499_v10 = vld [vmem:[#allocation145_spill] sm:$0xff] }
 0x38c   :  { %v5842_v36 = vadd.f32 1.0, %v9641_v60  ;;  %9664 = vtanh.f32 %v14304_v0  ;;  %v7126_v53 = vadd.f32 %v7125_v61, %v6551_v5  ;;  %v6353_v41 = vmul.f32 %v5841_v24, %v14166_v7  ;;  %v18500_v61 = vld [vmem:[#allocation100_spill] sm:$0xff]  ;;  %v14341_v7 = vpop.f32.mrf.mxu1  ;;  %v18503_v5 = vld [vmem:[#allocation123_spill] sm:$0xff] }
 0x38d   :  { %v9647_v34 = vpop.eup %9646  ;;  %v6043_v43 = vadd.f32 1.0, %v9643_v50  ;;  %v3566_v39 = vadd.f32 %v18499_v10, %v11962_v51  ;;  %v7090_v19 = vadd.f32 %v7089_v15, %v6552_v59  ;;  %v6554_v56 = vmul.f32 %v6042_v48, %v14173_v29  ;;  %18501 = vst [vmem:[#allocation30_spill] sm:$0xff] %v14341_v7  ;;  %v18502_v24 = vld [vmem:[#allocation124_spill] sm:$0xff]  ;;  %v14349_v48 = vpop.f32.mrf.mxu0 }
 0x38e   :  { %v9649_v45 = vpop.eup %9648  ;;  %v5843_v55 = vadd.f32 1.0, %v9645_v8  ;;  %v14334_v21 = vmul.f32 0.5, %v3562_v25  ;;  %v6864_v18 = vadd.f32 %v6352_v54, %v6350_v26  ;;  %9666 = vtanh.f32 %v14319_v47  ;;  %v18505_v54 = vld [vmem:[#allocation137_spill] sm:$0xff]  ;;  %18506 = vst [vmem:[#allocation48_spill] sm:$0xff] %v14349_v48 }
 0x38f   :  { %v14337_v4 = vmul.f32 0.5, %v4066_v52  ;;  %v4068_v60 = vadd.f32 %v18500_v61, %v11988_v46  ;;  %v18504_v50 = vpack.c.bf16 %v18502_v24, %v18503_v5  ;;  %v7127_v59 = vadd.f32 %v7126_v53, %v6553_v2 }
 0x390   :  { %v9651_v15 = vpop.eup %9650  ;;  %v6354_v8 = vmul.f32 %v5842_v36, %v14191_v58  ;;  %v6044_v29 = vadd.f32 1.0, %v9647_v34  ;;  %v3568_v26 = vadd.f32 %v18505_v54, %v11988_v46  ;;  %v6901_v52 = vadd.f32 %v6353_v41, %v6351_v35  ;;  %v14364_v41 = vpop.f32.mrf.mxu1 }
 0x391   :  { %4424 = vmatmul.mubr.bf16.gmra.mxu1 %v18504_v50  ;;  %v9653_v25 = vpop.eup %9652  ;;  %v6555_v10 = vmul.f32 %v6043_v43, %v14199_v9  ;;  %v5844_v61 = vadd.f32 1.0, %v9649_v45  ;;  %v14353_v7 = vmul.f32 0.5, %v3566_v39  ;;  %v7091_v5 = vadd.f32 %v7090_v19, %v6554_v56  ;;  %v18507_v9 = vld [vmem:[#allocation156_spill] sm:$0xff]  ;;  %18508 = vst [vmem:[#allocation47_spill] sm:$0xff] %v14364_v41  ;;  %v14369_v39 = vpop.f32.mrf.mxu0 }
 0x392   :  { %4433 = vmatprep.mubr.bf16.mxu1 %v17973_v11  ;;  %v9655_v24 = vpop.eup %9654  ;;  %v6355_v2 = vmul.f32 %v5843_v55, %v14208_v42  ;;  %9668 = vtanh.f32 %v14334_v21  ;;  %v4070_v58 = vadd.f32 %v13668_v12, %v11962_v51  ;;  %v6045_v34 = vadd.f32 1.0, %v9651_v15  ;;  %18509 = vst [vmem:[#allocation145_spill] sm:$0xff] %v14369_v39 }
 0x393   :  { %v9657_v36 = vpop.eup %9656  ;;  %9670 = vtanh.f32 %v14337_v4  ;;  %v14360_v53 = vmul.f32 0.5, %v4068_v60  ;;  %v3570_v35 = vadd.f32 %v18507_v9, %v11962_v51  ;;  %v6865_v43 = vadd.f32 %v6864_v18, %v6354_v8  ;;  %v18510_v18 = vld [vmem:[#allocation157_spill] sm:$0xff] }
 0x394   :  { %v6556_v19 = vmul.f32 %v6044_v29, %v14220_v32  ;;  %v5845_v42 = vadd.f32 1.0, %v9653_v25  ;;  %v14367_v56 = vmul.f32 0.5, %v3568_v26  ;;  %v7128_v45 = vadd.f32 %v7127_v59, %v6555_v10  ;;  %v18511_v59 = vld [vmem:[#allocation54_spill] sm:$0xff]  ;;  %v14383_v26 = vpop.f32.mrf.mxu1  ;;  %v18514_v10 = vld [vmem:[#allocation133_spill] sm:$0xff] }
 0x395   :  { %v9659_v12 = vpop.eup %9658  ;;  %v6356_v55 = vmul.f32 %v5844_v61, %v14228_v6  ;;  %v6046_v50 = vadd.f32 1.0, %v9655_v24  ;;  %9672 = vtanh.f32 %v14353_v7  ;;  %v6902_v15 = vadd.f32 %v6901_v52, %v6355_v2  ;;  %18512 = vst [vmem:[#allocation100_spill] sm:$0xff] %v14383_v26  ;;  %v18513_v25 = vld [vmem:[#allocation134_spill] sm:$0xff] }
 0x396   :  { %v9661_v60 = vpop.eup %9660  ;;  %v5846_v54 = vadd.f32 1.0, %v9657_v36  ;;  %v14373_v9 = vmul.f32 0.5, %v4070_v58  ;;  %v4072_v32 = vadd.f32 %v18510_v18, %v11988_v46  ;;  %v6557_v8 = vmul.f32 %v6045_v34, %v14239_v63  ;;  %v14390_v63 = vpop.f32.mrf.mxu0 }
 0x397   :  { %9674 = vtanh.f32 %v14360_v53  ;;  %v14379_v29 = vmul.f32 0.5, %v3570_v35  ;;  %v3572_v6 = vadd.f32 %v18511_v59, %v11988_v46  ;;  %v18515_v52 = vpack.c.bf16 %v18513_v25, %v18514_v10  ;;  %v9663_v61 = vpop.eup %9662  ;;  %18516 = vst [vmem:[#allocation124_spill] sm:$0xff] %v14390_v63  ;;  %v18517_v59 = vld [vmem:[#allocation159_spill] sm:$0xff] }
 0x398   :  { %v7092_v24 = vadd.f32 %v7091_v5, %v6556_v19  ;;  %v6357_v2 = vmul.f32 %v5845_v42, %v14250_v28  ;;  %v6047_v58 = vadd.f32 1.0, %v9659_v12  ;;  %9676 = vtanh.f32 %v14367_v56  ;;  %v18518_v5 = vld [vmem:[#allocation104_spill] sm:$0xff] }
 0x399   :  { %4434 = vmatmul.mubr.bf16.gmra.mxu1 %v18515_v52  ;;  %v9665_v36 = vpop.eup %9664  ;;  %v6866_v34 = vadd.f32 %v6865_v43, %v6356_v55  ;;  %v6558_v35 = vmul.f32 %v6046_v50, %v14258_v27  ;;  %v5847_v18 = vadd.f32 1.0, %v9661_v60  ;;  %v4076_v25 = vadd.f32 %v18517_v59, %v11962_v51  ;;  %v14405_v27 = vpop.f32.mrf.mxu1 }
 0x39a   :  { %4443 = vmatprep.mubr.bf16.mxu1 %v17973_v11  ;;  %v6358_v10 = vmul.f32 %v5846_v54, %v14268_v16  ;;  %9678 = vtanh.f32 %v14373_v9  ;;  %v14398_v28 = vmul.f32 0.5, %v4072_v32  ;;  %v3576_v19 = vadd.f32 %v18518_v5, %v11962_v51  ;;  %18519 = vst [vmem:[#allocation123_spill] sm:$0xff] %v14405_v27  ;;  %v18520_v54 = vld [vmem:[#allocation160_spill] sm:$0xff]  ;;  %v14410_v52 = vpop.f32.mrf.mxu0 }
 0x39b   :  { %v7129_v42 = vadd.f32 %v7128_v45, %v6557_v8  ;;  %v6048_v12 = vadd.f32 1.0, %v9663_v61  ;;  %9680 = vtanh.f32 %v14379_v29  ;;  %v14403_v43 = vmul.f32 0.5, %v3572_v6  ;;  %v9667_v55 = vpop.eup %9666  ;;  %18521 = vst [vmem:[#allocation137_spill] sm:$0xff] %v14410_v52  ;;  %v18522_v6 = vld [vmem:[#allocation53_spill] sm:$0xff] }
 0x39c   :  { %v6903_v50 = vadd.f32 %v6902_v15, %v6357_v2  ;;  %v6559_v60 = vmul.f32 %v6047_v58, %v14279_v22  ;;  %v5848_v16 = vadd.f32 1.0, %v9665_v36  ;;  %v4078_v32 = vadd.f32 %v18520_v54, %v11988_v46  ;;  %v18523_v22 = vld [vmem:[#allocation161_spill] sm:$0xff] }
 0x39d   :  { %v7093_v59 = vadd.f32 %v7092_v24, %v6558_v35  ;;  %v6359_v45 = vmul.f32 %v5847_v18, %v14287_v33  ;;  %v14413_v8 = vmul.f32 0.5, %v4076_v25  ;;  %v3578_v61 = vadd.f32 %v18522_v6, %v11988_v46  ;;  %v18524_v33 = vld [vmem:[#allocation102_spill] sm:$0xff]  ;;  %v14426_v35 = vpop.f32.mrf.mxu1  ;;  %v18526_v18 = vld [vmem:[#allocation132_spill] sm:$0xff] }
 0x39e   :  { %v6867_v5 = vadd.f32 %v6866_v34, %v6358_v10  ;;  %9682 = vtanh.f32 %v14398_v28  ;;  %v14418_v15 = vmul.f32 0.5, %v3576_v19  ;;  %v4080_v2 = vadd.f32 %v18523_v22, %v11962_v51  ;;  %18525 = vst [vmem:[#allocation156_spill] sm:$0xff] %v14426_v35  ;;  %v18527_v34 = vld [vmem:[#allocation28_spill] sm:$0xff] }
 0x39f   :  { %v9669_v58 = vpop.eup %9668  ;;  %v6560_v36 = vmul.f32 %v6048_v12, %v14294_v62  ;;  %v6049_v54 = vadd.f32 1.0, %v9667_v55  ;;  %9684 = vtanh.f32 %v14403_v43  ;;  %v3580_v24 = vadd.f32 %v18524_v33, %v11962_v51  ;;  %v18529_v62 = vld [vmem:[#allocation76_spill] sm:$0xff]  ;;  %v14436_v55 = vpop.f32.mrf.mxu0 }
 0x3a0   :  { %v18528_v25 = vpack.c.bf16 %v18526_v18, %v18527_v34  ;;  %v9671_v10 = vpop.eup %9670  ;;  %v7130_v19 = vadd.f32 %v7129_v42, %v6559_v60  ;;  %v6360_v6 = vmul.f32 %v5848_v16, %v14304_v0  ;;  %v14432_v22 = vmul.f32 0.5, %v4078_v32  ;;  %18530 = vst [vmem:[#allocation157_spill] sm:$0xff] %v14436_v55  ;;  %v18531_v18 = vld [vmem:[#allocation51_spill] sm:$0xff]  ;;  %v18532_v16 = vld [vmem:[#allocation146_spill] sm:$0xff] }
 0x3a1   :  { %v4082_v12 = vadd.f32 %v18529_v62, %v11988_v46  ;;  %v6904_v33 = vadd.f32 %v6903_v50, %v6359_v45  ;;  %9686 = vtanh.f32 %v14413_v8  ;;  %v14440_v35 = vmul.f32 0.5, %v3578_v61  ;;  %v14452_v61 = vpop.f32.mrf.mxu1  ;;  %v14459_v41 = vpop.f32.mrf.mxu0 }
 0x3a2   :  { %4444 = vmatmul.mubr.bf16.gmra.mxu1 %v18528_v25  ;;  %v3582_v34 = vadd.f32 %v18531_v18, %v11988_v46  ;;  %v9673_v42 = vpop.eup %9672  ;;  %v5849_v60 = vadd.f32 1.0, %v9669_v58  ;;  %9688 = vtanh.f32 %v14418_v15  ;;  %v14445_v0 = vmul.f32 0.5, %v4080_v2  ;;  %18533 = vst [vmem:[#allocation54_spill] sm:$0xff] %v14452_v61  ;;  %v18534_v2 = vld [vmem:[#allocation16_spill] sm:$0xff]  ;;  %18535 = vst [vmem:[#allocation134_spill] sm:$0xff] %v14459_v41  ;;  %v18539_v41 = vld [vmem:[#allocation73_spill] sm:$0xff] }
 0x3a3   :  { %4453 = vmatprep.mubr.bf16.mxu1 %v17973_v11  ;;  %v4086_v32 = vadd.f32 %v18532_v16, %v11962_v51  ;;  %v7094_v25 = vadd.f32 %v7093_v59, %v6560_v36  ;;  %v6561_v62 = vmul.f32 %v6049_v54, %v14319_v47  ;;  %v6050_v50 = vadd.f32 1.0, %v9671_v10  ;;  %v18536_v36 = vld [vmem:[#allocation87_spill] sm:$0xff]  ;;  %v18537_v10 = vld [vmem:[#allocation109_spill] sm:$0xff] }
 0x3a4   :  { %v14450_v45 = vmul.f32 0.5, %v3580_v24  ;;  %v9675_v27 = vpop.eup %9674  ;;  %v6868_v26 = vadd.f32 %v6867_v5, %v6360_v6  ;;  %9690 = vtanh.f32 %v14432_v22  ;;  %v14455_v58 = vmul.f32 0.5, %v4082_v12 }
 0x3a5   :  { %v3586_v18 = vadd.f32 %v18534_v2, %v11962_v51  ;;  %v9677_v16 = vpop.eup %9676  ;;  %v5850_v59 = vadd.f32 1.0, %v9673_v42  ;;  %9692 = vtanh.f32 %v14440_v35  ;;  %v14462_v47 = vmul.f32 0.5, %v3582_v34  ;;  %v14474_v34 = vpop.f32.mrf.mxu1 }
 0x3a6   :  { %v4088_v54 = vadd.f32 %v18536_v36, %v11988_v46  ;;  %v6361_v5 = vmul.f32 %v5849_v60, %v14334_v21  ;;  %9694 = vtanh.f32 %v14445_v0  ;;  %v14468_v24 = vmul.f32 0.5, %v4086_v32  ;;  %18538 = vst [vmem:[#allocation133_spill] sm:$0xff] %v14474_v34  ;;  %v18540_v36 = vld [vmem:[#allocation135_spill] sm:$0xff] }
 0x3a7   :  { %v3588_v6 = vadd.f32 %v18537_v10, %v11988_v46  ;;  %v9679_v12 = vpop.eup %9678  ;;  %v7131_v2 = vadd.f32 %v7130_v19, %v6561_v62  ;;  %v6562_v42 = vmul.f32 %v6050_v50, %v14337_v4  ;;  %v6051_v61 = vadd.f32 1.0, %v9675_v27  ;;  %v18542_v10 = vld [vmem:[#allocation52_spill] sm:$0xff]  ;;  %v14484_v62 = vpop.f32.mrf.mxu0 }
 0x3a8   :  { %9696 = vtanh.f32 %v14450_v45  ;;  %v18541_v55 = vpack.c.bf16 %v18539_v41, %v18540_v36  ;;  %v9681_v21 = vpop.eup %9680  ;;  %v5851_v60 = vadd.f32 1.0, %v9677_v16  ;;  %v14480_v32 = vmul.f32 0.5, %v3586_v18  ;;  %18543 = vst [vmem:[#allocation159_spill] sm:$0xff] %v14484_v62  ;;  %v18544_v41 = vld [vmem:[#allocation17_spill] sm:$0xff]  ;;  %v14499_v52 = vpop.f32.mrf.mxu1 }
 0x3a9   :  { %9698 = vtanh.f32 %v14455_v58  ;;  %v4090_v19 = vadd.f32 %v18542_v10, %v11962_v51  ;;  %v6362_v4 = vmul.f32 %v5850_v59, %v14353_v7  ;;  %v14489_v27 = vmul.f32 0.5, %v4088_v54  ;;  %v18545_v7 = vld [vmem:[#allocation164_spill] sm:$0xff]  ;;  %18546 = vst [vmem:[#allocation104_spill] sm:$0xff] %v14499_v52 }
 0x3aa   :  { %4454 = vmatmul.mubr.bf16.gmra.mxu1 %v18541_v55  ;;  %9700 = vtanh.f32 %v14462_v47  ;;  %v3590_v55 = vadd.f32 %v18544_v41, %v11962_v51  ;;  %v6905_v50 = vadd.f32 %v6904_v33, %v6361_v5  ;;  %v6052_v16 = vadd.f32 1.0, %v9679_v12  ;;  %v18547_v5 = vld [vmem:[#allocation120_spill] sm:$0xff]  ;;  %v14507_v12 = vpop.f32.mrf.mxu0  ;;  %v18551_v41 = vld [vmem:[#allocation29_spill] sm:$0xff] }
 0x3ab   :  { %4463 = vmatprep.mubr.bf16.mxu1 %v17973_v11  ;;  %9702 = vtanh.f32 %v14468_v24  ;;  %v14494_v18 = vmul.f32 0.5, %v3588_v6  ;;  %v9683_v36 = vpop.eup %9682  ;;  %v7095_v10 = vadd.f32 %v7094_v25, %v6562_v42  ;;  %v6563_v34 = vmul.f32 %v6051_v61, %v14360_v53  ;;  %18548 = vst [vmem:[#allocation160_spill] sm:$0xff] %v14507_v12  ;;  %v18549_v61 = vld [vmem:[#allocation166_spill] sm:$0xff] }
 0x3ac   :  { %v5852_v62 = vadd.f32 1.0, %v9681_v21  ;;  %v4092_v59 = vadd.f32 %v18545_v7, %v11988_v46  ;;  %v9685_v54 = vpop.eup %9684  ;;  %v6363_v63 = vmul.f32 %v5851_v60, %v14367_v56  ;;  %9704 = vtanh.f32 %v14480_v32  ;;  %v14514_v21 = vpop.f32.mrf.mxu1 }
 0x3ad   :  { %v14503_v33 = vmul.f32 0.5, %v4090_v19  ;;  %v3592_v6 = vadd.f32 %v18547_v5, %v11988_v46  ;;  %v6869_v25 = vadd.f32 %v6868_v26, %v6362_v4  ;;  %9706 = vtanh.f32 %v14489_v27  ;;  %18550 = vst [vmem:[#allocation53_spill] sm:$0xff] %v14514_v21  ;;  %v18554_v21 = vld [vmem:[#allocation34_spill] sm:$0xff] }
 0x3ae   :  { %v14510_v53 = vmul.f32 0.5, %v3590_v55  ;;  %v4096_v42 = vadd.f32 %v18549_v61, %v11962_v51  ;;  %v9687_v56 = vpop.eup %9686  ;;  %v6564_v60 = vmul.f32 %v6052_v16, %v14373_v9  ;;  %v6053_v19 = vadd.f32 1.0, %v9683_v36  ;;  %v14523_v12 = vpop.f32.mrf.mxu1  ;;  %v18553_v61 = vld [vmem:[#allocation136_spill] sm:$0xff]  ;;  %v18556_v36 = vld [vmem:[#allocation65_spill] sm:$0xff] }
 0x3af   :  { %9708 = vtanh.f32 %v14494_v18  ;;  %v3596_v7 = vadd.f32 %v18551_v41, %v11962_v51  ;;  %v9689_v5 = vpop.eup %9688  ;;  %v7132_v26 = vadd.f32 %v7131_v2, %v6563_v34  ;;  %v6364_v4 = vmul.f32 %v5852_v62, %v14379_v29  ;;  %18552 = vst [vmem:[#allocation161_spill] sm:$0xff] %v14523_v12  ;;  %v14533_v2 = vpop.f32.mrf.mxu0 }
 0x3b0   :  { %v5853_v55 = vadd.f32 1.0, %v9685_v54  ;;  %v14521_v52 = vmul.f32 0.5, %v4092_v59  ;;  %v18555_v39 = vpack.c.bf16 %v18553_v61, %v18554_v21  ;;  %v6906_v9 = vadd.f32 %v6905_v50, %v6363_v63  ;;  %18557 = vst [vmem:[#allocation102_spill] sm:$0xff] %v14533_v2  ;;  %v14541_v63 = vpop.f32.mrf.mxu1 }
 0x3b1   :  { %9710 = vtanh.f32 %v14503_v33  ;;  %v14529_v16 = vmul.f32 0.5, %v3592_v6  ;;  %v4098_v41 = vadd.f32 %v18556_v36, %v11988_v46  ;;  %v9691_v29 = vpop.eup %9690  ;;  %v6054_v34 = vadd.f32 1.0, %v9687_v56  ;;  %18558 = vst [vmem:[#allocation132_spill] sm:$0xff] %v14541_v63 }
 0x3b2   :  { %4464 = vmatmul.mubr.bf16.gmra.mxu1 %v18555_v39  ;;  %9712 = vtanh.f32 %v14510_v53  ;;  %v14537_v62 = vmul.f32 0.5, %v4096_v42  ;;  %v3598_v39 = vadd.f32 %v13967_v38, %v11988_v46  ;;  %v9693_v50 = vpop.eup %9692  ;;  %v7096_v59 = vadd.f32 %v7095_v10, %v6564_v60  ;;  %v18559_v42 = vld [vmem:[#allocation131_spill] sm:$0xff]  ;;  %v14550_v2 = vpop.f32.mrf.mxu1 }
 0x3b3   :  { %4473 = vmatprep.mubr.bf16.mxu1 %v17973_v11  ;;  %v6565_v54 = vmul.f32 %v6053_v19, %v14398_v28  ;;  %v5854_v6 = vadd.f32 1.0, %v9689_v5  ;;  %v14544_v21 = vmul.f32 0.5, %v3596_v7  ;;  %v9695_v61 = vpop.eup %9694  ;;  %v6870_v36 = vadd.f32 %v6869_v25, %v6364_v4  ;;  %18560 = vst [vmem:[#allocation28_spill] sm:$0xff] %v14550_v2  ;;  %v14557_v60 = vpop.f32.mrf.mxu0 }
 0x3b4   :  { %v6365_v56 = vmul.f32 %v5853_v55, %v14403_v43  ;;  %9714 = vtanh.f32 %v14521_v52  ;;  %v4100_v12 = vadd.f32 %v18559_v42, %v11962_v51  ;;  %v6055_v63 = vadd.f32 1.0, %v9691_v29  ;;  %18561 = vst [vmem:[#allocation76_spill] sm:$0xff] %v14557_v60  ;;  %v18562_v60 = vld [vmem:[#allocation130_spill] sm:$0xff] }
 0x3b5   :  { %v9697_v38 = vpop.eup %9696  ;;  %9716 = vtanh.f32 %v14529_v16  ;;  %v14553_v10 = vmul.f32 0.5, %v4098_v41  ;;  %v3600_v28 = vadd.f32 %v14007_v37, %v11962_v51  ;;  %v6566_v43 = vmul.f32 %v6054_v34, %v14413_v8  ;;  %v14569_v34 = vpop.f32.mrf.mxu1 }
 0x3b6   :  { %v9699_v25 = vpop.eup %9698  ;;  %v5855_v19 = vadd.f32 1.0, %v9693_v50  ;;  %9718 = vtanh.f32 %v14537_v62  ;;  %v14561_v7 = vmul.f32 0.5, %v3598_v39  ;;  %v7133_v4 = vadd.f32 %v7132_v26, %v6565_v54  ;;  %18563 = vst [vmem:[#allocation51_spill] sm:$0xff] %v14569_v34  ;;  %v18564_v50 = vld [vmem:[#allocation38_spill] sm:$0xff]  ;;  %v18565_v39 = vld [vmem:[#allocation32_spill] sm:$0xff] }
 0x3b7   :  { %v9701_v5 = vpop.eup %9700  ;;  %v6366_v55 = vmul.f32 %v5854_v6, %v14418_v15  ;;  %v6056_v29 = vadd.f32 1.0, %v9695_v61  ;;  %9720 = vtanh.f32 %v14544_v21  ;;  %v6907_v42 = vadd.f32 %v6906_v9, %v6365_v56  ;;  %v14578_v9 = vpop.f32.mrf.mxu0  ;;  %v18618_v34 = vld [vmem:[#allocation42_spill] sm:$0xff] }
 0x3b8   :  { %v9703_v41 = vpop.eup %9702  ;;  %v5856_v37 = vadd.f32 1.0, %v9697_v38  ;;  %v14565_v2 = vmul.f32 0.5, %v4100_v12  ;;  %v4102_v8 = vadd.f32 %v18562_v60, %v11988_v46  ;;  %v18566_v48 = vpack.c.bf16 %v18564_v50, %v18565_v39 }
 0x3b9   :  { %v6567_v26 = vmul.f32 %v6055_v63, %v14432_v22  ;;  %v6057_v15 = vadd.f32 1.0, %v9699_v25  ;;  %9722 = vtanh.f32 %v14553_v10  ;;  %v14576_v54 = vmul.f32 0.5, %v3600_v28  ;;  %v9705_v12 = vpop.eup %9704 }
 0x3ba   :  { %4474 = vmatmul.mubr.bf16.gmra.mxu1 %v18566_v48  ;;  %v7097_v6 = vadd.f32 %v7096_v59, %v6566_v43  ;;  %v6367_v61 = vmul.f32 %v5855_v19, %v14440_v35  ;;  %v5857_v56 = vadd.f32 1.0, %v9701_v5  ;;  %9724 = vtanh.f32 %v14561_v7  ;;  %v9707_v38 = vpop.eup %9706  ;;  %v18567_v35 = vld [vmem:[#allocation167_spill] sm:$0xff]  ;;  %v14592_v43 = vpop.f32.mrf.mxu1 }
 0x3bb   :  { %4483 = vmatprep.mubr.bf16.mxu1 %v17973_v11  ;;  %v6871_v48 = vadd.f32 %v6870_v36, %v6366_v55  ;;  %v6568_v22 = vmul.f32 %v6056_v29, %v14445_v0  ;;  %v6058_v63 = vadd.f32 1.0, %v9703_v41  ;;  %v3602_v28 = vadd.f32 %v14036_v3, %v11988_v46  ;;  %18568 = vst [vmem:[#allocation146_spill] sm:$0xff] %v14592_v43  ;;  %v14596_v5 = vpop.f32.mrf.mxu0  ;;  %v18615_v43 = vld [vmem:[#allocation94_spill] sm:$0xff] }
 0x3bc   :  { %v9709_v60 = vpop.eup %9708  ;;  %v6368_v25 = vmul.f32 %v5856_v37, %v14450_v45  ;;  %9726 = vtanh.f32 %v14565_v2  ;;  %v14588_v50 = vmul.f32 0.5, %v4102_v8  ;;  %v4106_v59 = vadd.f32 %v18567_v35, %v11962_v51 }
 0x3bd   :  { %v7134_v19 = vadd.f32 %v7133_v4, %v6567_v26  ;;  %v6569_v36 = vmul.f32 %v6057_v15, %v14455_v58  ;;  %v5858_v0 = vadd.f32 1.0, %v9705_v12  ;;  %9728 = vtanh.f32 %v14576_v54 }
 0x3be   :  { %v9711_v3 = vpop.eup %9710  ;;  %v6908_v55 = vadd.f32 %v6907_v42, %v6367_v61  ;;  %v6369_v45 = vmul.f32 %v5857_v56, %v14462_v47  ;;  %v6059_v29 = vadd.f32 1.0, %v9707_v38  ;;  %v3606_v41 = vadd.f32 %v14072_v40, %v11962_v51  ;;  %v18569_v42 = vld [vmem:[#allocation58_spill] sm:$0xff]  ;;  %v14609_v47 = vpop.f32.mrf.mxu1  ;;  %v18571_v61 = vld [vmem:[#allocation31_spill] sm:$0xff]  ;;  %v18572_v56 = vld [vmem:[#allocation72_spill] sm:$0xff] }
 0x3bf   :  { %v9713_v37 = vpop.eup %9712  ;;  %v7098_v8 = vadd.f32 %v7097_v6, %v6568_v22  ;;  %v6570_v39 = vmul.f32 %v6058_v63, %v14468_v24  ;;  %v5859_v4 = vadd.f32 1.0, %v9709_v60  ;;  %v14602_v26 = vmul.f32 0.5, %v3602_v28  ;;  %18570 = vst [vmem:[#allocation16_spill] sm:$0xff] %v14609_v47  ;;  %v14617_v63 = vpop.f32.mrf.mxu0 }
 0x3c0   :  { %v6872_v58 = vadd.f32 %v6871_v48, %v6368_v25  ;;  %9730 = vtanh.f32 %v14588_v50  ;;  %v14605_v15 = vmul.f32 0.5, %v4106_v59  ;;  %v4108_v12 = vadd.f32 %v18569_v42, %v11988_v46 }
 0x3c1   :  { %v18573_v40 = vpack.c.bf16 %v18571_v61, %v18572_v56  ;;  %v9715_v6 = vpop.eup %9714  ;;  %v7135_v38 = vadd.f32 %v7134_v19, %v6569_v36  ;;  %v6370_v24 = vmul.f32 %v5858_v0, %v14480_v32  ;;  %v6060_v22 = vadd.f32 1.0, %v9711_v3  ;;  %v18574_v32 = vld [vmem:[#allocation46_spill] sm:$0xff] }
 0x3c2   :  { %v3608_v48 = vadd.f32 %v14098_v49, %v11988_v46  ;;  %v9717_v28 = vpop.eup %9716  ;;  %v6909_v60 = vadd.f32 %v6908_v55, %v6369_v45  ;;  %v6571_v25 = vmul.f32 %v6059_v29, %v14489_v27  ;;  %v5860_v35 = vadd.f32 1.0, %v9713_v37  ;;  %v14632_v55 = vpop.f32.mrf.mxu1 }
 0x3c3   :  { %4484 = vmatmul.mubr.bf16.gmra.mxu1 %v18573_v40  ;;  %v14621_v59 = vmul.f32 0.5, %v3606_v41  ;;  %v9719_v42 = vpop.eup %9718  ;;  %v7099_v61 = vadd.f32 %v7098_v8, %v6570_v39  ;;  %v6371_v19 = vmul.f32 %v5859_v4, %v14494_v18  ;;  %9732 = vtanh.f32 %v14602_v26  ;;  %18575 = vst [vmem:[#allocation87_spill] sm:$0xff] %v14632_v55  ;;  %v18576_v41 = vld [vmem:[#allocation57_spill] sm:$0xff]  ;;  %v14639_v8 = vpop.f32.mrf.mxu0 }
 0x3c4   :  { %4493 = vmatprep.mubr.bf16.mxu1 %v17973_v11  ;;  %v4110_v49 = vadd.f32 %v18574_v32, %v11962_v51  ;;  %v9721_v36 = vpop.eup %9720  ;;  %v6061_v0 = vadd.f32 1.0, %v9715_v6  ;;  %9734 = vtanh.f32 %v14605_v15  ;;  %v14628_v3 = vmul.f32 0.5, %v4108_v12 }
 0x3c5   :  { %v3610_v27 = vadd.f32 %v14131_v1, %v11962_v51  ;;  %v6873_v45 = vadd.f32 %v6872_v58, %v6370_v24  ;;  %v6572_v29 = vmul.f32 %v6060_v22, %v14503_v33  ;;  %v14635_v18 = vmul.f32 0.5, %v3608_v48  ;;  %v14651_v48 = vpop.f32.mrf.mxu1 }
 0x3c6   :  { %v4112_v37 = vadd.f32 %v18576_v41, %v11988_v46  ;;  %v9723_v39 = vpop.eup %9722  ;;  %v7136_v4 = vadd.f32 %v7135_v38, %v6571_v25  ;;  %v6372_v12 = vmul.f32 %v5860_v35, %v14510_v53  ;;  %v5861_v56 = vadd.f32 1.0, %v9717_v28  ;;  %18577 = vst [vmem:[#allocation109_spill] sm:$0xff] %v14651_v48  ;;  %v14656_v35 = vpop.f32.mrf.mxu0  ;;  %v18580_v41 = vld [vmem:[#allocation35_spill] sm:$0xff] }
 0x3c7   :  { %9736 = vtanh.f32 %v14621_v59  ;;  %v9725_v1 = vpop.eup %9724  ;;  %v6910_v40 = vadd.f32 %v6909_v60, %v6371_v19  ;;  %v6062_v6 = vadd.f32 1.0, %v9719_v42  ;;  %v5862_v58 = vadd.f32 1.0, %v9721_v36 }
 0x3c8   :  { %v14643_v24 = vmul.f32 0.5, %v4110_v49  ;;  %v6573_v33 = vmul.f32 %v6061_v0, %v14521_v52  ;;  %9738 = vtanh.f32 %v14628_v3  ;;  %v14647_v22 = vmul.f32 0.5, %v3610_v27  ;;  %v18578_v49 = vld [vmem:[#allocation122_spill] sm:$0xff] }
 0x3c9   :  { %v3612_v38 = vadd.f32 %v14162_v17, %v11988_v46  ;;  %v9727_v53 = vpop.eup %9726  ;;  %v7100_v28 = vadd.f32 %v7099_v61, %v6572_v29  ;;  %v6063_v25 = vadd.f32 1.0, %v9723_v39  ;;  %9740 = vtanh.f32 %v14635_v18 }
 0x3ca   :  { %v14654_v60 = vmul.f32 0.5, %v4112_v37  ;;  %v9729_v42 = vpop.eup %9728  ;;  %v6874_v52 = vadd.f32 %v6873_v45, %v6372_v12  ;;  %v6373_v19 = vmul.f32 %v5861_v56, %v14529_v16  ;;  %v5863_v32 = vadd.f32 1.0, %v9725_v1  ;;  %v14669_v16 = vpop.f32.mrf.mxu1  ;;  %v18581_v37 = vld [vmem:[#allocation75_spill] sm:$0xff] }
 0x3cb   :  { %v4116_v36 = vadd.f32 %v18578_v49, %v11962_v51  ;;  %v6574_v17 = vmul.f32 %v6062_v6, %v14537_v62  ;;  %v6374_v0 = vmul.f32 %v5862_v58, %v14544_v21  ;;  %9742 = vtanh.f32 %v14643_v24  ;;  %18579 = vst [vmem:[#allocation73_spill] sm:$0xff] %v14669_v16  ;;  %v14678_v56 = vpop.f32.mrf.mxu0 }
 0x3cc   :  { %v3616_v61 = vadd.f32 %v14195_v30, %v11962_v51  ;;  %v7137_v27 = vadd.f32 %v7136_v4, %v6573_v33  ;;  %v6064_v29 = vadd.f32 1.0, %v9727_v53  ;;  %9744 = vtanh.f32 %v14647_v22  ;;  %v18583_v30 = vld [vmem:[#allocation20_spill] sm:$0xff] }
 0x3cd   :  { %v14667_v45 = vmul.f32 0.5, %v3612_v38  ;;  %v18582_v39 = vpack.c.bf16 %v18580_v41, %v18581_v37  ;;  %v9731_v62 = vpop.eup %9730  ;;  %v6575_v21 = vmul.f32 %v6063_v25, %v14553_v10  ;;  %v5864_v12 = vadd.f32 1.0, %v9729_v42  ;;  %v14686_v38 = vpop.f32.mrf.mxu1 }
 0x3ce   :  { %9746 = vtanh.f32 %v14654_v60  ;;  %v4118_v4 = vadd.f32 %v18583_v30, %v11988_v46  ;;  %v6911_v1 = vadd.f32 %v6910_v40, %v6373_v19  ;;  %v6375_v6 = vmul.f32 %v5863_v32, %v14561_v7  ;;  %18584 = vst [vmem:[#allocation135_spill] sm:$0xff] %v14686_v38  ;;  %v18601_v38 = vld [vmem:[#allocation41_spill] sm:$0xff] }
 0x3cf   :  { %4494 = vmatmul.mubr.bf16.gmra.mxu1 %v18582_v39  ;;  %v14682_v58 = vmul.f32 0.5, %v4116_v36  ;;  %v3618_v33 = vadd.f32 %v14224_v44, %v11988_v46  ;;  %v7101_v10 = vadd.f32 %v7100_v28, %v6574_v17  ;;  %v6875_v53 = vadd.f32 %v6874_v52, %v6374_v0  ;;  %v14701_v36 = vpop.f32.mrf.mxu0 }
 0x3d0   :  { %4503 = vmatprep.mubr.bf16.mxu1 %v17973_v11  ;;  %v14688_v25 = vmul.f32 0.5, %v3616_v61  ;;  %v4120_v42 = vadd.f32 %v13958_v20, %v11962_v51  ;;  %v9733_v49 = vpop.eup %9732  ;;  %v6576_v41 = vmul.f32 %v6064_v29, %v14565_v2  ;;  %v6065_v40 = vadd.f32 1.0, %v9731_v62  ;;  %v14703_v20 = vpop.f32.mrf.mxu1 }
 0x3d1   :  { %9748 = vtanh.f32 %v14667_v45  ;;  %v3620_v7 = vadd.f32 %v14254_v23, %v11962_v51  ;;  %v9735_v19 = vpop.eup %9734  ;;  %v7138_v44 = vadd.f32 %v7137_v27, %v6575_v21  ;;  %v6376_v32 = vmul.f32 %v5864_v12, %v14576_v54  ;;  %18585 = vst [vmem:[#allocation52_spill] sm:$0xff] %v14703_v20 }
 0x3d2   :  { %v14697_v28 = vmul.f32 0.5, %v4118_v4  ;;  %v4122_v52 = vadd.f32 %v13976_v57, %v11988_v46  ;;  %v6912_v2 = vadd.f32 %v6911_v1, %v6375_v6  ;;  %9750 = vtanh.f32 %v14682_v58  ;;  %v18586_v57 = vld [vmem:[#allocation70_spill] sm:$0xff]  ;;  %v14715_v29 = vpop.f32.mrf.mxu1  ;;  %v14725_v1 = vpop.f32.mrf.mxu0 }
 0x3d3   :  { %v14706_v17 = vmul.f32 0.5, %v3618_v33  ;;  %v3622_v23 = vadd.f32 %v14283_v14, %v11988_v46  ;;  %v5865_v61 = vadd.f32 1.0, %v9733_v49  ;;  %9752 = vtanh.f32 %v14688_v25  ;;  %18587 = vst [vmem:[#allocation17_spill] sm:$0xff] %v14715_v29  ;;  %v18589_v33 = vld [vmem:[#allocation74_spill] sm:$0xff] }
 0x3d4   :  { %v9737_v0 = vpop.eup %9736  ;;  %v14711_v54 = vmul.f32 0.5, %v4120_v42  ;;  %v4126_v27 = vadd.f32 %v18586_v57, %v11962_v51  ;;  %v7102_v37 = vadd.f32 %v7101_v10, %v6576_v41  ;;  %v6577_v39 = vmul.f32 %v6065_v40, %v14588_v50  ;;  %v14727_v6 = vpop.f32.mrf.mxu1  ;;  %v18590_v10 = vld [vmem:[#allocation37_spill] sm:$0xff]  ;;  %v18594_v57 = vld [vmem:[#allocation115_spill] sm:$0xff] }
 0x3d5   :  { %v6066_v62 = vadd.f32 1.0, %v9735_v19  ;;  %v14718_v21 = vmul.f32 0.5, %v3620_v7  ;;  %v9739_v12 = vpop.eup %9738  ;;  %v6876_v30 = vadd.f32 %v6875_v53, %v6376_v32  ;;  %9754 = vtanh.f32 %v14697_v28  ;;  %18588 = vst [vmem:[#allocation164_spill] sm:$0xff] %v14727_v6  ;;  %v18592_v41 = vld [vmem:[#allocation105_spill] sm:$0xff] }
 0x3d6   :  { %v14721_v14 = vmul.f32 0.5, %v4122_v52  ;;  %v3626_v4 = vadd.f32 %v14306_v13, %v11962_v51  ;;  %v18591_v42 = vpack.c.bf16 %v18589_v33, %v18590_v10  ;;  %v9741_v50 = vpop.eup %9740  ;;  %v5866_v49 = vadd.f32 1.0, %v9737_v0  ;;  %v14744_v32 = vpop.f32.mrf.mxu1 }
 0x3d7   :  { %9756 = vtanh.f32 %v14706_v17  ;;  %v14733_v53 = vmul.f32 0.5, %v3622_v23  ;;  %v4128_v40 = vadd.f32 %v18592_v41, %v11988_v46  ;;  %v6377_v13 = vmul.f32 %v5865_v61, %v14602_v26  ;;  %18593 = vst [vmem:[#allocation120_spill] sm:$0xff] %v14744_v32 }
 0x3d8   :  { %4504 = vmatmul.mubr.bf16.gmra.mxu1 %v18591_v42  ;;  %9758 = vtanh.f32 %v14711_v54  ;;  %v14740_v7 = vmul.f32 0.5, %v4126_v27  ;;  %v3628_v19 = vadd.f32 %v14328_v31, %v11988_v46  ;;  %v9743_v52 = vpop.eup %9742  ;;  %v7139_v0 = vadd.f32 %v7138_v44, %v6577_v39  ;;  %v14753_v42 = vpop.f32.mrf.mxu0 }
 0x3d9   :  { %4513 = vmatprep.mubr.bf16.mxu1 %v17973_v11  ;;  %v6067_v23 = vadd.f32 1.0, %v9739_v12  ;;  %9760 = vtanh.f32 %v14718_v21  ;;  %v4130_v33 = vadd.f32 %v18594_v57, %v11962_v51  ;;  %v9745_v10 = vpop.eup %9744  ;;  %v6578_v26 = vmul.f32 %v6066_v62, %v14605_v15  ;;  %v14755_v31 = vpop.f32.mrf.mxu1  ;;  %v18596_v12 = vld [vmem:[#allocation48_spill] sm:$0xff] }
 0x3da   :  { %v5867_v61 = vadd.f32 1.0, %v9741_v50  ;;  %9762 = vtanh.f32 %v14721_v14  ;;  %v14751_v27 = vmul.f32 0.5, %v3626_v4  ;;  %18595 = vst [vmem:[#allocation166_spill] sm:$0xff] %v14755_v31  ;;  %v6378_v44 = vmul.f32 %v5866_v49, %v14621_v59  ;;  %v18597_v4 = vld [vmem:[#allocation121_spill] sm:$0xff] }
 0x3db   :  { %v9747_v41 = vpop.eup %9746  ;;  %9764 = vtanh.f32 %v14733_v53  ;;  %v14759_v39 = vmul.f32 0.5, %v4128_v40  ;;  %v3630_v57 = vadd.f32 %v18596_v12, %v11962_v51  ;;  %v6068_v15 = vadd.f32 1.0, %v9743_v52  ;;  %v14768_v32 = vpop.f32.mrf.mxu1 }
 0x3dc   :  { %9766 = vtanh.f32 %v14740_v7  ;;  %v14764_v62 = vmul.f32 0.5, %v3628_v19  ;;  %v4132_v50 = vadd.f32 %v18597_v4, %v11988_v46  ;;  %18598 = vst [vmem:[#allocation29_spill] sm:$0xff] %v14768_v32  ;;  %v6913_v31 = vadd.f32 %v6912_v2, %v6377_v13  ;;  %v14775_v19 = vpop.f32.mrf.mxu0  ;;  %v18600_v4 = vld [vmem:[#allocation40_spill] sm:$0xff] }
 0x3dd   :  { %v6579_v59 = vmul.f32 %v6067_v23, %v14628_v3  ;;  %v5868_v49 = vadd.f32 1.0, %v9745_v10  ;;  %v14771_v6 = vmul.f32 0.5, %v4130_v33  ;;  %v7103_v29 = vadd.f32 %v7102_v37, %v6578_v26  ;;  %v14777_v20 = vpop.f32.mrf.mxu1  ;;  %v18603_v37 = vld [vmem:[#allocation145_spill] sm:$0xff] }
 0x3de   :  { %v9749_v40 = vpop.eup %9748  ;;  %v6379_v12 = vmul.f32 %v5867_v61, %v14635_v18  ;;  %v6069_v52 = vadd.f32 1.0, %v9747_v41  ;;  %9768 = vtanh.f32 %v14751_v27  ;;  %18599 = vst [vmem:[#allocation136_spill] sm:$0xff] %v14777_v20  ;;  %v18602_v32 = vpack.c.bf16 %v18600_v4, %v18601_v38  ;;  %v18604_v38 = vld [vmem:[#allocation168_spill] sm:$0xff]  ;;  %v14801_v4 = vpop.f32.mrf.mxu0 }
 0x3df   :  { %v6877_v2 = vadd.f32 %v6876_v30, %v6378_v44  ;;  %9770 = vtanh.f32 %v14759_v39  ;;  %v14783_v3 = vmul.f32 0.5, %v3630_v57  ;;  %v3632_v13 = vadd.f32 %v18603_v37, %v11988_v46  ;;  %v9751_v18 = vpop.eup %9750  ;;  %v18605_v61 = vld [vmem:[#allocation124_spill] sm:$0xff]  ;;  %v14803_v37 = vpop.f32.mrf.mxu1 }
 0x3e0   :  { %4514 = vmatmul.mubr.bf16.gmra.mxu1 %v18602_v32  ;;  %v6580_v23 = vmul.f32 %v6068_v15, %v14643_v24  ;;  %9772 = vtanh.f32 %v14764_v62  ;;  %v14790_v33 = vmul.f32 0.5, %v4132_v50  ;;  %v4136_v32 = vadd.f32 %v18604_v38, %v11962_v51  ;;  %v9753_v30 = vpop.eup %9752  ;;  %v18606_v15 = vld [vmem:[#allocation55_spill] sm:$0xff]  ;;  %18607 = vst [vmem:[#allocation34_spill] sm:$0xff] %v14803_v37 }
 0x3e1   :  { %4523 = vmatprep.mubr.bf16.mxu1 %v17973_v11  ;;  %v7140_v10 = vadd.f32 %v7139_v0, %v6579_v59  ;;  %v6380_v26 = vmul.f32 %v5868_v49, %v14647_v22  ;;  %9774 = vtanh.f32 %v14771_v6  ;;  %v3636_v41 = vadd.f32 %v18605_v61, %v11962_v51  ;;  %v18608_v59 = vld [vmem:[#allocation137_spill] sm:$0xff]  ;;  %v14824_v55 = vpop.f32.mrf.mxu1 }
 0x3e2   :  { %v6914_v44 = vadd.f32 %v6913_v31, %v6379_v12  ;;  %v6581_v57 = vmul.f32 %v6069_v52, %v14654_v60  ;;  %v5869_v24 = vadd.f32 1.0, %v9749_v40  ;;  %v4138_v50 = vadd.f32 %v18606_v15, %v11988_v46  ;;  %v9755_v38 = vpop.eup %9754  ;;  %v18609_v40 = vld [vmem:[#allocation142_spill] sm:$0xff]  ;;  %18611 = vst [vmem:[#allocation65_spill] sm:$0xff] %v14824_v55 }
 0x3e3   :  { %v6070_v0 = vadd.f32 1.0, %v9751_v18  ;;  %9776 = vtanh.f32 %v14783_v3  ;;  %v14806_v22 = vmul.f32 0.5, %v3632_v13  ;;  %v3638_v49 = vadd.f32 %v18608_v59, %v11988_v46  ;;  %v18610_v13 = vld [vmem:[#allocation157_spill] sm:$0xff] }
 0x3e4   :  { %v9757_v31 = vpop.eup %9756  ;;  %v7104_v12 = vadd.f32 %v7103_v29, %v6580_v23  ;;  %9778 = vtanh.f32 %v14790_v33  ;;  %v14811_v60 = vmul.f32 0.5, %v4136_v32  ;;  %v4140_v52 = vadd.f32 %v18609_v40, %v11962_v51  ;;  %v14822_v32 = vpop.f32.mrf.mxu0 }
 0x3e5   :  { %v9759_v61 = vpop.eup %9758  ;;  %v6878_v15 = vadd.f32 %v6877_v2, %v6380_v26  ;;  %v5870_v37 = vadd.f32 1.0, %v9753_v30  ;;  %v14815_v18 = vmul.f32 0.5, %v3636_v41  ;;  %v3640_v20 = vadd.f32 %v18610_v13, %v11962_v51 }
 0x3e6   :  { %v9761_v16 = vpop.eup %9760  ;;  %v7141_v48 = vadd.f32 %v7140_v10, %v6581_v57  ;;  %v6381_v59 = vmul.f32 %v5869_v24, %v14667_v45  ;;  %v6071_v29 = vadd.f32 1.0, %v9755_v38  ;;  %v14820_v23 = vmul.f32 0.5, %v4138_v50  ;;  %v18612_v10 = vld [vmem:[#allocation96_spill] sm:$0xff] }
 0x3e7   :  { %v9763_v40 = vpop.eup %9762  ;;  %v6582_v2 = vmul.f32 %v6070_v0, %v14682_v58  ;;  %v5871_v30 = vadd.f32 1.0, %v9757_v31  ;;  %9780 = vtanh.f32 %v14806_v22  ;;  %v14828_v26 = vmul.f32 0.5, %v3638_v49 }
 0x3e8   :  { %v9765_v41 = vpop.eup %9764  ;;  %v6072_v13 = vadd.f32 1.0, %v9759_v61  ;;  %9782 = vtanh.f32 %v14811_v60  ;;  %v14831_v45 = vmul.f32 0.5, %v4140_v52  ;;  %v4142_v57 = vadd.f32 %v18612_v10, %v11988_v46  ;;  %v14841_v61 = vpop.f32.mrf.mxu0 }
 0x3e9   :  { %v9767_v24 = vpop.eup %9766  ;;  %v6382_v50 = vmul.f32 %v5870_v37, %v14688_v25  ;;  %v5872_v38 = vadd.f32 1.0, %v9761_v16  ;;  %9784 = vtanh.f32 %v14815_v18  ;;  %v14837_v58 = vmul.f32 0.5, %v3640_v20  ;;  %v14843_v52 = vpop.f32.mrf.mxu1  ;;  %v18614_v16 = vld [vmem:[#allocation134_spill] sm:$0xff] }
 0x3ea   :  { %v6915_v0 = vadd.f32 %v6914_v44, %v6381_v59  ;;  %v6583_v49 = vmul.f32 %v6071_v29, %v14697_v28  ;;  %v6073_v31 = vadd.f32 1.0, %v9763_v40  ;;  %9786 = vtanh.f32 %v14820_v23  ;;  %18613 = vst [vmem:[#allocation131_spill] sm:$0xff] %v14843_v52 }
 0x3eb   :  { %v9769_v55 = vpop.eup %9768  ;;  %v6383_v10 = vmul.f32 %v5871_v30, %v14706_v17  ;;  %v5873_v47 = vadd.f32 1.0, %v9765_v41  ;;  %9788 = vtanh.f32 %v14828_v26  ;;  %v3642_v25 = vadd.f32 %v18614_v16, %v11988_v46 }
 0x3ec   :  { %v9771_v20 = vpop.eup %9770  ;;  %v6584_v44 = vmul.f32 %v6072_v13, %v14711_v54  ;;  %v6074_v28 = vadd.f32 1.0, %v9767_v24  ;;  %9790 = vtanh.f32 %v14831_v45  ;;  %v14851_v37 = vmul.f32 0.5, %v4142_v57  ;;  %v14858_v13 = vpop.f32.mrf.mxu0  ;;  %v18617_v57 = vld [vmem:[#allocation77_spill] sm:$0xff] }
 0x3ed   :  { %v9773_v59 = vpop.eup %9772  ;;  %v7105_v29 = vadd.f32 %v7104_v12, %v6582_v2  ;;  %v6879_v40 = vadd.f32 %v6878_v15, %v6382_v50  ;;  %v6384_v52 = vmul.f32 %v5872_v38, %v14718_v21  ;;  %9792 = vtanh.f32 %v14837_v58  ;;  %v14860_v24 = vpop.f32.mrf.mxu1 }
 0x3ee   :  { %v9775_v17 = vpop.eup %9774  ;;  %v7142_v30 = vadd.f32 %v7141_v48, %v6583_v49  ;;  %v6585_v41 = vmul.f32 %v6073_v31, %v14721_v14  ;;  %v5874_v16 = vadd.f32 1.0, %v9769_v55  ;;  %v4146_v54 = vadd.f32 %v18615_v43, %v11962_v51  ;;  %18616 = vst [vmem:[#allocation130_spill] sm:$0xff] %v14860_v24  ;;  %v18620_v14 = vld [vmem:[#allocation159_spill] sm:$0xff] }
 0x3ef   :  { %v18619_v12 = vpack.c.bf16 %v18617_v57, %v18618_v34  ;;  %v6916_v15 = vadd.f32 %v6915_v0, %v6383_v10  ;;  %v6385_v21 = vmul.f32 %v5873_v47, %v14733_v53  ;;  %v6075_v2 = vadd.f32 1.0, %v9771_v20  ;;  %v18621_v47 = vld [vmem:[#allocation152_spill] sm:$0xff] }
 0x3f0   :  { %v14866_v50 = vmul.f32 0.5, %v3642_v25  ;;  %v9777_v55 = vpop.eup %9776  ;;  %v7106_v48 = vadd.f32 %v7105_v29, %v6584_v44  ;;  %v6586_v43 = vmul.f32 %v6074_v28, %v14740_v7  ;;  %9794 = vtanh.f32 %v14851_v37  ;;  %v18622_v44 = vld [vmem:[#allocation160_spill] sm:$0xff]  ;;  %v14880_v28 = vpop.f32.mrf.mxu0 }
 0x3f1   :  { %4524 = vmatmul.mubr.bf16.gmra.mxu1 %v18619_v12  ;;  %v3646_v38 = vadd.f32 %v18620_v14, %v11962_v51  ;;  %v9779_v49 = vpop.eup %9778  ;;  %v6880_v34 = vadd.f32 %v6879_v40, %v6384_v52  ;;  %v5875_v31 = vadd.f32 1.0, %v9773_v59  ;;  %v6076_v0 = vadd.f32 1.0, %v9775_v17  ;;  %v18623_v52 = vld [vmem:[#allocation154_spill] sm:$0xff] }
 0x3f2   :  { %4533 = vmatprep.mubr.bf16.mxu1 %v17973_v11  ;;  %v4148_v53 = vadd.f32 %v18621_v47, %v11988_v46  ;;  %v7143_v10 = vadd.f32 %v7142_v30, %v6585_v41  ;;  %v6386_v25 = vmul.f32 %v5874_v16, %v14751_v27  ;;  %v14876_v20 = vmul.f32 0.5, %v4146_v54  ;;  %v14888_v16 = vpop.f32.mrf.mxu1 }
 0x3f3   :  { %v3648_v7 = vadd.f32 %v18622_v44, %v11988_v46  ;;  %v6917_v29 = vadd.f32 %v6916_v15, %v6385_v21  ;;  %v6587_v57 = vmul.f32 %v6075_v2, %v14759_v39  ;;  %9796 = vtanh.f32 %v14866_v50  ;;  %18624 = vst [vmem:[#allocation38_spill] sm:$0xff] %v14888_v16  ;;  %v18625_v39 = vld [vmem:[#allocation102_spill] sm:$0xff] }
 0x3f4   :  { %v4150_v59 = vadd.f32 %v18623_v52, %v11962_v51  ;;  %v9781_v40 = vpop.eup %9780  ;;  %v7107_v17 = vadd.f32 %v7106_v48, %v6586_v43  ;;  %v5876_v30 = vadd.f32 1.0, %v9777_v55  ;;  %v6077_v41 = vadd.f32 1.0, %v9779_v49  ;;  %v18626_v48 = vld [vmem:[#allocation43_spill] sm:$0xff]  ;;  %v14903_v49 = vpop.f32.mrf.mxu1 }
 0x3f5   :  { %v14886_v27 = vmul.f32 0.5, %v3646_v38  ;;  %v9783_v54 = vpop.eup %9782  ;;  %v6387_v12 = vmul.f32 %v5875_v31, %v14764_v62  ;;  %v6588_v15 = vmul.f32 %v6076_v0, %v14771_v6  ;;  %v14892_v21 = vmul.f32 0.5, %v4148_v53  ;;  %v14901_v38 = vpop.f32.mrf.mxu0  ;;  %18627 = vst [vmem:[#allocation32_spill] sm:$0xff] %v14903_v49  ;;  %v18628_v53 = vld [vmem:[#allocation76_spill] sm:$0xff]  ;;  %v18629_v52 = vld [vmem:[#allocation171_spill] sm:$0xff] }
 0x3f6   :  { %v3650_v2 = vadd.f32 %v18625_v39, %v11962_v51  ;;  %v9785_v14 = vpop.eup %9784  ;;  %v6881_v47 = vadd.f32 %v6880_v34, %v6386_v25  ;;  %9798 = vtanh.f32 %v14876_v20  ;;  %v14897_v55 = vmul.f32 0.5, %v3648_v7 }
 0x3f7   :  { %v4152_v43 = vadd.f32 %v18626_v48, %v11988_v46  ;;  %v9787_v62 = vpop.eup %9786  ;;  %v7144_v6 = vadd.f32 %v7143_v10, %v6587_v57  ;;  %v5877_v31 = vadd.f32 1.0, %v9781_v40  ;;  %v14905_v0 = vmul.f32 0.5, %v4150_v59  ;;  %v14914_v48 = vpop.f32.mrf.mxu1 }
 0x3f8   :  { %v3652_v44 = vadd.f32 %v18628_v53, %v11988_v46  ;;  %v9789_v34 = vpop.eup %9788  ;;  %v6388_v25 = vmul.f32 %v5876_v30, %v14783_v3  ;;  %v6589_v7 = vmul.f32 %v6077_v41, %v14790_v33  ;;  %9800 = vtanh.f32 %v14886_v27  ;;  %18630 = vst [vmem:[#allocation167_spill] sm:$0xff] %v14914_v48  ;;  %v14924_v30 = vpop.f32.mrf.mxu0 }
 0x3f9   :  { %v4156_v39 = vadd.f32 %v18629_v52, %v11962_v51  ;;  %v9791_v49 = vpop.eup %9790  ;;  %v6918_v10 = vadd.f32 %v6917_v29, %v6387_v12  ;;  %v7108_v57 = vadd.f32 %v7107_v17, %v6588_v15  ;;  %9802 = vtanh.f32 %v14892_v21  ;;  %18631 = vst [vmem:[#allocation58_spill] sm:$0xff] %v14924_v30  ;;  %v14926_v41 = vpop.f32.mrf.mxu1  ;;  %v18633_v52 = vld [vmem:[#allocation141_spill] sm:$0xff]  ;;  %v18634_v29 = vld [vmem:[#allocation79_spill] sm:$0xff] }
 0x3fa   :  { %v14917_v59 = vmul.f32 0.5, %v3650_v2  ;;  %v9793_v40 = vpop.eup %9792  ;;  %v6078_v53 = vadd.f32 1.0, %v9783_v54  ;;  %9804 = vtanh.f32 %v14897_v55  ;;  %v14920_v3 = vmul.f32 0.5, %v4152_v43  ;;  %18632 = vst [vmem:[#allocation31_spill] sm:$0xff] %v14926_v41 }
 0x3fb   :  { %v3656_v33 = vadd.f32 %v14578_v9, %v11962_v51  ;;  %v18635_v17 = vpack.c.bf16 %v18633_v52, %v18634_v29  ;;  %v6389_v12 = vmul.f32 %v5877_v31, %v14806_v22  ;;  %v5878_v15 = vadd.f32 1.0, %v9785_v14  ;;  %v14939_v52 = vpop.f32.mrf.mxu1 }
 0x3fc   :  { %9806 = vtanh.f32 %v14905_v0  ;;  %v14933_v54 = vmul.f32 0.5, %v3652_v44  ;;  %v6882_v2 = vadd.f32 %v6881_v47, %v6388_v25  ;;  %v7145_v43 = vadd.f32 %v7144_v6, %v6589_v7  ;;  %v18636_v47 = vld [vmem:[#allocation116_spill] sm:$0xff] }
 0x3fd   :  { %4534 = vmatmul.mubr.bf16.gmra.mxu1 %v18635_v17  ;;  %v6079_v9 = vadd.f32 1.0, %v9787_v62  ;;  %v14936_v48 = vmul.f32 0.5, %v4156_v39  ;;  %v9795_v16 = vpop.eup %9794  ;;  %v5879_v41 = vadd.f32 1.0, %v9789_v34  ;;  %v6080_v24 = vadd.f32 1.0, %v9791_v49  ;;  %v14947_v62 = vpop.f32.mrf.mxu0  ;;  %v18637_v39 = vld [vmem:[#allocation95_spill] sm:$0xff] }
 0x3fe   :  { %4543 = vmatprep.mubr.bf16.mxu1 %v17973_v11  ;;  %v5880_v30 = vadd.f32 1.0, %v9793_v40  ;;  %9808 = vtanh.f32 %v14917_v59  ;;  %v6590_v22 = vmul.f32 %v6078_v53, %v14811_v60  ;;  %v14943_v14 = vmul.f32 0.5, %v3656_v33  ;;  %v14953_v34 = vpop.f32.mrf.mxu1 }
 0x3ff   :  { %9810 = vtanh.f32 %v14920_v3  ;;  %v4158_v6 = vadd.f32 %v18636_v47, %v11988_v46  ;;  %v6919_v31 = vadd.f32 %v6918_v10, %v6389_v12  ;;  %v6390_v44 = vmul.f32 %v5878_v15, %v14815_v18  ;;  %v14971_v12 = vpop.f32.mrf.mxu0 }
 0x400   :  { %9812 = vtanh.f32 %v14933_v54  ;;  %v3658_v49 = vadd.f32 %v14596_v5, %v11988_v46  ;;  %v9797_v60 = vpop.eup %9796  ;;  %v6591_v25 = vmul.f32 %v6079_v9, %v14820_v23  ;;  %v6081_v7 = vadd.f32 1.0, %v9795_v16  ;;  %v14964_v33 = vpop.f32.mrf.mxu1  ;;  %v18638_v16 = vld [vmem:[#allocation172_spill] sm:$0xff] }
 0x401   :  { %9814 = vtanh.f32 %v14936_v48  ;;  %v4160_v40 = vadd.f32 %v18637_v39, %v11962_v51  ;;  %v6391_v10 = vmul.f32 %v5879_v41, %v14828_v26  ;;  %v6592_v18 = vmul.f32 %v6080_v24, %v14831_v45 }
 0x402   :  { %v6392_v53 = vmul.f32 %v5880_v30, %v14837_v58  ;;  %v3660_v5 = vadd.f32 %v14617_v63, %v11962_v51  ;;  %v7109_v29 = vadd.f32 %v7108_v57, %v6590_v22  ;;  %9816 = vtanh.f32 %v14943_v14  ;;  %v14977_v58 = vpop.f32.mrf.mxu1  ;;  %v18639_v57 = vld [vmem:[#allocation45_spill] sm:$0xff]  ;;  %v18640_v30 = vld [vmem:[#allocation39_spill] sm:$0xff] }
 0x403   :  { %v14967_v23 = vmul.f32 0.5, %v4158_v6  ;;  %v4162_v17 = vadd.f32 %v18638_v16, %v11988_v46  ;;  %v9799_v26 = vpop.eup %9798  ;;  %v6883_v41 = vadd.f32 %v6882_v2, %v6390_v44  ;;  %v5881_v45 = vadd.f32 1.0, %v9797_v60  ;;  %v18642_v6 = vld [vmem:[#allocation173_spill] sm:$0xff] }
 0x404   :  { %v14973_v24 = vmul.f32 0.5, %v3658_v49  ;;  %v3662_v63 = vadd.f32 %v14639_v8, %v11988_v46  ;;  %v18641_v15 = vpack.c.bf16 %v18639_v57, %v18640_v30  ;;  %v7146_v9 = vadd.f32 %v7145_v43, %v6591_v25  ;;  %v14990_v16 = vpop.f32.mrf.mxu1  ;;  %v18644_v43 = vld [vmem:[#allocation26_spill] sm:$0xff] }
 0x405   :  { %v6593_v22 = vmul.f32 %v6081_v7, %v14851_v37  ;;  %v14983_v47 = vmul.f32 0.5, %v4160_v40  ;;  %v4166_v2 = vadd.f32 %v18642_v6, %v11962_v51  ;;  %v9801_v44 = vpop.eup %9800  ;;  %v6920_v49 = vadd.f32 %v6919_v31, %v6391_v10  ;;  %18643 = vst [vmem:[#allocation72_spill] sm:$0xff] %v14990_v16  ;;  %v14997_v7 = vpop.f32.mrf.mxu0 }
 0x406   :  { %4544 = vmatmul.mubr.bf16.gmra.mxu1 %v18641_v15  ;;  %v7110_v60 = vadd.f32 %v7109_v29, %v6592_v18  ;;  %v6884_v8 = vadd.f32 %v6883_v41, %v6392_v53  ;;  %v14988_v39 = vmul.f32 0.5, %v3660_v5  ;;  %v9803_v57 = vpop.eup %9802  ;;  %v6082_v30 = vadd.f32 1.0, %v9799_v26  ;;  %v18645_v18 = vld [vmem:[#allocation99_spill] sm:$0xff]  ;;  %v15015_v15 = vpop.f32.mrf.mxu1 }
 0x407   :  { %4553 = vmatprep.mubr.bf16.mxu1 %v17973_v11  ;;  %9818 = vtanh.f32 %v14967_v23  ;;  %v14993_v37 = vmul.f32 0.5, %v4162_v17  ;;  %v4168_v25 = vadd.f32 %v18644_v43, %v11988_v46  ;;  %v9805_v40 = vpop.eup %9804  ;;  %v6393_v31 = vmul.f32 %v5881_v45, %v14866_v50  ;;  %v18646_v45 = vld [vmem:[#allocation64_spill] sm:$0xff]  ;;  %18647 = vst [vmem:[#allocation46_spill] sm:$0xff] %v15015_v15  ;;  %v15021_v43 = vpop.f32.mrf.mxu0 }
 0x408   :  { %9820 = vtanh.f32 %v14973_v24  ;;  %v15001_v10 = vmul.f32 0.5, %v3662_v63  ;;  %v4170_v53 = vadd.f32 %v18645_v18, %v11962_v51  ;;  %v7147_v29 = vadd.f32 %v7146_v9, %v6593_v22 }
 0x409   :  { %v9807_v5 = vpop.eup %9806  ;;  %9822 = vtanh.f32 %v14983_v47  ;;  %v15006_v17 = vmul.f32 0.5, %v4166_v2  ;;  %v3666_v26 = vadd.f32 %v14656_v35, %v11962_v51  ;;  %v5882_v41 = vadd.f32 1.0, %v9801_v44 }
 0x40a   :  { %9824 = vtanh.f32 %v14988_v39  ;;  %v15011_v50 = vmul.f32 0.5, %v4168_v25  ;;  %v4172_v63 = vadd.f32 %v18646_v45, %v11988_v46  ;;  %v6594_v9 = vmul.f32 %v6082_v30, %v14876_v20 }
 0x40b   :  { %v9809_v6 = vpop.eup %9808  ;;  %v6083_v22 = vadd.f32 1.0, %v9803_v57  ;;  %9826 = vtanh.f32 %v14993_v37  ;;  %v15019_v2 = vmul.f32 0.5, %v4170_v53  ;;  %v5883_v44 = vadd.f32 1.0, %v9805_v40 }
 0x40c   :  { %v9811_v35 = vpop.eup %9810  ;;  %v6084_v18 = vadd.f32 1.0, %v9807_v5  ;;  %9828 = vtanh.f32 %v15001_v10  ;;  %v15024_v25 = vmul.f32 0.5, %v4172_v63  ;;  %v6921_v16 = vadd.f32 %v6920_v49, %v6393_v31  ;;  %v15035_v5 = vpop.f32.mrf.mxu1 }
 0x40d   :  { %v9813_v45 = vpop.eup %9812  ;;  %9830 = vtanh.f32 %v15006_v17  ;;  %v15027_v15 = vmul.f32 0.5, %v3666_v26  ;;  %v3668_v20 = vadd.f32 %v14678_v56, %v11988_v46  ;;  %v6394_v30 = vmul.f32 %v5882_v41, %v14886_v27  ;;  %18648 = vst [vmem:[#allocation57_spill] sm:$0xff] %v15035_v5  ;;  %v15041_v56 = vpop.f32.mrf.mxu0 }
 0x40e   :  { %v9815_v57 = vpop.eup %9814  ;;  %v5884_v53 = vadd.f32 1.0, %v9809_v6  ;;  %9832 = vtanh.f32 %v15011_v50  ;;  %v3670_v40 = vadd.f32 %v14701_v36, %v11962_v51  ;;  %v7111_v63 = vadd.f32 %v7110_v60, %v6594_v9 }
 0x40f   :  { %v6595_v49 = vmul.f32 %v6083_v22, %v14892_v21  ;;  %9834 = vtanh.f32 %v15019_v2  ;;  %v3672_v31 = vadd.f32 %v14725_v1, %v11988_v46  ;;  %v9817_v26 = vpop.eup %9816  ;;  %v6395_v27 = vmul.f32 %v5883_v44, %v14897_v55  ;;  %v15054_v55 = vpop.f32.mrf.mxu1 }
 0x410   :  { %v6596_v41 = vmul.f32 %v6084_v18, %v14905_v0  ;;  %v6085_v6 = vadd.f32 1.0, %v9811_v35  ;;  %9836 = vtanh.f32 %v15024_v25  ;;  %v5885_v36 = vadd.f32 1.0, %v9813_v45  ;;  %18649 = vst [vmem:[#allocation122_spill] sm:$0xff] %v15054_v55  ;;  %v18650_v0 = vld [vmem:[#allocation82_spill] sm:$0xff] }
 0x411   :  { %v6086_v5 = vadd.f32 1.0, %v9815_v57  ;;  %9838 = vtanh.f32 %v15027_v15  ;;  %v15047_v21 = vmul.f32 0.5, %v3668_v20  ;;  %v6885_v60 = vadd.f32 %v6884_v8, %v6394_v30  ;;  %v18651_v35 = vld [vmem:[#allocation78_spill] sm:$0xff]  ;;  %v18653_v20 = vld [vmem:[#allocation81_spill] sm:$0xff]  ;;  %v15063_v30 = vpop.f32.mrf.mxu0 }
 0x412   :  { %v6396_v9 = vmul.f32 %v5884_v53, %v14917_v59  ;;  %v15050_v1 = vmul.f32 0.5, %v3670_v40  ;;  %v3676_v22 = vadd.f32 %v14753_v42, %v11962_v51  ;;  %v18652_v44 = vpack.c.bf16 %v18650_v0, %v18651_v35 }
 0x413   :  { %v7148_v18 = vadd.f32 %v7147_v29, %v6595_v49  ;;  %v5886_v45 = vadd.f32 1.0, %v9817_v26  ;;  %v15059_v57 = vmul.f32 0.5, %v3672_v31  ;;  %v4176_v8 = vadd.f32 %v18653_v20, %v11962_v51  ;;  %v18654_v31 = vld [vmem:[#allocation126_spill] sm:$0xff] }
 0x414   :  { %4554 = vmatmul.mubr.bf16.gmra.mxu1 %v18652_v44  ;;  %v9819_v59 = vpop.eup %9818  ;;  %v6922_v53 = vadd.f32 %v6921_v16, %v6395_v27  ;;  %v7112_v42 = vadd.f32 %v7111_v63, %v6596_v41  ;;  %v6597_v40 = vmul.f32 %v6085_v6, %v14920_v3  ;;  %v3678_v0 = vadd.f32 %v14775_v19, %v11988_v46 }
 0x415   :  { %4563 = vmatprep.mubr.bf16.mxu1 %v17973_v11  ;;  %v9821_v35 = vpop.eup %9820  ;;  %v6397_v29 = vmul.f32 %v5885_v36, %v14933_v54  ;;  %v6598_v49 = vmul.f32 %v6086_v5, %v14936_v48  ;;  %9840 = vtanh.f32 %v15047_v21  ;;  %v4178_v26 = vadd.f32 %v18654_v31, %v11988_v46  ;;  %v15083_v5 = vpop.f32.mrf.mxu0 }
 0x416   :  { %v9823_v44 = vpop.eup %9822  ;;  %v6886_v20 = vadd.f32 %v6885_v60, %v6396_v9  ;;  %9842 = vtanh.f32 %v15050_v1  ;;  %v15075_v16 = vmul.f32 0.5, %v3676_v22  ;;  %v3680_v3 = vadd.f32 %v14801_v4, %v11962_v51  ;;  %v15089_v9 = vpop.f32.mrf.mxu1 }
 0x417   :  { %v9825_v19 = vpop.eup %9824  ;;  %v6398_v63 = vmul.f32 %v5886_v45, %v14943_v14  ;;  %v6087_v54 = vadd.f32 1.0, %v9819_v59  ;;  %9844 = vtanh.f32 %v15059_v57  ;;  %v15081_v48 = vmul.f32 0.5, %v4176_v8  ;;  %18655 = vst [vmem:[#allocation35_spill] sm:$0xff] %v15089_v9 }
 0x418   :  { %v9827_v27 = vpop.eup %9826  ;;  %v7149_v41 = vadd.f32 %v7148_v18, %v6597_v40  ;;  %v5887_v6 = vadd.f32 1.0, %v9821_v35  ;;  %v15085_v36 = vmul.f32 0.5, %v3678_v0  ;;  %v3686_v60 = vadd.f32 %v14841_v61, %v11962_v51  ;;  %v18656_v18 = vld [vmem:[#allocation30_spill] sm:$0xff] }
 0x419   :  { %v9829_v4 = vpop.eup %9828  ;;  %v6923_v22 = vadd.f32 %v6922_v53, %v6397_v29  ;;  %v7113_v14 = vadd.f32 %v7112_v42, %v6598_v49  ;;  %v6088_v45 = vadd.f32 1.0, %v9823_v44  ;;  %v15091_v59 = vmul.f32 0.5, %v4178_v26  ;;  %v15102_v42 = vpop.f32.mrf.mxu0 }
 0x41a   :  { %v9831_v8 = vpop.eup %9830  ;;  %v5888_v31 = vadd.f32 1.0, %v9825_v19  ;;  %9846 = vtanh.f32 %v15075_v16  ;;  %v4180_v40 = vadd.f32 %v18656_v18, %v11962_v51  ;;  %v15096_v0 = vmul.f32 0.5, %v3680_v3  ;;  %v15104_v29 = vpop.f32.mrf.mxu1 }
 0x41b   :  { %v9833_v35 = vpop.eup %9832  ;;  %v6887_v55 = vadd.f32 %v6886_v20, %v6398_v63  ;;  %v6599_v61 = vmul.f32 %v6087_v54, %v14967_v23  ;;  %9848 = vtanh.f32 %v15081_v48  ;;  %v3682_v53 = vadd.f32 %v14822_v32, %v11988_v46  ;;  %18657 = vst [vmem:[#allocation75_spill] sm:$0xff] %v15104_v29 }
 0x41c   :  { %v9835_v49 = vpop.eup %9834  ;;  %v6399_v26 = vmul.f32 %v5887_v6, %v14973_v24  ;;  %v6089_v44 = vadd.f32 1.0, %v9827_v27  ;;  %9850 = vtanh.f32 %v15085_v36  ;;  %v15108_v3 = vmul.f32 0.5, %v3686_v60  ;;  %v15118_v24 = vpop.f32.mrf.mxu1 }
 0x41d   :  { %v9837_v20 = vpop.eup %9836  ;;  %v6600_v23 = vmul.f32 %v6088_v45, %v14983_v47  ;;  %v6090_v19 = vadd.f32 1.0, %v9831_v8  ;;  %9852 = vtanh.f32 %v15091_v59  ;;  %v3688_v32 = vadd.f32 %v14858_v13, %v11988_v46  ;;  %18658 = vst [vmem:[#allocation20_spill] sm:$0xff] %v15118_v24  ;;  %v18659_v47 = vld [vmem:[#allocation47_spill] sm:$0xff]  ;;  %v15124_v8 = vpop.f32.mrf.mxu0 }
 0x41e   :  { %v9839_v63 = vpop.eup %9838  ;;  %v6400_v54 = vmul.f32 %v5888_v31, %v14988_v39  ;;  %v6091_v18 = vadd.f32 1.0, %v9833_v35  ;;  %v15115_v29 = vmul.f32 0.5, %v4180_v40  ;;  %9854 = vtanh.f32 %v15096_v0  ;;  %v15128_v31 = vpop.f32.mrf.mxu1  ;;  %v18661_v40 = vld [vmem:[#allocation44_spill] sm:$0xff] }
 0x41f   :  { %v7150_v27 = vadd.f32 %v7149_v41, %v6599_v61  ;;  %v6092_v6 = vadd.f32 1.0, %v9835_v49  ;;  %v4182_v60 = vadd.f32 %v18659_v47, %v11988_v46  ;;  %v15122_v45 = vmul.f32 0.5, %v3682_v53  ;;  %18660 = vst [vmem:[#allocation70_spill] sm:$0xff] %v15128_v31  ;;  %v18662_v35 = vld [vmem:[#allocation80_spill] sm:$0xff] }
 0x420   :  { %v6601_v13 = vmul.f32 %v6089_v44, %v14993_v37  ;;  %v5889_v9 = vadd.f32 1.0, %v9829_v4  ;;  %v6093_v39 = vadd.f32 1.0, %v9837_v20  ;;  %9856 = vtanh.f32 %v15108_v3  ;;  %v15139_v20 = vpop.f32.mrf.mxu1 }
 0x421   :  { %v18663_v24 = vpack.c.bf16 %v18661_v40, %v18662_v35  ;;  %v6924_v41 = vadd.f32 %v6923_v22, %v6399_v26  ;;  %v6602_v61 = vmul.f32 %v6090_v19, %v15006_v17  ;;  %v5890_v49 = vadd.f32 1.0, %v9839_v63  ;;  %v18664_v17 = vld [vmem:[#allocation100_spill] sm:$0xff]  ;;  %v15147_v19 = vpop.f32.mrf.mxu0  ;;  %v18665_v40 = vld [vmem:[#allocation123_spill] sm:$0xff] }
 0x422   :  { %v15134_v53 = vmul.f32 0.5, %v3688_v32  ;;  %v9841_v47 = vpop.eup %9840  ;;  %v7114_v37 = vadd.f32 %v7113_v14, %v6600_v23  ;;  %v6888_v4 = vadd.f32 %v6887_v55, %v6400_v54  ;;  %v6603_v44 = vmul.f32 %v6091_v18, %v15011_v50  ;;  %v15153_v63 = vpop.f32.mrf.mxu1 }
 0x423   :  { %4564 = vmatmul.mubr.bf16.gmra.mxu1 %v18663_v24  ;;  %9858 = vtanh.f32 %v15115_v29  ;;  %v9843_v31 = vpop.eup %9842  ;;  %v6604_v24 = vmul.f32 %v6092_v6, %v15019_v2  ;;  %v15142_v22 = vmul.f32 0.5, %v4182_v60  ;;  %v4186_v26 = vadd.f32 %v18664_v17, %v11962_v51 }
 0x424   :  { %4573 = vmatprep.mubr.bf16.mxu1 %v17973_v11  ;;  %9860 = vtanh.f32 %v15122_v45  ;;  %v9845_v14 = vpop.eup %9844  ;;  %v7151_v55 = vadd.f32 %v7150_v27, %v6601_v13  ;;  %v6401_v50 = vmul.f32 %v5889_v9, %v15001_v10  ;;  %v6605_v23 = vmul.f32 %v6093_v39, %v15024_v25  ;;  %v15164_v39 = vpop.f32.mrf.mxu0 }
 0x425   :  { %v3690_v32 = vadd.f32 %v14880_v28, %v11962_v51  ;;  %v7115_v2 = vadd.f32 %v7114_v37, %v6602_v61  ;;  %v6402_v54 = vmul.f32 %v5890_v49, %v15027_v15  ;;  %v5891_v18 = vadd.f32 1.0, %v9841_v47  ;;  %v15166_v15 = vpop.f32.mrf.mxu1 }
 0x426   :  { %9862 = vtanh.f32 %v15134_v53  ;;  %v7152_v6 = vadd.f32 %v7151_v55, %v6603_v44  ;;  %v5892_v60 = vadd.f32 1.0, %v9843_v31  ;;  %v4188_v27 = vadd.f32 %v18665_v40, %v11988_v46  ;;  %18666 = vst [vmem:[#allocation74_spill] sm:$0xff] %v15166_v15  ;;  %v18667_v31 = vld [vmem:[#allocation156_spill] sm:$0xff] }
 0x427   :  { %v15159_v13 = vmul.f32 0.5, %v3690_v32  ;;  %v9847_v10 = vpop.eup %9846  ;;  %v7116_v25 = vadd.f32 %v7115_v2, %v6604_v24  ;;  %v5893_v9 = vadd.f32 1.0, %v9845_v14  ;;  %9864 = vtanh.f32 %v15142_v22  ;;  %v15176_v55 = vpop.f32.mrf.mxu1  ;;  %v18670_v32 = vld [vmem:[#allocation144_spill] sm:$0xff] }
 0x428   :  { %v15162_v28 = vmul.f32 0.5, %v4186_v26  ;;  %v9849_v35 = vpop.eup %9848  ;;  %v7153_v61 = vadd.f32 %v7152_v6, %v6605_v23  ;;  %v4190_v49 = vadd.f32 %v18667_v31, %v11962_v51  ;;  %v3692_v47 = vadd.f32 %v14901_v38, %v11988_v46  ;;  %v18668_v26 = vld [vmem:[#allocation54_spill] sm:$0xff]  ;;  %18669 = vst [vmem:[#allocation37_spill] sm:$0xff] %v15176_v55  ;;  %v18671_v23 = vld [vmem:[#allocation143_spill] sm:$0xff] }
 0x429   :  { %9866 = vtanh.f32 %v15159_v13  ;;  %v9851_v37 = vpop.eup %9850  ;;  %v6925_v44 = vadd.f32 %v6924_v41, %v6401_v50  ;;  %v6889_v24 = vadd.f32 %v6888_v4, %v6402_v54  ;;  %v6403_v17 = vmul.f32 %v5891_v18, %v15047_v21  ;;  %v15189_v54 = vpop.f32.mrf.mxu0 }
 0x42a   :  { %v4192_v14 = vadd.f32 %v18668_v26, %v11988_v46  ;;  %v18672_v2 = vpack.c.bf16 %v18670_v32, %v18671_v23  ;;  %v9853_v6 = vpop.eup %9852  ;;  %v6404_v40 = vmul.f32 %v5892_v60, %v15050_v1  ;;  %v5894_v31 = vadd.f32 1.0, %v9847_v10  ;;  %v15191_v18 = vpop.f32.mrf.mxu1 }
 0x42b   :  { %v15182_v15 = vmul.f32 0.5, %v4188_v27  ;;  %v15184_v38 = vmul.f32 0.5, %v3692_v47  ;;  %v9855_v21 = vpop.eup %9854  ;;  %v7117_v41 = vrot.slane %v7116_v25, 4  ;;  %v6405_v4 = vmul.f32 %v5893_v9, %v15059_v57  ;;  %18673 = vst [vmem:[#allocation105_spill] sm:$0xff] %v15191_v18  ;;  %v18674_v57 = vld [vmem:[#allocation133_spill] sm:$0xff] }
 0x42c   :  { %4574 = vmatmul.mubr.bf16.gmra.mxu1 %v18672_v2  ;;  %v6094_v50 = vadd.f32 1.0, %v9849_v35  ;;  %9868 = vtanh.f32 %v15162_v28  ;;  %v7154_v26 = vrot.slane %v7153_v61, 4  ;;  %v5895_v1 = vadd.f32 1.0, %v9851_v37  ;;  %v15200_v35 = vpop.f32.mrf.mxu1 }
 0x42d   :  { %4583 = vmatprep.mubr.bf16.mxu1 %v17973_v11  ;;  %v15193_v60 = vmul.f32 0.5, %v4190_v49  ;;  %9870 = vtanh.f32 %v15184_v38  ;;  %v9857_v27 = vpop.eup %9856  ;;  %v6926_v10 = vadd.f32 %v6925_v44, %v6403_v17  ;;  %v6095_v47 = vadd.f32 1.0, %v9853_v6  ;;  %18675 = vst [vmem:[#allocation115_spill] sm:$0xff] %v15200_v35  ;;  %v18677_v17 = vld [vmem:[#allocation104_spill] sm:$0xff]  ;;  %v15211_v6 = vpop.f32.mrf.mxu0 }
 0x42e   :  { %v15196_v32 = vmul.f32 0.5, %v4192_v14  ;;  %v4196_v9 = vadd.f32 %v18674_v57, %v11962_v51  ;;  %v6890_v23 = vadd.f32 %v6889_v24, %v6404_v40  ;;  %v6406_v2 = vmul.f32 %v5894_v31, %v15075_v16  ;;  %v15213_v57 = vpop.f32.mrf.mxu1 }
 0x42f   :  { %v5896_v18 = vadd.f32 1.0, %v9855_v21  ;;  %9872 = vtanh.f32 %v15182_v15  ;;  %v15204_v37 = vadd.f32 %v7117_v41, %v7116_v25  ;;  %v6927_v55 = vadd.f32 %v6926_v10, %v6405_v4  ;;  %18678 = vst [vmem:[#allocation121_spill] sm:$0xff] %v15213_v57  ;;  %v18679_v21 = vld [vmem:[#allocation58_spill] sm:$0xff]  ;;  %v18682_v10 = vld [vmem:[#allocation36_spill] sm:$0xff] }
 0x430   :  { %v9859_v49 = vpop.eup %9858  ;;  %v15207_v44 = vmul.f32 %v6094_v50, %v15081_v48  ;;  %v4198_v14 = vadd.f32 %v18677_v17, %v11988_v46  ;;  %v7155_v40 = vadd.f32 %v7154_v26, %v7153_v61  ;;  %v6407_v16 = vmul.f32 %v5895_v1, %v15085_v36  ;;  %v15225_v4 = vpop.f32.mrf.mxu1  ;;  %v18681_v50 = vld [vmem:[#allocation83_spill] sm:$0xff] }
 0x431   :  { %18676 = vst [vmem:[#allocation48_spill] sm:$0xff] %v15204_v37  ;;  %v9861_v24 = vpop.eup %9860  ;;  %v5898_v31 = vadd.f32 1.0, %v9857_v27  ;;  %9874 = vtanh.f32 %v15193_v60  ;;  %v15218_v25 = vmul.f32 %v6095_v47, %v15091_v59  ;;  %v15221_v48 = vmul.f32 0.5, %v4196_v9  ;;  %18680 = vst [vmem:[#allocation40_spill] sm:$0xff] %v15225_v4  ;;  %v18684_v59 = vld [vmem:[#allocation53_spill] sm:$0xff] }
 0x432   :  { %9876 = vtanh.f32 %v15196_v32  ;;  %v3696_v41 = vadd.f32 %v18679_v21, %v11962_v51  ;;  %v18683_v61 = vpack.c.bf16 %v18681_v50, %v18682_v10  ;;  %v6891_v26 = vadd.f32 %v6890_v23, %v6406_v2  ;;  %v15239_v50 = vpop.f32.mrf.mxu0  ;;  %v15241_v10 = vpop.f32.mrf.mxu1 }
 0x433   :  { %v9863_v36 = vpop.eup %9862  ;;  %v6096_v1 = vadd.f32 1.0, %v9859_v49  ;;  %v6408_v27 = vmul.f32 %v5896_v18, %v15096_v0  ;;  %v4200_v47 = vadd.f32 %v18684_v59, %v11962_v51  ;;  %v5897_v17 = vadd.f32 1.0, %v9861_v24  ;;  %18685 = vst [vmem:[#allocation41_spill] sm:$0xff] %v15241_v10 }
 0x434   :  { %4584 = vmatmul.mubr.bf16.gmra.mxu1 %v18683_v61  ;;  %v15235_v21 = vmul.f32 0.5, %v4198_v14  ;;  %v3698_v4 = vadd.f32 %v14947_v62, %v11988_v46  ;;  %v9865_v23 = vpop.eup %9864  ;;  %v7156_v2 = vrot.slane %v7155_v40, 2  ;;  %v6928_v0 = vadd.f32 %v6927_v55, %v6407_v16  ;;  %v18686_v62 = vld [vmem:[#allocation161_spill] sm:$0xff]  ;;  %v15251_v9 = vpop.f32.mrf.mxu1 }
 0x435   :  { %4593 = vmatprep.mubr.bf16.mxu1 %v17973_v11  ;;  %v6410_v18 = vmul.f32 %v5898_v31, %v15108_v3  ;;  %v3700_v49 = vadd.f32 %v14971_v12, %v11962_v51  ;;  %v5899_v59 = vadd.f32 1.0, %v9863_v36  ;;  %9878 = vtanh.f32 %v15221_v48  ;;  %18687 = vst [vmem:[#allocation145_spill] sm:$0xff] %v15251_v9 }
 0x436   :  { %v9867_v61 = vpop.eup %9866  ;;  %v15247_v14 = vmul.f32 0.5, %v3696_v41  ;;  %v4202_v24 = vadd.f32 %v18686_v62, %v11988_v46  ;;  %v6608_v37 = vmul.f32 %v6096_v1, %v15115_v29  ;;  %v6892_v10 = vadd.f32 %v6891_v26, %v6408_v27  ;;  %v15260_v41 = vpop.f32.mrf.mxu0 }
 0x437   :  { %v5900_v55 = vadd.f32 1.0, %v9867_v61  ;;  %v15254_v16 = vmul.f32 0.5, %v4200_v47  ;;  %v6097_v3 = vadd.f32 1.0, %v9865_v23  ;;  %v6409_v12 = vmul.f32 %v5897_v17, %v15122_v45  ;;  %v15262_v36 = vpop.f32.mrf.mxu1  ;;  %v18690_v17 = vld [vmem:[#allocation85_spill] sm:$0xff]  ;;  %v18691_v23 = vld [vmem:[#allocation86_spill] sm:$0xff] }
 0x438   :  { %9880 = vtanh.f32 %v15235_v21  ;;  %v15258_v31 = vmul.f32 0.5, %v3698_v4  ;;  %18688 = vst [vmem:[#allocation168_spill] sm:$0xff] %v15262_v36  ;;  %v6893_v57 = vadd.f32 %v6892_v10, %v6410_v18  ;;  %v15265_v29 = vmul.f32 0.5, %v3700_v49 }
 0x439   :  { %v9869_v62 = vpop.eup %9868  ;;  %v6412_v9 = vmul.f32 %v5900_v55, %v15159_v13  ;;  %v3702_v26 = vadd.f32 %v14997_v7, %v11988_v46  ;;  %v7157_v27 = vadd.f32 %v7156_v2, %v7155_v40  ;;  %v6411_v45 = vmul.f32 %v5899_v59, %v15134_v53  ;;  %v15273_v47 = vpop.f32.mrf.mxu1  ;;  %v18693_v7 = vld [vmem:[#allocation132_spill] sm:$0xff] }
 0x43a   :  { %v9871_v1 = vpop.eup %9870  ;;  %9882 = vtanh.f32 %v15247_v14  ;;  %v15271_v4 = vmul.f32 0.5, %v4202_v24  ;;  %18689 = vst [vmem:[#allocation124_spill] sm:$0xff] %v15273_v47  ;;  %v18692_v10 = vpack.c.bf16 %v18690_v17, %v18691_v23  ;;  %v4206_v49 = vadd.f32 %v18693_v7, %v11962_v51  ;;  %v15286_v59 = vpop.f32.mrf.mxu0  ;;  %v18697_v7 = vld [vmem:[#allocation51_spill] sm:$0xff] }
 0x43b   :  { %v6894_v13 = vadd.f32 %v6893_v57, %v6412_v9  ;;  %v5901_v18 = vadd.f32 1.0, %v9871_v1  ;;  %9884 = vtanh.f32 %v15254_v16  ;;  %v6609_v40 = vmul.f32 %v6097_v3, %v15142_v22  ;;  %v15288_v57 = vpop.f32.mrf.mxu1 }
 0x43c   :  { %4594 = vmatmul.mubr.bf16.gmra.mxu1 %v18692_v10  ;;  %v9873_v53 = vpop.eup %9872  ;;  %v6929_v2 = vadd.f32 %v6928_v0, %v6409_v12  ;;  %9886 = vtanh.f32 %v15258_v31  ;;  %v3706_v61 = vadd.f32 %v15021_v43, %v11962_v51  ;;  %18694 = vst [vmem:[#allocation55_spill] sm:$0xff] %v15288_v57  ;;  %v6098_v9 = vadd.f32 1.0, %v9869_v62  ;;  %v18695_v0 = vld [vmem:[#allocation28_spill] sm:$0xff]  ;;  %v15308_v57 = vpop.f32.mrf.mxu0 }
 0x43d   :  { %4603 = vmatprep.mubr.bf16.mxu1 %v17973_v11  ;;  %v6413_v24 = vmul.f32 %v5901_v18, %v15184_v38  ;;  %9888 = vtanh.f32 %v15265_v29  ;;  %v15292_v55 = vmul.f32 0.5, %v3702_v26  ;;  %v6895_v22 = vrot.slane %v6894_v13, 4  ;;  %v15297_v43 = vpop.f32.mrf.mxu1 }
 0x43e   :  { %v9875_v1 = vpop.eup %9874  ;;  %v6930_v17 = vadd.f32 %v6929_v2, %v6411_v45  ;;  %9890 = vtanh.f32 %v15271_v4  ;;  %v4208_v3 = vadd.f32 %v18695_v0, %v11988_v46  ;;  %18696 = vst [vmem:[#allocation137_spill] sm:$0xff] %v15297_v43  ;;  %v7160_v23 = vadd.f32 %v6608_v37, %v15207_v44 }
 0x43f   :  { %v9877_v12 = vpop.eup %9876  ;;  %v6099_v62 = vadd.f32 1.0, %v9873_v53  ;;  %v15300_v10 = vmul.f32 0.5, %v4206_v49  ;;  %v3708_v38 = vadd.f32 %v15041_v56, %v11988_v46  ;;  %v7158_v26 = vrot.slane %v7157_v27, 1  ;;  %v15310_v0 = vpop.f32.mrf.mxu1 }
 0x440   :  { %v6931_v18 = vadd.f32 %v6930_v17, %v6413_v24  ;;  %v15304_v45 = vmul.f32 0.5, %v3706_v61  ;;  %v4210_v2 = vadd.f32 %v18697_v7, %v11962_v51  ;;  %18698 = vst [vmem:[#allocation142_spill] sm:$0xff] %v15310_v0  ;;  %v6610_v43 = vmul.f32 %v6098_v9, %v15162_v28  ;;  %v18699_v28 = vld [vmem:[#allocation146_spill] sm:$0xff] }
 0x441   :  { %v6100_v37 = vadd.f32 1.0, %v9875_v1  ;;  %9892 = vtanh.f32 %v15292_v55  ;;  %v3710_v44 = vadd.f32 %v15063_v30, %v11962_v51  ;;  %v7197_v56 = vadd.f32 %v6609_v40, %v15218_v25  ;;  %v15330_v25 = vpop.f32.mrf.mxu0  ;;  %v18702_v40 = vld [vmem:[#allocation138_spill] sm:$0xff] }
 0x442   :  { %v6896_v49 = vadd.f32 %v6895_v22, %v6894_v13  ;;  %v6101_v53 = vadd.f32 1.0, %v9877_v12  ;;  %v15317_v61 = vmul.f32 0.5, %v4208_v3  ;;  %v9879_v24 = vpop.eup %9878  ;;  %v6611_v17 = vmul.f32 %v6099_v62, %v15182_v15  ;;  %v15332_v13 = vpop.f32.mrf.mxu1  ;;  %v18703_v15 = vld [vmem:[#allocation88_spill] sm:$0xff] }
 0x443   :  { %9894 = vtanh.f32 %v15300_v10  ;;  %v15321_v7 = vmul.f32 0.5, %v3708_v38  ;;  %v4212_v9 = vadd.f32 %v18699_v28, %v11988_v46  ;;  %v15325_v1 = vadd.f32 %v7158_v26, %v7157_v27  ;;  %18701 = vst [vmem:[#allocation96_spill] sm:$0xff] %v15332_v13 }
 0x444   :  { %v6932_v0 = vrot.slane %v6931_v18, 4  ;;  %9896 = vtanh.f32 %v15304_v45  ;;  %v15328_v30 = vmul.f32 0.5, %v4210_v2  ;;  %v18704_v22 = vpack.c.bf16 %v18702_v40, %v18703_v15 }
 0x445   :  { %18700 = vst [vmem:[#allocation157_spill] sm:$0xff] %v15325_v1  ;;  %v9881_v3 = vpop.eup %9880  ;;  %v7161_v12 = vadd.f32 %v7160_v23, %v6610_v43  ;;  %v6612_v62 = vmul.f32 %v6100_v37, %v15193_v60  ;;  %v15338_v38 = vmul.f32 0.5, %v3710_v44  ;;  %v3712_v27 = vadd.f32 %v15083_v5, %v11988_v46  ;;  %v15345_v1 = vpop.f32.mrf.mxu1  ;;  %v18706_v43 = vld [vmem:[#allocation16_spill] sm:$0xff] }
 0x446   :  { %4604 = vmatmul.mubr.bf16.gmra.mxu1 %v18704_v22  ;;  %v6897_v26 = vrot.slane %v6896_v49, 2  ;;  %v6613_v2 = vmul.f32 %v6101_v53, %v15196_v32  ;;  %v6102_v28 = vadd.f32 1.0, %v9879_v24  ;;  %9898 = vtanh.f32 %v15317_v61  ;;  %18705 = vst [vmem:[#allocation134_spill] sm:$0xff] %v15345_v1  ;;  %v15355_v53 = vpop.f32.mrf.mxu0  ;;  %v18708_v22 = vld [vmem:[#allocation87_spill] sm:$0xff] }
 0x447   :  { %4613 = vmatprep.mubr.bf16.mxu1 %v17973_v11  ;;  %v9883_v40 = vpop.eup %9882  ;;  %v7198_v15 = vadd.f32 %v7197_v56, %v6611_v17  ;;  %9900 = vtanh.f32 %v15321_v7  ;;  %v15348_v60 = vmul.f32 0.5, %v4212_v9  ;;  %v4216_v23 = vadd.f32 %v18706_v43, %v11962_v51  ;;  %v15357_v24 = vpop.f32.mrf.mxu1 }
 0x448   :  { %v9885_v5 = vpop.eup %9884  ;;  %v6933_v37 = vadd.f32 %v6932_v0, %v6931_v18  ;;  %v6103_v44 = vadd.f32 1.0, %v9881_v3  ;;  %9902 = vtanh.f32 %v15328_v30  ;;  %v3716_v32 = vadd.f32 %v15102_v42, %v11962_v51  ;;  %18707 = vst [vmem:[#allocation94_spill] sm:$0xff] %v15357_v24 }
 0x449   :  { %v9887_v56 = vpop.eup %9886  ;;  %v7162_v17 = vadd.f32 %v7161_v12, %v6612_v62  ;;  %9904 = vtanh.f32 %v15338_v38  ;;  %v15360_v9 = vmul.f32 0.5, %v3712_v27  ;;  %v4218_v43 = vadd.f32 %v18708_v22, %v11988_v46  ;;  %v15365_v42 = vpop.f32.mrf.mxu1 }
 0x44a   :  { %v9889_v18 = vpop.eup %9888  ;;  %v6898_v0 = vadd.f32 %v6897_v26, %v6896_v49  ;;  %v7199_v3 = vadd.f32 %v7198_v15, %v6613_v2  ;;  %v6614_v1 = vmul.f32 %v6102_v28, %v15221_v48  ;;  %v5902_v13 = vadd.f32 1.0, %v9883_v40  ;;  %18709 = vst [vmem:[#allocation77_spill] sm:$0xff] %v15365_v42  ;;  %v15375_v26 = vpop.f32.mrf.mxu0  ;;  %v18711_v2 = vld [vmem:[#allocation140_spill] sm:$0xff] }
 0x44b   :  { %v9891_v47 = vpop.eup %9890  ;;  %v6104_v36 = vadd.f32 1.0, %v9885_v5  ;;  %9906 = vtanh.f32 %v15348_v60  ;;  %v15368_v12 = vmul.f32 0.5, %v4216_v23  ;;  %v3718_v62 = vadd.f32 %v15124_v8, %v11988_v46  ;;  %v15377_v48 = vpop.f32.mrf.mxu1  ;;  %v18712_v28 = vld [vmem:[#allocation148_spill] sm:$0xff]  ;;  %v18714_v8 = vld [vmem:[#allocation109_spill] sm:$0xff] }
 0x44c   :  { %v6934_v27 = vrot.slane %v6933_v37, 2  ;;  %v6615_v22 = vmul.f32 %v6103_v44, %v15235_v21  ;;  %v5903_v24 = vadd.f32 1.0, %v9887_v56  ;;  %v15373_v49 = vmul.f32 0.5, %v3716_v32  ;;  %18710 = vst [vmem:[#allocation42_spill] sm:$0xff] %v15377_v48 }
 0x44d   :  { %v18713_v40 = vpack.c.bf16 %v18711_v2, %v18712_v28  ;;  %v5904_v15 = vadd.f32 1.0, %v9889_v18  ;;  %9908 = vtanh.f32 %v15360_v9  ;;  %v15383_v23 = vmul.f32 0.5, %v4218_v43  ;;  %v15389_v42 = vpop.f32.mrf.mxu1 }
 0x44e   :  { %v4220_v5 = vadd.f32 %v18714_v8, %v11962_v51  ;;  %v9893_v21 = vpop.eup %9892  ;;  %v6899_v44 = vrot.slane %v6898_v0, 1  ;;  %v7163_v32 = vadd.f32 %v7162_v17, %v6614_v1  ;;  %v6414_v56 = vmul.f32 %v5902_v13, %v15247_v14  ;;  %18715 = vst [vmem:[#allocation159_spill] sm:$0xff] %v15389_v42  ;;  %v15400_v14 = vpop.f32.mrf.mxu0  ;;  %v18717_v17 = vld [vmem:[#allocation73_spill] sm:$0xff] }
 0x44f   :  { %4614 = vmatmul.mubr.bf16.gmra.mxu1 %v18713_v40  ;;  %v6105_v48 = vadd.f32 1.0, %v9891_v47  ;;  %v6616_v2 = vmul.f32 %v6104_v36, %v15254_v16  ;;  %9910 = vtanh.f32 %v15368_v12  ;;  %v15393_v18 = vmul.f32 0.5, %v3718_v62  ;;  %v15402_v47 = vpop.f32.mrf.mxu1 }
 0x450   :  { %4623 = vmatprep.mubr.bf16.mxu1 %v17973_v11  ;;  %v3720_v43 = vadd.f32 %v15147_v19, %v11962_v51  ;;  %v9895_v28 = vpop.eup %9894  ;;  %v6935_v40 = vadd.f32 %v6934_v27, %v6933_v37  ;;  %v7200_v8 = vadd.f32 %v7199_v3, %v6615_v22  ;;  %v6415_v35 = vmul.f32 %v5903_v24, %v15258_v31 }
 0x451   :  { %v15398_v1 = vmul.f32 0.5, %v4220_v5  ;;  %18716 = vst [vmem:[#allocation152_spill] sm:$0xff] %v15402_v47  ;;  %v9897_v13 = vpop.eup %9896  ;;  %v6416_v16 = vmul.f32 %v5904_v15, %v15265_v29  ;;  %v5905_v36 = vadd.f32 1.0, %v9893_v21  ;;  %9912 = vtanh.f32 %v15373_v49  ;;  %v15414_v24 = vpop.f32.mrf.mxu1 }
 0x452   :  { %v4222_v19 = vadd.f32 %v18717_v17, %v11988_v46  ;;  %v15408_v62 = vadd.f32 %v6899_v44, %v6898_v0  ;;  %v6617_v37 = vmul.f32 %v6105_v48, %v15271_v4  ;;  %9914 = vtanh.f32 %v15383_v23  ;;  %18719 = vst [vmem:[#allocation154_spill] sm:$0xff] %v15414_v24  ;;  %v18720_v4 = vld [vmem:[#allocation135_spill] sm:$0xff]  ;;  %v15422_v21 = vpop.f32.mrf.mxu0  ;;  %v18722_v44 = vld [vmem:[#allocation92_spill] sm:$0xff] }
 0x453   :  { %v3722_v31 = vadd.f32 %v15164_v39, %v11988_v46  ;;  %v9899_v3 = vpop.eup %9898  ;;  %v7164_v27 = vadd.f32 %v7163_v32, %v6616_v2  ;;  %v6106_v29 = vadd.f32 1.0, %v9895_v28  ;;  %9916 = vtanh.f32 %v15393_v18  ;;  %v15424_v39 = vpop.f32.mrf.mxu1  ;;  %v18723_v17 = vld [vmem:[#allocation147_spill] sm:$0xff] }
 0x454   :  { %18718 = vst [vmem:[#allocation160_spill] sm:$0xff] %v15408_v62  ;;  %v15417_v22 = vmul.f32 0.5, %v3720_v43  ;;  %v9901_v15 = vpop.eup %9900  ;;  %v6936_v5 = vrot.slane %v6935_v40, 1  ;;  %v5906_v0 = vadd.f32 1.0, %v9897_v13  ;;  %9918 = vtanh.f32 %v15398_v1  ;;  %18721 = vst [vmem:[#allocation102_spill] sm:$0xff] %v15424_v39  ;;  %v18725_v39 = vld [vmem:[#allocation52_spill] sm:$0xff] }
 0x455   :  { %v4226_v48 = vadd.f32 %v18720_v4, %v11962_v51  ;;  %v18724_v32 = vpack.c.bf16 %v18722_v44, %v18723_v17  ;;  %v9903_v2 = vpop.eup %9902  ;;  %v6938_v28 = vadd.f32 %v6416_v16, %v6414_v56  ;;  %v6417_v43 = vmul.f32 %v5905_v36, %v15292_v55  ;;  %v15439_v17 = vpop.f32.mrf.mxu1 }
 0x456   :  { %v15430_v62 = vmul.f32 0.5, %v4222_v19  ;;  %v3726_v13 = vadd.f32 %v15189_v54, %v11962_v51  ;;  %v9905_v4 = vpop.eup %9904  ;;  %v7201_v24 = vadd.f32 %v7200_v8, %v6617_v37  ;;  %v6107_v47 = vadd.f32 1.0, %v9899_v3 }
 0x457   :  { %4624 = vmatmul.mubr.bf16.gmra.mxu1 %v18724_v32  ;;  %v15435_v42 = vmul.f32 0.5, %v3722_v31  ;;  %v4228_v44 = vadd.f32 %v18725_v39, %v11988_v46  ;;  %v6618_v56 = vmul.f32 %v6106_v29, %v15300_v10  ;;  %v5907_v55 = vadd.f32 1.0, %v9901_v15  ;;  %v15450_v31 = vpop.f32.mrf.mxu0  ;;  %v15452_v3 = vpop.f32.mrf.mxu1 }
 0x458   :  { %4633 = vmatprep.mubr.bf16.mxu1 %v17973_v11  ;;  %9920 = vtanh.f32 %v15417_v22  ;;  %v3728_v54 = vadd.f32 %v15211_v6, %v11988_v46  ;;  %v9907_v16 = vpop.eup %9906  ;;  %v15445_v36 = vadd.f32 %v6936_v5, %v6935_v40  ;;  %v6418_v8 = vmul.f32 %v5906_v0, %v15304_v45  ;;  %v18727_v45 = vld [vmem:[#allocation17_spill] sm:$0xff] }
 0x459   :  { %v6108_v19 = vadd.f32 1.0, %v9903_v2  ;;  %v15448_v37 = vmul.f32 0.5, %v4226_v48  ;;  %v6975_v39 = vadd.f32 %v6417_v43, %v6415_v35  ;;  %v5908_v10 = vadd.f32 1.0, %v9905_v4  ;;  %v15463_v0 = vpop.f32.mrf.mxu1 }
 0x45a   :  { %18726 = vst [vmem:[#allocation43_spill] sm:$0xff] %v15445_v36  ;;  %9922 = vtanh.f32 %v15430_v62  ;;  %v15455_v29 = vmul.f32 0.5, %v3726_v13  ;;  %v9909_v15 = vpop.eup %9908  ;;  %v6619_v6 = vmul.f32 %v6107_v47, %v15317_v61  ;;  %v15459_v40 = vmul.f32 0.5, %v4228_v44  ;;  %v18728_v47 = vld [vmem:[#allocation164_spill] sm:$0xff]  ;;  %v15474_v44 = vpop.f32.mrf.mxu0 }
 0x45b   :  { %9924 = vtanh.f32 %v15435_v42  ;;  %v4230_v5 = vadd.f32 %v18727_v45, %v11962_v51  ;;  %v7165_v48 = vadd.f32 %v7164_v27, %v6618_v56  ;;  %v6419_v35 = vmul.f32 %v5907_v55, %v15321_v7  ;;  %v15476_v45 = vpop.f32.mrf.mxu1  ;;  %v18730_v27 = vld [vmem:[#allocation56_spill] sm:$0xff]  ;;  %v18731_v7 = vld [vmem:[#allocation91_spill] sm:$0xff] }
 0x45c   :  { %v15466_v32 = vmul.f32 0.5, %v3728_v54  ;;  %v3730_v2 = vadd.f32 %v15239_v50, %v11962_v51  ;;  %v9911_v43 = vpop.eup %9910  ;;  %v6939_v13 = vadd.f32 %v6938_v28, %v6418_v8  ;;  %v6620_v61 = vmul.f32 %v6108_v19, %v15328_v30  ;;  %18729 = vst [vmem:[#allocation76_spill] sm:$0xff] %v15476_v45 }
 0x45d   :  { %9926 = vtanh.f32 %v15448_v37  ;;  %v4232_v4 = vadd.f32 %v18728_v47, %v11988_v46  ;;  %v18732_v56 = vpack.c.bf16 %v18730_v27, %v18731_v7  ;;  %v6420_v55 = vmul.f32 %v5908_v10, %v15338_v38  ;;  %v15489_v47 = vpop.f32.mrf.mxu1 }
 0x45e   :  { %v6109_v50 = vadd.f32 1.0, %v9907_v16  ;;  %9928 = vtanh.f32 %v15455_v29  ;;  %v3732_v30 = vadd.f32 %v15260_v41, %v11988_v46  ;;  %v9913_v28 = vpop.eup %9912  ;;  %v7202_v54 = vadd.f32 %v7201_v24, %v6619_v6  ;;  %18733 = vst [vmem:[#allocation171_spill] sm:$0xff] %v15489_v47  ;;  %v18734_v16 = vld [vmem:[#allocation120_spill] sm:$0xff]  ;;  %v15500_v6 = vpop.f32.mrf.mxu0 }
 0x45f   :  { %4634 = vmatmul.mubr.bf16.gmra.mxu1 %v18732_v56  ;;  %v5909_v8 = vadd.f32 1.0, %v9909_v15  ;;  %9930 = vtanh.f32 %v15459_v40  ;;  %v15487_v19 = vmul.f32 0.5, %v4230_v5  ;;  %v9915_v27 = vpop.eup %9914  ;;  %v6976_v7 = vadd.f32 %v6975_v39, %v6419_v35  ;;  %v15502_v5 = vpop.f32.mrf.mxu1 }
 0x460   :  { %4643 = vmatprep.mubr.bf16.mxu1 %v17973_v11  ;;  %9932 = vtanh.f32 %v15466_v32  ;;  %v15492_v38 = vmul.f32 0.5, %v3730_v2  ;;  %v4236_v41 = vadd.f32 %v18734_v16, %v11962_v51  ;;  %v9917_v10 = vpop.eup %9916  ;;  %v7166_v56 = vadd.f32 %v7165_v48, %v6620_v61  ;;  %18735 = vst [vmem:[#allocation141_spill] sm:$0xff] %v15502_v5 }
 0x461   :  { %v6110_v36 = vadd.f32 1.0, %v9911_v43  ;;  %v15496_v24 = vmul.f32 0.5, %v4232_v4  ;;  %v3736_v15 = vadd.f32 %v15286_v59, %v11962_v51  ;;  %v9919_v39 = vpop.eup %9918  ;;  %v6940_v35 = vadd.f32 %v6939_v13, %v6420_v55  ;;  %v18736_v43 = vld [vmem:[#allocation166_spill] sm:$0xff]  ;;  %v15511_v59 = vpop.f32.mrf.mxu1 }
 0x462   :  { %v6621_v2 = vmul.f32 %v6109_v50, %v15348_v60  ;;  %v5910_v47 = vadd.f32 1.0, %v9913_v28  ;;  %v15505_v45 = vmul.f32 0.5, %v3732_v30  ;;  %v6421_v16 = vmul.f32 %v5909_v8, %v15360_v9  ;;  %18737 = vst [vmem:[#allocation79_spill] sm:$0xff] %v15511_v59  ;;  %v15522_v30 = vpop.f32.mrf.mxu0  ;;  %v18739_v8 = vld [vmem:[#allocation89_spill] sm:$0xff] }
 0x463   :  { %v6111_v48 = vadd.f32 1.0, %v9915_v27  ;;  %9934 = vtanh.f32 %v15487_v19  ;;  %v4238_v61 = vadd.f32 %v18736_v43, %v11988_v46  ;;  %v5911_v4 = vadd.f32 1.0, %v9917_v10  ;;  %v15524_v28 = vpop.f32.mrf.mxu1  ;;  %v18740_v27 = vld [vmem:[#allocation151_spill] sm:$0xff] }
 0x464   :  { %9936 = vtanh.f32 %v15492_v38  ;;  %v15514_v5 = vmul.f32 0.5, %v4236_v41  ;;  %v3738_v60 = vadd.f32 %v15308_v57, %v11988_v46  ;;  %v6622_v55 = vmul.f32 %v6110_v36, %v15368_v12  ;;  %18738 = vst [vmem:[#allocation116_spill] sm:$0xff] %v15524_v28  ;;  %v18742_v57 = vld [vmem:[#allocation29_spill] sm:$0xff] }
 0x465   :  { %v9921_v13 = vpop.eup %9920  ;;  %v6112_v9 = vadd.f32 1.0, %v9919_v39  ;;  %9938 = vtanh.f32 %v15496_v24  ;;  %v15520_v50 = vmul.f32 0.5, %v3736_v15  ;;  %v18741_v10 = vpack.c.bf16 %v18739_v8, %v18740_v27  ;;  %v15539_v27 = vpop.f32.mrf.mxu1 }
 0x466   :  { %v7203_v41 = vadd.f32 %v7202_v54, %v6621_v2  ;;  %v6422_v43 = vmul.f32 %v5910_v47, %v15373_v49  ;;  %9940 = vtanh.f32 %v15505_v45  ;;  %v4240_v12 = vadd.f32 %v18742_v57, %v11962_v51  ;;  %18743 = vst [vmem:[#allocation95_spill] sm:$0xff] %v15539_v27 }
 0x467   :  { %4644 = vmatmul.mubr.bf16.gmra.mxu1 %v18741_v10  ;;  %v9923_v36 = vpop.eup %9922  ;;  %v6977_v15 = vadd.f32 %v6976_v7, %v6421_v16  ;;  %v6623_v39 = vmul.f32 %v6111_v48, %v15383_v23  ;;  %v15535_v59 = vmul.f32 0.5, %v4238_v61  ;;  %v3740_v8 = vadd.f32 %v15330_v25, %v11962_v51  ;;  %v18744_v23 = vld [vmem:[#allocation136_spill] sm:$0xff]  ;;  %v15549_v48 = vpop.f32.mrf.mxu0 }
 0x468   :  { %4653 = vmatprep.mubr.bf16.mxu1 %v17973_v11  ;;  %v9925_v54 = vpop.eup %9924  ;;  %v6423_v49 = vmul.f32 %v5911_v4, %v15393_v18  ;;  %v5912_v47 = vadd.f32 1.0, %v9921_v13  ;;  %9942 = vtanh.f32 %v15514_v5  ;;  %v15543_v2 = vmul.f32 0.5, %v3738_v60  ;;  %v15551_v25 = vpop.f32.mrf.mxu1 }
 0x469   :  { %v7167_v10 = vadd.f32 %v7166_v56, %v6622_v55  ;;  %v6624_v7 = vmul.f32 %v6112_v9, %v15398_v1  ;;  %9944 = vtanh.f32 %v15520_v50  ;;  %v4242_v16 = vadd.f32 %v18744_v23, %v11988_v46  ;;  %18745 = vst [vmem:[#allocation172_spill] sm:$0xff] %v15551_v25 }
 0x46a   :  { %v9927_v61 = vpop.eup %9926  ;;  %v6941_v57 = vadd.f32 %v6940_v35, %v6422_v43  ;;  %v6113_v18 = vadd.f32 1.0, %v9923_v36  ;;  %v15553_v4 = vmul.f32 0.5, %v4240_v12  ;;  %v3742_v60 = vadd.f32 %v15355_v53, %v11988_v46  ;;  %v15560_v9 = vpop.f32.mrf.mxu1  ;;  %v18747_v35 = vld [vmem:[#allocation34_spill] sm:$0xff] }
 0x46b   :  { %v9929_v56 = vpop.eup %9928  ;;  %v7204_v13 = vadd.f32 %v7203_v41, %v6623_v39  ;;  %v5913_v1 = vadd.f32 1.0, %v9925_v54  ;;  %9946 = vtanh.f32 %v15535_v59  ;;  %v15558_v55 = vmul.f32 0.5, %v3740_v8  ;;  %18746 = vst [vmem:[#allocation45_spill] sm:$0xff] %v15560_v9  ;;  %v15570_v8 = vpop.f32.mrf.mxu0 }
 0x46c   :  { %v9931_v23 = vpop.eup %9930  ;;  %v6978_v27 = vadd.f32 %v6977_v15, %v6423_v49  ;;  %v6424_v25 = vmul.f32 %v5912_v47, %v15417_v22  ;;  %9948 = vtanh.f32 %v15543_v2  ;;  %v4246_v43 = vadd.f32 %v18747_v35, %v11962_v51  ;;  %v15572_v54 = vpop.f32.mrf.mxu1  ;;  %v18749_v15 = vld [vmem:[#allocation50_spill] sm:$0xff]  ;;  %v18750_v49 = vld [vmem:[#allocation153_spill] sm:$0xff] }
 0x46d   :  { %v9933_v12 = vpop.eup %9932  ;;  %v7168_v53 = vadd.f32 %v7167_v10, %v6624_v7  ;;  %v6114_v36 = vadd.f32 1.0, %v9927_v61  ;;  %v15566_v41 = vmul.f32 0.5, %v4242_v16  ;;  %v3746_v39 = vadd.f32 %v15375_v26, %v11962_v51  ;;  %18748 = vst [vmem:[#allocation39_spill] sm:$0xff] %v15572_v54  ;;  %v18752_v16 = vld [vmem:[#allocation65_spill] sm:$0xff] }
 0x46e   :  { %v18751_v22 = vpack.c.bf16 %v18749_v15, %v18750_v49  ;;  %v6625_v47 = vmul.f32 %v6113_v18, %v15430_v62  ;;  %v5914_v9 = vadd.f32 1.0, %v9929_v56  ;;  %9950 = vtanh.f32 %v15553_v4  ;;  %v15586_v35 = vpop.f32.mrf.mxu1 }
 0x46f   :  { %v15579_v10 = vmul.f32 0.5, %v3742_v60  ;;  %v6425_v7 = vmul.f32 %v5913_v1, %v15435_v42  ;;  %v6115_v26 = vadd.f32 1.0, %v9931_v23  ;;  %9952 = vtanh.f32 %v15558_v55  ;;  %18753 = vst [vmem:[#allocation173_spill] sm:$0xff] %v15586_v35  ;;  %v18754_v1 = vld [vmem:[#allocation131_spill] sm:$0xff] }
 0x470   :  { %4654 = vmatmul.mubr.bf16.gmra.mxu1 %v18751_v22  ;;  %v4248_v61 = vadd.f32 %v18752_v16, %v11988_v46  ;;  %v9935_v15 = vpop.eup %9934  ;;  %v6942_v49 = vadd.f32 %v6941_v57, %v6424_v25  ;;  %v5915_v62 = vadd.f32 1.0, %v9933_v12  ;;  %v15588_v18 = vmul.f32 0.5, %v4246_v43  ;;  %v15598_v16 = vpop.f32.mrf.mxu0 }
 0x471   :  { %4663 = vmatprep.mubr.bf16.mxu1 %v17973_v11  ;;  %v3748_v60 = vadd.f32 %v15400_v14, %v11988_v46  ;;  %v9937_v56 = vpop.eup %9936  ;;  %v6626_v22 = vmul.f32 %v6114_v36, %v15448_v37  ;;  %9954 = vtanh.f32 %v15566_v41  ;;  %v15594_v42 = vmul.f32 0.5, %v3746_v39  ;;  %v15600_v35 = vpop.f32.mrf.mxu1 }
 0x472   :  { %v4250_v23 = vadd.f32 %v18754_v1, %v11962_v51  ;;  %18755 = vst [vmem:[#allocation26_spill] sm:$0xff] %v15600_v35  ;;  %v9939_v25 = vpop.eup %9938  ;;  %v7205_v57 = vadd.f32 %v7204_v13, %v6625_v47  ;;  %v6426_v43 = vmul.f32 %v5914_v9, %v15455_v29  ;;  %9956 = vtanh.f32 %v15579_v10 }
 0x473   :  { %v3750_v14 = vadd.f32 %v15422_v21, %v11962_v51  ;;  %v9941_v37 = vpop.eup %9940  ;;  %v6979_v12 = vadd.f32 %v6978_v27, %v6425_v7  ;;  %v6627_v36 = vmul.f32 %v6115_v26, %v15459_v40  ;;  %v6116_v39 = vadd.f32 1.0, %v9935_v15  ;;  %v15609_v1 = vpop.f32.mrf.mxu1  ;;  %v18757_v7 = vld [vmem:[#allocation84_spill] sm:$0xff]  ;;  %v18758_v26 = vld [vmem:[#allocation62_spill] sm:$0xff] }
 0x474   :  { %v15607_v54 = vmul.f32 0.5, %v4248_v61  ;;  %v6427_v35 = vmul.f32 %v5915_v62, %v15466_v32  ;;  %v5916_v28 = vadd.f32 1.0, %v9937_v56  ;;  %9958 = vtanh.f32 %v15588_v18  ;;  %v15618_v40 = vpop.f32.mrf.mxu0 }
 0x475   :  { %v15613_v29 = vmul.f32 0.5, %v3748_v60  ;;  %v9943_v13 = vpop.eup %9942  ;;  %v7169_v9 = vadd.f32 %v7168_v53, %v6626_v22  ;;  %v6117_v47 = vadd.f32 1.0, %v9939_v25  ;;  %9960 = vtanh.f32 %v15594_v42  ;;  %v15620_v27 = vpop.f32.mrf.mxu1  ;;  %v18760_v53 = vld [vmem:[#allocation130_spill] sm:$0xff] }
 0x476   :  { %v15616_v21 = vmul.f32 0.5, %v4250_v23  ;;  %18756 = vst [vmem:[#allocation99_spill] sm:$0xff] %v15620_v27  ;;  %v18759_v61 = vpack.c.bf16 %v18757_v7, %v18758_v26  ;;  %v9945_v32 = vpop.eup %9944  ;;  %v6943_v15 = vadd.f32 %v6942_v49, %v6426_v43  ;;  %v5917_v62 = vadd.f32 1.0, %v9941_v37 }
 0x477   :  { %v15625_v60 = vmul.f32 0.5, %v3750_v14  ;;  %v4252_v56 = vadd.f32 %v18760_v53, %v11988_v46  ;;  %v7206_v22 = vadd.f32 %v7205_v57, %v6627_v36  ;;  %v6628_v23 = vmul.f32 %v6116_v39, %v15487_v19  ;;  %v15634_v7 = vpop.f32.mrf.mxu1  ;;  %v18762_v19 = vld [vmem:[#allocation38_spill] sm:$0xff]  ;;  %v15642_v39 = vpop.f32.mrf.mxu0 }
 0x478   :  { %4664 = vmatmul.mubr.bf16.gmra.mxu1 %v18759_v61  ;;  %9962 = vtanh.f32 %v15607_v54  ;;  %v3752_v25 = vadd.f32 %v15450_v31, %v11988_v46  ;;  %18761 = vst [vmem:[#allocation64_spill] sm:$0xff] %v15634_v7  ;;  %v9947_v26 = vpop.eup %9946  ;;  %v6980_v49 = vadd.f32 %v6979_v12, %v6427_v35  ;;  %v6428_v43 = vmul.f32 %v5916_v28, %v15492_v38 }
 0x479   :  { %4673 = vmatprep.mubr.bf16.mxu1 %v17973_v11  ;;  %v6118_v14 = vadd.f32 1.0, %v9943_v13  ;;  %9964 = vtanh.f32 %v15613_v29  ;;  %v9949_v37 = vpop.eup %9948  ;;  %v6629_v61 = vmul.f32 %v6117_v47, %v15496_v24  ;;  %v5918_v57 = vadd.f32 1.0, %v9945_v32  ;;  %v15644_v31 = vpop.f32.mrf.mxu1  ;;  %v18764_v32 = vld [vmem:[#allocation32_spill] sm:$0xff] }
 0x47a   :  { %9966 = vtanh.f32 %v15616_v21  ;;  %v4256_v36 = vadd.f32 %v18762_v19, %v11962_v51  ;;  %18763 = vst [vmem:[#allocation82_spill] sm:$0xff] %v15644_v31  ;;  %v6429_v35 = vmul.f32 %v5917_v62, %v15505_v45  ;;  %v15648_v38 = vmul.f32 0.5, %v4252_v56 }
 0x47b   :  { %9968 = vtanh.f32 %v15625_v60  ;;  %v3756_v28 = vadd.f32 %v15474_v44, %v11962_v51  ;;  %v9951_v24 = vpop.eup %9950  ;;  %v7170_v12 = vadd.f32 %v7169_v9, %v6628_v23  ;;  %v6119_v13 = vadd.f32 1.0, %v9947_v26  ;;  %v15656_v19 = vpop.f32.mrf.mxu1  ;;  %v18766_v23 = vld [vmem:[#allocation167_spill] sm:$0xff] }
 0x47c   :  { %v15652_v47 = vmul.f32 0.5, %v3752_v25  ;;  %v4258_v53 = vadd.f32 %v18764_v32, %v11988_v46  ;;  %18765 = vst [vmem:[#allocation78_spill] sm:$0xff] %v15656_v19  ;;  %v9953_v31 = vpop.eup %9952  ;;  %v6944_v7 = vadd.f32 %v6943_v15, %v6428_v43  ;;  %v6630_v45 = vmul.f32 %v6118_v14, %v15514_v5  ;;  %v15666_v26 = vpop.f32.mrf.mxu0  ;;  %v18767_v19 = vld [vmem:[#allocation63_spill] sm:$0xff]  ;;  %v18768_v15 = vld [vmem:[#allocation60_spill] sm:$0xff] }
 0x47d   :  { %v5919_v62 = vadd.f32 1.0, %v9949_v37  ;;  %v3758_v56 = vadd.f32 %v15500_v6, %v11988_v46  ;;  %v7207_v27 = vadd.f32 %v7206_v22, %v6629_v61  ;;  %v6430_v44 = vmul.f32 %v5918_v57, %v15520_v50  ;;  %v15668_v32 = vpop.f32.mrf.mxu1 }
 0x47e   :  { %v15662_v9 = vmul.f32 0.5, %v4256_v36  ;;  %v4260_v25 = vadd.f32 %v18766_v23, %v11962_v51  ;;  %v18769_v43 = vpack.c.bf16 %v18767_v19, %v18768_v15  ;;  %v9955_v5 = vpop.eup %9954  ;;  %v6981_v14 = vadd.f32 %v6980_v49, %v6429_v35 }
 0x47f   :  { %9970 = vtanh.f32 %v15648_v38  ;;  %v15674_v6 = vmul.f32 0.5, %v3756_v28  ;;  %v3760_v50 = vadd.f32 %v15522_v30, %v11962_v51  ;;  %v9957_v22 = vpop.eup %9956  ;;  %v6631_v37 = vmul.f32 %v6119_v13, %v15535_v59  ;;  %v15683_v36 = vpop.f32.mrf.mxu1  ;;  %v18770_v59 = vld [vmem:[#allocation31_spill] sm:$0xff] }
 0x480   :  { %4674 = vmatmul.mubr.bf16.gmra.mxu1 %v18769_v43  ;;  %v6120_v61 = vadd.f32 1.0, %v9951_v24  ;;  %9972 = vtanh.f32 %v15652_v47  ;;  %v15681_v57 = vmul.f32 0.5, %v4258_v53  ;;  %v7171_v49 = vadd.f32 %v7170_v12, %v6630_v45  ;;  %v15693_v13 = vpop.f32.mrf.mxu0 }
 0x481   :  { %4683 = vmatprep.mubr.bf16.mxu1 %v17973_v11  ;;  %v6431_v35 = vmul.f32 %v5919_v62, %v15543_v2  ;;  %v5920_v28 = vadd.f32 1.0, %v9953_v31  ;;  %v15686_v19 = vmul.f32 0.5, %v3758_v56  ;;  %v9959_v23 = vpop.eup %9958  ;;  %v6945_v30 = vadd.f32 %v6944_v7, %v6430_v44  ;;  %v15695_v53 = vpop.f32.mrf.mxu1 }
 0x482   :  { %9974 = vtanh.f32 %v15662_v9  ;;  %v15689_v15 = vmul.f32 0.5, %v4260_v25  ;;  %v4262_v24 = vadd.f32 %v18770_v59, %v11988_v46  ;;  %v9961_v43 = vpop.eup %9960  ;;  %v6121_v12 = vadd.f32 1.0, %v9955_v5 }
 0x483   :  { %v5921_v45 = vadd.f32 1.0, %v9957_v22  ;;  %9976 = vtanh.f32 %v15674_v6  ;;  %v15698_v2 = vmul.f32 0.5, %v3760_v50  ;;  %v7208_v31 = vadd.f32 %v7207_v27, %v6631_v37  ;;  %v15704_v56 = vpop.f32.mrf.mxu1  ;;  %v15713_v37 = vpop.f32.mrf.mxu0 }
 0x484   :  { %v6632_v7 = vmul.f32 %v6120_v61, %v15553_v4  ;;  %9978 = vtanh.f32 %v15681_v57  ;;  %v3762_v62 = vadd.f32 %v15549_v48, %v11988_v46  ;;  %18771 = vst [vmem:[#allocation81_spill] sm:$0xff] %v15704_v56  ;;  %v6982_v25 = vadd.f32 %v6981_v14, %v6431_v35  ;;  %v18773_v61 = vld [vmem:[#allocation101_spill] sm:$0xff] }
 0x485   :  { %v9963_v44 = vpop.eup %9962  ;;  %v6432_v59 = vmul.f32 %v5920_v28, %v15558_v55  ;;  %v6122_v5 = vadd.f32 1.0, %v9959_v23  ;;  %9980 = vtanh.f32 %v15686_v19  ;;  %v5922_v50 = vadd.f32 1.0, %v9961_v43  ;;  %v15715_v48 = vpop.f32.mrf.mxu1  ;;  %v18774_v14 = vld [vmem:[#allocation93_spill] sm:$0xff] }
 0x486   :  { %v9965_v22 = vpop.eup %9964  ;;  %9982 = vtanh.f32 %v15689_v15  ;;  %v15709_v27 = vmul.f32 0.5, %v4262_v24  ;;  %v4266_v4 = vadd.f32 %v14939_v52, %v11962_v51  ;;  %18772 = vst [vmem:[#allocation126_spill] sm:$0xff] %v15715_v48  ;;  %v18775_v35 = vpack.c.bf16 %v18773_v61, %v18774_v14 }
 0x487   :  { %v9967_v55 = vpop.eup %9966  ;;  %v6633_v28 = vmul.f32 %v6121_v12, %v15566_v41  ;;  %v6433_v23 = vmul.f32 %v5921_v45, %v15579_v10  ;;  %9984 = vtanh.f32 %v15698_v2  ;;  %v3766_v24 = vadd.f32 %v15570_v8, %v11962_v51  ;;  %v15730_v14 = vpop.f32.mrf.mxu1 }
 0x488   :  { %4684 = vmatmul.mubr.bf16.gmra.mxu1 %v18775_v35  ;;  %v9969_v52 = vpop.eup %9968  ;;  %v7172_v43 = vadd.f32 %v7171_v49, %v6632_v7  ;;  %v6123_v56 = vadd.f32 1.0, %v9963_v44  ;;  %v15726_v48 = vmul.f32 0.5, %v3762_v62  ;;  %v4268_v61 = vadd.f32 %v14953_v34, %v11988_v46  ;;  %v15739_v7 = vpop.f32.mrf.mxu0 }
 0x489   :  { %4693 = vmatprep.mubr.bf16.mxu1 %v17973_v11  ;;  %v6946_v41 = vadd.f32 %v6945_v30, %v6432_v59  ;;  %v6634_v10 = vmul.f32 %v6122_v5, %v15588_v18  ;;  %v5923_v12 = vadd.f32 1.0, %v9965_v22  ;;  %v3768_v45 = vadd.f32 %v15598_v16, %v11988_v46  ;;  %v15741_v62 = vpop.f32.mrf.mxu1 }
 0x48a   :  { %v6434_v8 = vmul.f32 %v5922_v50, %v15594_v42  ;;  %v6124_v35 = vadd.f32 1.0, %v9967_v55  ;;  %9986 = vtanh.f32 %v15709_v27  ;;  %v15737_v49 = vmul.f32 0.5, %v4266_v4 }
 0x48b   :  { %v7209_v34 = vadd.f32 %v7208_v31, %v6633_v28  ;;  %v6983_v44 = vadd.f32 %v6982_v25, %v6433_v23  ;;  %v5924_v30 = vadd.f32 1.0, %v9969_v52  ;;  %v15743_v59 = vmul.f32 0.5, %v3766_v24  ;;  %v15751_v22 = vpop.f32.mrf.mxu1  ;;  %v18777_v24 = vld [vmem:[#allocation103_spill] sm:$0xff] }
 0x48c   :  { %v9971_v18 = vpop.eup %9970  ;;  %v6635_v5 = vmul.f32 %v6123_v56, %v15607_v54  ;;  %9988 = vtanh.f32 %v15726_v48  ;;  %v15747_v42 = vmul.f32 0.5, %v4268_v61  ;;  %v4270_v16 = vadd.f32 %v14964_v33, %v11962_v51  ;;  %v15762_v33 = vpop.f32.mrf.mxu0  ;;  %v18778_v52 = vld [vmem:[#allocation155_spill] sm:$0xff] }
 0x48d   :  { %v9973_v50 = vpop.eup %9972  ;;  %v7173_v4 = vadd.f32 %v7172_v43, %v6634_v10  ;;  %v6435_v31 = vmul.f32 %v5923_v12, %v15613_v29  ;;  %v15754_v25 = vmul.f32 0.5, %v3768_v45  ;;  %v3770_v55 = vadd.f32 %v15618_v40, %v11962_v51  ;;  %v15764_v23 = vpop.f32.mrf.mxu1 }
 0x48e   :  { %v6947_v28 = vadd.f32 %v6946_v41, %v6434_v8  ;;  %v6636_v54 = vmul.f32 %v6124_v35, %v15616_v21  ;;  %9990 = vtanh.f32 %v15737_v49  ;;  %v4272_v56 = vadd.f32 %v14977_v58, %v11988_v46  ;;  %18776 = vst [vmem:[#allocation30_spill] sm:$0xff] %v15764_v23 }
 0x48f   :  { %v18779_v29 = vpack.c.bf16 %v18777_v24, %v18778_v52  ;;  %v9975_v43 = vpop.eup %9974  ;;  %v6436_v61 = vmul.f32 %v5924_v30, %v15625_v60  ;;  %v6125_v40 = vadd.f32 1.0, %v9971_v18  ;;  %9992 = vtanh.f32 %v15743_v59  ;;  %v15777_v45 = vpop.f32.mrf.mxu1  ;;  %v18781_v30 = vld [vmem:[#allocation72_spill] sm:$0xff] }
 0x490   :  { %v3772_v21 = vadd.f32 %v15642_v39, %v11988_v46  ;;  %v9977_v58 = vpop.eup %9976  ;;  %v7210_v41 = vadd.f32 %v7209_v34, %v6635_v5  ;;  %v5925_v10 = vadd.f32 1.0, %v9973_v50  ;;  %9994 = vtanh.f32 %v15747_v42  ;;  %18780 = vst [vmem:[#allocation47_spill] sm:$0xff] %v15777_v45 }
 0x491   :  { %4694 = vmatmul.mubr.bf16.gmra.mxu1 %v18779_v29  ;;  %v15775_v12 = vmul.f32 0.5, %v4270_v16  ;;  %v9979_v8 = vpop.eup %9978  ;;  %v6984_v35 = vadd.f32 %v6983_v44, %v6435_v31  ;;  %9996 = vtanh.f32 %v15754_v25  ;;  %v15780_v60 = vmul.f32 0.5, %v3770_v55  ;;  %v15788_v16 = vpop.f32.mrf.mxu0 }
 0x492   :  { %4703 = vmatprep.mubr.bf16.mxu1 %v17973_v11  ;;  %v4276_v39 = vadd.f32 %v18781_v30, %v11962_v51  ;;  %v9981_v18 = vpop.eup %9980  ;;  %v7174_v24 = vadd.f32 %v7173_v4, %v6636_v54  ;;  %v6126_v52 = vadd.f32 1.0, %v9975_v43  ;;  %v15784_v34 = vmul.f32 0.5, %v4272_v56  ;;  %v15790_v50 = vpop.f32.mrf.mxu1  ;;  %v18783_v56 = vld [vmem:[#allocation46_spill] sm:$0xff] }
 0x493   :  { %v3776_v5 = vadd.f32 %v15666_v26, %v11962_v51  ;;  %18782 = vst [vmem:[#allocation44_spill] sm:$0xff] %v15790_v50  ;;  %v9983_v44 = vpop.eup %9982  ;;  %v6948_v31 = vadd.f32 %v6947_v28, %v6436_v61  ;;  %v6637_v55 = vmul.f32 %v6125_v40, %v15648_v38  ;;  %v5926_v29 = vadd.f32 1.0, %v9977_v58 }
 0x494   :  { %v15793_v45 = vmul.f32 0.5, %v3772_v21  ;;  %v9985_v30 = vpop.eup %9984  ;;  %v6437_v4 = vmul.f32 %v5925_v10, %v15652_v47  ;;  %v6127_v54 = vadd.f32 1.0, %v9979_v8  ;;  %9998 = vtanh.f32 %v15775_v12  ;;  %v15799_v43 = vpop.f32.mrf.mxu1  ;;  %v18786_v10 = vld [vmem:[#allocation158_spill] sm:$0xff]  ;;  %v18787_v8 = vld [vmem:[#allocation97_spill] sm:$0xff] }
 0x495   :  { %v4278_v26 = vadd.f32 %v18783_v56, %v11988_v46  ;;  %18784 = vst [vmem:[#allocation80_spill] sm:$0xff] %v15799_v43  ;;  %v5927_v23 = vadd.f32 1.0, %v9981_v18  ;;  %10000 = vtanh.f32 %v15780_v60  ;;  %v15802_v28 = vmul.f32 0.5, %v4276_v39  ;;  %v15810_v21 = vpop.f32.mrf.mxu0 }
 0x496   :  { %v3778_v38 = vadd.f32 %v15693_v13, %v11988_v46  ;;  %v6638_v61 = vmul.f32 %v6126_v52, %v15662_v9  ;;  %v6128_v40 = vadd.f32 1.0, %v9983_v44  ;;  %10002 = vtanh.f32 %v15784_v34  ;;  %v15812_v58 = vpop.f32.mrf.mxu1  ;;  %v18789_v44 = vld [vmem:[#allocation57_spill] sm:$0xff] }
 0x497   :  { %v15808_v47 = vmul.f32 0.5, %v3776_v5  ;;  %18785 = vst [vmem:[#allocation100_spill] sm:$0xff] %v15812_v58  ;;  %v18788_v18 = vpack.c.bf16 %v18786_v10, %v18787_v8  ;;  %v9987_v39 = vpop.eup %9986  ;;  %v7211_v56 = vadd.f32 %v7210_v41, %v6637_v55  ;;  %v6438_v43 = vmul.f32 %v5926_v29, %v15674_v6 }
 0x498   :  { %v5928_v13 = vadd.f32 1.0, %v9985_v30  ;;  %10004 = vtanh.f32 %v15793_v45  ;;  %v6985_v9 = vadd.f32 %v6984_v35, %v6437_v4  ;;  %v6639_v52 = vmul.f32 %v6127_v54, %v15681_v57  ;;  %v15825_v50 = vpop.f32.mrf.mxu1  ;;  %v18790_v30 = vld [vmem:[#allocation122_spill] sm:$0xff]  ;;  %v3791_v54 = vpop.f32.mrf.mxu0 }
 0x499   :  { %4704 = vmatmul.mubr.bf16.gmra.mxu1 %v18788_v18  ;;  %v15821_v5 = vmul.f32 0.5, %v4278_v26  ;;  %v4280_v58 = vadd.f32 %v18789_v44, %v11962_v51  ;;  %v9989_v10 = vpop.eup %9988  ;;  %v6439_v41 = vmul.f32 %v5927_v23, %v15686_v19  ;;  %10006 = vtanh.f32 %v15802_v28 }
 0x49a   :  { %4713 = vmatprep.mubr.bf16.mxu1 %v17973_v11  ;;  %v15829_v6 = vmul.f32 0.5, %v3778_v38  ;;  %v3780_v55 = vadd.f32 %v15713_v37, %v11962_v51  ;;  %v7175_v35 = vadd.f32 %v7174_v24, %v6638_v61  ;;  %v6640_v57 = vmul.f32 %v6128_v40, %v15689_v15  ;;  %v15836_v26 = vpop.f32.mrf.mxu1  ;;  %v3795_v44 = vpop.f32.mrf.mxu0 }
 0x49b   :  { %v6129_v29 = vadd.f32 1.0, %v9987_v39  ;;  %v4282_v4 = vadd.f32 %v18790_v30, %v11988_v46  ;;  %18791 = vst [vmem:[#allocation123_spill] sm:$0xff] %v15836_v26  ;;  %v9991_v8 = vpop.eup %9990  ;;  %v6949_v18 = vadd.f32 %v6948_v31, %v6438_v43  ;;  %v6440_v19 = vmul.f32 %v5928_v13, %v15698_v2  ;;  %v18793_v2 = vld [vmem:[#allocation35_spill] sm:$0xff] }
 0x49c   :  { %10008 = vtanh.f32 %v15808_v47  ;;  %v3782_v23 = vadd.f32 %v15739_v7, %v11988_v46  ;;  %v9993_v37 = vpop.eup %9992  ;;  %v7212_v24 = vadd.f32 %v7211_v56, %v6639_v52  ;;  %v5929_v38 = vadd.f32 1.0, %v9989_v10  ;;  %v15845_v61 = vpop.f32.mrf.mxu1 }
 0x49d   :  { %10010 = vtanh.f32 %v15821_v5  ;;  %v15843_v15 = vmul.f32 0.5, %v4280_v58  ;;  %18792 = vst [vmem:[#allocation156_spill] sm:$0xff] %v15845_v61  ;;  %v9995_v40 = vpop.eup %9994  ;;  %v6986_v39 = vadd.f32 %v6985_v9, %v6439_v41  ;;  %v15848_v31 = vmul.f32 0.5, %v3780_v55  ;;  %v18794_v9 = vld [vmem:[#allocation165_spill] sm:$0xff]  ;;  %v18795_v41 = vld [vmem:[#allocation18_spill] sm:$0xff] }
 0x49e   :  { %10012 = vtanh.f32 %v15829_v6  ;;  %v4286_v43 = vadd.f32 %v18793_v2, %v11962_v51  ;;  %v9997_v13 = vpop.eup %9996  ;;  %v7176_v7 = vadd.f32 %v7175_v35, %v6640_v57  ;;  %v6641_v56 = vmul.f32 %v6129_v29, %v15709_v27  ;;  %v15857_v10 = vpop.f32.mrf.mxu1 }
 0x49f   :  { %v15853_v52 = vmul.f32 0.5, %v4282_v4  ;;  %v3786_v58 = vadd.f32 %v15762_v33, %v11962_v51  ;;  %v18796_v30 = vpack.c.bf16 %v18794_v9, %v18795_v41  ;;  %v6950_v55 = vadd.f32 %v6949_v18, %v6440_v19 }
 0x4a0   :  { %v6130_v61 = vadd.f32 1.0, %v9991_v8  ;;  %v5930_v26 = vadd.f32 1.0, %v9993_v37  ;;  %v15862_v2 = vmul.f32 0.5, %v3782_v23  ;;  %v6441_v27 = vmul.f32 %v5929_v38, %v15726_v48  ;;  %v15869_v57 = vpop.f32.mrf.mxu1  ;;  %v18798_v48 = vld [vmem:[#allocation75_spill] sm:$0xff] }
 0x4a1   :  { %4714 = vmatmul.mubr.bf16.gmra.mxu1 %v18796_v30  ;;  %v6131_v35 = vadd.f32 1.0, %v9995_v40  ;;  %10014 = vtanh.f32 %v15843_v15  ;;  %v15867_v33 = vmul.f32 0.5, %v3786_v58  ;;  %18797 = vst [vmem:[#allocation54_spill] sm:$0xff] %v15869_v57  ;;  %v9999_v29 = vpop.eup %9998  ;;  %v5931_v4 = vadd.f32 1.0, %v9997_v13  ;;  %v3797_v40 = vpop.f32.mrf.mxu0 }
 0x4a2   :  { %4723 = vmatprep.mubr.bf16.mxu1 %v17973_v11  ;;  %10016 = vtanh.f32 %v15848_v31  ;;  %v15872_v18 = vmul.f32 0.5, %v4286_v43  ;;  %v3788_v8 = vadd.f32 %v15788_v16, %v11988_v46  ;;  %v10001_v19 = vpop.eup %10000  ;;  %v7213_v23 = vadd.f32 %v7212_v24, %v6641_v56  ;;  %v15881_v58 = vpop.f32.mrf.mxu1 }
 0x4a3   :  { %10018 = vtanh.f32 %v15853_v52  ;;  %v4288_v37 = vadd.f32 %v18798_v48, %v11988_v46  ;;  %v3790_v38 = vadd.f32 %v15810_v21, %v11962_v51  ;;  %18799 = vst [vmem:[#allocation144_spill] sm:$0xff] %v15881_v58  ;;  %v10003_v13 = vpop.eup %10002  ;;  %v6642_v43 = vmul.f32 %v6130_v61, %v15737_v49 }
 0x4a4   :  { %v6442_v9 = vmul.f32 %v5930_v26, %v15743_v59  ;;  %10020 = vtanh.f32 %v15862_v2  ;;  %v15886_v16 = vmul.f32 0.5, %v3788_v8  ;;  %v6643_v56 = vmul.f32 %v6131_v35, %v15747_v42  ;;  %v15892_v21 = vpop.f32.mrf.mxu1  ;;  %v3799_v35 = vpop.f32.mrf.mxu0  ;;  %v18802_v8 = vld [vmem:[#allocation163_spill] sm:$0xff] }
 0x4a5   :  { %v10005_v24 = vpop.eup %10004  ;;  %v6132_v41 = vadd.f32 1.0, %v9999_v29  ;;  %10022 = vtanh.f32 %v15867_v33  ;;  %v15890_v30 = vmul.f32 0.5, %v3790_v38  ;;  %18800 = vst [vmem:[#allocation143_spill] sm:$0xff] %v15892_v21  ;;  %v6443_v48 = vmul.f32 %v5931_v4, %v15754_v25  ;;  %v18803_v38 = vld [vmem:[#allocation162_spill] sm:$0xff]  ;;  %v18805_v4 = vld [vmem:[#allocation20_spill] sm:$0xff] }
 0x4a6   :  { %v5932_v58 = vadd.f32 1.0, %v10001_v19  ;;  %10024 = vtanh.f32 %v15872_v18  ;;  %v3792_v49 = vadd.f32 %v3791_v54, %v11988_v46  ;;  %v10007_v59 = vpop.eup %10006  ;;  %v6987_v26 = vadd.f32 %v6986_v39, %v6441_v27  ;;  %v15901_v29 = vpop.f32.mrf.mxu1 }
 0x4a7   :  { %v15897_v61 = vmul.f32 0.5, %v4288_v37  ;;  %10026 = vtanh.f32 %v15886_v16  ;;  %v3796_v42 = vadd.f32 %v3795_v44, %v11962_v51  ;;  %18801 = vst [vmem:[#allocation133_spill] sm:$0xff] %v15901_v29  ;;  %v18804_v21 = vpack.c.bf16 %v18802_v8, %v18803_v38 }
 0x4a8   :  { %v7177_v25 = vadd.f32 %v7176_v7, %v6642_v43  ;;  %v4290_v19 = vadd.f32 %v18805_v4, %v11962_v51  ;;  %10028 = vtanh.f32 %v15890_v30  ;;  %v15909_v54 = vmul.f32 0.5, %v3792_v49  ;;  %v15913_v57 = vpop.f32.mrf.mxu1 }
 0x4a9   :  { %4724 = vmatmul.mubr.bf16.gmra.mxu1 %v18804_v21  ;;  %v10009_v39 = vpop.eup %10008  ;;  %v6951_v27 = vadd.f32 %v6950_v55, %v6442_v9  ;;  %v7214_v44 = vadd.f32 %v7213_v23, %v6643_v56  ;;  %v6644_v37 = vmul.f32 %v6132_v41, %v15775_v12  ;;  %v6133_v29 = vadd.f32 1.0, %v10003_v13  ;;  %18806 = vst [vmem:[#allocation104_spill] sm:$0xff] %v15913_v57  ;;  %v3801_v23 = vpop.f32.mrf.mxu0  ;;  %v18808_v41 = vld [vmem:[#allocation70_spill] sm:$0xff] }
 0x4aa   :  { %4733 = vmatprep.mubr.bf16.mxu1 %v17973_v11  ;;  %v10011_v8 = vpop.eup %10010  ;;  %v6988_v21 = vadd.f32 %v6987_v26, %v6443_v48  ;;  %v6444_v7 = vmul.f32 %v5932_v58, %v15780_v60  ;;  %10030 = vtanh.f32 %v15909_v54  ;;  %v15917_v43 = vmul.f32 0.5, %v3796_v42  ;;  %v15921_v12 = vpop.f32.mrf.mxu1 }
 0x4ab   :  { %v10013_v49 = vpop.eup %10012  ;;  %v5933_v38 = vadd.f32 1.0, %v10005_v24  ;;  %v6134_v4 = vadd.f32 1.0, %v10007_v59  ;;  %10032 = vtanh.f32 %v15897_v61  ;;  %v3798_v55 = vadd.f32 %v3797_v40, %v11988_v46  ;;  %18807 = vst [vmem:[#allocation58_spill] sm:$0xff] %v15921_v12 }
 0x4ac   :  { %v5934_v13 = vadd.f32 1.0, %v10009_v39  ;;  %v15923_v9 = vmul.f32 0.5, %v4290_v19  ;;  %10034 = vtanh.f32 %v15917_v43  ;;  %v3800_v60 = vadd.f32 %v3799_v35, %v11962_v51  ;;  %v15931_v59 = vpop.f32.mrf.mxu1 }
 0x4ad   :  { %v7178_v58 = vadd.f32 %v7177_v25, %v6644_v37  ;;  %v6135_v56 = vadd.f32 1.0, %v10011_v8  ;;  %v4292_v24 = vadd.f32 %v18808_v41, %v11988_v46  ;;  %v15929_v48 = vmul.f32 0.5, %v3798_v55  ;;  %18809 = vst [vmem:[#allocation83_spill] sm:$0xff] %v15931_v59  ;;  %v18811_v55 = vld [vmem:[#allocation66_spill] sm:$0xff] }
 0x4ae   :  { %v10015_v40 = vpop.eup %10014  ;;  %v5935_v26 = vadd.f32 1.0, %v10013_v49  ;;  %v4296_v42 = vadd.f32 %v15139_v20, %v11962_v51  ;;  %v15935_v19 = vmul.f32 0.5, %v3800_v60  ;;  %v3802_v39 = vadd.f32 %v3801_v23, %v11988_v46  ;;  %v15942_v8 = vpop.f32.mrf.mxu1  ;;  %v18812_v49 = vld [vmem:[#allocation90_spill] sm:$0xff] }
 0x4af   :  { %v10017_v12 = vpop.eup %10016  ;;  %v6645_v35 = vmul.f32 %v6133_v29, %v15784_v34  ;;  %v6445_v25 = vmul.f32 %v5933_v38, %v15793_v45  ;;  %v6646_v37 = vmul.f32 %v6134_v4, %v15802_v28  ;;  %10036 = vtanh.f32 %v15929_v48  ;;  %18810 = vst [vmem:[#allocation36_spill] sm:$0xff] %v15942_v8 }
 0x4b0   :  { %v18813_v41 = vpack.c.bf16 %v18811_v55, %v18812_v49  ;;  %v10019_v20 = vpop.eup %10018  ;;  %v6446_v60 = vmul.f32 %v5934_v13, %v15808_v47  ;;  %10038 = vtanh.f32 %v15923_v9  ;;  %v4298_v34 = vadd.f32 %v15153_v63, %v11988_v46  ;;  %v15957_v23 = vpop.f32.mrf.mxu1  ;;  %v18815_v63 = vld [vmem:[#allocation74_spill] sm:$0xff] }
 0x4b1   :  { %v15951_v29 = vmul.f32 0.5, %v3802_v39  ;;  %v10021_v45 = vpop.eup %10020  ;;  %v6952_v28 = vadd.f32 %v6951_v27, %v6444_v7  ;;  %v6136_v38 = vadd.f32 1.0, %v10015_v40  ;;  %v15954_v4 = vmul.f32 0.5, %v4292_v24  ;;  %18814 = vst [vmem:[#allocation53_spill] sm:$0xff] %v15957_v23 }
 0x4b2   :  { %4734 = vmatmul.mubr.bf16.gmra.mxu1 %v18813_v41  ;;  %10040 = vtanh.f32 %v15935_v19  ;;  %v10023_v55 = vpop.eup %10022  ;;  %v6647_v47 = vmul.f32 %v6135_v56, %v15821_v5  ;;  %v6447_v13 = vmul.f32 %v5935_v26, %v15829_v6  ;;  %v15961_v49 = vmul.f32 0.5, %v4296_v42  ;;  %v15966_v24 = vpop.f32.mrf.mxu1 }
 0x4b3   :  { %4743 = vmatprep.mubr.bf16.mxu1 %v17973_v11  ;;  %v4300_v39 = vadd.f32 %v18815_v63, %v11962_v51  ;;  %v10025_v41 = vpop.eup %10024  ;;  %v7215_v8 = vadd.f32 %v7214_v44, %v6645_v35  ;;  %v6989_v27 = vadd.f32 %v6988_v21, %v6445_v25  ;;  %v5936_v7 = vadd.f32 1.0, %v10017_v12  ;;  %v18816_v44 = vld [vmem:[#allocation37_spill] sm:$0xff] }
 0x4b4   :  { %10042 = vtanh.f32 %v15951_v29  ;;  %v10027_v40 = vpop.eup %10026  ;;  %v7179_v23 = vadd.f32 %v7178_v58, %v6646_v37  ;;  %v6953_v59 = vadd.f32 %v6952_v28, %v6446_v60  ;;  %v5937_v57 = vadd.f32 1.0, %v10021_v45  ;;  %v15974_v12 = vpop.f32.mrf.mxu1  ;;  %v18817_v28 = vld [vmem:[#allocation112_spill] sm:$0xff] }
 0x4b5   :  { %v15968_v5 = vmul.f32 0.5, %v4298_v34  ;;  %v10029_v6 = vpop.eup %10028  ;;  %v6648_v56 = vmul.f32 %v6136_v38, %v15843_v15  ;;  %v5938_v26 = vadd.f32 1.0, %v10023_v55  ;;  %10044 = vtanh.f32 %v15954_v4  ;;  %v18818_v38 = vld [vmem:[#allocation19_spill] sm:$0xff] }
 0x4b6   :  { %v4302_v21 = vadd.f32 %v18816_v44, %v11988_v46  ;;  %v15976_v42 = vadd.f32 %v7215_v8, %v6647_v47  ;;  %v6990_v35 = vadd.f32 %v6989_v27, %v6447_v13  ;;  %10046 = vtanh.f32 %v15961_v49  ;;  %v15982_v45 = vpop.f32.mrf.mxu1  ;;  %v18820_v13 = vld [vmem:[#allocation105_spill] sm:$0xff] }
 0x4b7   :  { %v15979_v58 = vmul.f32 0.5, %v4300_v39  ;;  %v10031_v25 = vpop.eup %10030  ;;  %v6448_v37 = vmul.f32 %v5936_v7, %v15848_v31  ;;  %v6137_v60 = vadd.f32 1.0, %v10019_v20  ;;  %v5939_v15 = vadd.f32 1.0, %v10027_v40 }
 0x4b8   :  { %v5940_v34 = vadd.f32 1.0, %v10029_v6  ;;  %v18819_v55 = vpack.c.bf16 %v18817_v28, %v18818_v38  ;;  %v10033_v63 = vpop.eup %10032  ;;  %v6449_v8 = vmul.f32 %v5937_v57, %v15862_v2  ;;  %v6138_v47 = vadd.f32 1.0, %v10025_v41  ;;  %v15995_v6 = vpop.f32.mrf.mxu1  ;;  %v18822_v2 = vld [vmem:[#allocation115_spill] sm:$0xff]  ;;  %v18823_v41 = vld [vmem:[#allocation121_spill] sm:$0xff] }
 0x4b9   :  { %10048 = vtanh.f32 %v15968_v5  ;;  %v4306_v39 = vadd.f32 %v18820_v13, %v11962_v51  ;;  %v10035_v31 = vpop.eup %10034  ;;  %v7180_v20 = vadd.f32 %v7179_v23, %v6648_v56  ;;  %v6450_v27 = vmul.f32 %v5938_v26, %v15867_v33  ;;  %18821 = vst [vmem:[#allocation161_spill] sm:$0xff] %v15995_v6 }
 0x4ba   :  { %4744 = vmatmul.mubr.bf16.gmra.mxu1 %v18819_v55  ;;  %v5941_v7 = vadd.f32 1.0, %v10031_v25  ;;  %v15993_v40 = vmul.f32 0.5, %v4302_v21  ;;  %v5942_v44 = vadd.f32 1.0, %v10035_v31  ;;  %10050 = vtanh.f32 %v15979_v58  ;;  %v16005_v56 = vpop.f32.mrf.mxu1 }
 0x4bb   :  { %4753 = vmatprep.mubr.bf16.mxu1 %v17973_v11  ;;  %v4308_v57 = vadd.f32 %v18822_v2, %v11988_v46  ;;  %v4310_v28 = vadd.f32 %v18823_v41, %v11962_v51  ;;  %v6954_v38 = vadd.f32 %v6953_v59, %v6448_v37  ;;  %v6649_v55 = vmul.f32 %v6137_v60, %v15853_v52 }
 0x4bc   :  { %v6451_v23 = vmul.f32 %v5939_v15, %v15886_v16  ;;  %v6452_v33 = vmul.f32 %v5940_v34, %v15890_v30  ;;  %v10037_v26 = vpop.eup %10036  ;;  %v6991_v21 = vadd.f32 %v6990_v35, %v6449_v8  ;;  %v6650_v25 = vmul.f32 %v6138_v47, %v15872_v18  ;;  %v16012_v37 = vpop.f32.mrf.mxu1  ;;  %v18824_v18 = vld [vmem:[#allocation40_spill] sm:$0xff]  ;;  %v18826_v47 = vld [vmem:[#allocation149_spill] sm:$0xff] }
 0x4bd   :  { %v6139_v13 = vadd.f32 1.0, %v10033_v63  ;;  %v16008_v31 = vmul.f32 0.5, %v4306_v39  ;;  %v10039_v2 = vpop.eup %10038  ;;  %v6955_v6 = vadd.f32 %v6954_v38, %v6450_v27  ;;  %v6453_v41 = vmul.f32 %v5941_v7, %v15909_v54 }
 0x4be   :  { %v6454_v59 = vmul.f32 %v5942_v44, %v15917_v43  ;;  %v5943_v52 = vadd.f32 1.0, %v10037_v26  ;;  %10052 = vtanh.f32 %v15993_v40  ;;  %v16015_v30 = vmul.f32 0.5, %v4308_v57  ;;  %v16022_v8 = vpop.f32.mrf.mxu1  ;;  %v18825_v43 = vld [vmem:[#allocation127_spill] sm:$0xff]  ;;  %v18828_v57 = vld [vmem:[#allocation41_spill] sm:$0xff] }
 0x4bf   :  { %v10041_v16 = vpop.eup %10040  ;;  %v16017_v35 = vmul.f32 0.5, %v4310_v28  ;;  %v4312_v60 = vadd.f32 %v18824_v18, %v11988_v46  ;;  %v6992_v15 = vadd.f32 %v6991_v21, %v6451_v23  ;;  %v6956_v34 = vadd.f32 %v6955_v6, %v6452_v33 }
 0x4c0   :  { %v6455_v63 = vmul.f32 %v5943_v52, %v15929_v48  ;;  %v5944_v54 = vadd.f32 1.0, %v10041_v16  ;;  %v18827_v39 = vpack.c.bf16 %v18825_v43, %v18826_v47  ;;  %v6651_v7 = vmul.f32 %v6139_v13, %v15897_v61  ;;  %v16033_v33 = vpop.f32.mrf.mxu1  ;;  %v18829_v13 = vld [vmem:[#allocation145_spill] sm:$0xff] }
 0x4c1   :  { %v10043_v27 = vpop.eup %10042  ;;  %v6140_v44 = vadd.f32 1.0, %v10039_v2  ;;  %10054 = vtanh.f32 %v16008_v31  ;;  %v4316_v28 = vadd.f32 %v18828_v57, %v11962_v51  ;;  %v6993_v6 = vadd.f32 %v6992_v15, %v6453_v41  ;;  %v18833_v47 = vld [vmem:[#allocation69_spill] sm:$0xff] }
 0x4c2   :  { %4754 = vmatmul.mubr.bf16.gmra.mxu1 %v18827_v39  ;;  %v6957_v48 = vadd.f32 %v6956_v34, %v6454_v59  ;;  %v6456_v38 = vmul.f32 %v5944_v54, %v15935_v19  ;;  %v5945_v23 = vadd.f32 1.0, %v10043_v27  ;;  %v10045_v26 = vpop.eup %10044  ;;  %v7217_v21 = vadd.f32 %v15976_v42, %v6649_v55  ;;  %v18830_v19 = vld [vmem:[#allocation168_spill] sm:$0xff]  ;;  %v16044_v15 = vpop.f32.mrf.mxu1 }
 0x4c3   :  { %4763 = vmatprep.mubr.bf16.mxu1 %v17973_v11  ;;  %10056 = vtanh.f32 %v16015_v30  ;;  %v16037_v61 = vmul.f32 0.5, %v4312_v60  ;;  %v4318_v2 = vadd.f32 %v18829_v13, %v11988_v46  ;;  %v10047_v52 = vpop.eup %10046  ;;  %v6994_v16 = vadd.f32 %v6993_v6, %v6455_v63  ;;  %18831 = vst [vmem:[#allocation85_spill] sm:$0xff] %v16044_v15  ;;  %v18832_v55 = vld [vmem:[#allocation124_spill] sm:$0xff] }
 0x4c4   :  { %v6958_v18 = vadd.f32 %v6957_v48, %v6456_v38  ;;  %v6457_v41 = vmul.f32 %v5945_v23, %v15951_v29  ;;  %v4320_v59 = vadd.f32 %v18830_v19, %v11962_v51  ;;  %v7181_v34 = vadd.f32 %v7180_v20, %v6650_v25  ;;  %v16053_v27 = vpop.f32.mrf.mxu1  ;;  %v18836_v38 = vld [vmem:[#allocation117_spill] sm:$0xff] }
 0x4c5   :  { %10058 = vtanh.f32 %v16017_v35  ;;  %v16047_v42 = vmul.f32 0.5, %v4316_v28  ;;  %v4322_v60 = vadd.f32 %v18832_v55, %v11988_v46  ;;  %v7218_v43 = vadd.f32 %v7217_v21, %v6651_v7  ;;  %18834 = vst [vmem:[#allocation86_spill] sm:$0xff] %v16053_v27  ;;  %v18835_v28 = vld [vmem:[#allocation118_spill] sm:$0xff] }
 0x4c6   :  { %v10049_v54 = vpop.eup %10048  ;;  %v6652_v63 = vmul.f32 %v6140_v44, %v15923_v9  ;;  %v6959_v39 = vadd.f32 %v6958_v18, %v18833_v47  ;;  %v6995_v29 = vadd.f32 %v6994_v16, %v6457_v41  ;;  %v6141_v57 = vadd.f32 1.0, %v10045_v26  ;;  %v18837_v9 = vld [vmem:[#allocation55_spill] sm:$0xff]  ;;  %v16064_v44 = vpop.f32.mrf.mxu1  ;;  %v18839_v21 = vld [vmem:[#allocation106_spill] sm:$0xff]  ;;  %v18842_v18 = vld [vmem:[#allocation137_spill] sm:$0xff] }
 0x4c7   :  { %v6142_v6 = vadd.f32 1.0, %v10047_v52  ;;  %10060 = vtanh.f32 %v16037_v61  ;;  %v16056_v20 = vmul.f32 0.5, %v4318_v2  ;;  %v10051_v25 = vpop.eup %10050  ;;  %v16060_v13 = vmul.f32 0.5, %v4320_v59  ;;  %18838 = vst [vmem:[#allocation132_spill] sm:$0xff] %v16064_v44  ;;  %v18840_v16 = vld [vmem:[#allocation139_spill] sm:$0xff]  ;;  %v18843_v59 = vld [vmem:[#allocation125_spill] sm:$0xff] }
 0x4c8   :  { %v6960_v48 = vadd.f32 %v6959_v39, %v18835_v28  ;;  %v6996_v23 = vadd.f32 %v6995_v29, %v18836_v38  ;;  %v4326_v7 = vadd.f32 %v18837_v9, %v11962_v51  ;;  %v18841_v26 = vpack.c.bf16 %v18839_v21, %v18840_v16  ;;  %v18844_v47 = vld [vmem:[#allocation119_spill] sm:$0xff]  ;;  %v18845_v29 = vld [vmem:[#allocation142_spill] sm:$0xff]  ;;  %v16079_v38 = vpop.f32.mrf.mxu1 }
 0x4c9   :  { %v6143_v52 = vadd.f32 1.0, %v10049_v54  ;;  %10062 = vtanh.f32 %v16047_v42  ;;  %v16070_v2 = vmul.f32 0.5, %v4322_v60  ;;  %v4328_v41 = vadd.f32 %v18842_v18, %v11988_v46  ;;  %18846 = vst [vmem:[#allocation28_spill] sm:$0xff] %v16079_v38  ;;  %v18847_v16 = vld [vmem:[#allocation71_spill] sm:$0xff] }
 0x4ca   :  { %4764 = vmatmul.mubr.bf16.gmra.mxu1 %v18841_v26  ;;  %v7182_v19 = vadd.f32 %v7181_v34, %v6652_v63  ;;  %v6961_v55 = vadd.f32 %v6960_v48, %v18843_v59  ;;  %v6997_v39 = vadd.f32 %v6996_v23, %v18844_v47  ;;  %v4330_v28 = vadd.f32 %v18845_v29, %v11962_v51  ;;  %v18848_v34 = vld [vmem:[#allocation129_spill] sm:$0xff]  ;;  %v16089_v23 = vpop.f32.mrf.mxu1  ;;  %v18856_v44 = vld [vmem:[#allocation27_spill] sm:$0xff] }
 0x4cb   :  { %4773 = vmatprep.mubr.bf16.mxu1 %v17973_v11  ;;  %v6653_v54 = vmul.f32 %v6141_v57, %v15954_v4  ;;  %v6654_v60 = vmul.f32 %v6142_v6, %v15961_v49  ;;  %v6144_v9 = vadd.f32 1.0, %v10051_v25  ;;  %10064 = vtanh.f32 %v16056_v20  ;;  %v10053_v21 = vpop.eup %10052  ;;  %18849 = vst [vmem:[#allocation51_spill] sm:$0xff] %v16089_v23  ;;  %v18850_v49 = vld [vmem:[#allocation96_spill] sm:$0xff]  ;;  %v18851_v25 = vld [vmem:[#allocation150_spill] sm:$0xff] }
 0x4cc   :  { %v6962_v26 = vadd.f32 %v6961_v55, %v18847_v16  ;;  %v6998_v63 = vadd.f32 %v6997_v39, %v18848_v34  ;;  %10066 = vtanh.f32 %v16060_v13  ;;  %v16087_v48 = vmul.f32 0.5, %v4326_v7  ;;  %v18852_v55 = vld [vmem:[#allocation128_spill] sm:$0xff]  ;;  %v18853_v7 = vld [vmem:[#allocation134_spill] sm:$0xff]  ;;  %v16103_v16 = vpop.f32.mrf.mxu1  ;;  %v18855_v34 = vld [vmem:[#allocation77_spill] sm:$0xff] }
 0x4cd   :  { %v6655_v18 = vmul.f32 %v6143_v52, %v15968_v5  ;;  %10068 = vtanh.f32 %v16070_v2  ;;  %v16093_v4 = vmul.f32 0.5, %v4328_v41  ;;  %v4332_v57 = vadd.f32 %v18850_v49, %v11988_v46  ;;  %18854 = vst [vmem:[#allocation146_spill] sm:$0xff] %v16103_v16  ;;  %v18868_v16 = vld [vmem:[#allocation22_spill] sm:$0xff] }
 0x4ce   :  { %v10055_v6 = vpop.eup %10054  ;;  %v6963_v59 = vadd.f32 %v6962_v26, %v18851_v25  ;;  %v6999_v47 = vadd.f32 %v6998_v63, %v18852_v55  ;;  %v16099_v39 = vmul.f32 0.5, %v4330_v28  ;;  %v4336_v29 = vadd.f32 %v18853_v7, %v11962_v51  ;;  %v18857_v26 = vld [vmem:[#allocation110_spill] sm:$0xff]  ;;  %v16113_v55 = vpop.f32.mrf.mxu1 }
 0x4cf   :  { %v7219_v5 = vadd.f32 %v7218_v43, %v6653_v54  ;;  %v7183_v52 = vadd.f32 %v7182_v19, %v6654_v60  ;;  %v6656_v41 = vmul.f32 %v6144_v9, %v15979_v58  ;;  %v4340_v23 = vadd.f32 %v18855_v34, %v11962_v51  ;;  %v18858_v28 = vld [vmem:[#allocation42_spill] sm:$0xff]  ;;  %18859 = vst [vmem:[#allocation138_spill] sm:$0xff] %v16113_v55  ;;  %v18861_v43 = vld [vmem:[#allocation61_spill] sm:$0xff] }
 0x4d0   :  { %v10057_v49 = vpop.eup %10056  ;;  %v6964_v27 = vadd.f32 %v6963_v59, %v18856_v44  ;;  %v7000_v25 = vadd.f32 %v6999_v47, %v18857_v26  ;;  %10070 = vtanh.f32 %v16087_v48  ;;  %v4342_v63 = vadd.f32 %v18858_v28, %v11988_v46  ;;  %v18860_v7 = vld [vmem:[#allocation170_spill] sm:$0xff]  ;;  %v18864_v59 = vld [vmem:[#allocation113_spill] sm:$0xff] }
 0x4d1   :  { %v18862_v19 = vpack.c.bf16 %v18860_v7, %v18861_v43  ;;  %v7220_v58 = vadd.f32 %v7219_v5, %v6655_v18  ;;  %10072 = vtanh.f32 %v16093_v4  ;;  %v16119_v54 = vmul.f32 0.5, %v4332_v57  ;;  %v18863_v44 = vld [vmem:[#allocation94_spill] sm:$0xff]  ;;  %v18865_v34 = vld [vmem:[#allocation33_spill] sm:$0xff]  ;;  %v16129_v7 = vpop.f32.mrf.mxu1 }
 0x4d2   :  { %v4338_v60 = vadd.f32 %v18863_v44, %v11988_v46  ;;  %v10059_v9 = vpop.eup %10058  ;;  %v6965_v47 = vadd.f32 %v6964_v27, %v18864_v59  ;;  %v7001_v26 = vadd.f32 %v7000_v25, %v18865_v34  ;;  %10074 = vtanh.f32 %v16099_v39  ;;  %18866 = vst [vmem:[#allocation88_spill] sm:$0xff] %v16129_v7  ;;  %v18867_v44 = vld [vmem:[#allocation68_spill] sm:$0xff]  ;;  %v18872_v34 = vld [vmem:[#allocation25_spill] sm:$0xff] }
 0x4d3   :  { %4774 = vmatmul.mubr.bf16.gmra.mxu1 %v18862_v19  ;;  %v16127_v28 = vmul.f32 0.5, %v4336_v29  ;;  %v7184_v18 = vadd.f32 %v7183_v52, %v6656_v41  ;;  %v6145_v5 = vadd.f32 1.0, %v10053_v21  ;;  %v6146_v57 = vadd.f32 1.0, %v10055_v6  ;;  %v16137_v25 = vpop.f32.mrf.mxu1  ;;  %v18870_v21 = vld [vmem:[#allocation159_spill] sm:$0xff] }
 0x4d4   :  { %4783 = vmatprep.mubr.bf16.mxu1 %v17973_v11  ;;  %v16131_v43 = vmul.f32 0.5, %v4340_v23  ;;  %v10061_v19 = vpop.eup %10060  ;;  %v6966_v55 = vadd.f32 %v6965_v47, %v18867_v44  ;;  %v7002_v38 = vadd.f32 %v7001_v26, %v18868_v16  ;;  %v6147_v15 = vadd.f32 1.0, %v10057_v49  ;;  %18869 = vst [vmem:[#allocation16_spill] sm:$0xff] %v16137_v25  ;;  %v18871_v52 = vld [vmem:[#allocation67_spill] sm:$0xff]  ;;  %v18873_v16 = vld [vmem:[#allocation152_spill] sm:$0xff] }
 0x4d5   :  { %v16135_v27 = vmul.f32 0.5, %v4342_v63  ;;  %v6148_v59 = vadd.f32 1.0, %v10059_v9  ;;  %10076 = vtanh.f32 %v16119_v54  ;;  %v16140_v29 = vmul.f32 0.5, %v4338_v60  ;;  %v16149_v63 = vpop.f32.mrf.mxu1 }
 0x4d6   :  { %v4346_v6 = vadd.f32 %v18870_v21, %v11962_v51  ;;  %v10063_v23 = vpop.eup %10062  ;;  %v6967_v41 = vadd.f32 %v6966_v55, %v18871_v52  ;;  %v7003_v47 = vadd.f32 %v7002_v38, %v18872_v34  ;;  %10078 = vtanh.f32 %v16127_v28  ;;  %18874 = vst [vmem:[#allocation87_spill] sm:$0xff] %v16149_v63  ;;  %v18875_v21 = vld [vmem:[#allocation111_spill] sm:$0xff]  ;;  %v18877_v52 = vld [vmem:[#allocation154_spill] sm:$0xff]  ;;  %v18879_v63 = vld [vmem:[#allocation108_spill] sm:$0xff] }
 0x4d7   :  { %v4348_v49 = vadd.f32 %v18873_v16, %v11988_v46  ;;  %v6657_v9 = vmul.f32 %v6145_v5, %v15993_v40  ;;  %v6658_v60 = vmul.f32 %v6146_v57, %v16008_v31  ;;  %v6149_v26 = vadd.f32 1.0, %v10061_v19  ;;  %v18876_v55 = vld [vmem:[#allocation23_spill] sm:$0xff]  ;;  %v16161_v16 = vpop.f32.mrf.mxu1  ;;  %v18880_v40 = vld [vmem:[#allocation169_spill] sm:$0xff] }
 0x4d8   :  { %10080 = vtanh.f32 %v16131_v43  ;;  %v10065_v44 = vpop.eup %10064  ;;  %v16155_v25 = vadd.f32 %v6967_v41, %v18875_v21  ;;  %v7004_v38 = vadd.f32 %v7003_v47, %v18876_v55  ;;  %v4350_v34 = vadd.f32 %v18877_v52, %v11962_v51  ;;  %18878 = vst [vmem:[#allocation140_spill] sm:$0xff] %v16161_v16  ;;  %v18882_v55 = vld [vmem:[#allocation107_spill] sm:$0xff] }
 0x4d9   :  { %10082 = vtanh.f32 %v16135_v27  ;;  %v18881_v5 = vpack.c.bf16 %v18879_v63, %v18880_v40  ;;  %v10067_v31 = vpop.eup %10066  ;;  %v6659_v57 = vmul.f32 %v6147_v15, %v16015_v30  ;;  %v6660_v19 = vmul.f32 %v6148_v59, %v16017_v35  ;;  %v18884_v63 = vld [vmem:[#allocation102_spill] sm:$0xff] }
 0x4da   :  { %v6150_v41 = vadd.f32 1.0, %v10063_v23  ;;  %v16168_v21 = vmul.f32 0.5, %v4346_v6  ;;  %v10069_v47 = vpop.eup %10068  ;;  %v16172_v7 = vadd.f32 %v7004_v38, %v18882_v55  ;;  %10084 = vtanh.f32 %v16140_v29 }
 0x4db   :  { %4784 = vmatmul.mubr.bf16.gmra.mxu1 %v18881_v5  ;;  %v16175_v52 = vmul.f32 0.5, %v4348_v49  ;;  %v4352_v40 = vadd.f32 %v18884_v63, %v11988_v46  ;;  %v16179_v5 = vpop.f32.mrf.mxu1  ;;  %v7221_v30 = vadd.f32 %v7220_v58, %v6657_v9  ;;  %v6661_v35 = vmul.f32 %v6149_v26, %v16037_v61 }
 0x4dc   :  { %4793 = vmatprep.mubr.bf16.mxu1 %v17973_v11  ;;  %18883 = vst [vmem:[#allocation148_spill] sm:$0xff] %v16172_v7  ;;  %18885 = vst [vmem:[#allocation109_spill] sm:$0xff] %v16179_v5  ;;  %v6151_v15 = vadd.f32 1.0, %v10065_v44  ;;  %v4356_v59 = vadd.f32 %v15439_v17, %v11962_v51  ;;  %v7185_v6 = vadd.f32 %v7184_v18, %v6658_v60  ;;  %v6152_v23 = vadd.f32 1.0, %v10067_v31 }
 0x4dd   :  { %v16184_v38 = vmul.f32 0.5, %v4350_v34  ;;  %v4358_v49 = vadd.f32 %v15452_v3, %v11988_v46  ;;  %v16188_v55 = vpop.f32.mrf.mxu1  ;;  %v10071_v16 = vpop.eup %10070  ;;  %v7222_v63 = vadd.f32 %v7221_v30, %v6659_v57  ;;  %v6662_v5 = vmul.f32 %v6150_v41, %v16047_v42  ;;  %v18887_v42 = vld [vmem:[#allocation76_spill] sm:$0xff]  ;;  %v18888_v41 = vld [vmem:[#allocation171_spill] sm:$0xff] }
 0x4de   :  { %v6153_v58 = vadd.f32 1.0, %v10069_v47  ;;  %10086 = vtanh.f32 %v16168_v21  ;;  %v10073_v61 = vpop.eup %10072  ;;  %v7186_v9 = vadd.f32 %v7185_v6, %v6660_v19  ;;  %v16193_v17 = vmul.f32 0.5, %v4352_v40  ;;  %v18890_v40 = vld [vmem:[#allocation174_spill] sm:$0xff]  ;;  %v18891_v30 = vld [vmem:[#allocation59_spill] sm:$0xff] }
 0x4df   :  { %10088 = vtanh.f32 %v16175_v52  ;;  %v4360_v18 = vadd.f32 %v15463_v0, %v11962_v51  ;;  %v16197_v60 = vpop.f32.mrf.mxu1  ;;  %v10075_v3 = vpop.eup %10074  ;;  %v7223_v26 = vadd.f32 %v7222_v63, %v6661_v35  ;;  %v6663_v44 = vmul.f32 %v6151_v15, %v16056_v20  ;;  %v18893_v63 = vld [vmem:[#allocation141_spill] sm:$0xff] }
 0x4e0   :  { %18886 = vst [vmem:[#allocation73_spill] sm:$0xff] %v16197_v60  ;;  %v16200_v34 = vmul.f32 0.5, %v4356_v59  ;;  %v4362_v31 = vadd.f32 %v18887_v42, %v11988_v46  ;;  %v6664_v57 = vmul.f32 %v6152_v23, %v16060_v13  ;;  %10090 = vtanh.f32 %v16184_v38 }
 0x4e1   :  { %v16206_v19 = vmul.f32 0.5, %v4358_v49  ;;  %v4366_v0 = vadd.f32 %v18888_v41, %v11962_v51  ;;  %v16210_v47 = vpop.f32.mrf.mxu1  ;;  %v18892_v35 = vpack.c.bf16 %v18890_v40, %v18891_v30  ;;  %v7187_v20 = vadd.f32 %v7186_v9, %v6662_v5 }
 0x4e2   :  { %18889 = vst [vmem:[#allocation135_spill] sm:$0xff] %v16210_v47  ;;  %v6665_v15 = vmul.f32 %v6153_v58, %v16070_v2  ;;  %v6154_v59 = vadd.f32 1.0, %v10071_v16  ;;  %v6155_v6 = vadd.f32 1.0, %v10073_v61  ;;  %v10077_v13 = vpop.eup %10076  ;;  %v6156_v23 = vadd.f32 1.0, %v10075_v3  ;;  %v18895_v16 = vld [vmem:[#allocation79_spill] sm:$0xff] }
 0x4e3   :  { %4794 = vmatmul.mubr.bf16.gmra.mxu1 %v18892_v35  ;;  %10092 = vtanh.f32 %v16193_v17  ;;  %v16218_v49 = vmul.f32 0.5, %v4360_v18  ;;  %v4368_v42 = vadd.f32 %v18893_v63, %v11988_v46  ;;  %v16222_v41 = vpop.f32.mrf.mxu1  ;;  %v10079_v40 = vpop.eup %10078  ;;  %v7224_v30 = vadd.f32 %v7223_v26, %v6663_v44  ;;  %v18897_v35 = vld [vmem:[#allocation116_spill] sm:$0xff] }
 0x4e4   :  { %4803 = vmatprep.mubr.bf16.mxu1 %v17973_v11  ;;  %18894 = vst [vmem:[#allocation92_spill] sm:$0xff] %v16222_v41  ;;  %10094 = vtanh.f32 %v16200_v34  ;;  %v16225_v2 = vmul.f32 0.5, %v4362_v31  ;;  %v4370_v11 = vadd.f32 %v18895_v16, %v11962_v51  ;;  %v6969_v58 = vrot.slane %v16155_v25, 4 }
 0x4e5   :  { %v10081_v5 = vpop.eup %10080  ;;  %v7188_v61 = vadd.f32 %v7187_v20, %v6664_v57  ;;  %10096 = vtanh.f32 %v16206_v19  ;;  %v16231_v9 = vmul.f32 0.5, %v4366_v0  ;;  %v16233_v18 = vpop.f32.mrf.mxu1  ;;  %v6666_v26 = vmul.f32 %v6154_v59, %v16087_v48  ;;  %v18898_v57 = vld [vmem:[#allocation95_spill] sm:$0xff] }
 0x4e6   :  { %18896 = vst [vmem:[#allocation147_spill] sm:$0xff] %v16233_v18  ;;  %v10083_v3 = vpop.eup %10082  ;;  %v6667_v44 = vmul.f32 %v6155_v6, %v16093_v4  ;;  %v16237_v31 = vmul.f32 0.5, %v4368_v42  ;;  %v4372_v63 = vadd.f32 %v18897_v35, %v11988_v46  ;;  %v7225_v16 = vadd.f32 %v7224_v30, %v6665_v15  ;;  %v18902_v42 = vld [vmem:[#allocation49_spill] sm:$0xff] }
 0x4e7   :  { %v6668_v41 = vmul.f32 %v6156_v23, %v16099_v39  ;;  %10098 = vtanh.f32 %v16218_v49  ;;  %v4376_v0 = vadd.f32 %v18898_v57, %v11962_v51  ;;  %v16245_v20 = vpop.f32.mrf.mxu1  ;;  %v10085_v18 = vpop.eup %10084  ;;  %v6157_v47 = vadd.f32 1.0, %v10077_v13  ;;  %v18901_v23 = vld [vmem:[#allocation114_spill] sm:$0xff] }
 0x4e8   :  { %18899 = vst [vmem:[#allocation52_spill] sm:$0xff] %v16245_v20  ;;  %v6160_v48 = vadd.f32 1.0, %v10081_v5  ;;  %10100 = vtanh.f32 %v16225_v2  ;;  %v16248_v4 = vmul.f32 0.5, %v4370_v11  ;;  %v16251_v59 = vadd.f32 %v6969_v58, %v16155_v25 }
 0x4e9   :  { %v6158_v15 = vadd.f32 1.0, %v10079_v40  ;;  %v6161_v6 = vadd.f32 1.0, %v10083_v3  ;;  %10102 = vtanh.f32 %v16231_v9  ;;  %v16254_v39 = vpop.f32.mrf.mxu1  ;;  %v18903_v30 = vpack.c.bf16 %v18901_v23, %v18902_v42  ;;  %v18904_v3 = vld [vmem:[#allocation172_spill] sm:$0xff] }
 0x4ea   :  { %18900 = vst [vmem:[#allocation17_spill] sm:$0xff] %v16254_v39  ;;  %v7189_v35 = vadd.f32 %v7188_v61, %v6666_v26  ;;  %v16259_v13 = vadd.f32 %v7225_v16, %v6667_v44  ;;  %10104 = vtanh.f32 %v16237_v31  ;;  %v16262_v11 = vmul.f32 0.5, %v4372_v63 }
 0x4eb   :  { %4804 = vmatmul.mubr.bf16.gmra.mxu1 %v18903_v30  ;;  %v10087_v5 = vpop.eup %10086  ;;  %v6159_v40 = vadd.f32 1.0, %v10085_v18  ;;  %v16265_v58 = vmul.f32 0.5, %v4376_v0  ;;  %v4378_v57 = vadd.f32 %v18904_v3, %v11988_v46  ;;  %v16269_v39 = vpop.f32.mrf.mxu1  ;;  %v16274_v61 = vmul.f32 %v6157_v47, %v16119_v54  ;;  %v18907_v54 = vld [vmem:[#allocation45_spill] sm:$0xff] }
 0x4ec   :  { %18905 = vst [vmem:[#allocation164_spill] sm:$0xff] %v16269_v39  ;;  %v10089_v23 = vpop.eup %10088  ;;  %v16271_v42 = vadd.f32 %v7189_v35, %v6668_v41  ;;  %v6672_v26 = vmul.f32 %v6160_v48, %v16131_v43  ;;  %10106 = vtanh.f32 %v16248_v4  ;;  %v6670_v18 = vmul.f32 %v6158_v15, %v16127_v28  ;;  %v18908_v43 = vld [vmem:[#allocation39_spill] sm:$0xff]  ;;  %v18909_v28 = vld [vmem:[#allocation173_spill] sm:$0xff] }
 0x4ed   :  { %v6673_v63 = vmul.f32 %v6161_v6, %v16135_v27  ;;  %v16281_v16 = vmul.f32 0.5, %v4378_v57  ;;  %v16283_v0 = vpop.f32.mrf.mxu1  ;;  %v10091_v30 = vpop.eup %10090  ;;  %v6162_v41 = vadd.f32 1.0, %v10087_v5  ;;  %10108 = vtanh.f32 %v16262_v11 }
 0x4ee   :  { %18906 = vst [vmem:[#allocation56_spill] sm:$0xff] %v16283_v0  ;;  %v4380_v47 = vadd.f32 %v18907_v54, %v11962_v51  ;;  %v4382_v48 = vadd.f32 %v18908_v43, %v11988_v46  ;;  %v6671_v35 = vmul.f32 %v6159_v40, %v16140_v29  ;;  %v6163_v3 = vadd.f32 1.0, %v10089_v23  ;;  %v18911_v54 = vld [vmem:[#allocation26_spill] sm:$0xff] }
 0x4ef   :  { %10110 = vtanh.f32 %v16265_v58  ;;  %v4386_v27 = vadd.f32 %v18909_v28, %v11962_v51  ;;  %v16294_v15 = vpop.f32.mrf.mxu1  ;;  %v7234_v5 = vadd.f32 %v6672_v26, %v6670_v18  ;;  %v4388_v44 = vadd.f32 %v18911_v54, %v11988_v46 }
 0x4f0   :  { %18910 = vst [vmem:[#allocation91_spill] sm:$0xff] %v16294_v15  ;;  %v10093_v6 = vpop.eup %10092  ;;  %v16296_v57 = vmul.f32 0.5, %v4380_v47  ;;  %v16298_v25 = vmul.f32 0.5, %v4382_v48  ;;  %v7271_v7 = vadd.f32 %v6673_v63, %v6671_v35  ;;  %v6164_v29 = vadd.f32 1.0, %v10091_v30  ;;  %v18913_v47 = vld [vmem:[#allocation99_spill] sm:$0xff]  ;;  %v18914_v35 = vld [vmem:[#allocation64_spill] sm:$0xff] }
 0x4f1   :  { %v10095_v43 = vpop.eup %10094  ;;  %10112 = vtanh.f32 %v16281_v16  ;;  %v16303_v40 = vmul.f32 0.5, %v4386_v27  ;;  %v16305_v23 = vpop.f32.mrf.mxu1  ;;  %v6674_v15 = vmul.f32 %v6162_v41, %v16168_v21  ;;  %v16308_v26 = vmul.f32 0.5, %v4388_v44 }
 0x4f2   :  { %18912 = vst [vmem:[#allocation120_spill] sm:$0xff] %v16305_v23  ;;  %v10097_v28 = vpop.eup %10096  ;;  %v4390_v18 = vadd.f32 %v15609_v1, %v11962_v51  ;;  %v4392_v48 = vadd.f32 %v18913_v47, %v11988_v46  ;;  %v6675_v63 = vmul.f32 %v6163_v3, %v16175_v52  ;;  %v6165_v30 = vadd.f32 1.0, %v10093_v6  ;;  %v18916_v1 = vld [vmem:[#allocation82_spill] sm:$0xff] }
 0x4f3   :  { %10114 = vtanh.f32 %v16296_v57  ;;  %v4396_v27 = vadd.f32 %v18914_v35, %v11962_v51  ;;  %v16318_v54 = vpop.f32.mrf.mxu1  ;;  %v4398_v41 = vadd.f32 %v18916_v1, %v11988_v46  ;;  %v6676_v52 = vmul.f32 %v6164_v29, %v16184_v38 }
 0x4f4   :  { %18915 = vst [vmem:[#allocation166_spill] sm:$0xff] %v16318_v54  ;;  %v10099_v23 = vpop.eup %10098  ;;  %10116 = vtanh.f32 %v16298_v25  ;;  %v16321_v21 = vmul.f32 0.5, %v4390_v18  ;;  %v16323_v44 = vmul.f32 0.5, %v4392_v48  ;;  %v6166_v3 = vadd.f32 1.0, %v10095_v43  ;;  %v18918_v48 = vld [vmem:[#allocation78_spill] sm:$0xff] }
 0x4f5   :  { %v10101_v47 = vpop.eup %10100  ;;  %v6167_v6 = vadd.f32 1.0, %v10097_v28  ;;  %10118 = vtanh.f32 %v16303_v40  ;;  %v16329_v35 = vpop.f32.mrf.mxu1  ;;  %v7235_v0 = vadd.f32 %v7234_v5, %v6674_v15  ;;  %v16332_v18 = vmul.f32 0.5, %v4396_v27 }
 0x4f6   :  { %18917 = vst [vmem:[#allocation89_spill] sm:$0xff] %v16329_v35  ;;  %v10103_v54 = vpop.eup %10102  ;;  %10120 = vtanh.f32 %v16308_v26  ;;  %v4400_v39 = vadd.f32 %v18918_v48, %v11962_v51  ;;  %v6677_v1 = vmul.f32 %v6165_v30, %v16193_v17  ;;  %v6168_v60 = vadd.f32 1.0, %v10099_v23 }
 0x4f7   :  { %v10105_v20 = vpop.eup %10104  ;;  %10122 = vtanh.f32 %v16321_v21  ;;  %v16338_v38 = vmul.f32 0.5, %v4398_v41  ;;  %v16340_v43 = vpop.f32.mrf.mxu1  ;;  %v7272_v15 = vadd.f32 %v7271_v7, %v6675_v63  ;;  %v6169_v5 = vadd.f32 1.0, %v10101_v47 }
 0x4f8   :  { %10124 = vtanh.f32 %v16323_v44  ;;  %v7236_v27 = vadd.f32 %v7235_v0, %v6676_v52  ;;  %v6678_v48 = vmul.f32 %v6166_v3, %v16200_v34  ;;  %v6679_v35 = vmul.f32 %v6167_v6, %v16206_v19  ;;  %v18920_v3 = vld [vmem:[#allocation81_spill] sm:$0xff] }
 0x4f9   :  { %v10107_v28 = vpop.eup %10106  ;;  %v4402_v17 = vadd.f32 %v15668_v32, %v11988_v46  ;;  %v16348_v23 = vpop.f32.mrf.mxu1  ;;  %v6170_v30 = vadd.f32 1.0, %v10103_v54  ;;  %v6171_v41 = vadd.f32 1.0, %v10105_v20  ;;  %10126 = vtanh.f32 %v16332_v18 }
 0x4fa   :  { %v16351_v29 = vmul.f32 0.5, %v4400_v39  ;;  %v10109_v7 = vpop.eup %10108  ;;  %v7273_v63 = vadd.f32 %v7272_v15, %v6677_v1  ;;  %v6680_v47 = vmul.f32 %v6168_v60, %v16218_v49  ;;  %10128 = vtanh.f32 %v16338_v38 }
 0x4fb   :  { %v4406_v34 = vadd.f32 %v15683_v36, %v11962_v51  ;;  %v16357_v19 = vpop.f32.mrf.mxu1  ;;  %v16361_v0 = vadd.f32 %v16259_v13, %v16274_v61  ;;  %v6681_v20 = vmul.f32 %v6169_v5, %v16225_v2  ;;  %v6172_v39 = vadd.f32 1.0, %v10107_v28 }
 0x4fc   :  { %v10111_v32 = vpop.eup %10110  ;;  %v4408_v54 = vadd.f32 %v15695_v53, %v11988_v46  ;;  %v7237_v52 = vadd.f32 %v7236_v27, %v6678_v48  ;;  %v7274_v60 = vadd.f32 %v7273_v63, %v6679_v35  ;;  %v16366_v49 = vmul.f32 0.5, %v4402_v17  ;;  %v18921_v35 = vld [vmem:[#allocation126_spill] sm:$0xff] }
 0x4fd   :  { %18919 = vst [vmem:[#allocation151_spill] sm:$0xff] %v16361_v0  ;;  %v4410_v36 = vadd.f32 %v18920_v3, %v11962_v51  ;;  %v16370_v6 = vpop.f32.mrf.mxu1  ;;  %v6682_v15 = vmul.f32 %v6170_v30, %v16231_v9  ;;  %v6683_v13 = vmul.f32 %v6171_v41, %v16237_v31  ;;  %v6173_v61 = vadd.f32 1.0, %v10109_v7 }
 0x4fe   :  { %v10113_v1 = vpop.eup %10112  ;;  %10130 = vtanh.f32 %v16351_v29  ;;  %v7238_v2 = vadd.f32 %v7237_v52, %v6680_v47  ;;  %v6174_v5 = vadd.f32 1.0, %v10111_v32  ;;  %v16375_v53 = vmul.f32 0.5, %v4406_v34  ;;  %v8830_v34 = vld [vmem:[#allocation9 + $0xe0] ss:$16 sps:$4 sm:$0xff]   ;;  %v8832_v32 = vld [vmem:[#allocation9 + $0xe4] ss:$16 sps:$4 sm:$0xff]  }
 0x4ff   :  { %v4412_v28 = vadd.f32 %v18921_v35, %v11988_v46  ;;  %v16379_v27 = vpop.f32.mrf.mxu1  ;;  %v7275_v17 = vadd.f32 %v7274_v60, %v6681_v20  ;;  %v6684_v63 = vmul.f32 %v6172_v39, %v16248_v4  ;;  %v16382_v3 = vmul.f32 0.5, %v4408_v54  ;;  %7914 = vmatprep.subr.bf16.mxu0 %v8832_v32 }
 0x500   :  { %v10115_v48 = vpop.eup %10114  ;;  %v4416_v9 = vadd.f32 %v15730_v14, %v11962_v51  ;;  %v6175_v30 = vadd.f32 1.0, %v10113_v1  ;;  %10132 = vtanh.f32 %v16366_v49  ;;  %v16387_v41 = vmul.f32 0.5, %v4410_v36  ;;  %7915 = vmatpush1.bf16.msra.mxu0 %v8830_v34 }
 0x501   :  { %v10117_v31 = vpop.eup %10116  ;;  %v4418_v7 = vadd.f32 %v15741_v62, %v11988_v46  ;;  %v16391_v47 = vpop.f32.mrf.mxu1  ;;  %v7239_v4 = vadd.f32 %v7238_v2, %v6682_v15  ;;  %v7276_v39 = vadd.f32 %v7275_v17, %v6683_v13  ;;  %v6685_v54 = vmul.f32 %v6173_v61, %v16262_v11  ;;  %v18923_v61 = vld [vmem:[#allocation30_spill] sm:$0xff] }
 0x502   :  { %18922 = vst [vmem:[#allocation29_spill] sm:$0xff] %v16391_v47  ;;  %v10119_v20 = vpop.eup %10118  ;;  %v4420_v14 = vadd.f32 %v15751_v22, %v11962_v51  ;;  %v6686_v60 = vmul.f32 %v6174_v5, %v16265_v58  ;;  %v6176_v36 = vadd.f32 1.0, %v10115_v48  ;;  %10134 = vtanh.f32 %v16375_v53 }
 0x503   :  { %v10121_v52 = vpop.eup %10120  ;;  %v16398_v1 = vmul.f32 0.5, %v4412_v28  ;;  %v16400_v62 = vpop.f32.mrf.mxu1  ;;  %v7240_v47 = vadd.f32 %v7239_v4, %v6684_v63  ;;  %v6177_v15 = vadd.f32 1.0, %v10117_v31  ;;  %10136 = vtanh.f32 %v16382_v3  ;;  %v18924_v63 = vld [vmem:[#allocation47_spill] sm:$0xff] }
 0x504   :  { %v10123_v35 = vpop.eup %10122  ;;  %v16403_v11 = vmul.f32 0.5, %v4416_v9  ;;  %v6687_v13 = vmul.f32 %v6175_v30, %v16281_v16  ;;  %10138 = vtanh.f32 %v16387_v41  ;;  %v16407_v58 = vmul.f32 0.5, %v4418_v7 }
 0x505   :  { %v10125_v22 = vpop.eup %10124  ;;  %v4422_v2 = vadd.f32 %v18923_v61, %v11988_v46  ;;  %v16411_v5 = vpop.f32.mrf.mxu1  ;;  %v6178_v28 = vadd.f32 1.0, %v10119_v20  ;;  %v6179_v48 = vadd.f32 1.0, %v10121_v52  ;;  %v16413_v17 = vmul.f32 0.5, %v4420_v14 }
 0x506   :  { %v4426_v9 = vadd.f32 %v18924_v63, %v11962_v51  ;;  %v10127_v31 = vpop.eup %10126  ;;  %v7277_v34 = vadd.f32 %v7276_v39, %v6685_v54  ;;  %v7241_v32 = vadd.f32 %v7240_v47, %v6686_v60  ;;  %v6688_v16 = vmul.f32 %v6176_v36, %v16296_v57  ;;  %v18925_v47 = vld [vmem:[#allocation44_spill] sm:$0xff] }
 0x507   :  { %10140 = vtanh.f32 %v16398_v1  ;;  %v16419_v30 = vpop.f32.mrf.mxu1  ;;  %v10129_v7 = vpop.eup %10128  ;;  %v6689_v4 = vmul.f32 %v6177_v15, %v16298_v25  ;;  %v6180_v61 = vadd.f32 1.0, %v10123_v35  ;;  %v6181_v20 = vadd.f32 1.0, %v10125_v22 }
 0x508   :  { %10142 = vtanh.f32 %v16403_v11  ;;  %v7278_v14 = vadd.f32 %v7277_v34, %v6687_v13  ;;  %v16424_v52 = vmul.f32 0.5, %v4422_v2  ;;  %v4428_v39 = vadd.f32 %v18925_v47, %v11988_v46  ;;  %v18926_v13 = vld [vmem:[#allocation80_spill] sm:$0xff] }
 0x509   :  { %10144 = vtanh.f32 %v16407_v58  ;;  %v16428_v57 = vpop.f32.mrf.mxu1  ;;  %v6690_v54 = vmul.f32 %v6178_v28, %v16303_v40  ;;  %v6691_v60 = vmul.f32 %v6179_v48, %v16308_v26  ;;  %v16433_v25 = vmul.f32 0.5, %v4426_v9  ;;  %v18927_v26 = vld [vmem:[#allocation100_spill] sm:$0xff] }
 0x50a   :  { %10146 = vtanh.f32 %v16413_v17  ;;  %v7242_v35 = vadd.f32 %v7241_v32, %v6688_v16  ;;  %v6182_v15 = vadd.f32 1.0, %v10127_v31  ;;  %v6183_v22 = vadd.f32 1.0, %v10129_v7 }
 0x50b   :  { %v10131_v36 = vpop.eup %10130  ;;  %v4430_v2 = vadd.f32 %v18926_v13, %v11962_v51  ;;  %v16437_v63 = vpop.f32.mrf.mxu1  ;;  %v7279_v34 = vadd.f32 %v7278_v14, %v6689_v4  ;;  %v6692_v47 = vmul.f32 %v6180_v61, %v16321_v21  ;;  %v6693_v40 = vmul.f32 %v6181_v20, %v16323_v44  ;;  %v18930_v61 = vld [vmem:[#allocation123_spill] sm:$0xff] }
 0x50c   :  { %v4432_v28 = vadd.f32 %v18927_v26, %v11988_v46  ;;  %v18928_v48 = vrot.slane %v16271_v42, 4  ;;  %10148 = vtanh.f32 %v16424_v52  ;;  %v16449_v31 = vmul.f32 0.5, %v4428_v39 }
 0x50d   :  { %v4436_v32 = vadd.f32 %v15825_v50, %v11962_v51  ;;  %v16453_v16 = vpop.f32.mrf.mxu1  ;;  %v10133_v21 = vpop.eup %10132  ;;  %v7243_v7 = vadd.f32 %v7242_v35, %v6690_v54  ;;  %v7280_v44 = vadd.f32 %v7279_v34, %v6691_v60  ;;  %v6184_v4 = vadd.f32 1.0, %v10131_v36  ;;  %v8833_v34 = vld [vmem:[#allocation9 + $0xc0] ss:$16 sps:$4 sm:$0xff]  }
 0x50e   :  { %v16446_v9 = vadd.f32 %v18928_v48, %v16271_v42  ;;  %v4438_v20 = vadd.f32 %v18930_v61, %v11988_v46  ;;  %v6694_v14 = vmul.f32 %v6182_v15, %v16332_v18  ;;  %v6695_v42 = vmul.f32 %v6183_v22, %v16338_v38  ;;  %v8835_v18 = vld [vmem:[#allocation9 + $0xc4] ss:$16 sps:$4 sm:$0xff]  }
 0x50f   :  { %10150 = vtanh.f32 %v16433_v25  ;;  %v16460_v39 = vmul.f32 0.5, %v4430_v2  ;;  %v16462_v13 = vpop.f32.mrf.mxu1  ;;  %v10135_v50 = vpop.eup %10134  ;;  %v18932_v26 = vrot.slane %v16251_v59, 2  ;;  %v7244_v60 = vadd.f32 %v7243_v7, %v6692_v47  ;;  %v18934_v2 = vld [vmem:[#allocation156_spill] sm:$0xff]  ;;  %7916 = vmatprep.subr.bf16.mxu0 %v8835_v18 }
 0x510   :  { %18929 = vst [vmem:[#allocation136_spill] sm:$0xff] %v16446_v9  ;;  %18931 = vst [vmem:[#allocation34_spill] sm:$0xff] %v16462_v13  ;;  %v7281_v36 = vadd.f32 %v7280_v44, %v6693_v40  ;;  %v16469_v35 = vmul.f32 0.5, %v4432_v28  ;;  %v10137_v15 = vpop.eup %10136  ;;  %v6185_v38 = vadd.f32 1.0, %v10133_v21  ;;  %10152 = vtanh.f32 %v16449_v31  ;;  %7917 = vmatpush1.bf16.msra.mxu0 %v8833_v34 }
 0x511   :  { %v16467_v54 = vadd.f32 %v18932_v26, %v16251_v59  ;;  %v16472_v22 = vmul.f32 0.5, %v4436_v32  ;;  %v4440_v48 = vadd.f32 %v18934_v2, %v11962_v51  ;;  %v16476_v61 = vpop.f32.mrf.mxu1  ;;  %v10139_v13 = vpop.eup %10138  ;;  %v6696_v40 = vmul.f32 %v6184_v4, %v16351_v29  ;;  %v18937_v29 = vld [vmem:[#allocation54_spill] sm:$0xff] }
 0x512   :  { %18935 = vst [vmem:[#allocation153_spill] sm:$0xff] %v16476_v61  ;;  %v16481_v28 = vmul.f32 0.5, %v4438_v20  ;;  %v7245_v21 = vadd.f32 %v7244_v60, %v6694_v14  ;;  %v7282_v7 = vadd.f32 %v7281_v36, %v6695_v42  ;;  %v6186_v44 = vadd.f32 1.0, %v10135_v50  ;;  %v18938_v50 = vld [vmem:[#allocation144_spill] sm:$0xff] }
 0x513   :  { %18933 = vst [vmem:[#allocation50_spill] sm:$0xff] %v16467_v54  ;;  %10154 = vtanh.f32 %v16460_v39  ;;  %v16484_v32 = vpop.f32.mrf.mxu1  ;;  %v16487_v2 = vmul.f32 0.5, %v4440_v48  ;;  %v4442_v59 = vadd.f32 %v15857_v10, %v11988_v46  ;;  %v4446_v4 = vadd.f32 %v18937_v29, %v11962_v51  ;;  %v18940_v10 = vld [vmem:[#allocation143_spill] sm:$0xff] }
 0x514   :  { %18936 = vst [vmem:[#allocation65_spill] sm:$0xff] %v16484_v32  ;;  %v10141_v26 = vpop.eup %10140  ;;  %10156 = vtanh.f32 %v16469_v35  ;;  %v6697_v14 = vmul.f32 %v6185_v38, %v16366_v49  ;;  %v6187_v42 = vadd.f32 1.0, %v10137_v15  ;;  %v4448_v60 = vadd.f32 %v18938_v50, %v11988_v46  ;;  %v18941_v38 = vld [vmem:[#allocation133_spill] sm:$0xff]  ;;  %v18944_v32 = vld [vmem:[#allocation58_spill] sm:$0xff] }
 0x515   :  { %v10143_v20 = vpop.eup %10142  ;;  %10158 = vtanh.f32 %v16472_v22  ;;  %v16497_v36 = vpop.f32.mrf.mxu1  ;;  %v7246_v18 = vadd.f32 %v7245_v21, %v6696_v40  ;;  %v16500_v48 = vmul.f32 0.5, %v4442_v59  ;;  %v4450_v29 = vadd.f32 %v18940_v10, %v11962_v51  ;;  %v18943_v59 = vld [vmem:[#allocation104_spill] sm:$0xff] }
 0x516   :  { %18939 = vst [vmem:[#allocation131_spill] sm:$0xff] %v16497_v36  ;;  %v10145_v34 = vpop.eup %10144  ;;  %10160 = vtanh.f32 %v16481_v28  ;;  %v6188_v9 = vadd.f32 1.0, %v10139_v13  ;;  %v6189_v49 = vadd.f32 1.0, %v10141_v26  ;;  %v16504_v15 = vmul.f32 0.5, %v4446_v4  ;;  %v8836_v10 = vld [vmem:[#allocation9 + $0xa0] ss:$16 sps:$4 sm:$0xff]  }
 0x517   :  { %v10147_v47 = vpop.eup %10146  ;;  %v4452_v0 = vadd.f32 %v18941_v38, %v11988_v46  ;;  %v16508_v50 = vpop.f32.mrf.mxu1  ;;  %v6698_v54 = vmul.f32 %v6186_v44, %v16375_v53  ;;  %10162 = vtanh.f32 %v16487_v2  ;;  %v16512_v40 = vmul.f32 0.5, %v4448_v60  ;;  %v8838_v36 = vld [vmem:[#allocation9 + $0xa4] ss:$16 sps:$4 sm:$0xff]   ;;  %v18946_v60 = vld [vmem:[#allocation83_spill] sm:$0xff] }
 0x518   :  { %18942 = vst [vmem:[#allocation84_spill] sm:$0xff] %v16508_v50  ;;  %v4456_v21 = vadd.f32 %v18943_v59, %v11962_v51  ;;  %v7283_v13 = vadd.f32 %v7282_v7, %v6697_v14  ;;  %v6190_v26 = vadd.f32 1.0, %v10143_v20  ;;  %v16516_v4 = vmul.f32 0.5, %v4450_v29  ;;  %7918 = vmatprep.subr.bf16.mxu0 %v8838_v36 }
 0x519   :  { %v4458_v38 = vadd.f32 %v18944_v32, %v11988_v46  ;;  %v16520_v61 = vpop.f32.mrf.mxu1  ;;  %v10149_v50 = vpop.eup %10148  ;;  %v6699_v53 = vmul.f32 %v6187_v42, %v16382_v3  ;;  %v6191_v44 = vadd.f32 1.0, %v10145_v34  ;;  %10164 = vtanh.f32 %v16500_v48  ;;  %7919 = vmatpush1.bf16.msra.mxu0 %v8836_v10  ;;  %v18948_v34 = vld [vmem:[#allocation36_spill] sm:$0xff] }
 0x51a   :  { %18945 = vst [vmem:[#allocation62_spill] sm:$0xff] %v16520_v61  ;;  %v4460_v59 = vadd.f32 %v18946_v60, %v11962_v51  ;;  %v6700_v7 = vmul.f32 %v6188_v9, %v16387_v41  ;;  %v6701_v20 = vmul.f32 %v6189_v49, %v16398_v1  ;;  %10166 = vtanh.f32 %v16504_v15 }
 0x51b   :  { %v16529_v14 = vmul.f32 0.5, %v4452_v0  ;;  %v16531_v32 = vpop.f32.mrf.mxu1  ;;  %v6192_v3 = vadd.f32 1.0, %v10147_v47  ;;  %10168 = vtanh.f32 %v16512_v40  ;;  %v16534_v42 = vmul.f32 0.5, %v4456_v21 }
 0x51c   :  { %18947 = vst [vmem:[#allocation130_spill] sm:$0xff] %v16531_v32  ;;  %v10151_v29 = vpop.eup %10150  ;;  %v4462_v36 = vadd.f32 %v18948_v34, %v11988_v46  ;;  %v7247_v60 = vadd.f32 %v7246_v18, %v6698_v54  ;;  %v6702_v41 = vmul.f32 %v6190_v26, %v16403_v11  ;;  %10170 = vtanh.f32 %v16516_v4  ;;  %v18949_v54 = vld [vmem:[#allocation53_spill] sm:$0xff] }
 0x51d   :  { %v16540_v1 = vmul.f32 0.5, %v4458_v38  ;;  %v16542_v0 = vpop.f32.mrf.mxu1  ;;  %v10153_v9 = vpop.eup %10152  ;;  %v7284_v49 = vadd.f32 %v7283_v13, %v6699_v53  ;;  %v6703_v47 = vmul.f32 %v6191_v44, %v16407_v58  ;;  %v6193_v10 = vadd.f32 1.0, %v10149_v50  ;;  %v8839_v58 = vld [vmem:[#allocation9 + $0x80] ss:$16 sps:$4 sm:$0xff]   ;;  %v8841_v50 = vld [vmem:[#allocation9 + $0x84] ss:$16 sps:$4 sm:$0xff]  }
 0x51e   :  { %v16545_v32 = vmul.f32 0.5, %v4460_v59  ;;  %v7248_v21 = vadd.f32 %v7247_v60, %v6700_v7  ;;  %v6194_v61 = vadd.f32 1.0, %v10151_v29  ;;  %10172 = vtanh.f32 %v16529_v14  ;;  %7920 = vmatprep.subr.bf16.mxu0 %v8841_v50 }
 0x51f   :  { %v4466_v11 = vadd.f32 %v18949_v54, %v11962_v51  ;;  %v16550_v18 = vpop.f32.mrf.mxu1  ;;  %v7285_v38 = vadd.f32 %v7284_v49, %v6701_v20  ;;  %v6704_v34 = vmul.f32 %v6192_v3, %v16413_v17  ;;  %10174 = vtanh.f32 %v16534_v42  ;;  %7921 = vmatpush1.bf16.msra.mxu0 %v8839_v58 }
 0x520   :  { %v10155_v26 = vpop.eup %10154  ;;  %v16554_v13 = vmul.f32 0.5, %v4462_v36  ;;  %v7249_v44 = vadd.f32 %v7248_v21, %v6702_v41  ;;  %v6195_v59 = vadd.f32 1.0, %v10153_v9  ;;  %10176 = vtanh.f32 %v16540_v1 }
 0x521   :  { %v10157_v53 = vpop.eup %10156  ;;  %v4468_v7 = vadd.f32 %v15966_v24, %v11988_v46  ;;  %v16559_v29 = vpop.f32.mrf.mxu1  ;;  %v7286_v20 = vadd.f32 %v7285_v38, %v6703_v47  ;;  %v6705_v17 = vmul.f32 %v6193_v10, %v16424_v52  ;;  %10178 = vtanh.f32 %v16545_v32  ;;  %v18951_v10 = vld [vmem:[#allocation161_spill] sm:$0xff] }
 0x522   :  { %v10159_v60 = vpop.eup %10158  ;;  %v4470_v3 = vadd.f32 %v15974_v12, %v11962_v51  ;;  %v6706_v41 = vmul.f32 %v6194_v61, %v16433_v25  ;;  %v6196_v9 = vadd.f32 1.0, %v10155_v26  ;;  %v16566_v49 = vmul.f32 0.5, %v4466_v11 }
 0x523   :  { %v10161_v36 = vpop.eup %10160  ;;  %v4472_v24 = vadd.f32 %v15982_v45, %v11988_v46  ;;  %v16570_v21 = vpop.f32.mrf.mxu1  ;;  %v7250_v47 = vadd.f32 %v7249_v44, %v6704_v34  ;;  %v6197_v52 = vadd.f32 1.0, %v10157_v53  ;;  %10180 = vtanh.f32 %v16554_v13 }
 0x524   :  { %18950 = vst [vmem:[#allocation38_spill] sm:$0xff] %v16570_v21  ;;  %v4476_v12 = vadd.f32 %v18951_v10, %v11962_v51  ;;  %v10163_v54 = vpop.eup %10162  ;;  %v6707_v38 = vmul.f32 %v6195_v59, %v16449_v31  ;;  %v6198_v25 = vadd.f32 1.0, %v10159_v60  ;;  %v16576_v61 = vmul.f32 0.5, %v4468_v7 }
 0x525   :  { %v4478_v11 = vadd.f32 %v16005_v56, %v11988_v46  ;;  %v16580_v45 = vpop.f32.mrf.mxu1  ;;  %v7287_v26 = vadd.f32 %v7286_v20, %v6705_v17  ;;  %v6199_v58 = vadd.f32 1.0, %v10161_v36  ;;  %v16582_v34 = vmul.f32 0.5, %v4470_v3 }
 0x526   :  { %18952 = vst [vmem:[#allocation32_spill] sm:$0xff] %v16580_v45  ;;  %v4480_v50 = vadd.f32 %v16012_v37, %v11962_v51  ;;  %v10165_v53 = vpop.eup %10164  ;;  %v7251_v44 = vadd.f32 %v7250_v47, %v6706_v41  ;;  %v6708_v10 = vmul.f32 %v6196_v9, %v16460_v39  ;;  %10182 = vtanh.f32 %v16566_v49 }
 0x527   :  { %v16588_v31 = vmul.f32 0.5, %v4472_v24  ;;  %v16590_v59 = vpop.f32.mrf.mxu1  ;;  %v10167_v56 = vpop.eup %10166  ;;  %v6709_v7 = vmul.f32 %v6197_v52, %v16469_v35  ;;  %v6200_v60 = vadd.f32 1.0, %v10163_v54  ;;  %v16593_v20 = vmul.f32 0.5, %v4476_v12 }
 0x528   :  { %18953 = vst [vmem:[#allocation167_spill] sm:$0xff] %v16590_v59  ;;  %v4482_v17 = vadd.f32 %v16022_v8, %v11988_v46  ;;  %v10169_v37 = vpop.eup %10168  ;;  %v7288_v3 = vadd.f32 %v7287_v26, %v6707_v38  ;;  %v6710_v36 = vmul.f32 %v6198_v25, %v16472_v22  ;;  %10184 = vtanh.f32 %v16576_v61 }
 0x529   :  { %v16599_v39 = vmul.f32 0.5, %v4478_v11  ;;  %v16601_v41 = vpop.f32.mrf.mxu1  ;;  %v10171_v9 = vpop.eup %10170  ;;  %v6711_v24 = vmul.f32 %v6199_v58, %v16481_v28  ;;  %10186 = vtanh.f32 %v16582_v34  ;;  %v16605_v35 = vmul.f32 0.5, %v4480_v50 }
 0x52a   :  { %18954 = vst [vmem:[#allocation63_spill] sm:$0xff] %v16601_v41  ;;  %v4486_v8 = vadd.f32 %v16033_v33, %v11962_v51  ;;  %v7252_v47 = vadd.f32 %v7251_v44, %v6708_v10  ;;  %v6201_v52 = vadd.f32 1.0, %v10165_v53  ;;  %v6202_v12 = vadd.f32 1.0, %v10167_v56  ;;  %v18956_v33 = vld [vmem:[#allocation85_spill] sm:$0xff] }
 0x52b   :  { %10188 = vtanh.f32 %v16588_v31  ;;  %v16610_v22 = vpop.f32.mrf.mxu1  ;;  %v10173_v54 = vpop.eup %10172  ;;  %v7289_v38 = vadd.f32 %v7288_v3, %v6709_v7  ;;  %v6712_v25 = vmul.f32 %v6200_v60, %v16487_v2  ;;  %v16614_v28 = vmul.f32 0.5, %v4482_v17  ;;  %v18958_v3 = vld [vmem:[#allocation28_spill] sm:$0xff] }
 0x52c   :  { %18955 = vst [vmem:[#allocation60_spill] sm:$0xff] %v16610_v22  ;;  %10190 = vtanh.f32 %v16593_v20  ;;  %v10175_v11 = vpop.eup %10174  ;;  %v6203_v26 = vadd.f32 1.0, %v10169_v37  ;;  %v6204_v58 = vadd.f32 1.0, %v10171_v9  ;;  %v4488_v50 = vadd.f32 %v18956_v33, %v11988_v46 }
 0x52d   :  { %10192 = vtanh.f32 %v16599_v39  ;;  %v16619_v53 = vpop.f32.mrf.mxu1  ;;  %v10177_v44 = vpop.eup %10176  ;;  %v7253_v10 = vadd.f32 %v7252_v47, %v6710_v36  ;;  %v7290_v56 = vadd.f32 %v7289_v38, %v6711_v24  ;;  %v16622_v2 = vmul.f32 0.5, %v4486_v8  ;;  %v18960_v36 = vld [vmem:[#allocation86_spill] sm:$0xff] }
 0x52e   :  { %18957 = vst [vmem:[#allocation31_spill] sm:$0xff] %v16619_v53  ;;  %10194 = vtanh.f32 %v16605_v35  ;;  %v10179_v7 = vpop.eup %10178  ;;  %v6713_v60 = vmul.f32 %v6201_v52, %v16500_v48  ;;  %v6714_v17 = vmul.f32 %v6202_v12, %v16504_v15  ;;  %v6205_v37 = vadd.f32 1.0, %v10173_v54  ;;  %v8842_v8 = vld [vmem:[#allocation9 + $0x60] ss:$16 sps:$4 sm:$0xff]   ;;  %v8844_v47 = vld [vmem:[#allocation9 + $0x64] ss:$16 sps:$4 sm:$0xff]  }
 0x52f   :  { %v4496_v9 = vadd.f32 %v18958_v3, %v11962_v51  ;;  %v16628_v22 = vpop.f32.mrf.mxu1  ;;  %v7254_v33 = vadd.f32 %v7253_v10, %v6712_v25  ;;  %v6206_v53 = vadd.f32 1.0, %v10175_v11  ;;  %10196 = vtanh.f32 %v16614_v28  ;;  %v18962_v25 = vld [vmem:[#allocation132_spill] sm:$0xff]  ;;  %7922 = vmatprep.subr.bf16.mxu0 %v8844_v47 }
 0x530   :  { %18959 = vst [vmem:[#allocation101_spill] sm:$0xff] %v16628_v22  ;;  %v4490_v24 = vadd.f32 %v18960_v36, %v11962_v51  ;;  %v10181_v38 = vpop.eup %10180  ;;  %v6715_v48 = vmul.f32 %v6203_v26, %v16512_v40  ;;  %v6716_v15 = vmul.f32 %v6204_v58, %v16516_v4  ;;  %v6207_v52 = vadd.f32 1.0, %v10177_v44  ;;  %v18963_v36 = vld [vmem:[#allocation51_spill] sm:$0xff]  ;;  %7923 = vmatpush1.bf16.msra.mxu0 %v8842_v8 }
 0x531   :  { %v16635_v12 = vmul.f32 0.5, %v4488_v50  ;;  %v16637_v54 = vpop.f32.mrf.mxu1  ;;  %v6208_v3 = vadd.f32 1.0, %v10179_v7  ;;  %v4492_v11 = vadd.f32 %v18962_v25, %v11988_v46  ;;  %v16641_v10 = vmul.f32 0.5, %v4496_v9  ;;  %v18971_v25 = vld [vmem:[#allocation88_spill] sm:$0xff] }
 0x532   :  { %18961 = vst [vmem:[#allocation93_spill] sm:$0xff] %v16637_v54  ;;  %v4498_v22 = vadd.f32 %v18963_v36, %v11988_v46  ;;  %v7291_v41 = vadd.f32 %v7290_v56, %v6713_v60  ;;  %v7255_v59 = vadd.f32 %v7254_v33, %v6714_v17  ;;  %v6717_v40 = vmul.f32 %v6205_v37, %v16529_v14  ;;  %v18966_v14 = vld [vmem:[#allocation146_spill] sm:$0xff] }
 0x533   :  { %10198 = vtanh.f32 %v16622_v2  ;;  %v16647_v4 = vpop.f32.mrf.mxu1  ;;  %v10183_v26 = vpop.eup %10182  ;;  %v6718_v58 = vmul.f32 %v6206_v53, %v16534_v42  ;;  %v6209_v50 = vadd.f32 1.0, %v10181_v38  ;;  %v16650_v44 = vmul.f32 0.5, %v4490_v24 }
 0x534   :  { %18964 = vst [vmem:[#allocation103_spill] sm:$0xff] %v16647_v4  ;;  %v16652_v7 = vmul.f32 0.5, %v4498_v22  ;;  %v7292_v9 = vadd.f32 %v7291_v41, %v6715_v48  ;;  %v6719_v47 = vmul.f32 %v6207_v52, %v16540_v1  ;;  %10200 = vtanh.f32 %v16635_v12 }
 0x535   :  { %18965 = vst [vmem:[#allocation155_spill] sm:$0xff] %v16650_v44  ;;  %v4500_v56 = vadd.f32 %v18966_v14, %v11962_v51  ;;  %v16658_v60 = vpop.f32.mrf.mxu1  ;;  %v10185_v17 = vpop.eup %10184  ;;  %v7256_v37 = vadd.f32 %v7255_v59, %v6716_v15  ;;  %v6720_v33 = vmul.f32 %v6208_v3, %v16545_v32  ;;  %v16661_v42 = vmul.f32 0.5, %v4492_v11  ;;  %v18970_v32 = vld [vmem:[#allocation138_spill] sm:$0xff] }
 0x536   :  { %18967 = vst [vmem:[#allocation72_spill] sm:$0xff] %v16658_v60  ;;  %10202 = vtanh.f32 %v16641_v10  ;;  %v10187_v22 = vpop.eup %10186  ;;  %v7293_v53 = vadd.f32 %v7292_v9, %v6717_v40  ;;  %v6210_v41 = vadd.f32 1.0, %v10183_v26  ;;  %v6721_v48 = vmul.f32 %v6209_v50, %v16554_v13  ;;  %v8845_v40 = vld [vmem:[#allocation9 + $0x40] ss:$16 sps:$4 sm:$0xff]   ;;  %v8847_v26 = vld [vmem:[#allocation9 + $0x44] ss:$16 sps:$4 sm:$0xff]  }
 0x537   :  { %18968 = vst [vmem:[#allocation46_spill] sm:$0xff] %v16661_v42  ;;  %10204 = vtanh.f32 %v16652_v7  ;;  %v16665_v1 = vmul.f32 0.5, %v4500_v56  ;;  %v16667_v24 = vpop.f32.mrf.mxu1  ;;  %v7257_v38 = vadd.f32 %v7256_v37, %v6718_v58  ;;  %v4502_v59 = vadd.f32 %v18970_v32, %v11988_v46  ;;  %v18973_v50 = vld [vmem:[#allocation16_spill] sm:$0xff]  ;;  %7924 = vmatprep.subr.bf16.mxu0 %v8847_v26 }
 0x538   :  { %18969 = vst [vmem:[#allocation158_spill] sm:$0xff] %v16667_v24  ;;  %v10189_v8 = vpop.eup %10188  ;;  %10206 = vtanh.f32 %v16650_v44  ;;  %v7294_v52 = vadd.f32 %v7293_v53, %v6719_v47  ;;  %v6211_v3 = vadd.f32 1.0, %v10185_v17  ;;  %v4506_v11 = vadd.f32 %v18971_v25, %v11962_v51  ;;  %v18974_v53 = vld [vmem:[#allocation87_spill] sm:$0xff]  ;;  %7925 = vmatpush1.bf16.msra.mxu0 %v8845_v40 }
 0x539   :  { %v10191_v15 = vpop.eup %10190  ;;  %10208 = vtanh.f32 %v16665_v1  ;;  %v16676_v36 = vpop.f32.mrf.mxu1  ;;  %v7258_v9 = vadd.f32 %v7257_v38, %v6720_v33  ;;  %v16679_v13 = vmul.f32 0.5, %v4502_v59  ;;  %v4508_v14 = vadd.f32 %v18973_v50, %v11988_v46  ;;  %v18976_v59 = vld [vmem:[#allocation140_spill] sm:$0xff] }
 0x53a   :  { %18972 = vst [vmem:[#allocation97_spill] sm:$0xff] %v16676_v36  ;;  %v10193_v58 = vpop.eup %10192  ;;  %10210 = vtanh.f32 %v16661_v42  ;;  %v6722_v56 = vmul.f32 %v6210_v41, %v16566_v49  ;;  %v6212_v17 = vadd.f32 1.0, %v10187_v22  ;;  %v16684_v37 = vmul.f32 0.5, %v4506_v11  ;;  %v18977_v41 = vld [vmem:[#allocation109_spill] sm:$0xff] }
 0x53b   :  { %v10195_v47 = vpop.eup %10194  ;;  %v4510_v32 = vadd.f32 %v18974_v53, %v11962_v51  ;;  %v16688_v25 = vpop.f32.mrf.mxu1  ;;  %v7295_v33 = vadd.f32 %v7294_v52, %v6721_v48  ;;  %10212 = vtanh.f32 %v16679_v13  ;;  %v16691_v38 = vmul.f32 0.5, %v4508_v14  ;;  %v18979_v14 = vld [vmem:[#allocation73_spill] sm:$0xff] }
 0x53c   :  { %18975 = vst [vmem:[#allocation57_spill] sm:$0xff] %v16688_v25  ;;  %v4512_v50 = vadd.f32 %v18976_v59, %v11988_v46  ;;  %v10197_v36 = vpop.eup %10196  ;;  %v6213_v49 = vadd.f32 1.0, %v10189_v8  ;;  %10214 = vtanh.f32 %v16684_v37  ;;  %v4516_v11 = vadd.f32 %v18977_v41, %v11962_v51 }
 0x53d   :  { %v16696_v22 = vmul.f32 0.5, %v4510_v32  ;;  %v16700_v53 = vpop.f32.mrf.mxu1  ;;  %v6723_v48 = vmul.f32 %v6211_v3, %v16576_v61  ;;  %10216 = vtanh.f32 %v16691_v38  ;;  %v4518_v40 = vadd.f32 %v16188_v55, %v11988_v46  ;;  %v18981_v55 = vld [vmem:[#allocation135_spill] sm:$0xff] }
 0x53e   :  { %18978 = vst [vmem:[#allocation122_spill] sm:$0xff] %v16700_v53  ;;  %v16704_v52 = vmul.f32 0.5, %v4512_v50  ;;  %v6724_v8 = vmul.f32 %v6212_v17, %v16582_v34  ;;  %v16710_v26 = vmul.f32 0.5, %v4516_v11  ;;  %v4520_v32 = vadd.f32 %v18979_v14, %v11962_v51 }
 0x53f   :  { %10218 = vtanh.f32 %v16696_v22  ;;  %v16714_v59 = vpop.f32.mrf.mxu1  ;;  %v6214_v61 = vadd.f32 1.0, %v10191_v15  ;;  %v16719_v3 = vmul.f32 0.5, %v4518_v40  ;;  %v4522_v50 = vadd.f32 %v18981_v55, %v11988_v46  ;;  %v18983_v40 = vld [vmem:[#allocation92_spill] sm:$0xff] }
 0x540   :  { %18980 = vst [vmem:[#allocation35_spill] sm:$0xff] %v16714_v59  ;;  %v16716_v41 = vpop.eup %10198  ;;  %10220 = vtanh.f32 %v16704_v52  ;;  %v7259_v34 = vadd.f32 %v7258_v9, %v6722_v56  ;;  %v6725_v17 = vmul.f32 %v6213_v49, %v16588_v31  ;;  %v16725_v11 = vmul.f32 0.5, %v4520_v32  ;;  %v8848_v55 = vld [vmem:[#allocation9 + $0x20] ss:$16 sps:$4 sm:$0xff]   ;;  %v8850_v9 = vld [vmem:[#allocation9 + $0x24] ss:$16 sps:$4 sm:$0xff]  }
 0x541   :  { %10222 = vtanh.f32 %v16710_v26  ;;  %v16727_v14 = vpop.f32.mrf.mxu1  ;;  %v16729_v59 = vpop.eup %10200  ;;  %v6215_v53 = vadd.f32 1.0, %v10193_v58  ;;  %v16732_v15 = vmul.f32 0.5, %v4522_v50  ;;  %v4526_v25 = vadd.f32 %v18983_v40, %v11962_v51  ;;  %v18984_v32 = vld [vmem:[#allocation147_spill] sm:$0xff]  ;;  %7926 = vmatprep.subr.bf16.mxu0 %v8850_v9 }
 0x542   :  { %18982 = vst [vmem:[#allocation165_spill] sm:$0xff] %v16727_v14  ;;  %10224 = vtanh.f32 %v16719_v3  ;;  %v7296_v31 = vadd.f32 %v7295_v33, %v6723_v48  ;;  %v7260_v49 = vadd.f32 %v7259_v34, %v6724_v8  ;;  %v4528_v14 = vadd.f32 %v18984_v32, %v11988_v46  ;;  %v18986_v8 = vld [vmem:[#allocation52_spill] sm:$0xff]  ;;  %v18987_v32 = vld [vmem:[#allocation17_spill] sm:$0xff]  ;;  %7927 = vmatpush1.bf16.msra.mxu0 %v8848_v55 }
 0x543   :  { %v10203_v56 = vpop.eup %10202  ;;  %10226 = vtanh.f32 %v16725_v11  ;;  %v16739_v24 = vpop.f32.mrf.mxu1  ;;  %v6726_v60 = vmul.f32 %v6214_v61, %v16593_v20  ;;  %v6216_v50 = vadd.f32 1.0, %v10195_v47  ;;  %v16743_v4 = vmul.f32 0.5, %v4526_v25  ;;  %v18989_v61 = vld [vmem:[#allocation164_spill] sm:$0xff] }
 0x544   :  { %18985 = vst [vmem:[#allocation18_spill] sm:$0xff] %v16739_v24  ;;  %v10205_v58 = vpop.eup %10204  ;;  %10228 = vtanh.f32 %v16732_v15  ;;  %v7297_v33 = vadd.f32 %v7296_v31, %v6725_v17  ;;  %v16747_v48 = vmul.f32 0.5, %v4528_v14  ;;  %v4530_v34 = vadd.f32 %v18986_v8, %v11962_v51 }
 0x545   :  { %v16745_v40 = vpop.eup %10206  ;;  %v4532_v24 = vadd.f32 %v18987_v32, %v11988_v46  ;;  %v16753_v54 = vpop.f32.mrf.mxu1  ;;  %v6727_v47 = vmul.f32 %v6215_v53, %v16599_v39  ;;  %v6222_v25 = vadd.f32 1.0, %v10203_v56  ;;  %10230 = vtanh.f32 %v16743_v4  ;;  %v18992_v53 = vld [vmem:[#allocation56_spill] sm:$0xff] }
 0x546   :  { %18988 = vst [vmem:[#allocation75_spill] sm:$0xff] %v16753_v54  ;;  %v10209_v20 = vpop.eup %10208  ;;  %v4536_v17 = vadd.f32 %v18989_v61, %v11962_v51  ;;  %v6223_v9 = vadd.f32 1.0, %v10205_v58  ;;  %10232 = vtanh.f32 %v16747_v48  ;;  %v16762_v8 = vmul.f32 0.5, %v4530_v34  ;;  %v18993_v34 = vld [vmem:[#allocation91_spill] sm:$0xff] }
 0x547   :  { %v16759_v14 = vpop.eup %10210  ;;  %v6224_v31 = vadd.f32 1.0, %v10209_v20  ;;  %v16764_v32 = vpop.f32.mrf.mxu1  ;;  %v16766_v55 = vadd.f32 1.0, %v10197_v36  ;;  %v16768_v54 = vmul.f32 0.5, %v4532_v24  ;;  %v4538_v56 = vadd.f32 %v18992_v53, %v11988_v46 }
 0x548   :  { %18990 = vst [vmem:[#allocation163_spill] sm:$0xff] %v16759_v14  ;;  %18991 = vst [vmem:[#allocation162_spill] sm:$0xff] %v16764_v32  ;;  %v16770_v39 = vmul.f32 0.5, %v4536_v17  ;;  %v10213_v61 = vpop.eup %10212  ;;  %v16774_v42 = vadd.f32 %v7260_v49, %v6726_v60  ;;  %10234 = vtanh.f32 %v16762_v8  ;;  %v4540_v20 = vadd.f32 %v18993_v34, %v11962_v51 }
 0x549   :  { %v6736_v58 = vmul.f32 %v6224_v31, %v16665_v1  ;;  %v16780_v32 = vpop.f32.mrf.mxu1  ;;  %v10215_v36 = vpop.eup %10214  ;;  %v6734_v24 = vmul.f32 %v6222_v25, %v16641_v10  ;;  %v6225_v17 = vadd.f32 1.0, %v10213_v61  ;;  %10236 = vtanh.f32 %v16768_v54 }
 0x54a   :  { %18994 = vst [vmem:[#allocation20_spill] sm:$0xff] %v16780_v32  ;;  %v16784_v45 = vmul.f32 0.5, %v4538_v56  ;;  %v10217_v53 = vpop.eup %10216  ;;  %v16787_v60 = vmul.f32 %v6216_v50, %v16605_v35  ;;  %v6735_v1 = vmul.f32 %v6223_v9, %v16652_v7  ;;  %v6226_v49 = vadd.f32 1.0, %v10215_v36  ;;  %v18996_v7 = vld [vmem:[#allocation120_spill] sm:$0xff] }
 0x54b   :  { %10238 = vtanh.f32 %v16770_v39  ;;  %v16791_v31 = vpop.f32.mrf.mxu1  ;;  %v7308_v32 = vadd.f32 %v6736_v58, %v6734_v24  ;;  %v6737_v10 = vmul.f32 %v6225_v17, %v16679_v13  ;;  %v6227_v25 = vadd.f32 1.0, %v10217_v53  ;;  %v8851_v36 = vld [vmem:[#allocation9] ss:$16 sps:$4 sm:$0xff]  }
 0x54c   :  { %18995 = vst [vmem:[#allocation70_spill] sm:$0xff] %v16791_v31  ;;  %v10219_v34 = vpop.eup %10218  ;;  %10240 = vtanh.f32 %v16784_v45  ;;  %v6738_v61 = vmul.f32 %v6226_v49, %v16684_v37  ;;  %v16796_v35 = vmul.f32 0.5, %v4540_v20  ;;  %v4542_v50 = vadd.f32 %v18996_v7, %v11988_v46  ;;  %v8853_v31 = vld [vmem:[#allocation9 + $0x4] ss:$16 sps:$4 sm:$0xff]  }
 0x54d   :  { %v10221_v56 = vpop.eup %10220  ;;  %v6228_v21 = vadd.f32 1.0, %v10219_v34  ;;  %v16800_v9 = vpop.f32.mrf.mxu1  ;;  %v16802_v58 = vadd.f32 %v7297_v33, %v6727_v47  ;;  %v16805_v13 = vadd.f32 1.0, %v16716_v41  ;;  %v6739_v24 = vmul.f32 %v6227_v25, %v16691_v38  ;;  %7928 = vmatprep.subr.bf16.mxu0 %v8853_v31 }
 0x54e   :  { %18997 = vst [vmem:[#allocation66_spill] sm:$0xff] %v16800_v9  ;;  %v10223_v14 = vpop.eup %10222  ;;  %v6229_v17 = vadd.f32 1.0, %v10221_v56  ;;  %v7345_v53 = vadd.f32 %v6737_v10, %v6735_v1  ;;  %v7309_v20 = vadd.f32 %v7308_v32, %v6738_v61  ;;  %10242 = vtanh.f32 %v16796_v35  ;;  %7929 = vmatpush1.bf16.msra.mxu0 %v8851_v36 }
 0x54f   :  { %v10225_v37 = vpop.eup %10224  ;;  %v6740_v49 = vmul.f32 %v6228_v21, %v16696_v22  ;;  %v6230_v34 = vadd.f32 1.0, %v10223_v14  ;;  %v16809_v7 = vpop.f32.mrf.mxu1  ;;  %v16813_v41 = vmul.f32 0.5, %v4542_v50  ;;  %v18998_v21 = vld [vmem:[#allocation166_spill] sm:$0xff]  ;;  %v16824_v56 = vmul.f32 %v16766_v55, %v16614_v28  ;;  %v18999_v50 = vld [vmem:[#allocation89_spill] sm:$0xff] }
 0x550   :  { %v10227_v9 = vpop.eup %10226  ;;  %v6741_v44 = vmul.f32 %v6229_v17, %v16704_v52  ;;  %v6231_v33 = vadd.f32 1.0, %v10225_v37  ;;  %v7346_v47 = vadd.f32 %v7345_v53, %v6739_v24  ;;  %v4546_v22 = vadd.f32 %v18998_v21, %v11962_v51  ;;  %v8854_v21 = vld [vmem:[#allocation9 + $0x1e0] ss:$16 sps:$4 sm:$0xff]  }
 0x551   :  { %v10229_v38 = vpop.eup %10228  ;;  %v6742_v1 = vmul.f32 %v6230_v34, %v16710_v26  ;;  %v6232_v32 = vadd.f32 1.0, %v10227_v9  ;;  %v16818_v14 = vpop.f32.mrf.mxu1  ;;  %v7310_v31 = vadd.f32 %v7309_v20, %v6740_v49  ;;  %10244 = vtanh.f32 %v16813_v41 }
 0x552   :  { %v6743_v10 = vmul.f32 %v6231_v33, %v16719_v3  ;;  %v6233_v52 = vadd.f32 1.0, %v10229_v38  ;;  %v10231_v25 = vpop.eup %10230  ;;  %v16827_v61 = vadd.f32 1.0, %v16729_v59  ;;  %v16829_v26 = vmul.f32 0.5, %v4546_v22  ;;  %v8856_v22 = vld [vmem:[#allocation9 + $0x1e4] ss:$16 sps:$4 sm:$0xff]  }
 0x553   :  { %v4548_v9 = vadd.f32 %v18999_v50, %v11988_v46  ;;  %v16833_v36 = vpop.f32.mrf.mxu1  ;;  %v10233_v24 = vpop.eup %10232  ;;  %v7347_v3 = vadd.f32 %v7346_v47, %v6741_v44  ;;  %v7311_v17 = vadd.f32 %v7310_v31, %v6742_v1  ;;  %v6234_v37 = vadd.f32 1.0, %v10231_v25  ;;  %7930 = vmatprep.subr.bf16.mxu0 %v8856_v22 }
 0x554   :  { %v4550_v53 = vadd.f32 %v16340_v43, %v11962_v51  ;;  %v6744_v28 = vmul.f32 %v6232_v32, %v16725_v11  ;;  %v6235_v55 = vadd.f32 1.0, %v10233_v24  ;;  %10246 = vtanh.f32 %v16829_v26  ;;  %7931 = vmatpush2.bf16.msra.mxu0 %v8854_v21 }
 0x555   :  { %v16839_v59 = vmul.f32 0.5, %v4548_v9  ;;  %v16841_v20 = vpop.f32.mrf.mxu1  ;;  %v10235_v49 = vpop.eup %10234  ;;  %v7348_v34 = vadd.f32 %v7347_v3, %v6743_v10  ;;  %v6745_v33 = vmul.f32 %v6233_v52, %v16732_v15  ;;  %v4552_v44 = vadd.f32 %v16348_v23, %v11988_v46 }
 0x556   :  { %v16844_v38 = vmul.f32 0.5, %v4550_v53  ;;  %v10237_v47 = vpop.eup %10236  ;;  %v6746_v43 = vmul.f32 %v6234_v37, %v16743_v4  ;;  %v6236_v11 = vadd.f32 1.0, %v10235_v49  ;;  %v4556_v1 = vadd.f32 %v16357_v19, %v11962_v51 }
 0x557   :  { %10248 = vtanh.f32 %v16839_v59  ;;  %v16852_v32 = vpop.f32.mrf.mxu1  ;;  %v6747_v15 = vmul.f32 %v6235_v55, %v16747_v48  ;;  %v6237_v10 = vadd.f32 1.0, %v10237_v47  ;;  %v16856_v23 = vmul.f32 0.5, %v4552_v44 }
 0x558   :  { %v10239_v31 = vpop.eup %10238  ;;  %10250 = vtanh.f32 %v16844_v38  ;;  %v16860_v4 = vadd.f32 %v16774_v42, %v16787_v60  ;;  %v7312_v25 = vadd.f32 %v7311_v17, %v6744_v28  ;;  %v6748_v19 = vmul.f32 %v6236_v11, %v16762_v8 }
 0x559   :  { %v10241_v52 = vpop.eup %10240  ;;  %v16863_v50 = vmul.f32 0.5, %v4556_v1  ;;  %v16865_v9 = vpop.f32.mrf.mxu1  ;;  %v7349_v24 = vadd.f32 %v7348_v34, %v6745_v33  ;;  %v6238_v48 = vadd.f32 1.0, %v10239_v31  ;;  %10252 = vtanh.f32 %v16856_v23 }
 0x55a   :  { %v4558_v3 = vadd.f32 %v16370_v6, %v11988_v46  ;;  %v7313_v37 = vadd.f32 %v7312_v25, %v6746_v43  ;;  %v6749_v42 = vmul.f32 %v6237_v10, %v16768_v54  ;;  %v4560_v8 = vadd.f32 %v16379_v27, %v11962_v51  ;;  %v19000_v6 = vld [vmem:[#allocation29_spill] sm:$0xff]  ;;  %v8859_v25 = vld [vmem:[#allocation9 + $0x1c4] ss:$16 sps:$4 sm:$0xff]  }
 0x55b   :  { %10254 = vtanh.f32 %v16863_v50  ;;  %v16874_v60 = vpop.f32.mrf.mxu1  ;;  %v16878_v17 = vmul.f32 %v16805_v13, %v16622_v2  ;;  %v7350_v53 = vadd.f32 %v7349_v24, %v6747_v15  ;;  %v4562_v55 = vadd.f32 %v19000_v6, %v11988_v46  ;;  %v10243_v49 = vpop.eup %10242  ;;  %7932 = vmatprep.subr.bf16.mxu0 %v8859_v25 }
 0x55c   :  { %v16880_v28 = vmul.f32 0.5, %v4558_v3  ;;  %v7314_v34 = vadd.f32 %v7313_v37, %v6748_v19  ;;  %v6239_v54 = vadd.f32 1.0, %v10241_v52  ;;  %v16884_v33 = vmul.f32 0.5, %v4560_v8 }
 0x55d   :  { %v4566_v27 = vadd.f32 %v16400_v62, %v11962_v51  ;;  %v16888_v44 = vpop.f32.mrf.mxu1  ;;  %v6750_v47 = vmul.f32 %v6238_v48, %v16770_v39  ;;  %v16892_v2 = vmul.f32 0.5, %v4562_v55  ;;  %v4568_v13 = vadd.f32 %v16411_v5, %v11988_v46  ;;  %v19002_v55 = vld [vmem:[#allocation153_spill] sm:$0xff] }
 0x55e   :  { %10256 = vtanh.f32 %v16880_v28  ;;  %v10245_v43 = vpop.eup %10244  ;;  %v7351_v11 = vadd.f32 %v7350_v53, %v6749_v42  ;;  %v4570_v62 = vadd.f32 %v16419_v30, %v11962_v51  ;;  %v6240_v22 = vadd.f32 1.0, %v10243_v49  ;;  %v8857_v30 = vld [vmem:[#allocation9 + $0x1c0] ss:$16 sps:$4 sm:$0xff]  }
 0x55f   :  { %10258 = vtanh.f32 %v16884_v33  ;;  %v16897_v1 = vmul.f32 0.5, %v4566_v27  ;;  %v16901_v21 = vpop.f32.mrf.mxu1  ;;  %v16904_v39 = vmul.f32 0.5, %v4568_v13  ;;  %v4572_v31 = vadd.f32 %v16428_v57, %v11988_v46  ;;  %7933 = vmatpush2.bf16.msra.mxu0 %v8857_v30 }
 0x560   :  { %10260 = vtanh.f32 %v16892_v2  ;;  %v6241_v5 = vadd.f32 1.0, %v10245_v43  ;;  %v16909_v15 = vmul.f32 0.5, %v4570_v62  ;;  %v4576_v10 = vadd.f32 %v16437_v63, %v11962_v51  ;;  %v19001_v63 = vld [vmem:[#allocation34_spill] sm:$0xff]  ;;  %v19003_v62 = vld [vmem:[#allocation65_spill] sm:$0xff] }
 0x561   :  { %10262 = vtanh.f32 %v16897_v1  ;;  %v16913_v52 = vpop.f32.mrf.mxu1  ;;  %v10247_v19 = vpop.eup %10246  ;;  %v6751_v24 = vmul.f32 %v6239_v54, %v16784_v45  ;;  %v16917_v48 = vmul.f32 0.5, %v4572_v31  ;;  %v4578_v57 = vadd.f32 %v16453_v16, %v11988_v46 }
 0x562   :  { %10264 = vtanh.f32 %v16904_v39  ;;  %v6242_v3 = vadd.f32 1.0, %v10247_v19  ;;  %v16922_v37 = vmul.f32 0.5, %v4576_v10  ;;  %v4580_v42 = vadd.f32 %v19001_v63, %v11962_v51 }
 0x563   :  { %10266 = vtanh.f32 %v16909_v15  ;;  %v16926_v8 = vpop.f32.mrf.mxu1  ;;  %v7315_v45 = vadd.f32 %v7314_v34, %v6750_v47  ;;  %v16929_v6 = vmul.f32 0.5, %v4578_v57  ;;  %v4582_v16 = vadd.f32 %v19002_v55, %v11988_v46 }
 0x564   :  { %v10249_v53 = vpop.eup %10248  ;;  %10268 = vtanh.f32 %v16917_v48  ;;  %v6752_v54 = vmul.f32 %v6240_v22, %v16796_v35  ;;  %v6753_v27 = vmul.f32 %v6241_v5, %v16813_v41  ;;  %v16936_v13 = vmul.f32 0.5, %v4580_v42  ;;  %v19004_v41 = vld [vmem:[#allocation131_spill] sm:$0xff] }
 0x565   :  { %v10251_v49 = vpop.eup %10250  ;;  %10270 = vtanh.f32 %v16922_v37  ;;  %v16938_v43 = vpop.f32.mrf.mxu1  ;;  %v6243_v34 = vadd.f32 1.0, %v10249_v53  ;;  %v16941_v47 = vmul.f32 0.5, %v4582_v16  ;;  %v4586_v31 = vadd.f32 %v19003_v62, %v11962_v51 }
 0x566   :  { %10272 = vtanh.f32 %v16929_v6  ;;  %v10253_v10 = vpop.eup %10252  ;;  %v6754_v30 = vmul.f32 %v6242_v3, %v16829_v26  ;;  %v6244_v35 = vadd.f32 1.0, %v10251_v49  ;;  %v4588_v22 = vadd.f32 %v19004_v41, %v11988_v46  ;;  %v19005_v26 = vld [vmem:[#allocation84_spill] sm:$0xff] }
 0x567   :  { %10274 = vtanh.f32 %v16936_v13  ;;  %v16949_v5 = vpop.f32.mrf.mxu1  ;;  %v16953_v19 = vadd.f32 %v16802_v58, %v16824_v56  ;;  %v7352_v57 = vadd.f32 %v7351_v11, %v6751_v24  ;;  %v6245_v63 = vadd.f32 1.0, %v10253_v10  ;;  %v19006_v11 = vld [vmem:[#allocation62_spill] sm:$0xff] }
 0x568   :  { %v10255_v25 = vpop.eup %10254  ;;  %v16955_v42 = vmul.f32 0.5, %v4586_v31  ;;  %v7316_v53 = vadd.f32 %v7315_v45, %v6752_v54  ;;  %10276 = vtanh.f32 %v16941_v47  ;;  %v4590_v3 = vadd.f32 %v19005_v26, %v11962_v51 }
 0x569   :  { %v6246_v55 = vadd.f32 1.0, %v10255_v25  ;;  %v16960_v16 = vpop.f32.mrf.mxu1  ;;  %v16964_v49 = vadd.f32 %v16860_v4, %v16878_v17  ;;  %v16968_v58 = vmul.f32 %v16827_v61, %v16635_v12  ;;  %v6755_v56 = vmul.f32 %v6243_v34, %v16839_v59  ;;  %v8860_v61 = vld [vmem:[#allocation9 + $0x1a0] ss:$16 sps:$4 sm:$0xff]   ;;  %v8862_v59 = vld [vmem:[#allocation9 + $0x1a4] ss:$16 sps:$4 sm:$0xff]  }
 0x56a   :  { %v4592_v24 = vadd.f32 %v19006_v11, %v11988_v46  ;;  %v7353_v54 = vadd.f32 %v7352_v57, %v6753_v27  ;;  %v7317_v62 = vadd.f32 %v7316_v53, %v6754_v30  ;;  %v6756_v31 = vmul.f32 %v6244_v35, %v16844_v38  ;;  %v19007_v38 = vld [vmem:[#allocation130_spill] sm:$0xff]  ;;  %7934 = vmatprep.subr.bf16.mxu0 %v8862_v59 }
 0x56b   :  { %v10257_v45 = vpop.eup %10256  ;;  %v16974_v10 = vmul.f32 0.5, %v4588_v22  ;;  %v16976_v41 = vpop.f32.mrf.mxu1  ;;  %v6757_v17 = vmul.f32 %v6245_v63, %v16856_v23  ;;  %10278 = vtanh.f32 %v16955_v42  ;;  %v16980_v12 = vmul.f32 0.5, %v4590_v3  ;;  %7935 = vmatpush2.bf16.msra.mxu0 %v8860_v61 }
 0x56c   :  { %v10259_v4 = vpop.eup %10258  ;;  %v6247_v25 = vadd.f32 1.0, %v10257_v45  ;;  %v6758_v27 = vmul.f32 %v6246_v55, %v16863_v50  ;;  %v16983_v57 = vmul.f32 0.5, %v4592_v24  ;;  %v4596_v35 = vadd.f32 %v19007_v38, %v11962_v51 }
 0x56d   :  { %v10261_v34 = vpop.eup %10260  ;;  %v6248_v30 = vadd.f32 1.0, %v10259_v4  ;;  %v16987_v22 = vpop.f32.mrf.mxu1  ;;  %v6220_v23 = vadd.f32 1.0, %v16745_v40  ;;  %v7354_v63 = vadd.f32 %v7353_v54, %v6755_v56  ;;  %v4598_v3 = vadd.f32 %v16542_v0, %v11988_v46 }
 0x56e   :  { %v10263_v53 = vpop.eup %10262  ;;  %v6249_v26 = vadd.f32 1.0, %v10261_v34  ;;  %v7318_v45 = vadd.f32 %v7317_v62, %v6756_v31  ;;  %v6759_v50 = vmul.f32 %v6247_v25, %v16880_v28  ;;  %10280 = vtanh.f32 %v16974_v10 }
 0x56f   :  { %v10265_v11 = vpop.eup %10264  ;;  %v6250_v55 = vadd.f32 1.0, %v10263_v53  ;;  %v16994_v24 = vpop.f32.mrf.mxu1  ;;  %v6760_v38 = vmul.f32 %v6248_v30, %v16884_v33  ;;  %10282 = vtanh.f32 %v16980_v12  ;;  %v4600_v0 = vadd.f32 %v16550_v18, %v11962_v51  ;;  %v19010_v30 = vld [vmem:[#allocation155_spill] sm:$0xff] }
 0x570   :  { %19008 = vst [vmem:[#allocation90_spill] sm:$0xff] %v16994_v24  ;;  %v10267_v4 = vpop.eup %10266  ;;  %v6251_v40 = vadd.f32 1.0, %v10265_v11  ;;  %v7355_v54 = vadd.f32 %v7354_v63, %v6757_v17  ;;  %v7319_v62 = vadd.f32 %v7318_v45, %v6758_v27  ;;  %10284 = vtanh.f32 %v16983_v57  ;;  %v19011_v27 = vld [vmem:[#allocation163_spill] sm:$0xff] }
 0x571   :  { %v10269_v56 = vpop.eup %10268  ;;  %v17001_v28 = vmul.f32 0.5, %v4596_v35  ;;  %v17003_v31 = vpop.f32.mrf.mxu1  ;;  %v6761_v61 = vmul.f32 %v6249_v26, %v16892_v2  ;;  %v6762_v33 = vmul.f32 %v6250_v55, %v16897_v1  ;;  %v17007_v59 = vmul.f32 0.5, %v4598_v3 }
 0x572   :  { %19009 = vst [vmem:[#allocation74_spill] sm:$0xff] %v17003_v31  ;;  %v10271_v25 = vpop.eup %10270  ;;  %v4602_v34 = vadd.f32 %v16559_v29, %v11988_v46  ;;  %v6732_v17 = vmul.f32 %v6220_v23, %v19010_v30  ;;  %v6221_v53 = vadd.f32 1.0, %v19011_v27  ;;  %v7356_v63 = vadd.f32 %v7355_v54, %v6759_v50  ;;  %v19013_v23 = vld [vmem:[#allocation38_spill] sm:$0xff] }
 0x573   :  { %v10273_v18 = vpop.eup %10272  ;;  %v6252_v35 = vadd.f32 1.0, %v10267_v4  ;;  %v17013_v11 = vpop.f32.mrf.mxu1  ;;  %v7320_v31 = vadd.f32 %v7319_v62, %v6760_v38  ;;  %v6763_v2 = vmul.f32 %v6251_v40, %v16904_v39  ;;  %v6253_v26 = vadd.f32 1.0, %v10269_v56 }
 0x574   :  { %19012 = vst [vmem:[#allocation37_spill] sm:$0xff] %v17013_v11  ;;  %v10275_v45 = vpop.eup %10274  ;;  %v17016_v1 = vmul.f32 0.5, %v4600_v0  ;;  %v6254_v3 = vadd.f32 1.0, %v10271_v25  ;;  %10286 = vtanh.f32 %v17001_v28  ;;  %v17019_v29 = vmul.f32 0.5, %v4602_v34  ;;  %v19015_v0 = vld [vmem:[#allocation32_spill] sm:$0xff] }
 0x575   :  { %v4606_v55 = vadd.f32 %v19013_v23, %v11962_v51  ;;  %v17023_v30 = vpop.f32.mrf.mxu1  ;;  %v10277_v50 = vpop.eup %10276  ;;  %v7357_v4 = vadd.f32 %v7356_v63, %v6761_v61  ;;  %v7321_v54 = vadd.f32 %v7320_v31, %v6762_v33  ;;  %v6255_v27 = vadd.f32 1.0, %v10273_v18  ;;  %v8863_v25 = vld [vmem:[#allocation9 + $0x180] ss:$16 sps:$4 sm:$0xff]   ;;  %v8865_v34 = vld [vmem:[#allocation9 + $0x184] ss:$16 sps:$4 sm:$0xff]   ;;  %v19017_v31 = vld [vmem:[#allocation167_spill] sm:$0xff] }
 0x576   :  { %19014 = vst [vmem:[#allocation112_spill] sm:$0xff] %v17023_v30  ;;  %10288 = vtanh.f32 %v17007_v59  ;;  %v6764_v39 = vmul.f32 %v6252_v35, %v16909_v15  ;;  %v6256_v38 = vadd.f32 1.0, %v10275_v45  ;;  %v4608_v56 = vadd.f32 %v19015_v0, %v11988_v46  ;;  %7936 = vmatprep.subr.bf16.mxu0 %v8865_v34 }
 0x577   :  { %v17027_v40 = vmul.f32 0.5, %v4606_v55  ;;  %v17031_v62 = vpop.f32.mrf.mxu1  ;;  %v7358_v23 = vadd.f32 %v7357_v4, %v6763_v2  ;;  %v6765_v30 = vmul.f32 %v6253_v26, %v16917_v48  ;;  %10290 = vtanh.f32 %v17016_v1  ;;  %v19019_v2 = vld [vmem:[#allocation63_spill] sm:$0xff]  ;;  %7937 = vmatpush2.bf16.msra.mxu0 %v8863_v25 }
 0x578   :  { %19016 = vst [vmem:[#allocation19_spill] sm:$0xff] %v17031_v62  ;;  %v4610_v61 = vadd.f32 %v19017_v31, %v11962_v51  ;;  %v10279_v33 = vpop.eup %10278  ;;  %v6766_v15 = vmul.f32 %v6254_v3, %v16922_v37  ;;  %v6257_v18 = vadd.f32 1.0, %v10277_v50  ;;  %10292 = vtanh.f32 %v17019_v29  ;;  %v19020_v50 = vld [vmem:[#allocation60_spill] sm:$0xff] }
 0x579   :  { %v17039_v63 = vmul.f32 0.5, %v4608_v56  ;;  %v17041_v35 = vpop.f32.mrf.mxu1  ;;  %v6767_v45 = vmul.f32 %v6255_v27, %v16929_v6  ;;  %10294 = vtanh.f32 %v17027_v40  ;;  %v4612_v26 = vadd.f32 %v19019_v2, %v11988_v46  ;;  %v8866_v2 = vld [vmem:[#allocation9 + $0x160] ss:$16 sps:$4 sm:$0xff]  }
 0x57a   :  { %19018 = vst [vmem:[#allocation105_spill] sm:$0xff] %v17041_v35  ;;  %v17045_v48 = vmul.f32 0.5, %v4610_v61  ;;  %v17051_v37 = vadd.f32 %v16953_v19, %v16968_v58  ;;  %v7322_v3 = vadd.f32 %v7321_v54, %v6764_v39  ;;  %v6768_v55 = vmul.f32 %v6256_v38, %v16936_v13  ;;  %v19023_v38 = vld [vmem:[#allocation46_spill] sm:$0xff] }
 0x57b   :  { %v4616_v4 = vadd.f32 %v19020_v50, %v11962_v51  ;;  %v17056_v0 = vpop.f32.mrf.mxu1  ;;  %v10281_v6 = vpop.eup %10280  ;;  %v7359_v27 = vadd.f32 %v7358_v23, %v6765_v30  ;;  %v6258_v56 = vadd.f32 1.0, %v10279_v33  ;;  %10296 = vtanh.f32 %v17039_v63  ;;  %v19024_v23 = vld [vmem:[#allocation31_spill] sm:$0xff] }
 0x57c   :  { %19021 = vst [vmem:[#allocation115_spill] sm:$0xff] %v17056_v0  ;;  %v17059_v34 = vmul.f32 0.5, %v4612_v26  ;;  %v10283_v25 = vpop.eup %10282  ;;  %v17062_v31 = vadd.f32 %v16964_v49, %v6732_v17  ;;  %v7323_v19 = vadd.f32 %v7322_v3, %v6766_v15  ;;  %v6769_v58 = vmul.f32 %v6257_v18, %v16941_v47  ;;  %v8868_v49 = vld [vmem:[#allocation9 + $0x164] ss:$16 sps:$4 sm:$0xff]   ;;  %v19025_v47 = vld [vmem:[#allocation101_spill] sm:$0xff] }
 0x57d   :  { %v17065_v13 = vmul.f32 0.5, %v4616_v4  ;;  %v17067_v54 = vpop.f32.mrf.mxu1  ;;  %v10285_v39 = vpop.eup %10284  ;;  %v17070_v61 = vmul.f32 %v6221_v53, %v19023_v38  ;;  %v7360_v30 = vadd.f32 %v7359_v27, %v6767_v45  ;;  %10298 = vtanh.f32 %v17045_v48  ;;  %v19027_v3 = vld [vmem:[#allocation93_spill] sm:$0xff]  ;;  %7938 = vmatprep.subr.bf16.mxu0 %v8868_v49  ;;  %v19028_v27 = vld [vmem:[#allocation103_spill] sm:$0xff] }
 0x57e   :  { %19022 = vst [vmem:[#allocation121_spill] sm:$0xff] %v17067_v54  ;;  %v4618_v33 = vadd.f32 %v19024_v23, %v11988_v46  ;;  %v7324_v17 = vadd.f32 %v7323_v19, %v6768_v55  ;;  %v6259_v15 = vadd.f32 1.0, %v10281_v6  ;;  %10300 = vtanh.f32 %v17059_v34  ;;  %7939 = vmatpush2.bf16.msra.mxu0 %v8866_v2 }
 0x57f   :  { %v4620_v18 = vadd.f32 %v19025_v47, %v11962_v51  ;;  %v17078_v26 = vpop.f32.mrf.mxu1  ;;  %v6770_v53 = vmul.f32 %v6258_v56, %v16955_v42  ;;  %10302 = vtanh.f32 %v17065_v13  ;;  %v4622_v50 = vadd.f32 %v19027_v3, %v11988_v46 }
 0x580   :  { %19026 = vst [vmem:[#allocation40_spill] sm:$0xff] %v17078_v26  ;;  %v17082_v45 = vmul.f32 0.5, %v4618_v33  ;;  %v7361_v4 = vadd.f32 %v7360_v30, %v6769_v58  ;;  %v6260_v55 = vadd.f32 1.0, %v10283_v25  ;;  %v4626_v19 = vadd.f32 %v19028_v27, %v11962_v51  ;;  %v19030_v33 = vld [vmem:[#allocation72_spill] sm:$0xff]  ;;  %v19031_v30 = vld [vmem:[#allocation158_spill] sm:$0xff] }
 0x581   :  { %v17086_v6 = vmul.f32 0.5, %v4620_v18  ;;  %v17090_v38 = vpop.f32.mrf.mxu1  ;;  %v10287_v23 = vpop.eup %10286  ;;  %v6261_v42 = vadd.f32 1.0, %v10285_v39  ;;  %v17093_v56 = vmul.f32 0.5, %v4622_v50  ;;  %v4628_v47 = vadd.f32 %v19030_v33, %v11988_v46  ;;  %v19033_v50 = vld [vmem:[#allocation97_spill] sm:$0xff] }
 0x582   :  { %19029 = vst [vmem:[#allocation127_spill] sm:$0xff] %v17090_v38  ;;  %10304 = vtanh.f32 %v17082_v45  ;;  %v6771_v25 = vmul.f32 %v6259_v15, %v16974_v10  ;;  %v17099_v58 = vmul.f32 0.5, %v4626_v19  ;;  %v4630_v18 = vadd.f32 %v19031_v30, %v11962_v51  ;;  %v19034_v19 = vld [vmem:[#allocation57_spill] sm:$0xff] }
 0x583   :  { %v10289_v49 = vpop.eup %10288  ;;  %10306 = vtanh.f32 %v17086_v6  ;;  %v17103_v2 = vpop.f32.mrf.mxu1  ;;  %v7325_v39 = vadd.f32 %v7324_v17, %v6770_v53  ;;  %v17106_v3 = vmul.f32 0.5, %v4628_v47  ;;  %v4632_v27 = vadd.f32 %v19033_v50, %v11988_v46  ;;  %v19036_v50 = vld [vmem:[#allocation122_spill] sm:$0xff] }
 0x584   :  { %19032 = vst [vmem:[#allocation149_spill] sm:$0xff] %v17103_v2  ;;  %10308 = vtanh.f32 %v17093_v56  ;;  %v10291_v33 = vpop.eup %10290  ;;  %v6772_v10 = vmul.f32 %v6260_v55, %v16980_v12  ;;  %v17112_v15 = vmul.f32 0.5, %v4630_v18  ;;  %v4636_v30 = vadd.f32 %v19034_v19, %v11962_v51  ;;  %v19037_v18 = vld [vmem:[#allocation35_spill] sm:$0xff] }
 0x585   :  { %10310 = vtanh.f32 %v17099_v58  ;;  %v17116_v38 = vpop.f32.mrf.mxu1  ;;  %v10293_v17 = vpop.eup %10292  ;;  %v6773_v53 = vmul.f32 %v6261_v42, %v16983_v57  ;;  %v6262_v47 = vadd.f32 1.0, %v10287_v23  ;;  %v17119_v2 = vmul.f32 0.5, %v4632_v27  ;;  %v19039_v23 = vld [vmem:[#allocation165_spill] sm:$0xff] }
 0x586   :  { %19035 = vst [vmem:[#allocation41_spill] sm:$0xff] %v17116_v38  ;;  %v4638_v26 = vadd.f32 %v19036_v50, %v11988_v46  ;;  %v10295_v54 = vpop.eup %10294  ;;  %v6263_v12 = vadd.f32 1.0, %v10289_v49  ;;  %10312 = vtanh.f32 %v17106_v3  ;;  %v17124_v55 = vmul.f32 0.5, %v4636_v30 }
 0x587   :  { %v4640_v19 = vadd.f32 %v19037_v18, %v11962_v51  ;;  %v17128_v0 = vpop.f32.mrf.mxu1  ;;  %v6264_v38 = vadd.f32 1.0, %v10291_v33  ;;  %10314 = vtanh.f32 %v17112_v15  ;;  %v4642_v42 = vadd.f32 %v19039_v23, %v11988_v46 }
 0x588   :  { %19038 = vst [vmem:[#allocation145_spill] sm:$0xff] %v17128_v0  ;;  %v17131_v57 = vmul.f32 0.5, %v4638_v26  ;;  %v10297_v27 = vpop.eup %10296  ;;  %v7362_v50 = vadd.f32 %v7361_v4, %v6771_v25  ;;  %v6265_v49 = vadd.f32 1.0, %v10293_v17  ;;  %10316 = vtanh.f32 %v17119_v2  ;;  %v19041_v26 = vld [vmem:[#allocation18_spill] sm:$0xff]  ;;  %v19042_v25 = vld [vmem:[#allocation75_spill] sm:$0xff] }
 0x589   :  { %v17136_v30 = vmul.f32 0.5, %v4640_v19  ;;  %v17138_v35 = vpop.f32.mrf.mxu1  ;;  %v6774_v18 = vmul.f32 %v6262_v47, %v17001_v28  ;;  %v6266_v0 = vadd.f32 1.0, %v10295_v54  ;;  %10318 = vtanh.f32 %v17124_v55 }
 0x58a   :  { %19040 = vst [vmem:[#allocation168_spill] sm:$0xff] %v17138_v35  ;;  %v4646_v33 = vadd.f32 %v19041_v26, %v11962_v51  ;;  %v10299_v62 = vpop.eup %10298  ;;  %v7326_v11 = vadd.f32 %v7325_v39, %v6772_v10  ;;  %v6775_v23 = vmul.f32 %v6263_v12, %v17007_v59  ;;  %v17145_v4 = vmul.f32 0.5, %v4642_v42  ;;  %v19044_v39 = vld [vmem:[#allocation162_spill] sm:$0xff] }
 0x58b   :  { %v4648_v17 = vadd.f32 %v19042_v25, %v11988_v46  ;;  %v17149_v19 = vpop.f32.mrf.mxu1  ;;  %v10301_v35 = vpop.eup %10300  ;;  %v7363_v24 = vadd.f32 %v7362_v50, %v6773_v53  ;;  %v6776_v28 = vmul.f32 %v6264_v38, %v17016_v1  ;;  %v6267_v54 = vadd.f32 1.0, %v10297_v27  ;;  %v19046_v1 = vld [vmem:[#allocation20_spill] sm:$0xff] }
 0x58c   :  { %19043 = vst [vmem:[#allocation124_spill] sm:$0xff] %v17149_v19  ;;  %10320 = vtanh.f32 %v17131_v57  ;;  %v10303_v47 = vpop.eup %10302  ;;  %v6777_v26 = vmul.f32 %v6265_v49, %v17019_v29  ;;  %v17155_v59 = vmul.f32 0.5, %v4646_v33  ;;  %v4650_v10 = vadd.f32 %v19044_v39, %v11962_v51 }
 0x58d   :  { %10322 = vtanh.f32 %v17136_v30  ;;  %v17159_v12 = vpop.f32.mrf.mxu1  ;;  %v7327_v42 = vadd.f32 %v7326_v11, %v6774_v18  ;;  %v6778_v53 = vmul.f32 %v6266_v0, %v17027_v40  ;;  %v6268_v50 = vadd.f32 1.0, %v10299_v62  ;;  %v19048_v40 = vld [vmem:[#allocation70_spill] sm:$0xff] }
 0x58e   :  { %19045 = vst [vmem:[#allocation69_spill] sm:$0xff] %v17159_v12  ;;  %v4652_v38 = vadd.f32 %v19046_v1, %v11988_v46  ;;  %v7364_v25 = vadd.f32 %v7363_v24, %v6775_v23  ;;  %v6269_v19 = vadd.f32 1.0, %v10301_v35  ;;  %10324 = vtanh.f32 %v17145_v4  ;;  %v19049_v35 = vld [vmem:[#allocation66_spill] sm:$0xff] }
 0x58f   :  { %v10305_v27 = vpop.eup %10304  ;;  %v17165_v29 = vmul.f32 0.5, %v4648_v17  ;;  %v17167_v49 = vpop.f32.mrf.mxu1  ;;  %v7328_v39 = vadd.f32 %v7327_v42, %v6776_v28  ;;  %v6779_v12 = vmul.f32 %v6267_v54, %v17039_v63  ;;  %v6270_v11 = vadd.f32 1.0, %v10303_v47 }
 0x590   :  { %19047 = vst [vmem:[#allocation118_spill] sm:$0xff] %v17167_v49  ;;  %v10307_v33 = vpop.eup %10306  ;;  %v4656_v62 = vadd.f32 %v19048_v40, %v11962_v51  ;;  %v7365_v18 = vadd.f32 %v7364_v25, %v6777_v26  ;;  %10326 = vtanh.f32 %v17155_v59  ;;  %v17173_v24 = vmul.f32 0.5, %v4650_v10  ;;  %v8869_v25 = vld [vmem:[#allocation9 + $0x140] ss:$16 sps:$4 sm:$0xff]   ;;  %v8871_v40 = vld [vmem:[#allocation9 + $0x144] ss:$16 sps:$4 sm:$0xff]  }
 0x591   :  { %v10309_v0 = vpop.eup %10308  ;;  %v4658_v23 = vadd.f32 %v19049_v35, %v11988_v46  ;;  %v17177_v17 = vpop.f32.mrf.mxu1  ;;  %v7329_v49 = vadd.f32 %v7328_v39, %v6778_v53  ;;  %v6780_v28 = vmul.f32 %v6268_v50, %v17045_v48  ;;  %v6271_v63 = vadd.f32 1.0, %v10305_v27  ;;  %7940 = vmatprep.subr.bf16.mxu0 %v8871_v40 }
 0x592   :  { %19050 = vst [vmem:[#allocation117_spill] sm:$0xff] %v17177_v17  ;;  %v10311_v1 = vpop.eup %10310  ;;  %v17180_v54 = vmul.f32 0.5, %v4652_v38  ;;  %v6781_v47 = vmul.f32 %v6269_v19, %v17059_v34  ;;  %v6272_v42 = vadd.f32 1.0, %v10307_v33  ;;  %10328 = vtanh.f32 %v17165_v29  ;;  %v8874_v38 = vld [vmem:[#allocation9 + $0x124] ss:$16 sps:$4 sm:$0xff]   ;;  %7941 = vmatpush2.bf16.msra.mxu0 %v8869_v25 }
 0x593   :  { %v4660_v26 = vadd.f32 %v16809_v7, %v11962_v51  ;;  %v17186_v10 = vpop.f32.mrf.mxu1  ;;  %v10313_v35 = vpop.eup %10312  ;;  %v7366_v17 = vadd.f32 %v7365_v18, %v6779_v12  ;;  %v6782_v53 = vmul.f32 %v6270_v11, %v17065_v13  ;;  %v6273_v48 = vadd.f32 1.0, %v10309_v0  ;;  %v8872_v11 = vld [vmem:[#allocation9 + $0x120] ss:$16 sps:$4 sm:$0xff]   ;;  %7942 = vmatprep.subr.bf16.mxu0 %v8874_v38 }
 0x594   :  { %19051 = vst [vmem:[#allocation55_spill] sm:$0xff] %v17186_v10  ;;  %v17189_v50 = vmul.f32 0.5, %v4656_v62  ;;  %v10315_v27 = vpop.eup %10314  ;;  %v6274_v34 = vadd.f32 1.0, %v10311_v1  ;;  %10330 = vtanh.f32 %v17173_v24  ;;  %v17192_v19 = vmul.f32 0.5, %v4658_v23 }
 0x595   :  { %v17194_v33 = vmul.f32 0.5, %v4660_v26  ;;  %v17196_v7 = vpop.f32.mrf.mxu1  ;;  %v10317_v39 = vpop.eup %10316  ;;  %v7330_v10 = vadd.f32 %v7329_v49, %v6780_v28  ;;  %v6783_v12 = vmul.f32 %v6271_v63, %v17082_v45  ;;  %10332 = vtanh.f32 %v17180_v54  ;;  %v8877_v49 = vld [vmem:[#allocation9 + $0x104] ss:$16 sps:$4 sm:$0xff]  }
 0x596   :  { %v4662_v13 = vadd.f32 %v16818_v14, %v11988_v46  ;;  %v10319_v62 = vpop.eup %10318  ;;  %v7367_v0 = vadd.f32 %v7366_v17, %v6781_v47  ;;  %v6784_v18 = vmul.f32 %v6272_v42, %v17086_v6  ;;  %v6275_v23 = vadd.f32 1.0, %v10313_v35  ;;  %7943 = vmatpush2.bf16.msra.mxu0 %v8872_v11  ;;  %v8875_v35 = vld [vmem:[#allocation9 + $0x100] ss:$16 sps:$4 sm:$0xff]  }
 0x597   :  { %10334 = vtanh.f32 %v17194_v33  ;;  %v17204_v1 = vpop.f32.mrf.mxu1  ;;  %v6785_v45 = vmul.f32 %v6273_v48, %v17093_v56  ;;  %v6276_v28 = vadd.f32 1.0, %v10315_v27  ;;  %v7331_v26 = vadd.f32 %v7330_v10, %v6782_v53  ;;  %7944 = vmatprep.subr.bf16.mxu0 %v8877_v49 }
 0x598   :  { %10336 = vtanh.f32 %v17189_v50  ;;  %v17208_v63 = vmul.f32 0.5, %v4662_v13  ;;  %v6786_v17 = vmul.f32 %v6274_v34, %v17099_v58  ;;  %v4666_v6 = vadd.f32 %v16833_v36, %v11962_v51  ;;  %v8880_v36 = vld [vmem:[#allocation9 + $0xec] ss:$16 sps:$4 sm:$0xff]  }
 0x599   :  { %v10321_v14 = vpop.eup %10320  ;;  %10338 = vtanh.f32 %v17192_v19  ;;  %v17214_v47 = vpop.f32.mrf.mxu1  ;;  %v7368_v25 = vadd.f32 %v7367_v0, %v6783_v12  ;;  %v6277_v40 = vadd.f32 1.0, %v10317_v39  ;;  %v6278_v56 = vadd.f32 1.0, %v10319_v62 }
 0x59a   :  { %v10323_v42 = vpop.eup %10322  ;;  %10340 = vtanh.f32 %v17208_v63  ;;  %v7332_v48 = vadd.f32 %v7331_v26, %v6784_v18  ;;  %v6787_v10 = vmul.f32 %v6275_v23, %v17106_v3  ;;  %v17218_v53 = vmul.f32 0.5, %v4666_v6  ;;  %7945 = vmatpush2.bf16.msra.mxu0 %v8875_v35 }
 0x59b   :  { %v4668_v58 = vadd.f32 %v16841_v20, %v11988_v46  ;;  %v17222_v38 = vpop.f32.mrf.mxu1  ;;  %v10325_v27 = vpop.eup %10324  ;;  %v7369_v34 = vadd.f32 %v7368_v25, %v6785_v45  ;;  %v6788_v39 = vmul.f32 %v6276_v28, %v17112_v15  ;;  %v6279_v12 = vadd.f32 1.0, %v10321_v14  ;;  %7955 = vmatprep.subr.bf16.mxu0 %v8880_v36 }
 0x59c   :  { %v4670_v13 = vadd.f32 %v16852_v32, %v11962_v51  ;;  %v7333_v11 = vadd.f32 %v7332_v48, %v6786_v17  ;;  %v6280_v62 = vadd.f32 1.0, %v10323_v42  ;;  %10342 = vtanh.f32 %v17218_v53 }
 0x59d   :  { %v17228_v3 = vmul.f32 0.5, %v4668_v58  ;;  %v17230_v0 = vpop.f32.mrf.mxu1  ;;  %v10327_v20 = vpop.eup %10326  ;;  %v6789_v18 = vmul.f32 %v6277_v40, %v17119_v2  ;;  %v6790_v23 = vmul.f32 %v6278_v56, %v17124_v55  ;;  %v4672_v15 = vadd.f32 %v16865_v9, %v11988_v46 }
 0x59e   :  { %v17234_v49 = vmul.f32 0.5, %v4670_v13  ;;  %v7370_v32 = vadd.f32 %v7369_v34, %v6787_v10  ;;  %v6281_v45 = vadd.f32 1.0, %v10325_v27  ;;  %v4676_v28 = vadd.f32 %v16874_v60, %v11962_v51 }
 0x59f   :  { %10344 = vtanh.f32 %v17228_v3  ;;  %v17241_v14 = vpop.f32.mrf.mxu1  ;;  %v10329_v26 = vpop.eup %10328  ;;  %v7334_v2 = vadd.f32 %v7333_v11, %v6788_v39  ;;  %v6791_v55 = vmul.f32 %v6279_v12, %v17131_v57  ;;  %v17245_v17 = vmul.f32 0.5, %v4672_v15 }
 0x5a0   :  { %10346 = vtanh.f32 %v17234_v49  ;;  %v7265_v9 = vrot.slane %v17062_v31, 4  ;;  %v6792_v6 = vmul.f32 %v6280_v62, %v17136_v30  ;;  %v6282_v42 = vadd.f32 1.0, %v10327_v20 }
 0x5a1   :  { %v17249_v25 = vmul.f32 0.5, %v4676_v28  ;;  %v17251_v40 = vpop.f32.mrf.mxu1  ;;  %v10331_v60 = vpop.eup %10330  ;;  %v7371_v56 = vadd.f32 %v7370_v32, %v6789_v18  ;;  %v7335_v35 = vadd.f32 %v7334_v2, %v6790_v23  ;;  %10348 = vtanh.f32 %v17245_v17 }
 0x5a2   :  { %v4678_v57 = vadd.f32 %v16888_v44, %v11988_v46  ;;  %v10333_v48 = vpop.eup %10332  ;;  %v6793_v10 = vmul.f32 %v6281_v45, %v17145_v4  ;;  %v6283_v58 = vadd.f32 1.0, %v10329_v26  ;;  %v4680_v30 = vadd.f32 %v16901_v21, %v11962_v51 }
 0x5a3   :  { %10350 = vtanh.f32 %v17249_v25  ;;  %v17260_v36 = vpop.f32.mrf.mxu1  ;;  %v17264_v34 = vadd.f32 %v17051_v37, %v17070_v61  ;;  %v7372_v39 = vadd.f32 %v7371_v56, %v6791_v55  ;;  %v4682_v44 = vadd.f32 %v16913_v52, %v11988_v46 }
 0x5a4   :  { %v10335_v27 = vpop.eup %10334  ;;  %v17266_v12 = vmul.f32 0.5, %v4678_v57  ;;  %v7336_v13 = vadd.f32 %v7335_v35, %v6792_v6  ;;  %v6794_v11 = vmul.f32 %v6282_v42, %v17155_v59  ;;  %v17271_v62 = vmul.f32 0.5, %v4680_v30 }
 0x5a5   :  { %v10337_v4 = vpop.eup %10336  ;;  %v4686_v21 = vadd.f32 %v16926_v8, %v11962_v51  ;;  %v6288_v18 = vadd.f32 1.0, %v10335_v27  ;;  %v17276_v37 = vmul.f32 0.5, %v4682_v44  ;;  %v4688_v61 = vadd.f32 %v16938_v43, %v11988_v46  ;;  %v17280_v23 = vpop.f32.mrf.mxu1 }
 0x5a6   :  { %v10339_v20 = vpop.eup %10338  ;;  %10352 = vtanh.f32 %v17266_v12  ;;  %v7373_v15 = vadd.f32 %v7372_v39, %v6793_v10  ;;  %v6795_v59 = vmul.f32 %v6283_v58, %v17165_v29  ;;  %v6286_v8 = vadd.f32 1.0, %v10337_v4 }
 0x5a7   :  { %v10341_v52 = vpop.eup %10340  ;;  %10354 = vtanh.f32 %v17271_v62  ;;  %v17284_v32 = vmul.f32 0.5, %v4686_v21  ;;  %v17287_v28 = vmul.f32 0.5, %v4688_v61  ;;  %v17289_v26 = vadd.f32 1.0, %v10331_v60  ;;  %v17300_v56 = vpop.f32.mrf.mxu1 }
 0x5a8   :  { %v6289_v45 = vadd.f32 1.0, %v10341_v52  ;;  %10356 = vtanh.f32 %v17276_v37  ;;  %v6287_v2 = vadd.f32 1.0, %v10339_v20  ;;  %v4690_v43 = vadd.f32 %v16949_v5, %v11962_v51 }
 0x5a9   :  { %10358 = vtanh.f32 %v17284_v32  ;;  %v10343_v55 = vpop.eup %10342  ;;  %v17294_v29 = vadd.f32 %v7336_v13, %v6794_v11  ;;  %v6800_v6 = vmul.f32 %v6288_v18, %v17194_v33  ;;  %v4692_v42 = vadd.f32 %v16960_v16, %v11988_v46 }
 0x5aa   :  { %10360 = vtanh.f32 %v17287_v28  ;;  %v6801_v60 = vmul.f32 %v6289_v45, %v17208_v63  ;;  %v6290_v35 = vadd.f32 1.0, %v10343_v55  ;;  %v17303_v57 = vmul.f32 0.5, %v4690_v43  ;;  %v19052_v45 = vld [vmem:[#allocation90_spill] sm:$0xff]  ;;  %v19054_v55 = vld [vmem:[#allocation37_spill] sm:$0xff] }
 0x5ab   :  { %v4696_v5 = vadd.f32 %v16976_v41, %v11962_v51  ;;  %v17307_v58 = vadd.f32 1.0, %v10333_v48  ;;  %v6798_v33 = vmul.f32 %v6286_v8, %v17189_v50  ;;  %v17310_v30 = vmul.f32 0.5, %v4692_v42  ;;  %v17320_v50 = vpop.f32.mrf.mxu1 }
 0x5ac   :  { %v10345_v10 = vpop.eup %10344  ;;  %v4698_v16 = vadd.f32 %v16987_v22, %v11988_v46  ;;  %v6799_v39 = vmul.f32 %v6287_v2, %v17192_v19  ;;  %v6802_v63 = vmul.f32 %v6290_v35, %v17218_v53  ;;  %10362 = vtanh.f32 %v17303_v57 }
 0x5ad   :  { %v10347_v27 = vpop.eup %10346  ;;  %v6291_v44 = vadd.f32 1.0, %v10345_v10  ;;  %v7382_v4 = vadd.f32 %v6800_v6, %v6798_v33  ;;  %10364 = vtanh.f32 %v17310_v30  ;;  %v17318_v48 = vmul.f32 0.5, %v4696_v5  ;;  %v19055_v5 = vld [vmem:[#allocation112_spill] sm:$0xff]  ;;  %v19056_v33 = vld [vmem:[#allocation19_spill] sm:$0xff] }
 0x5ae   :  { %v6292_v41 = vadd.f32 1.0, %v10347_v27  ;;  %v10349_v13 = vpop.eup %10348  ;;  %v17322_v11 = vadd.f32 %v7373_v15, %v6795_v59  ;;  %v7419_v22 = vadd.f32 %v6801_v60, %v6799_v39  ;;  %v17325_v19 = vmul.f32 0.5, %v4698_v16 }
 0x5af   :  { %v6803_v21 = vmul.f32 %v6291_v44, %v17228_v3  ;;  %v7383_v20 = vadd.f32 %v7382_v4, %v6802_v63  ;;  %v6293_v61 = vadd.f32 1.0, %v10349_v13  ;;  %10366 = vtanh.f32 %v17318_v48  ;;  %v19053_v3 = vld [vmem:[#allocation74_spill] sm:$0xff] }
 0x5b0   :  { %v10351_v53 = vpop.eup %10350  ;;  %v6804_v18 = vmul.f32 %v6292_v41, %v17234_v49  ;;  %10368 = vtanh.f32 %v17325_v19  ;;  %v4700_v15 = vadd.f32 %v19052_v45, %v11962_v51  ;;  %v4702_v43 = vadd.f32 %v19053_v3, %v11988_v46  ;;  %v17337_v49 = vpop.f32.mrf.mxu1  ;;  %v19057_v45 = vld [vmem:[#allocation105_spill] sm:$0xff] }
 0x5b1   :  { %v7420_v52 = vadd.f32 %v7419_v22, %v6803_v21  ;;  %v6294_v8 = vadd.f32 1.0, %v10351_v53  ;;  %v6805_v2 = vmul.f32 %v6293_v61, %v17245_v17  ;;  %v4706_v6 = vadd.f32 %v19054_v55, %v11962_v51 }
 0x5b2   :  { %v7384_v59 = vadd.f32 %v7383_v20, %v6804_v18  ;;  %v17340_v35 = vmul.f32 0.5, %v4700_v15  ;;  %v4708_v10 = vadd.f32 %v19055_v5, %v11988_v46  ;;  %v4710_v16 = vadd.f32 %v19056_v33, %v11962_v51  ;;  %v17357_v18 = vpop.f32.mrf.mxu1 }
 0x5b3   :  { %v10353_v42 = vpop.eup %10352  ;;  %v6806_v60 = vmul.f32 %v6294_v8, %v17249_v25  ;;  %v7421_v27 = vadd.f32 %v7420_v52, %v6805_v2  ;;  %v17346_v63 = vmul.f32 0.5, %v4702_v43  ;;  %v17348_v44 = vmul.f32 0.5, %v4706_v6 }
 0x5b4   :  { %v10355_v17 = vpop.eup %10354  ;;  %v6295_v39 = vadd.f32 1.0, %v10353_v42  ;;  %10370 = vtanh.f32 %v17340_v35  ;;  %v17351_v25 = vmul.f32 0.5, %v4708_v10  ;;  %v17355_v20 = vmul.f32 0.5, %v4710_v16  ;;  %v17377_v33 = vpop.f32.mrf.mxu1 }
 0x5b5   :  { %v10357_v4 = vpop.eup %10356  ;;  %v7385_v41 = vadd.f32 %v7384_v59, %v6806_v60  ;;  %v6296_v13 = vadd.f32 1.0, %v10355_v17  ;;  %10372 = vtanh.f32 %v17346_v63  ;;  %v4712_v15 = vadd.f32 %v19057_v45, %v11988_v46  ;;  %v19058_v60 = vld [vmem:[#allocation115_spill] sm:$0xff] }
 0x5b6   :  { %v10359_v22 = vpop.eup %10358  ;;  %v6807_v21 = vmul.f32 %v6295_v39, %v17266_v12  ;;  %v6297_v53 = vadd.f32 1.0, %v10357_v4  ;;  %10374 = vtanh.f32 %v17348_v44  ;;  %v17367_v3 = vmul.f32 %v17289_v26, %v17173_v24 }
 0x5b7   :  { %v10361_v61 = vpop.eup %10360  ;;  %v6808_v52 = vmul.f32 %v6296_v13, %v17271_v62  ;;  %v6298_v8 = vadd.f32 1.0, %v10359_v22  ;;  %10376 = vtanh.f32 %v17351_v25  ;;  %v17371_v62 = vmul.f32 0.5, %v4712_v15 }
 0x5b8   :  { %v7422_v59 = vadd.f32 %v7421_v27, %v6807_v21  ;;  %v6809_v2 = vmul.f32 %v6297_v53, %v17276_v37  ;;  %v6299_v12 = vadd.f32 1.0, %v10361_v61  ;;  %10378 = vtanh.f32 %v17355_v20  ;;  %v19059_v37 = vld [vmem:[#allocation121_spill] sm:$0xff]  ;;  %v19061_v53 = vld [vmem:[#allocation127_spill] sm:$0xff] }
 0x5b9   :  { %v6810_v43 = vmul.f32 %v6298_v8, %v17284_v32  ;;  %v10363_v55 = vpop.eup %10362  ;;  %v7386_v6 = vadd.f32 %v7385_v41, %v6808_v52  ;;  %v4716_v5 = vadd.f32 %v19058_v60, %v11962_v51  ;;  %v4718_v10 = vadd.f32 %v19059_v37, %v11988_v46  ;;  %v19060_v32 = vld [vmem:[#allocation40_spill] sm:$0xff]  ;;  %v19062_v61 = vld [vmem:[#allocation149_spill] sm:$0xff] }
 0x5ba   :  { %v7423_v42 = vadd.f32 %v7422_v59, %v6809_v2  ;;  %v10365_v16 = vpop.eup %10364  ;;  %v6811_v24 = vmul.f32 %v6299_v12, %v17287_v28  ;;  %v6300_v26 = vadd.f32 1.0, %v10363_v55  ;;  %10380 = vtanh.f32 %v17371_v62  ;;  %v19063_v59 = vld [vmem:[#allocation41_spill] sm:$0xff]  ;;  %v17398_v12 = vpop.f32.mrf.mxu1 }
 0x5bb   :  { %v4720_v17 = vadd.f32 %v19060_v32, %v11962_v51  ;;  %v7387_v27 = vadd.f32 %v7386_v6, %v6810_v43  ;;  %v6301_v39 = vadd.f32 1.0, %v10365_v16  ;;  %v17383_v4 = vmul.f32 0.5, %v4716_v5  ;;  %v19066_v32 = vld [vmem:[#allocation124_spill] sm:$0xff] }
 0x5bc   :  { %v17385_v41 = vmul.f32 0.5, %v4718_v10  ;;  %v10367_v13 = vpop.eup %10366  ;;  %v6812_v22 = vmul.f32 %v6300_v26, %v17303_v57  ;;  %v4722_v28 = vadd.f32 %v19061_v53, %v11988_v46  ;;  %v4726_v52 = vadd.f32 %v19062_v61, %v11962_v51  ;;  %v19064_v10 = vld [vmem:[#allocation145_spill] sm:$0xff]  ;;  %v19065_v26 = vld [vmem:[#allocation168_spill] sm:$0xff] }
 0x5bd   :  { %v17388_v21 = vmul.f32 0.5, %v4720_v17  ;;  %v10369_v8 = vpop.eup %10368  ;;  %v6813_v45 = vmul.f32 %v6301_v39, %v17310_v30  ;;  %v6302_v15 = vadd.f32 1.0, %v10367_v13  ;;  %10382 = vtanh.f32 %v17383_v4 }
 0x5be   :  { %v4728_v2 = vadd.f32 %v19063_v59, %v11988_v46  ;;  %v7424_v57 = vadd.f32 %v7423_v42, %v6811_v24  ;;  %v6303_v43 = vadd.f32 1.0, %v10369_v8  ;;  %10384 = vtanh.f32 %v17385_v41  ;;  %v19067_v8 = vld [vmem:[#allocation69_spill] sm:$0xff] }
 0x5bf   :  { %v17401_v55 = vmul.f32 0.5, %v4722_v28  ;;  %v7388_v6 = vadd.f32 %v7387_v27, %v6812_v22  ;;  %v6814_v60 = vmul.f32 %v6302_v15, %v17318_v48  ;;  %10386 = vtanh.f32 %v17388_v21  ;;  %v17418_v27 = vpop.f32.mrf.mxu1 }
 0x5c0   :  { %v17405_v30 = vmul.f32 0.5, %v4726_v52  ;;  %v7425_v5 = vadd.f32 %v7424_v57, %v6813_v45  ;;  %v17408_v37 = vmul.f32 0.5, %v4728_v2  ;;  %v4730_v42 = vadd.f32 %v19064_v10, %v11962_v51  ;;  %v19068_v57 = vld [vmem:[#allocation118_spill] sm:$0xff] }
 0x5c1   :  { %10388 = vtanh.f32 %v17401_v55  ;;  %v10371_v16 = vpop.eup %10370  ;;  %v6815_v24 = vmul.f32 %v6303_v43, %v17325_v19  ;;  %v4732_v48 = vadd.f32 %v19065_v26, %v11988_v46  ;;  %v4736_v17 = vadd.f32 %v19066_v32, %v11962_v51 }
 0x5c2   :  { %10390 = vtanh.f32 %v17405_v30  ;;  %v10373_v39 = vpop.eup %10372  ;;  %v7389_v13 = vadd.f32 %v7388_v6, %v6814_v60  ;;  %v6304_v22 = vadd.f32 1.0, %v10371_v16  ;;  %v17421_v53 = vmul.f32 0.5, %v4730_v42  ;;  %v17437_v16 = vpop.f32.mrf.mxu1 }
 0x5c3   :  { %10392 = vtanh.f32 %v17408_v37  ;;  %v10375_v28 = vpop.eup %10374  ;;  %v6305_v61 = vadd.f32 1.0, %v10373_v39  ;;  %v17423_v19 = vmul.f32 0.5, %v4732_v48  ;;  %v17425_v52 = vmul.f32 0.5, %v4736_v17 }
 0x5c4   :  { %v4738_v45 = vadd.f32 %v19067_v8, %v11988_v46  ;;  %v10377_v15 = vpop.eup %10376  ;;  %v6816_v59 = vmul.f32 %v6304_v22, %v17340_v35  ;;  %v6306_v2 = vadd.f32 1.0, %v10375_v28  ;;  %10394 = vtanh.f32 %v17421_v53  ;;  %v19069_v8 = vld [vmem:[#allocation117_spill] sm:$0xff] }
 0x5c5   :  { %v4740_v43 = vadd.f32 %v19068_v57, %v11962_v51  ;;  %v10379_v6 = vpop.eup %10378  ;;  %v6817_v60 = vmul.f32 %v6305_v61, %v17346_v63  ;;  %v6307_v10 = vadd.f32 1.0, %v10377_v15  ;;  %10396 = vtanh.f32 %v17423_v19 }
 0x5c6   :  { %v17435_v42 = vmul.f32 0.5, %v4738_v45  ;;  %v7426_v26 = vadd.f32 %v7425_v5, %v6815_v24  ;;  %v6818_v48 = vmul.f32 %v6306_v2, %v17348_v44  ;;  %v6308_v35 = vadd.f32 1.0, %v10379_v6  ;;  %v19070_v44 = vld [vmem:[#allocation55_spill] sm:$0xff] }
 0x5c7   :  { %10398 = vtanh.f32 %v17425_v52  ;;  %v10381_v32 = vpop.eup %10380  ;;  %v7390_v17 = vadd.f32 %v7389_v13, %v6816_v59  ;;  %v6819_v39 = vmul.f32 %v6307_v10, %v17351_v25  ;;  %v17443_v63 = vmul.f32 0.5, %v4740_v43  ;;  %v17453_v13 = vpop.f32.mrf.mxu1 }
 0x5c8   :  { %10400 = vtanh.f32 %v17435_v42  ;;  %v7427_v22 = vadd.f32 %v7426_v26, %v6817_v60  ;;  %v6820_v28 = vmul.f32 %v6308_v35, %v17355_v20  ;;  %v6309_v61 = vadd.f32 1.0, %v10381_v32 }
 0x5c9   :  { %v4742_v5 = vadd.f32 %v19069_v8, %v11988_v46  ;;  %v7391_v24 = vadd.f32 %v7390_v17, %v6818_v48  ;;  %10402 = vtanh.f32 %v17443_v63  ;;  %v4746_v45 = vadd.f32 %v19070_v44, %v11962_v51 }
 0x5ca   :  { %v4748_v25 = vadd.f32 %v17196_v7, %v11988_v46  ;;  %v10383_v15 = vpop.eup %10382  ;;  %v7428_v59 = vadd.f32 %v7427_v22, %v6819_v39  ;;  %v6821_v2 = vmul.f32 %v6309_v61, %v17371_v62  ;;  %v4750_v57 = vadd.f32 %v17204_v1, %v11962_v51  ;;  %v17473_v22 = vpop.f32.mrf.mxu1 }
 0x5cb   :  { %v17456_v20 = vmul.f32 0.5, %v4742_v5  ;;  %v10385_v43 = vpop.eup %10384  ;;  %v6310_v6 = vadd.f32 1.0, %v10383_v15  ;;  %v17460_v60 = vmul.f32 0.5, %v4746_v45  ;;  %v4752_v7 = vadd.f32 %v17214_v47, %v11988_v46 }
 0x5cc   :  { %v17462_v10 = vmul.f32 0.5, %v4748_v25  ;;  %v10387_v26 = vpop.eup %10386  ;;  %v7392_v48 = vadd.f32 %v7391_v24, %v6820_v28  ;;  %v6311_v35 = vadd.f32 1.0, %v10385_v43  ;;  %v17467_v62 = vmul.f32 0.5, %v4750_v57 }
 0x5cd   :  { %10404 = vtanh.f32 %v17456_v20  ;;  %v6822_v17 = vmul.f32 %v6310_v6, %v17383_v4  ;;  %v6312_v1 = vadd.f32 1.0, %v10387_v26  ;;  %v17471_v39 = vmul.f32 0.5, %v4752_v7 }
 0x5ce   :  { %v10389_v32 = vpop.eup %10388  ;;  %10406 = vtanh.f32 %v17460_v60  ;;  %v6823_v47 = vmul.f32 %v6311_v35, %v17385_v41  ;;  %v4756_v28 = vadd.f32 %v17222_v38, %v11962_v51  ;;  %v7429_v24 = vadd.f32 %v7428_v59, %v6821_v2  ;;  %v17488_v59 = vpop.f32.mrf.mxu1 }
 0x5cf   :  { %v10391_v61 = vpop.eup %10390  ;;  %v6313_v8 = vadd.f32 1.0, %v10389_v32  ;;  %10408 = vtanh.f32 %v17462_v10  ;;  %v6824_v4 = vmul.f32 %v6312_v1, %v17388_v21  ;;  %v7393_v45 = vadd.f32 %v7392_v48, %v6822_v17 }
 0x5d0   :  { %v10393_v5 = vpop.eup %10392  ;;  %v6314_v44 = vadd.f32 1.0, %v10391_v61  ;;  %10410 = vtanh.f32 %v17467_v62  ;;  %v7430_v57 = vadd.f32 %v7429_v24, %v6823_v47  ;;  %v17484_v6 = vmul.f32 0.5, %v4756_v28  ;;  %v17503_v28 = vpop.f32.mrf.mxu1 }
 0x5d1   :  { %v6825_v25 = vmul.f32 %v6313_v8, %v17401_v55  ;;  %v6315_v15 = vadd.f32 1.0, %v10393_v5  ;;  %10412 = vtanh.f32 %v17471_v39  ;;  %v10395_v41 = vpop.eup %10394  ;;  %v4758_v38 = vadd.f32 %v17230_v0, %v11988_v46 }
 0x5d2   :  { %v6826_v43 = vmul.f32 %v6314_v44, %v17405_v30  ;;  %v10397_v21 = vpop.eup %10396  ;;  %v7394_v2 = vadd.f32 %v7393_v45, %v6824_v4  ;;  %v6316_v26 = vadd.f32 1.0, %v10395_v41  ;;  %v4760_v55 = vadd.f32 %v17241_v14, %v11962_v51 }
 0x5d3   :  { %v6827_v7 = vmul.f32 %v6315_v15, %v17408_v37  ;;  %v7431_v35 = vadd.f32 %v7430_v57, %v6825_v25  ;;  %v6317_v32 = vadd.f32 1.0, %v10397_v21  ;;  %10414 = vtanh.f32 %v17484_v6 }
 0x5d4   :  { %v10399_v48 = vpop.eup %10398  ;;  %v17494_v30 = vmul.f32 0.5, %v4758_v38  ;;  %v7395_v1 = vadd.f32 %v7394_v2, %v6826_v43  ;;  %v6828_v0 = vmul.f32 %v6316_v26, %v17421_v53  ;;  %v17497_v47 = vmul.f32 0.5, %v4760_v55 }
 0x5d5   :  { %v10401_v17 = vpop.eup %10400  ;;  %v6318_v61 = vadd.f32 1.0, %v10399_v48  ;;  %v6829_v37 = vmul.f32 %v6317_v32, %v17423_v19  ;;  %v4762_v14 = vadd.f32 %v17251_v40, %v11988_v46  ;;  %v7432_v24 = vadd.f32 %v7431_v35, %v6827_v7 }
 0x5d6   :  { %v6319_v8 = vadd.f32 1.0, %v10401_v17  ;;  %10416 = vtanh.f32 %v17494_v30  ;;  %v10403_v5 = vpop.eup %10402  ;;  %v4766_v53 = vadd.f32 %v17260_v36, %v11962_v51  ;;  %v7396_v44 = vadd.f32 %v7395_v1, %v6828_v0 }
 0x5d7   :  { %v6830_v4 = vmul.f32 %v6318_v61, %v17425_v52  ;;  %10418 = vtanh.f32 %v17497_v47  ;;  %v6320_v45 = vadd.f32 1.0, %v10403_v5  ;;  %v17510_v25 = vmul.f32 0.5, %v4762_v14 }
 0x5d8   :  { %v6831_v19 = vmul.f32 %v6319_v8, %v17435_v42  ;;  %v7433_v15 = vadd.f32 %v7432_v24, %v6829_v37  ;;  %v17512_v41 = vmul.f32 0.5, %v4766_v53  ;;  %v4768_v40 = vadd.f32 %v17280_v23, %v11988_v46  ;;  %v17522_v42 = vpop.f32.mrf.mxu1 }
 0x5d9   :  { %v4770_v52 = vadd.f32 %v17300_v56, %v11962_v51  ;;  %v7397_v43 = vadd.f32 %v7396_v44, %v6830_v4  ;;  %v6832_v38 = vmul.f32 %v6320_v45, %v17443_v63  ;;  %10420 = vtanh.f32 %v17510_v25 }
 0x5da   :  { %v10405_v57 = vpop.eup %10404  ;;  %v4772_v36 = vadd.f32 %v17320_v50, %v11988_v46  ;;  %10422 = vtanh.f32 %v17512_v41  ;;  %v17525_v7 = vmul.f32 0.5, %v4768_v40  ;;  %v7434_v26 = vadd.f32 %v7433_v15, %v6831_v19  ;;  %v4801_v8 = vpop.f32.mrf.mxu1 }
 0x5db   :  { %v10407_v21 = vpop.eup %10406  ;;  %v6321_v2 = vadd.f32 1.0, %v10405_v57  ;;  %v17527_v23 = vmul.f32 0.5, %v4770_v52  ;;  %v4776_v63 = vadd.f32 %v17337_v49, %v11962_v51  ;;  %v4778_v17 = vadd.f32 %v17357_v18, %v11988_v46 }
 0x5dc   :  { %v10409_v56 = vpop.eup %10408  ;;  %v6322_v55 = vadd.f32 1.0, %v10407_v21  ;;  %v17529_v48 = vmul.f32 0.5, %v4772_v36  ;;  %10424 = vtanh.f32 %v17525_v7  ;;  %v17543_v49 = vmul.f32 %v17307_v58, %v17180_v54 }
 0x5dd   :  { %v10411_v35 = vpop.eup %10410  ;;  %v6833_v50 = vmul.f32 %v6321_v2, %v17456_v20  ;;  %v6323_v32 = vadd.f32 1.0, %v10409_v56  ;;  %10426 = vtanh.f32 %v17527_v23  ;;  %v17539_v37 = vmul.f32 0.5, %v4776_v63 }
 0x5de   :  { %v10413_v1 = vpop.eup %10412  ;;  %v6834_v0 = vmul.f32 %v6322_v55, %v17460_v60  ;;  %v6324_v61 = vadd.f32 1.0, %v10411_v35  ;;  %v7398_v20 = vadd.f32 %v7397_v43, %v6832_v38  ;;  %10428 = vtanh.f32 %v17529_v48 }
 0x5df   :  { %v6325_v14 = vadd.f32 1.0, %v10413_v1  ;;  %v17548_v18 = vadd.f32 %v17294_v29, %v17367_v3  ;;  %v7435_v5 = vadd.f32 %v7434_v26, %v6833_v50  ;;  %v6835_v60 = vmul.f32 %v6323_v32, %v17462_v10  ;;  %v4805_v3 = vpop.f32.mrf.mxu1 }
 0x5e0   :  { %v17551_v24 = vmul.f32 0.5, %v4778_v17  ;;  %v10415_v4 = vpop.eup %10414  ;;  %v7399_v53 = vadd.f32 %v7398_v20, %v6834_v0  ;;  %10430 = vtanh.f32 %v17539_v37  ;;  %v4780_v54 = vadd.f32 %v17377_v33, %v11962_v51 }
 0x5e1   :  { %v4782_v58 = vadd.f32 %v17398_v12, %v11988_v46  ;;  %v6836_v44 = vmul.f32 %v6324_v61, %v17467_v62  ;;  %v6326_v19 = vadd.f32 1.0, %v10415_v4  ;;  %v4786_v29 = vadd.f32 %v17418_v27, %v11962_v51 }
 0x5e2   :  { %10432 = vtanh.f32 %v17551_v24  ;;  %v6837_v45 = vmul.f32 %v6325_v14, %v17471_v39  ;;  %v17563_v15 = vmul.f32 0.5, %v4780_v54  ;;  %v4788_v33 = vadd.f32 %v17437_v16, %v11988_v46 }
 0x5e3   :  { %v10417_v10 = vpop.eup %10416  ;;  %v17565_v40 = vmul.f32 0.5, %v4782_v58  ;;  %v7436_v52 = vadd.f32 %v7435_v5, %v6835_v60  ;;  %v6838_v62 = vmul.f32 %v6326_v19, %v17484_v6  ;;  %v17570_v57 = vmul.f32 0.5, %v4786_v29  ;;  %v4807_v6 = vpop.f32.mrf.mxu1 }
 0x5e4   :  { %v10419_v12 = vpop.eup %10418  ;;  %v4790_v27 = vadd.f32 %v17453_v13, %v11962_v51  ;;  %v6327_v43 = vadd.f32 1.0, %v10417_v10  ;;  %10434 = vtanh.f32 %v17563_v15  ;;  %v17575_v39 = vmul.f32 0.5, %v4788_v33 }
 0x5e5   :  { %v4792_v38 = vadd.f32 %v17473_v22, %v11988_v46  ;;  %v7400_v36 = vadd.f32 %v7399_v53, %v6836_v44  ;;  %v6328_v21 = vadd.f32 1.0, %v10419_v12  ;;  %10436 = vtanh.f32 %v17565_v40  ;;  %v4809_v20 = vpop.f32.mrf.mxu1 }
 0x5e6   :  { %v17580_v16 = vmul.f32 0.5, %v4790_v27  ;;  %v10421_v2 = vpop.eup %10420  ;;  %v7437_v56 = vadd.f32 %v7436_v52, %v6837_v45  ;;  %10438 = vtanh.f32 %v17570_v57  ;;  %v4796_v26 = vadd.f32 %v17488_v59, %v11962_v51 }
 0x5e7   :  { %v17583_v13 = vmul.f32 0.5, %v4792_v38  ;;  %v10423_v55 = vpop.eup %10422  ;;  %v7401_v63 = vadd.f32 %v7400_v36, %v6838_v62  ;;  %v6329_v35 = vadd.f32 1.0, %v10421_v2  ;;  %10440 = vtanh.f32 %v17575_v39  ;;  %v4811_v29 = vpop.f32.mrf.mxu1 }
 0x5e8   :  { %v4798_v22 = vadd.f32 %v17503_v28, %v11988_v46  ;;  %v6839_v50 = vmul.f32 %v6327_v43, %v17494_v30  ;;  %v6330_v32 = vadd.f32 1.0, %v10423_v55  ;;  %10442 = vtanh.f32 %v17580_v16 }
 0x5e9   :  { %v17592_v17 = vmul.f32 0.5, %v4796_v26  ;;  %v10425_v1 = vpop.eup %10424  ;;  %v6840_v0 = vmul.f32 %v6328_v21, %v17497_v47  ;;  %10444 = vtanh.f32 %v17583_v13  ;;  %v4800_v61 = vadd.f32 %v17522_v42, %v11962_v51 }
 0x5ea   :  { %v17596_v59 = vmul.f32 0.5, %v4798_v22  ;;  %v10427_v14 = vpop.eup %10426  ;;  %v6841_v28 = vmul.f32 %v6329_v35, %v17510_v25  ;;  %v6842_v30 = vmul.f32 %v6330_v32, %v17512_v41  ;;  %v4802_v5 = vadd.f32 %v4801_v8, %v11988_v46  ;;  %v19072_v22 = vld [vmem:[#allocation148_spill] sm:$0xff] }
 0x5eb   :  { %10446 = vtanh.f32 %v17592_v17  ;;  %v10429_v60 = vpop.eup %10428  ;;  %v6331_v4 = vadd.f32 1.0, %v10425_v1  ;;  %v6332_v47 = vadd.f32 1.0, %v10427_v14  ;;  %v17605_v53 = vmul.f32 0.5, %v4800_v61 }
 0x5ec   :  { %10448 = vtanh.f32 %v17596_v59  ;;  %v7302_v54 = vrot.slane %v17264_v34, 4  ;;  %v17610_v42 = vadd.f32 %v17322_v11, %v17543_v49  ;;  %v7438_v25 = vadd.f32 %v7437_v56, %v6839_v50 }
 0x5ed   :  { %v17612_v58 = vmul.f32 0.5, %v4802_v5  ;;  %v10431_v41 = vpop.eup %10430  ;;  %v7402_v44 = vadd.f32 %v7401_v63, %v6840_v0  ;;  %v6333_v19 = vadd.f32 1.0, %v10429_v60  ;;  %10450 = vtanh.f32 %v17605_v53 }
 0x5ee   :  { %v4806_v8 = vadd.f32 %v4805_v3, %v11962_v51  ;;  %v7339_v45 = vrot.slane %v17548_v18, 4  ;;  %v7439_v33 = vadd.f32 %v7438_v25, %v6841_v28  ;;  %v4808_v11 = vadd.f32 %v4807_v6, %v11988_v46  ;;  %v19071_v6 = vld [vmem:[#allocation50_spill] sm:$0xff] }
 0x5ef   :  { %v10433_v10 = vpop.eup %10432  ;;  %10452 = vtanh.f32 %v17612_v58  ;;  %v7403_v49 = vadd.f32 %v7402_v44, %v6842_v30  ;;  %v6843_v12 = vmul.f32 %v6331_v4, %v17525_v7  ;;  %v6844_v52 = vmul.f32 %v6332_v47, %v17527_v23 }
 0x5f0   :  { %v17621_v62 = vmul.f32 0.5, %v4806_v8  ;;  %v6334_v27 = vadd.f32 1.0, %v10431_v41  ;;  %v17623_v43 = vmul.f32 0.5, %v4808_v11  ;;  %v4810_v3 = vadd.f32 %v4809_v20, %v11962_v51 }
 0x5f1   :  { %v4812_v38 = vadd.f32 %v4811_v29, %v11988_v46  ;;  %v10435_v36 = vpop.eup %10434  ;;  %v6845_v21 = vmul.f32 %v6333_v19, %v17529_v48  ;;  %v6335_v2 = vadd.f32 1.0, %v10433_v10  ;;  %v6973_v56 = vrot.slane %v19071_v6, 1  ;;  %v19074_v19 = vld [vmem:[#allocation160_spill] sm:$0xff] }
 0x5f2   :  { %10454 = vtanh.f32 %v17621_v62  ;;  %v10437_v7 = vpop.eup %10436  ;;  %v6336_v26 = vadd.f32 1.0, %v10435_v36  ;;  %v17631_v23 = vmul.f32 0.5, %v4810_v3  ;;  %v7440_v51 = vadd.f32 %v7439_v33, %v6843_v12 }
 0x5f3   :  { %10456 = vtanh.f32 %v17623_v43  ;;  %v17633_v55 = vmul.f32 0.5, %v4812_v38  ;;  %v10439_v63 = vpop.eup %10438  ;;  %v6337_v35 = vadd.f32 1.0, %v10437_v7  ;;  %v6974_v46 = vadd.f32 %v6973_v56, %v19071_v6  ;;  %v19075_v38 = vld [vmem:[#allocation21_spill] sm:$0xff]  ;;  %v19076_v7 = vld [vmem:[#allocation151_spill] sm:$0xff] }
 0x5f4   :  { %v19073_v48 = vrot.slane %v19072_v22, 4  ;;  %v10441_v32 = vpop.eup %10440  ;;  %v6846_v1 = vmul.f32 %v6334_v27, %v17539_v37  ;;  %v6338_v0 = vadd.f32 1.0, %v10439_v63  ;;  %10458 = vtanh.f32 %v17631_v23 }
 0x5f5   :  { %v10443_v61 = vpop.eup %10442  ;;  %v6847_v20 = vmul.f32 %v6335_v2, %v17551_v24  ;;  %v6339_v14 = vadd.f32 1.0, %v10441_v32  ;;  %10460 = vtanh.f32 %v17633_v55  ;;  %v7404_v5 = vadd.f32 %v7403_v49, %v6844_v52 }
 0x5f6   :  { %v7007_v50 = vadd.f32 %v19073_v48, %v19072_v22  ;;  %v10445_v30 = vpop.eup %10444  ;;  %v7441_v60 = vadd.f32 %v7440_v51, %v6845_v21  ;;  %v6848_v4 = vmul.f32 %v6336_v26, %v17563_v15  ;;  %v6340_v47 = vadd.f32 1.0, %v10443_v61 }
 0x5f7   :  { %v6849_v37 = vmul.f32 %v6337_v35, %v17565_v40  ;;  %v6341_v41 = vadd.f32 1.0, %v10445_v30  ;;  %v7473_v8 = vsel %vm7472_vm0, %v6974_v46, %v19074_v19  ;;  %v7405_v24 = vadd.f32 %v7404_v5, %v6846_v1 }
 0x5f8   :  { %v7008_v28 = vrot.slane %v7007_v50, 2  ;;  %v10447_v25 = vpop.eup %10446  ;;  %v6850_v10 = vmul.f32 %v6338_v0, %v17570_v57  ;;  %v7442_v11 = vadd.f32 %v7441_v60, %v6847_v20  ;;  %v6851_v49 = vmul.f32 %v6339_v14, %v17575_v39  ;;  %v19078_v20 = vld [vmem:[#allocation43_spill] sm:$0xff]  ;;  %v19079_v14 = vld [vmem:[#allocation24_spill] sm:$0xff] }
 0x5f9   :  { %v10449_v29 = vpop.eup %10448  ;;  %v6342_v33 = vadd.f32 1.0, %v10447_v25  ;;  %v7376_v27 = vrot.slane %v17610_v42, 4  ;;  %v7406_v40 = vadd.f32 %v7405_v24, %v6848_v4  ;;  %v6852_v3 = vmul.f32 %v6340_v47, %v17580_v16 }
 0x5fa   :  { %v7009_v44 = vadd.f32 %v7008_v28, %v7007_v50  ;;  %v6343_v12 = vadd.f32 1.0, %v10449_v29  ;;  %v10451_v52 = vpop.eup %10450  ;;  %v17653_v36 = vsel %vm7474_vm1, %v19075_v38, %v7473_v8  ;;  %v7443_v2 = vadd.f32 %v7442_v11, %v6849_v37  ;;  %v19081_v8 = vld [vmem:[#allocation48_spill] sm:$0xff] }
 0x5fb   :  { %v6853_v57 = vmul.f32 %v6341_v41, %v17583_v13  ;;  %v6344_v6 = vadd.f32 1.0, %v10451_v52  ;;  %v19077_v39 = vrot.slane %v19076_v7, 4  ;;  %v7407_v63 = vadd.f32 %v7406_v40, %v6850_v10  ;;  %v19083_v11 = vld [vmem:[#allocation136_spill] sm:$0xff] }
 0x5fc   :  { %v7010_v15 = vrot.slane %v7009_v44, 1  ;;  %v10453_v21 = vpop.eup %10452  ;;  %v6854_v51 = vmul.f32 %v6342_v33, %v17592_v17  ;;  %v7266_v16 = vadd.f32 %v7265_v9, %v17062_v31  ;;  %v7303_v46 = vadd.f32 %v7302_v54, %v17264_v34 }
 0x5fd   :  { %v7229_v26 = vadd.f32 %v19077_v39, %v19076_v7  ;;  %v6345_v35 = vadd.f32 1.0, %v10453_v21  ;;  %v7444_v22 = vadd.f32 %v7443_v2, %v6851_v49  ;;  %v6855_v13 = vmul.f32 %v6343_v12, %v17596_v59 }
 0x5fe   :  { %v7011_v56 = vadd.f32 %v7010_v15, %v7009_v44  ;;  %v7340_v50 = vadd.f32 %v7339_v45, %v17548_v18  ;;  %v7377_v32 = vadd.f32 %v7376_v27, %v17610_v42  ;;  %v7408_v17 = vadd.f32 %v7407_v63, %v6852_v3 }
 0x5ff   :  { %v10455_v48 = vpop.eup %10454  ;;  %v6856_v1 = vmul.f32 %v6344_v6, %v17605_v53  ;;  %v7445_v61 = vadd.f32 %v7444_v22, %v6853_v57  ;;  %v6857_v31 = vmul.f32 %v6345_v35, %v17612_v58  ;;  %v7230_v45 = vrot.slane %v7229_v26, 2  ;;  %v19080_v53 = vld [vmem:[#allocation157_spill] sm:$0xff] }
 0x600   :  { %v10457_v0 = vpop.eup %10456  ;;  %v6346_v9 = vadd.f32 1.0, %v10455_v48  ;;  %v7486_v34 = vsel %vm7472_vm0, %v7011_v56, %v19078_v20  ;;  %v7409_v54 = vadd.f32 %v7408_v17, %v6854_v51  ;;  %v7267_v58 = vrot.slane %v7266_v16, 2 }
 0x601   :  { %v6347_v59 = vadd.f32 1.0, %v10457_v0  ;;  %v7487_v28 = vsel %vm7474_vm1, %v19079_v14, %v7486_v34  ;;  %v10459_v18 = vpop.eup %10458  ;;  %v7446_v42 = vadd.f32 %v7445_v61, %v6855_v13  ;;  %v7304_v37 = vrot.slane %v7303_v46, 2 }
 0x602   :  { %v6858_v30 = vmul.f32 %v6346_v9, %v17621_v62  ;;  %v7488_v5 = vsel %vm7476_vm2, %v19080_v53, %v7487_v28  ;;  %v10461_v60 = vpop.eup %10460  ;;  %v7410_v4 = vadd.f32 %v7409_v54, %v6856_v1  ;;  %v6348_v25 = vadd.f32 1.0, %v10459_v18 }
 0x603   :  { %v6859_v47 = vmul.f32 %v6347_v59, %v17623_v43  ;;  %v7341_v41 = vrot.slane %v7340_v50, 2  ;;  %v7447_v44 = vadd.f32 %v7446_v42, %v6857_v31  ;;  %v6349_v19 = vadd.f32 1.0, %v10461_v60 }
 0x604   :  { %v19082_v29 = vrot.slane %v19081_v8, 2  ;;  %v7378_v10 = vrot.slane %v7377_v32, 2  ;;  %v7411_v33 = vadd.f32 %v7410_v4, %v6858_v30  ;;  %v6860_v62 = vmul.f32 %v6348_v25, %v17631_v23  ;;  %v8878_v4 = vld [vmem:[#allocation9 + $0xe8] ss:$16 sps:$4 sm:$0xff]   ;;  %v8883_v25 = vld [vmem:[#allocation9 + $0xcc] ss:$16 sps:$4 sm:$0xff]  }
 0x605   :  { %v19084_v49 = vrot.slane %v19083_v11, 2  ;;  %v7231_v15 = vadd.f32 %v7230_v45, %v7229_v26  ;;  %v7448_v52 = vadd.f32 %v7447_v44, %v6859_v47  ;;  %v6861_v43 = vmul.f32 %v6349_v19, %v17633_v55  ;;  %v8889_v44 = vld [vmem:[#allocation9 + $0x8c] ss:$16 sps:$4 sm:$0xff]   ;;  %v8887_v19 = vld [vmem:[#allocation9 + $0x88] ss:$16 sps:$4 sm:$0xff]  }
 0x606   :  { %v7120_v24 = vadd.f32 %v19082_v29, %v19081_v8  ;;  %v7268_v27 = vadd.f32 %v7267_v58, %v7266_v16  ;;  %v7412_v40 = vadd.f32 %v7411_v33, %v6860_v62  ;;  %v7305_v3 = vadd.f32 %v7304_v37, %v7303_v46  ;;  %v8881_v37 = vld [vmem:[#allocation9 + $0xc8] ss:$16 sps:$4 sm:$0xff]   ;;  %v8892_v8 = vld [vmem:[#allocation9 + $0x6c] ss:$16 sps:$4 sm:$0xff]  }
 0x607   :  { %v7194_v12 = vadd.f32 %v19084_v49, %v19083_v11  ;;  %v7342_v38 = vadd.f32 %v7341_v41, %v7340_v50  ;;  %v7449_v21 = vadd.f32 %v7448_v52, %v6861_v43  ;;  %v7379_v57 = vadd.f32 %v7378_v10, %v7377_v32  ;;  %v8884_v41 = vld [vmem:[#allocation9 + $0xa8] ss:$16 sps:$4 sm:$0xff]   ;;  %v8898_v33 = vld [vmem:[#allocation9 + $0x2c] ss:$16 sps:$4 sm:$0xff]  }
 0x608   :  { %v7121_v2 = vrot.slane %v7120_v24, 1  ;;  %v7413_v6 = vrot.slane %v7412_v40, 4  ;;  %v7232_v7 = vrot.slane %v7231_v15, 1  ;;  %v7269_v23 = vrot.slane %v7268_v27, 1  ;;  %v8890_v29 = vld [vmem:[#allocation9 + $0x68] ss:$16 sps:$4 sm:$0xff]  }
 0x609   :  { %v7195_v56 = vrot.slane %v7194_v12, 1  ;;  %v7450_v39 = vrot.slane %v7449_v21, 4  ;;  %v7306_v51 = vrot.slane %v7305_v3, 1  ;;  %v7343_v35 = vrot.slane %v7342_v38, 1  ;;  %v8893_v10 = vld [vmem:[#allocation9 + $0x48] ss:$16 sps:$4 sm:$0xff]  }
 0x60a   :  { %v7414_v63 = vadd.f32 %v7413_v6, %v7412_v40  ;;  %v7122_v26 = vadd.f32 %v7121_v2, %v7120_v24  ;;  %v7380_v13 = vrot.slane %v7379_v57, 1  ;;  %v7233_v16 = vadd.f32 %v7232_v7, %v7231_v15  ;;  %v8895_v24 = vld [vmem:[#allocation9 + $0x4c] ss:$16 sps:$4 sm:$0xff]   ;;  %v8896_v62 = vld [vmem:[#allocation9 + $0x28] ss:$16 sps:$4 sm:$0xff]  }
 0x60b   :  { %v7451_v22 = vadd.f32 %v7450_v39, %v7449_v21  ;;  %v7196_v55 = vadd.f32 %v7195_v56, %v7194_v12  ;;  %v7270_v46 = vadd.f32 %v7269_v23, %v7268_v27  ;;  %v7307_v1 = vadd.f32 %v7306_v51, %v7305_v3  ;;  %v8901_v11 = vld [vmem:[#allocation9 + $0xc] ss:$16 sps:$4 sm:$0xff]   ;;  %v8899_v49 = vld [vmem:[#allocation9 + $0x8] ss:$16 sps:$4 sm:$0xff]   ;;  %v19085_v51 = vld [vmem:[#allocation98_spill] sm:$0xff] }
 0x60c   :  { %v7415_v48 = vrot.slane %v7414_v63, 2  ;;  %v7477_v32 = vsel %vm7476_vm2, %v7122_v26, %v17653_v36  ;;  %v7344_v0 = vadd.f32 %v7343_v35, %v7342_v38  ;;  %v7381_v31 = vadd.f32 %v7380_v13, %v7379_v57  ;;  %v8904_v12 = vld [vmem:[#allocation9 + $0x1ec] ss:$16 sps:$4 sm:$0xff]   ;;  %v8902_v15 = vld [vmem:[#allocation9 + $0x1e8] ss:$16 sps:$4 sm:$0xff]  }
 0x60d   :  { %v7452_v17 = vrot.slane %v7451_v22, 2  ;;  %v7479_v34 = vsel %vm7478_vm3, %v7196_v55, %v7477_v32  ;;  %v7489_v14 = vsel %vm7478_vm3, %v7233_v16, %v7488_v5  ;;  %v8886_v5 = vld [vmem:[#allocation9 + $0xac] ss:$16 sps:$4 sm:$0xff]   ;;  %v8905_v43 = vld [vmem:[#allocation9 + $0x1c8] ss:$16 sps:$4 sm:$0xff]   ;;  %v19086_v35 = vsub.s32 0, %v19085_v51 }
 0x60e   :  { %v7416_v50 = vadd.f32 %v7415_v48, %v7414_v63  ;;  %v7481_v59 = vsel %vm7480_vm4, %v7270_v46, %v7479_v34  ;;  %v7490_v45 = vsel %vm7480_vm4, %v7307_v1, %v7489_v14  ;;  %v8907_v52 = vld [vmem:[#allocation9 + $0x1cc] ss:$16 sps:$4 sm:$0xff]   ;;  %v8908_v40 = vld [vmem:[#allocation9 + $0x1a8] ss:$16 sps:$4 sm:$0xff]   ;;  %v7572_v63 = vld [vmem:[%s17713_s6] sm:$0xf] }
 0x60f   :  { %v7453_v61 = vadd.f32 %v7452_v17, %v7451_v22  ;;  %v7483_v18 = vsel %vm7482_vm5, %v7344_v0, %v7481_v59  ;;  %v7491_v30 = vsel %vm7482_vm5, %v7381_v31, %v7490_v45  ;;  %v8910_v27 = vld [vmem:[#allocation9 + $0x1ac] ss:$16 sps:$4 sm:$0xff]   ;;  %v8911_v38 = vld [vmem:[#allocation9 + $0x188] ss:$16 sps:$4 sm:$0xff]   ;;  %v7577_v22 = vrot.slane %v7572_v63, %v19086_v35  ;;  %s10586_s6 = smov [#allocation11]  }
 0x610   :  { %v7417_v9 = vrot.slane %v7416_v50, 1  ;;  %v8913_v3 = vld [vmem:[#allocation9 + $0x18c] ss:$16 sps:$4 sm:$0xff]   ;;  %v8914_v2 = vld [vmem:[#allocation9 + $0x168] ss:$16 sps:$4 sm:$0xff]   ;;  %v19087_v26 = vsub.s32 1, %v19085_v51 }
 0x611   :  { %v7454_v20 = vrot.slane %v7453_v61, 1  ;;  %v8916_v21 = vld [vmem:[#allocation9 + $0x16c] ss:$16 sps:$4 sm:$0xff]   ;;  %v8917_v6 = vld [vmem:[#allocation9 + $0x148] ss:$16 sps:$4 sm:$0xff]   ;;  %v7584_v32 = vsub.s32 2, %v19085_v51 }
 0x612   :  { %v7418_v54 = vadd.f32 %v7417_v9, %v7416_v50  ;;  %v8919_v57 = vld [vmem:[#allocation9 + $0x14c] ss:$16 sps:$4 sm:$0xff]   ;;  %v8920_v7 = vld [vmem:[#allocation9 + $0x128] ss:$16 sps:$4 sm:$0xff]   ;;  %v7581_v13 = vrot.slane %v7572_v63, %v19087_v26  ;;  %v7588_v1 = vsub.s32 3, %v19085_v51  ;;  %s8006_s14 = sshll.u32 %s10586_s6, 4  ;;  %s8007_s14 = int_to_ptr.vmem [resolvable:$true] %s8006_s14 }
 0x613   :  { %v7455_v28 = vadd.f32 %v7454_v20, %v7453_v61  ;;  %v8922_v56 = vld [vmem:[#allocation9 + $0x12c] ss:$16 sps:$4 sm:$0xff]   ;;  %v8923_v23 = vld [vmem:[#allocation9 + $0x108] ss:$16 sps:$4 sm:$0xff]   ;;  %v7585_v0 = vrot.slane %v7572_v63, %v7584_v32  ;;  %s10547_s15 = scalar_lea.vmem %s8007_s14, 512  ;;  %p10552_p7 = scmp.lt.s32.totalorder %s8007_s14, %s8007_s14 }
 0x614   :  { %v7485_v42 = vsel %vm7484_vm6, %v7418_v54, %v7483_v18  ;;  %v8925_v39 = vld [vmem:[#allocation9 + $0x10c] ss:$16 sps:$4 sm:$0xff]   ;;  %v7589_v61 = vrot.slane %v7572_v63, %v7588_v1  ;;  %p10548_p6 = scmp.ne.s32.totalorder %s8007_s14, %s10547_s15  ;;  %p10553_p8 = scmp.lt.s32.totalorder %s10547_s15, %s10547_s15 }
 0x615   :  { %v7492_v36 = vsel %vm7484_vm6, %v7455_v28, %v7491_v30  ;;  %v7504_v53 = vmul.f32 0.00390625, %v7485_v42 }
 0x616   :  { %v7505_v60 = vmul.f32 0.00390625, %v7492_v36  ;;  %p10554_p9 = por %p10553_p8, %p10552_p7 }
 0x617   :  { %v17691_v47 = vpack.c.bf16 %v7504_v53, %v7504_v53 }
 0x618   :  { %v7507_v58 = vpack.c.bf16 %v7505_v60, %v7505_v60  ;;  %p10555_p10 = pnand %p10554_p9, %p10548_p6 }
 0x61a   :  { %7946 = vmatprep.mubr.bf16.mxu0 %v7507_v58 }
 0x61b   :  { %7947 = vmatmul.mubr.bf16.vlgmr.msra.gmra.mxu0 %v17691_v47 }
 0x61c   :  { %7956 = vmatpush1.bf16.msra.mxu0 %v8878_v4  ;;  %7987 = vmatprep.mubr.bf16.mxu0 %v7507_v58 }
 0x61d   :  { %7957 = vmatprep.subr.bf16.mxu0 %v8883_v25 }
 0x620   :  { %7958 = vmatpush1.bf16.msra.mxu0 %v8881_v37 }
 0x621   :  { %7959 = vmatprep.subr.bf16.mxu0 %v8886_v5 }
 0x624   :  { %7960 = vmatpush1.bf16.msra.mxu0 %v8884_v41 }
 0x625   :  { %7961 = vmatprep.subr.bf16.mxu0 %v8889_v44 }
 0x628   :  { %7962 = vmatpush1.bf16.msra.mxu0 %v8887_v19 }
 0x629   :  { %7963 = vmatprep.subr.bf16.mxu0 %v8892_v8 }
 0x62c   :  { %7964 = vmatpush1.bf16.msra.mxu0 %v8890_v29 }
 0x62d   :  { %7965 = vmatprep.subr.bf16.mxu0 %v8895_v24 }
 0x630   :  { %7966 = vmatpush1.bf16.msra.mxu0 %v8893_v10 }
 0x631   :  { %7967 = vmatprep.subr.bf16.mxu0 %v8898_v33 }
 0x634   :  { %7968 = vmatpush1.bf16.msra.mxu0 %v8896_v62 }
 0x635   :  { %7969 = vmatprep.subr.bf16.mxu0 %v8901_v11 }
 0x638   :  { %7970 = vmatpush1.bf16.msra.mxu0 %v8899_v49 }
 0x639   :  { %7971 = vmatprep.subr.bf16.mxu0 %v8904_v12 }
 0x63c   :  { %7972 = vmatpush2.bf16.msra.mxu0 %v8902_v15 }
 0x63d   :  { %7973 = vmatprep.subr.bf16.mxu0 %v8907_v52 }
 0x640   :  { %7974 = vmatpush2.bf16.msra.mxu0 %v8905_v43 }
 0x641   :  { %7975 = vmatprep.subr.bf16.mxu0 %v8910_v27 }
 0x644   :  { %7976 = vmatpush2.bf16.msra.mxu0 %v8908_v40 }
 0x645   :  { %7977 = vmatprep.subr.bf16.mxu0 %v8913_v3 }
 0x648   :  { %7978 = vmatpush2.bf16.msra.mxu0 %v8911_v38 }
 0x649   :  { %7979 = vmatprep.subr.bf16.mxu0 %v8916_v21 }
 0x64c   :  { %7980 = vmatpush2.bf16.msra.mxu0 %v8914_v2 }
 0x64d   :  { %7981 = vmatprep.subr.bf16.mxu0 %v8919_v57 }
 0x650   :  { %7982 = vmatpush2.bf16.msra.mxu0 %v8917_v6 }
 0x651   :  { %7983 = vmatprep.subr.bf16.mxu0 %v8922_v56 }
 0x654   :  { %7984 = vmatpush2.bf16.msra.mxu0 %v8920_v7 }
 0x655   :  { %7985 = vmatprep.subr.bf16.mxu0 %v8925_v39 }
 0x658   :  { %7986 = vmatpush2.bf16.msra.mxu0 %v8923_v23 }
 0x65b   :  { %7988 = vmatmul.mubr.bf16.vlgmr.msra.gmra.mxu0 %v17691_v47 }
 0x6db   :  { %v7948_v48 = vpop.f32.mrf.mxu0 }
 0x6dc   :  { %v7949_v55 = vadd.f32 %v7948_v48, %v7577_v22 }
 0x6dd   :  { %v7950_v16 = vpop.f32.mrf.mxu0 }
 0x6de   :  { %7996 = vst [vmem:[#allocation11] sm:$0xff] %v7949_v55  ;;  %v7951_v17 = vadd.f32 %v7950_v16, %v7581_v13 }
 0x6df   :  { %v7952_v46 = vpop.f32.mrf.mxu0 }
 0x6e0   :  { %7997 = vst [vmem:[#allocation11 + $0x8] sm:$0xff] %v7951_v17 }
 0x6e1   :  { %v7953_v50 = vpop.f32.mrf.mxu0 }
 0x71b   :  { %v7989_v31 = vpop.f32.mrf.mxu0 }
 0x71c   :  { %v7990_v9 = vadd.f32 %v7989_v31, %v7585_v0 }
 0x71d   :  { %v7991_v20 = vpop.f32.mrf.mxu0 }
 0x71e   :  { %7998 = vst [vmem:[#allocation11 + $0x10] sm:$0xff] %v7990_v9  ;;  %v7992_v34 = vadd.f32 %v7991_v20, %v7589_v61 }
 0x71f   :  { %v7993_v54 = vpop.f32.mrf.mxu0 }
 0x720   :  { %7999 = vst [vmem:[#allocation11 + $0x18] sm:$0xff] %v7992_v34 }
 0x721   :  { %v7994_v59 = vpop.f32.mrf.mxu0 }
 0x722   :  { %10558 = shalt.err (!%p10555_p10)
}
 0x723   :  { %8009 = dma.vmem_to_hbm [thread:$0]  %s8007_s14, 512, %s17714_s7, [#allocation5]  }
 0x724   :  { %10573 = dma.done.wait [#allocation5], 512  }
 0x725   :  { %10574 = vsyncadd [#allocation5], 4294966784 }
 0x726   :  { %8013 = vsyncpa [#allocation4], 1 }
 0x727   :  { %8014 = vsyncpa [#allocation7], 1 }
 0x728   :  { %8015 = vsyncpa [#allocation10], 1 }
 0x729   :  { %8016 = vsyncpa [#allocation5], 1 }

</bundles_post_ra>
